<compile_context>
chip_gen: v7x
topology: tpu7x:2x2x1
jax: 0.10.0
libtpu: 0.0.40
codegen_flags: <defaults>
</compile_context>

<pallas_src>
import functools

import jax
import jax.numpy as jnp
from jax.experimental import pallas as pl
from jax.experimental.pallas import tpu as pltpu


# ---------------------------------------------------------------------------
# Pallas kernels
# ---------------------------------------------------------------------------

def _mm_affine_kernel(x_ref, w_ref, s_ref, b_ref, o_ref, *, relu):
    """o = [relu]((x @ w) * scale + bias)  -- conv-as-matmul with folded BN."""
    y = jnp.dot(x_ref[...], w_ref[...], preferred_element_type=jnp.float32)
    y = y * s_ref[...] + b_ref[...]
    if relu:
        y = jnp.maximum(y, 0.0)
    o_ref[...] = y.astype(o_ref.dtype)


def _mm_affine_res_kernel(x_ref, w_ref, s_ref, b_ref, r_ref, o_ref, *, relu):
    """o = [relu]((x @ w) * scale + bias + residual) -- Inception residual tail."""
    y = jnp.dot(x_ref[...], w_ref[...], preferred_element_type=jnp.float32)
    y = y * s_ref[...] + b_ref[...] + r_ref[...].astype(jnp.float32)
    if relu:
        y = jnp.maximum(y, 0.0)
    o_ref[...] = y.astype(o_ref.dtype)


def _gap_kernel(x_ref, o_ref):
    """x: [B, HW, C] -> o: [B, C] mean over spatial (AdaptiveAvgPool2d(1))."""
    o_ref[...] = jnp.mean(x_ref[...].astype(jnp.float32), axis=1).astype(o_ref.dtype)


def _l2norm_kernel(x_ref, o_ref):
    """Row-wise L2 normalize (F.normalize(x, p=2, dim=1))."""
    x = x_ref[...].astype(jnp.float32)
    n = jnp.sqrt(jnp.sum(x * x, axis=1, keepdims=True))
    o_ref[...] = (x / jnp.maximum(n, 1e-12)).astype(o_ref.dtype)


# ---------------------------------------------------------------------------
# Pallas wrappers
# ---------------------------------------------------------------------------

_VMEM_SPEC = pl.BlockSpec(memory_space=pltpu.MemorySpace.VMEM)


def matmul_affine(x, w, scale, bias, *, relu, residual=None,
                  out_dtype=jnp.bfloat16, compute_dtype=jnp.bfloat16, tile_m=256):
    """y = [relu]((x @ w) * scale + bias [+ residual]); x:[M,K], w:[K,N].

    bf16 matmul inputs, f32 MXU accumulation, f32 epilogue.  No host-side pad:
    ragged M tail handled by pl.cdiv grid + Pallas write masking.  Small M uses a
    single full-array block (no grid padding waste for the batch=2 head matmuls).
    """
    M, K = x.shape
    N = w.shape[1]
    x = x.astype(compute_dtype)
    w = w.astype(compute_dtype)
    s2 = scale.reshape(1, N).astype(jnp.float32)
    b2 = bias.reshape(1, N).astype(jnp.float32)

    tile = M if M <= tile_m else tile_m          # tiny-M path: one full block
    grid = (pl.cdiv(M, tile),)

    in_specs = [
        pl.BlockSpec((tile, K), lambda i: (i, 0)),
        pl.BlockSpec((K, N), lambda i: (0, 0)),
        pl.BlockSpec((1, N), lambda i: (0, 0)),
        pl.BlockSpec((1, N), lambda i: (0, 0)),
    ]
    args = [x, w, s2, b2]
    if residual is None:
        kernel = functools.partial(_mm_affine_kernel, relu=relu)
    else:
        in_specs.append(pl.BlockSpec((tile, N), lambda i: (i, 0)))
        args.append(residual.astype(compute_dtype))
        kernel = functools.partial(_mm_affine_res_kernel, relu=relu)

    return pl.pallas_call(
        kernel,
        grid=grid,
        in_specs=in_specs,
        out_specs=pl.BlockSpec((tile, N), lambda i: (i, 0)),
        out_shape=jax.ShapeDtypeStruct((M, N), out_dtype),
        compiler_params=pltpu.CompilerParams(dimension_semantics=("parallel",)),
    )(*args)


def im2col(x, kh, kw, sh, sw, ph, pw):
    """NHWC im2col (bf16): one concatenate of shifted slices -> [M, kh*kw*C]."""
    x = jnp.pad(x, ((0, 0), (ph, ph), (pw, pw), (0, 0)))
    B, H, W, C = x.shape
    Ho = (H - kh) // sh + 1
    Wo = (W - kw) // sw + 1
    cols = []
    for i in range(kh):
        for j in range(kw):
            cols.append(x[:, i:i + sh * (Ho - 1) + 1:sh,
                          j:j + sw * (Wo - 1) + 1:sw, :])
    patches = jnp.concatenate(cols, axis=-1)          # [B,Ho,Wo,kh*kw*C], tap-major
    return patches.reshape(B * Ho * Wo, kh * kw * C), (B, Ho, Wo)


def basic_conv2d(x, p, stride, padding):
    """facenet BasicConv2d: Conv(bias=False) + BatchNorm(eval, folded) + ReLU."""
    kh, kw, cin, cout = p["w"].shape
    B, H, W, _ = x.shape
    if kh == 1 and kw == 1 and stride == 1 and padding == (0, 0):
        xm = x.reshape(B * H * W, cin)                # 1x1 conv: no im2col needed
        Ho, Wo = H, W
    else:
        xm, (B, Ho, Wo) = im2col(x, kh, kw, stride, stride, padding[0], padding[1])
    wm = p["w"].reshape(kh * kw * cin, cout)
    y = matmul_affine(xm, wm, p["scale"], p["bias"], relu=True)
    return y.reshape(B, Ho, Wo, cout)


def fused_conv1x1(x, plist):
    """Several 1x1 BasicConv2d branches sharing input x, fused into ONE matmul.

    Weights/scales/biases are concatenated along N; output is sliced per branch.
    Amortizes the X DMA and widens N toward the 128-lane store sweet spot.
    """
    B, H, W, C = x.shape
    couts = [p["w"].shape[-1] for p in plist]
    wm = jnp.concatenate([p["w"].reshape(C, c) for p, c in zip(plist, couts)], axis=1)
    scale = jnp.concatenate([p["scale"] for p in plist])
    bias = jnp.concatenate([p["bias"] for p in plist])
    y = matmul_affine(x.reshape(B * H * W, C), wm, scale, bias, relu=True)
    y = y.reshape(B, H, W, sum(couts))
    outs, off = [], 0
    for c in couts:
        outs.append(y[..., off:off + c])
        off += c
    return outs


def upconv_residual(x_cat, p, block_scale, relu, residual):
    """Inception block tail: 1x1 conv (with bias), *block_scale, +skip, [ReLU]."""
    B, H, W, C = x_cat.shape
    cout = p["w"].shape[-1]
    xm = x_cat.reshape(B * H * W, C)
    wm = p["w"].reshape(C, cout)
    scale = jnp.full((cout,), block_scale, jnp.float32)
    bias = p["b"].astype(jnp.float32) * block_scale
    rm = residual.reshape(B * H * W, cout)
    y = matmul_affine(xm, wm, scale, bias, relu=relu, residual=rm)
    return y.reshape(B, H, W, cout)


def max_pool(x, k, stride):
    """MaxPool2d(k, stride) via fused XLA maximum over k*k strided slices.

    Avoids materializing a k*k-inflated patch tensor in HBM (per perf review,
    which explicitly allows the XLA route for this op).
    """
    B, H, W, C = x.shape
    Ho = (H - k) // stride + 1
    Wo = (W - k) // stride + 1
    out = None
    for i in range(k):
        for j in range(k):
            v = x[:, i:i + stride * (Ho - 1) + 1:stride,
                  j:j + stride * (Wo - 1) + 1:stride, :]
            out = v if out is None else jnp.maximum(out, v)
    return out


def global_avg_pool(x_bhwc):
    B, H, W, C = x_bhwc.shape
    x = x_bhwc.reshape(B, H * W, C)
    return pl.pallas_call(
        _gap_kernel,
        in_specs=[_VMEM_SPEC],
        out_specs=_VMEM_SPEC,
        out_shape=jax.ShapeDtypeStruct((B, C), x.dtype),
    )(x)


def l2_normalize(x):
    return pl.pallas_call(
        _l2norm_kernel,
        in_specs=[_VMEM_SPEC],
        out_specs=_VMEM_SPEC,
        out_shape=jax.ShapeDtypeStruct(x.shape, jnp.float32),
    )(x)


def arcface_logits(emb, logits_w):
    """logits = emb @ normalize(W, dim=1).T  -- W row-normalization hoisted to JAX."""
    wn = logits_w / jnp.maximum(
        jnp.sqrt(jnp.sum(logits_w * logits_w, axis=1, keepdims=True)), 1e-12)
    nc = logits_w.shape[0]
    return matmul_affine(emb, wn.T,
                         jnp.ones((nc,), jnp.float32), jnp.zeros((nc,), jnp.float32),
                         relu=False, out_dtype=jnp.float32,
                         compute_dtype=jnp.float32)


# ---------------------------------------------------------------------------
# Deterministic parameter init (channels are the real facenet channels / 8)
# ---------------------------------------------------------------------------

def init_params(key, num_classes=32):
    keys = iter(jax.random.split(key, 256))

    def conv(kh, kw, cin, cout):
        k1, k2, k3 = jax.random.split(next(keys), 3)
        w = (jax.random.normal(k1, (kh, kw, cin, cout), jnp.float32)
             / jnp.sqrt(float(kh * kw * cin))).astype(jnp.bfloat16)
        # eval-mode BatchNorm folded: scale = gamma/sqrt(var+eps), bias = beta - mean*scale
        scale = 1.0 + 0.1 * jax.random.normal(k2, (cout,), jnp.float32)
        bias = 0.1 * jax.random.normal(k3, (cout,), jnp.float32)
        return {"w": w, "scale": scale, "bias": bias}

    def conv_b(cin, cout):  # 1x1 conv with bias, no BN / no ReLU (block "up" conv)
        k1, k2 = jax.random.split(next(keys), 2)
        w = (jax.random.normal(k1, (1, 1, cin, cout), jnp.float32)
             / jnp.sqrt(float(cin))).astype(jnp.bfloat16)
        b = 0.1 * jax.random.normal(k2, (cout,), jnp.float32)
        return {"w": w, "b": b}

    p = {
        "conv2d_1a": conv(3, 3, 3, 4),
        "conv2d_2a": conv(3, 3, 4, 4),
        "conv2d_2b": conv(3, 3, 4, 8),
        "conv2d_3b": conv(1, 1, 8, 10),
        "conv2d_4a": conv(3, 3, 10, 24),
        "conv2d_4b": conv(3, 3, 24, 32),
    }

    def block35():
        return {"b0": conv(1, 1, 32, 4),
                "b1_0": conv(1, 1, 32, 4), "b1_1": conv(3, 3, 4, 4),
                "b2_0": conv(1, 1, 32, 4), "b2_1": conv(3, 3, 4, 4),
                "b2_2": conv(3, 3, 4, 4),
                "up": conv_b(12, 32)}

    def block17():
        return {"b0": conv(1, 1, 112, 16),
                "b1_0": conv(1, 1, 112, 16), "b1_1": conv(1, 7, 16, 16),
                "b1_2": conv(7, 1, 16, 16),
                "up": conv_b(32, 112)}

    def block8():
        return {"b0": conv(1, 1, 224, 24),
                "b1_0": conv(1, 1, 224, 24), "b1_1": conv(1, 3, 24, 24),
                "b1_2": conv(3, 1, 24, 24),
                "up": conv_b(48, 224)}

    p["repeat_1"] = [block35() for _ in range(2)]
    p["mixed_6a"] = {"b0": conv(3, 3, 32, 48),
                     "b1_0": conv(1, 1, 32, 24), "b1_1": conv(3, 3, 24, 24),
                     "b1_2": conv(3, 3, 24, 32)}
    p["repeat_2"] = [block17() for _ in range(2)]
    p["mixed_7a"] = {"b0_0": conv(1, 1, 112, 32), "b0_1": conv(3, 3, 32, 48),
                     "b1_0": conv(1, 1, 112, 32), "b1_1": conv(3, 3, 32, 32),
                     "b2_0": conv(1, 1, 112, 32), "b2_1": conv(3, 3, 32, 32),
                     "b2_2": conv(3, 3, 32, 32)}
    p["repeat_3"] = [block8() for _ in range(2)]
    p["block8"] = block8()

    k1, k2, k3 = jax.random.split(next(keys), 3)
    p["last_linear_w"] = (jax.random.normal(k1, (224, 64), jnp.float32)
                          / jnp.sqrt(224.0)).astype(jnp.bfloat16)
    p["last_bn_scale"] = 1.0 + 0.1 * jax.random.normal(k2, (64,), jnp.float32)
    p["last_bn_bias"] = 0.1 * jax.random.normal(k3, (64,), jnp.float32)

    k1, k2 = jax.random.split(next(keys), 2)
    # PyTorch nn.Linear layout: [num_classes, embedding_dim]; kept f32 for the head.
    p["logits_w"] = jax.random.normal(k1, (num_classes, 64), jnp.float32) / jnp.sqrt(64.0)
    p["logits_b"] = 0.1 * jax.random.normal(k2, (num_classes,), jnp.float32)
    return p


# ---------------------------------------------------------------------------
# InceptionResnetV1 forward (eval mode)
# ---------------------------------------------------------------------------

def block35_fwd(x, bp):
    b0, b1, b2 = fused_conv1x1(x, [bp["b0"], bp["b1_0"], bp["b2_0"]])
    b1 = basic_conv2d(b1, bp["b1_1"], 1, (1, 1))
    b2 = basic_conv2d(b2, bp["b2_1"], 1, (1, 1))
    b2 = basic_conv2d(b2, bp["b2_2"], 1, (1, 1))
    cat = jnp.concatenate([b0, b1, b2], axis=-1)
    return upconv_residual(cat, bp["up"], 0.17, True, x)


def block17_fwd(x, bp):
    b0, b1 = fused_conv1x1(x, [bp["b0"], bp["b1_0"]])
    b1 = basic_conv2d(b1, bp["b1_1"], 1, (0, 3))
    b1 = basic_conv2d(b1, bp["b1_2"], 1, (3, 0))
    cat = jnp.concatenate([b0, b1], axis=-1)
    return upconv_residual(cat, bp["up"], 0.10, True, x)


def block8_fwd(x, bp, scale=0.20, relu=True):
    b0, b1 = fused_conv1x1(x, [bp["b0"], bp["b1_0"]])
    b1 = basic_conv2d(b1, bp["b1_1"], 1, (0, 1))
    b1 = basic_conv2d(b1, bp["b1_2"], 1, (1, 0))
    cat = jnp.concatenate([b0, b1], axis=-1)
    return upconv_residual(cat, bp["up"], scale, relu, x)


def mixed_6a_fwd(x, mp):
    b0 = basic_conv2d(x, mp["b0"], 2, (0, 0))
    b1 = basic_conv2d(x, mp["b1_0"], 1, (0, 0))
    b1 = basic_conv2d(b1, mp["b1_1"], 1, (1, 1))
    b1 = basic_conv2d(b1, mp["b1_2"], 2, (0, 0))
    b2 = max_pool(x, 3, 2)
    return jnp.concatenate([b0, b1, b2], axis=-1)


def mixed_7a_fwd(x, mp):
    b0, b1, b2 = fused_conv1x1(x, [mp["b0_0"], mp["b1_0"], mp["b2_0"]])
    b0 = basic_conv2d(b0, mp["b0_1"], 2, (0, 0))
    b1 = basic_conv2d(b1, mp["b1_1"], 2, (0, 0))
    b2 = basic_conv2d(b2, mp["b2_1"], 1, (1, 1))
    b2 = basic_conv2d(b2, mp["b2_2"], 2, (0, 0))
    b3 = max_pool(x, 3, 2)
    return jnp.concatenate([b0, b1, b2, b3], axis=-1)


def inception_resnet_v1(params, x_nchw, classify):
    # layout: NCHW (PyTorch) input -> NHWC bf16 internally.
    x = jnp.transpose(x_nchw, (0, 2, 3, 1)).astype(jnp.bfloat16)
    x = basic_conv2d(x, params["conv2d_1a"], 2, (0, 0))
    x = basic_conv2d(x, params["conv2d_2a"], 1, (0, 0))
    x = basic_conv2d(x, params["conv2d_2b"], 1, (1, 1))
    x = max_pool(x, 3, 2)
    x = basic_conv2d(x, params["conv2d_3b"], 1, (0, 0))
    x = basic_conv2d(x, params["conv2d_4a"], 1, (0, 0))
    x = basic_conv2d(x, params["conv2d_4b"], 2, (0, 0))
    for bp in params["repeat_1"]:
        x = block35_fwd(x, bp)
    x = mixed_6a_fwd(x, params["mixed_6a"])
    for bp in params["repeat_2"]:
        x = block17_fwd(x, bp)
    x = mixed_7a_fwd(x, params["mixed_7a"])
    for bp in params["repeat_3"]:
        x = block8_fwd(x, bp, scale=0.20, relu=True)
    x = block8_fwd(x, params["block8"], scale=1.0, relu=False)

    x = global_avg_pool(x)                      # AdaptiveAvgPool2d(1) + flatten
    # Dropout is identity in eval mode.
    # last_linear (bias=False) + last_bn (BatchNorm1d, eval mode) fused; tiny-M path.
    x = matmul_affine(x, params["last_linear_w"], params["last_bn_scale"],
                      params["last_bn_bias"], relu=False, out_dtype=jnp.float32)
    if classify:
        nc = params["logits_b"].shape[0]
        x = matmul_affine(x, params["logits_w"].T, jnp.ones((nc,), jnp.float32),
                          params["logits_b"], relu=False,
                          out_dtype=jnp.float32, compute_dtype=jnp.float32)
    else:
        x = l2_normalize(x)                     # F.normalize(x, p=2, dim=1)
    return x


def pretrained_facenet_forward(params, x, arcface=False):
    """Forward of Pretrained_Facenet."""
    if arcface:
        emb = inception_resnet_v1(params, x, classify=False)      # encode()
        return arcface_logits(emb, params["logits_w"])            # emb @ normalize(W).T
    return inception_resnet_v1(params, x, classify=True)          # classifier logits


# ---------------------------------------------------------------------------
# main
# ---------------------------------------------------------------------------

if __name__ == "__main__":
    NUM_CLASSES = 32
    key = jax.random.PRNGKey(0)
    pkey, xkey = jax.random.split(key)
    params = init_params(pkey, num_classes=NUM_CLASSES)

    # NCHW, matching the PyTorch module; 80x80 is the smallest spatial size the
    # InceptionResnetV1 stride/valid-padding stack supports.
    x = jax.random.normal(xkey, (2, 3, 80, 80), jnp.float32)

    fwd = jax.jit(pretrained_facenet_forward, static_argnames=("arcface",))

    logits = jax.block_until_ready(fwd(params, x, arcface=False))
    assert logits.shape == (2, NUM_CLASSES)
    arc = jax.block_until_ready(fwd(params, x, arcface=True))
    assert arc.shape == (2, NUM_CLASSES)
    assert bool(jnp.all(jnp.isfinite(logits))) and bool(jnp.all(jnp.isfinite(arc)))

    print("KERNEL_OK")
</pallas_src>

<mosaic_0001>
module attributes {stable_mosaic.version = 11 : i64} {
  func.func @_mm_affine_kernel(%arg0: i32, %arg1: memref<256x27xbf16, #tpu.memory_space<vmem>>, %arg2: memref<27x4xbf16, #tpu.memory_space<vmem>>, %arg3: memref<1x4xf32, #tpu.memory_space<vmem>>, %arg4: memref<1x4xf32, #tpu.memory_space<vmem>>, %arg5: memref<256x4xbf16, #tpu.memory_space<vmem>>) attributes {dimension_semantics = [#tpu.dimension_semantics<parallel>], iteration_bounds = array<i64: 12>, scalar_prefetch = 0 : i64, scratch_operands = 0 : i64, tpu.core_type = #tpu.core_type<tc>, window_params = [{transform_indices = @transform_0, window_bounds = array<i64: 256, 27>}, {pipeline_mode = #tpu.pipeline_mode<synchronous>, transform_indices = @transform_1, window_bounds = array<i64: 27, 4>}, {pipeline_mode = #tpu.pipeline_mode<synchronous>, transform_indices = @transform_2, window_bounds = array<i64: 1, 4>}, {pipeline_mode = #tpu.pipeline_mode<synchronous>, transform_indices = @transform_3, window_bounds = array<i64: 1, 4>}, {transform_indices = @transform_4, window_bounds = array<i64: 256, 4>}]} {
    %c0 = arith.constant 0 : index
    %c0_0 = arith.constant 0 : index
    %0 = vector.load %arg1[%c0, %c0_0] : memref<256x27xbf16, #tpu.memory_space<vmem>>, vector<256x27xbf16>
    %c0_1 = arith.constant 0 : index
    %c0_2 = arith.constant 0 : index
    %1 = vector.load %arg2[%c0_1, %c0_2] : memref<27x4xbf16, #tpu.memory_space<vmem>>, vector<27x4xbf16>
    %cst = arith.constant dense<0.000000e+00> : vector<256x4xf32>
    %2 = tpu.matmul %0, %1, %cst {dimension_numbers = #tpu.dot_dimension_numbers<[1], [0], [0], [1], [0, 0, 1, 1], [], []>} : vector<256x27xbf16>, vector<27x4xbf16>, vector<256x4xf32> -> vector<256x4xf32>
    %c0_3 = arith.constant 0 : index
    %c0_4 = arith.constant 0 : index
    %3 = vector.load %arg3[%c0_3, %c0_4] : memref<1x4xf32, #tpu.memory_space<vmem>>, vector<1x4xf32>
    %4 = vector.broadcast %3 : vector<1x4xf32> to vector<256x4xf32>
    %5 = arith.mulf %2, %4 : vector<256x4xf32>
    %c0_5 = arith.constant 0 : index
    %c0_6 = arith.constant 0 : index
    %6 = vector.load %arg4[%c0_5, %c0_6] : memref<1x4xf32, #tpu.memory_space<vmem>>, vector<1x4xf32>
    %7 = vector.broadcast %6 : vector<1x4xf32> to vector<256x4xf32>
    %8 = arith.addf %5, %7 : vector<256x4xf32>
    %cst_7 = arith.constant 0.000000e+00 : f32
    %9 = vector.broadcast %cst_7 : f32 to vector<256x4xf32>
    %10 = arith.maximumf %8, %9 : vector<256x4xf32>
    %11 = arith.truncf %10 : vector<256x4xf32> to vector<256x4xbf16>
    %c0_8 = arith.constant 0 : index
    %c0_9 = arith.constant 0 : index
    %12 = vector.load %arg5[%c0_8, %c0_9] : memref<256x4xbf16, #tpu.memory_space<vmem>>, vector<256x4xbf16>
    tpu.vector_store %arg5[%c0_8, %c0_9], %11 {strides = array<i32>} : memref<256x4xbf16, #tpu.memory_space<vmem>>, vector<256x4xbf16>,
    return
  }
  func.func @transform_0(%arg0: i32) -> (i32, i32) {
    %c0_i32 = arith.constant 0 : i32
    %c0_i32_0 = arith.constant 0 : i32
    return %arg0, %c0_i32 : i32, i32
  }
  func.func @transform_1(%arg0: i32) -> (i32, i32) {
    %c0_i32 = arith.constant 0 : i32
    %c0_i32_0 = arith.constant 0 : i32
    %c0_i32_1 = arith.constant 0 : i32
    return %c0_i32, %c0_i32_0 : i32, i32
  }
  func.func @transform_2(%arg0: i32) -> (i32, i32) {
    %c0_i32 = arith.constant 0 : i32
    %c0_i32_0 = arith.constant 0 : i32
    %c0_i32_1 = arith.constant 0 : i32
    return %c0_i32, %c0_i32_0 : i32, i32
  }
  func.func @transform_3(%arg0: i32) -> (i32, i32) {
    %c0_i32 = arith.constant 0 : i32
    %c0_i32_0 = arith.constant 0 : i32
    %c0_i32_1 = arith.constant 0 : i32
    return %c0_i32, %c0_i32_0 : i32, i32
  }
  func.func @transform_4(%arg0: i32) -> (i32, i32) {
    %c0_i32 = arith.constant 0 : i32
    %c0_i32_0 = arith.constant 0 : i32
    return %arg0, %c0_i32 : i32, i32
  }
}

module attributes {stable_mosaic.version = 11 : i64} {
  func.func @_mm_affine_kernel(%arg0: i32, %arg1: memref<256x36xbf16, #tpu.memory_space<vmem>>, %arg2: memref<36x4xbf16, #tpu.memory_space<vmem>>, %arg3: memref<1x4xf32, #tpu.memory_space<vmem>>, %arg4: memref<1x4xf32, #tpu.memory_space<vmem>>, %arg5: memref<256x4xbf16, #tpu.memory_space<vmem>>) attributes {dimension_semantics = [#tpu.dimension_semantics<parallel>], iteration_bounds = array<i64: 11>, scalar_prefetch = 0 : i64, scratch_operands = 0 : i64, tpu.core_type = #tpu.core_type<tc>, window_params = [{transform_indices = @transform_0, window_bounds = array<i64: 256, 36>}, {pipeline_mode = #tpu.pipeline_mode<synchronous>, transform_indices = @transform_1, window_bounds = array<i64: 36, 4>}, {pipeline_mode = #tpu.pipeline_mode<synchronous>, transform_indices = @transform_2, window_bounds = array<i64: 1, 4>}, {pipeline_mode = #tpu.pipeline_mode<synchronous>, transform_indices = @transform_3, window_bounds = array<i64: 1, 4>}, {transform_indices = @transform_4, window_bounds = array<i64: 256, 4>}]} {
    %c0 = arith.constant 0 : index
    %c0_0 = arith.constant 0 : index
    %0 = vector.load %arg1[%c0, %c0_0] : memref<256x36xbf16, #tpu.memory_space<vmem>>, vector<256x36xbf16>
    %c0_1 = arith.constant 0 : index
    %c0_2 = arith.constant 0 : index
    %1 = vector.load %arg2[%c0_1, %c0_2] : memref<36x4xbf16, #tpu.memory_space<vmem>>, vector<36x4xbf16>
    %cst = arith.constant dense<0.000000e+00> : vector<256x4xf32>
    %2 = tpu.matmul %0, %1, %cst {dimension_numbers = #tpu.dot_dimension_numbers<[1], [0], [0], [1], [0, 0, 1, 1], [], []>} : vector<256x36xbf16>, vector<36x4xbf16>, vector<256x4xf32> -> vector<256x4xf32>
    %c0_3 = arith.constant 0 : index
    %c0_4 = arith.constant 0 : index
    %3 = vector.load %arg3[%c0_3, %c0_4] : memref<1x4xf32, #tpu.memory_space<vmem>>, vector<1x4xf32>
    %4 = vector.broadcast %3 : vector<1x4xf32> to vector<256x4xf32>
    %5 = arith.mulf %2, %4 : vector<256x4xf32>
    %c0_5 = arith.constant 0 : index
    %c0_6 = arith.constant 0 : index
    %6 = vector.load %arg4[%c0_5, %c0_6] : memref<1x4xf32, #tpu.memory_space<vmem>>, vector<1x4xf32>
    %7 = vector.broadcast %6 : vector<1x4xf32> to vector<256x4xf32>
    %8 = arith.addf %5, %7 : vector<256x4xf32>
    %cst_7 = arith.constant 0.000000e+00 : f32
    %9 = vector.broadcast %cst_7 : f32 to vector<256x4xf32>
    %10 = arith.maximumf %8, %9 : vector<256x4xf32>
    %11 = arith.truncf %10 : vector<256x4xf32> to vector<256x4xbf16>
    %c0_8 = arith.constant 0 : index
    %c0_9 = arith.constant 0 : index
    %12 = vector.load %arg5[%c0_8, %c0_9] : memref<256x4xbf16, #tpu.memory_space<vmem>>, vector<256x4xbf16>
    tpu.vector_store %arg5[%c0_8, %c0_9], %11 {strides = array<i32>} : memref<256x4xbf16, #tpu.memory_space<vmem>>, vector<256x4xbf16>,
    return
  }
  func.func @transform_0(%arg0: i32) -> (i32, i32) {
    %c0_i32 = arith.constant 0 : i32
    %c0_i32_0 = arith.constant 0 : i32
    return %arg0, %c0_i32 : i32, i32
  }
  func.func @transform_1(%arg0: i32) -> (i32, i32) {
    %c0_i32 = arith.constant 0 : i32
    %c0_i32_0 = arith.constant 0 : i32
    %c0_i32_1 = arith.constant 0 : i32
    return %c0_i32, %c0_i32_0 : i32, i32
  }
  func.func @transform_2(%arg0: i32) -> (i32, i32) {
    %c0_i32 = arith.constant 0 : i32
    %c0_i32_0 = arith.constant 0 : i32
    %c0_i32_1 = arith.constant 0 : i32
    return %c0_i32, %c0_i32_0 : i32, i32
  }
  func.func @transform_3(%arg0: i32) -> (i32, i32) {
    %c0_i32 = arith.constant 0 : i32
    %c0_i32_0 = arith.constant 0 : i32
    %c0_i32_1 = arith.constant 0 : i32
    return %c0_i32, %c0_i32_0 : i32, i32
  }
  func.func @transform_4(%arg0: i32) -> (i32, i32) {
    %c0_i32 = arith.constant 0 : i32
    %c0_i32_0 = arith.constant 0 : i32
    return %arg0, %c0_i32 : i32, i32
  }
}

module attributes {stable_mosaic.version = 11 : i64} {
  func.func @_mm_affine_kernel(%arg0: i32, %arg1: memref<256x36xbf16, #tpu.memory_space<vmem>>, %arg2: memref<36x8xbf16, #tpu.memory_space<vmem>>, %arg3: memref<1x8xf32, #tpu.memory_space<vmem>>, %arg4: memref<1x8xf32, #tpu.memory_space<vmem>>, %arg5: memref<256x8xbf16, #tpu.memory_space<vmem>>) attributes {dimension_semantics = [#tpu.dimension_semantics<parallel>], iteration_bounds = array<i64: 11>, scalar_prefetch = 0 : i64, scratch_operands = 0 : i64, tpu.core_type = #tpu.core_type<tc>, window_params = [{transform_indices = @transform_0, window_bounds = array<i64: 256, 36>}, {pipeline_mode = #tpu.pipeline_mode<synchronous>, transform_indices = @transform_1, window_bounds = array<i64: 36, 8>}, {pipeline_mode = #tpu.pipeline_mode<synchronous>, transform_indices = @transform_2, window_bounds = array<i64: 1, 8>}, {pipeline_mode = #tpu.pipeline_mode<synchronous>, transform_indices = @transform_3, window_bounds = array<i64: 1, 8>}, {transform_indices = @transform_4, window_bounds = array<i64: 256, 8>}]} {
    %c0 = arith.constant 0 : index
    %c0_0 = arith.constant 0 : index
    %0 = vector.load %arg1[%c0, %c0_0] : memref<256x36xbf16, #tpu.memory_space<vmem>>, vector<256x36xbf16>
    %c0_1 = arith.constant 0 : index
    %c0_2 = arith.constant 0 : index
    %1 = vector.load %arg2[%c0_1, %c0_2] : memref<36x8xbf16, #tpu.memory_space<vmem>>, vector<36x8xbf16>
    %cst = arith.constant dense<0.000000e+00> : vector<256x8xf32>
    %2 = tpu.matmul %0, %1, %cst {dimension_numbers = #tpu.dot_dimension_numbers<[1], [0], [0], [1], [0, 0, 1, 1], [], []>} : vector<256x36xbf16>, vector<36x8xbf16>, vector<256x8xf32> -> vector<256x8xf32>
    %c0_3 = arith.constant 0 : index
    %c0_4 = arith.constant 0 : index
    %3 = vector.load %arg3[%c0_3, %c0_4] : memref<1x8xf32, #tpu.memory_space<vmem>>, vector<1x8xf32>
    %4 = vector.broadcast %3 : vector<1x8xf32> to vector<256x8xf32>
    %5 = arith.mulf %2, %4 : vector<256x8xf32>
    %c0_5 = arith.constant 0 : index
    %c0_6 = arith.constant 0 : index
    %6 = vector.load %arg4[%c0_5, %c0_6] : memref<1x8xf32, #tpu.memory_space<vmem>>, vector<1x8xf32>
    %7 = vector.broadcast %6 : vector<1x8xf32> to vector<256x8xf32>
    %8 = arith.addf %5, %7 : vector<256x8xf32>
    %cst_7 = arith.constant 0.000000e+00 : f32
    %9 = vector.broadcast %cst_7 : f32 to vector<256x8xf32>
    %10 = arith.maximumf %8, %9 : vector<256x8xf32>
    %11 = arith.truncf %10 : vector<256x8xf32> to vector<256x8xbf16>
    %c0_8 = arith.constant 0 : index
    %c0_9 = arith.constant 0 : index
    %12 = vector.load %arg5[%c0_8, %c0_9] : memref<256x8xbf16, #tpu.memory_space<vmem>>, vector<256x8xbf16>
    tpu.vector_store %arg5[%c0_8, %c0_9], %11 {strides = array<i32>} : memref<256x8xbf16, #tpu.memory_space<vmem>>, vector<256x8xbf16>,
    return
  }
  func.func @transform_0(%arg0: i32) -> (i32, i32) {
    %c0_i32 = arith.constant 0 : i32
    %c0_i32_0 = arith.constant 0 : i32
    return %arg0, %c0_i32 : i32, i32
  }
  func.func @transform_1(%arg0: i32) -> (i32, i32) {
    %c0_i32 = arith.constant 0 : i32
    %c0_i32_0 = arith.constant 0 : i32
    %c0_i32_1 = arith.constant 0 : i32
    return %c0_i32, %c0_i32_0 : i32, i32
  }
  func.func @transform_2(%arg0: i32) -> (i32, i32) {
    %c0_i32 = arith.constant 0 : i32
    %c0_i32_0 = arith.constant 0 : i32
    %c0_i32_1 = arith.constant 0 : i32
    return %c0_i32, %c0_i32_0 : i32, i32
  }
  func.func @transform_3(%arg0: i32) -> (i32, i32) {
    %c0_i32 = arith.constant 0 : i32
    %c0_i32_0 = arith.constant 0 : i32
    %c0_i32_1 = arith.constant 0 : i32
    return %c0_i32, %c0_i32_0 : i32, i32
  }
  func.func @transform_4(%arg0: i32) -> (i32, i32) {
    %c0_i32 = arith.constant 0 : i32
    %c0_i32_0 = arith.constant 0 : i32
    return %arg0, %c0_i32 : i32, i32
  }
}

module attributes {stable_mosaic.version = 11 : i64} {
  func.func @_mm_affine_kernel(%arg0: i32, %arg1: memref<256x8xbf16, #tpu.memory_space<vmem>>, %arg2: memref<8x10xbf16, #tpu.memory_space<vmem>>, %arg3: memref<1x10xf32, #tpu.memory_space<vmem>>, %arg4: memref<1x10xf32, #tpu.memory_space<vmem>>, %arg5: memref<256x10xbf16, #tpu.memory_space<vmem>>) attributes {dimension_semantics = [#tpu.dimension_semantics<parallel>], iteration_bounds = array<i64: 3>, scalar_prefetch = 0 : i64, scratch_operands = 0 : i64, tpu.core_type = #tpu.core_type<tc>, window_params = [{transform_indices = @transform_0, window_bounds = array<i64: 256, 8>}, {pipeline_mode = #tpu.pipeline_mode<synchronous>, transform_indices = @transform_1, window_bounds = array<i64: 8, 10>}, {pipeline_mode = #tpu.pipeline_mode<synchronous>, transform_indices = @transform_2, window_bounds = array<i64: 1, 10>}, {pipeline_mode = #tpu.pipeline_mode<synchronous>, transform_indices = @transform_3, window_bounds = array<i64: 1, 10>}, {transform_indices = @transform_4, window_bounds = array<i64: 256, 10>}]} {
    %c0 = arith.constant 0 : index
    %c0_0 = arith.constant 0 : index
    %0 = vector.load %arg1[%c0, %c0_0] : memref<256x8xbf16, #tpu.memory_space<vmem>>, vector<256x8xbf16>
    %c0_1 = arith.constant 0 : index
    %c0_2 = arith.constant 0 : index
    %1 = vector.load %arg2[%c0_1, %c0_2] : memref<8x10xbf16, #tpu.memory_space<vmem>>, vector<8x10xbf16>
    %cst = arith.constant dense<0.000000e+00> : vector<256x10xf32>
    %2 = tpu.matmul %0, %1, %cst {dimension_numbers = #tpu.dot_dimension_numbers<[1], [0], [0], [1], [0, 0, 1, 1], [], []>} : vector<256x8xbf16>, vector<8x10xbf16>, vector<256x10xf32> -> vector<256x10xf32>
    %c0_3 = arith.constant 0 : index
    %c0_4 = arith.constant 0 : index
    %3 = vector.load %arg3[%c0_3, %c0_4] : memref<1x10xf32, #tpu.memory_space<vmem>>, vector<1x10xf32>
    %4 = vector.broadcast %3 : vector<1x10xf32> to vector<256x10xf32>
    %5 = arith.mulf %2, %4 : vector<256x10xf32>
    %c0_5 = arith.constant 0 : index
    %c0_6 = arith.constant 0 : index
    %6 = vector.load %arg4[%c0_5, %c0_6] : memref<1x10xf32, #tpu.memory_space<vmem>>, vector<1x10xf32>
    %7 = vector.broadcast %6 : vector<1x10xf32> to vector<256x10xf32>
    %8 = arith.addf %5, %7 : vector<256x10xf32>
    %cst_7 = arith.constant 0.000000e+00 : f32
    %9 = vector.broadcast %cst_7 : f32 to vector<256x10xf32>
    %10 = arith.maximumf %8, %9 : vector<256x10xf32>
    %11 = arith.truncf %10 : vector<256x10xf32> to vector<256x10xbf16>
    %c0_8 = arith.constant 0 : index
    %c0_9 = arith.constant 0 : index
    %12 = vector.load %arg5[%c0_8, %c0_9] : memref<256x10xbf16, #tpu.memory_space<vmem>>, vector<256x10xbf16>
    tpu.vector_store %arg5[%c0_8, %c0_9], %11 {strides = array<i32>} : memref<256x10xbf16, #tpu.memory_space<vmem>>, vector<256x10xbf16>,
    return
  }
  func.func @transform_0(%arg0: i32) -> (i32, i32) {
    %c0_i32 = arith.constant 0 : i32
    %c0_i32_0 = arith.constant 0 : i32
    return %arg0, %c0_i32 : i32, i32
  }
  func.func @transform_1(%arg0: i32) -> (i32, i32) {
    %c0_i32 = arith.constant 0 : i32
    %c0_i32_0 = arith.constant 0 : i32
    %c0_i32_1 = arith.constant 0 : i32
    return %c0_i32, %c0_i32_0 : i32, i32
  }
  func.func @transform_2(%arg0: i32) -> (i32, i32) {
    %c0_i32 = arith.constant 0 : i32
    %c0_i32_0 = arith.constant 0 : i32
    %c0_i32_1 = arith.constant 0 : i32
    return %c0_i32, %c0_i32_0 : i32, i32
  }
  func.func @transform_3(%arg0: i32) -> (i32, i32) {
    %c0_i32 = arith.constant 0 : i32
    %c0_i32_0 = arith.constant 0 : i32
    %c0_i32_1 = arith.constant 0 : i32
    return %c0_i32, %c0_i32_0 : i32, i32
  }
  func.func @transform_4(%arg0: i32) -> (i32, i32) {
    %c0_i32 = arith.constant 0 : i32
    %c0_i32_0 = arith.constant 0 : i32
    return %arg0, %c0_i32 : i32, i32
  }
}

module attributes {stable_mosaic.version = 11 : i64} {
  func.func @_mm_affine_kernel(%arg0: i32, %arg1: memref<256x90xbf16, #tpu.memory_space<vmem>>, %arg2: memref<90x24xbf16, #tpu.memory_space<vmem>>, %arg3: memref<1x24xf32, #tpu.memory_space<vmem>>, %arg4: memref<1x24xf32, #tpu.memory_space<vmem>>, %arg5: memref<256x24xbf16, #tpu.memory_space<vmem>>) attributes {dimension_semantics = [#tpu.dimension_semantics<parallel>], iteration_bounds = array<i64: 2>, scalar_prefetch = 0 : i64, scratch_operands = 0 : i64, tpu.core_type = #tpu.core_type<tc>, window_params = [{transform_indices = @transform_0, window_bounds = array<i64: 256, 90>}, {pipeline_mode = #tpu.pipeline_mode<synchronous>, transform_indices = @transform_1, window_bounds = array<i64: 90, 24>}, {pipeline_mode = #tpu.pipeline_mode<synchronous>, transform_indices = @transform_2, window_bounds = array<i64: 1, 24>}, {pipeline_mode = #tpu.pipeline_mode<synchronous>, transform_indices = @transform_3, window_bounds = array<i64: 1, 24>}, {transform_indices = @transform_4, window_bounds = array<i64: 256, 24>}]} {
    %c0 = arith.constant 0 : index
    %c0_0 = arith.constant 0 : index
    %0 = vector.load %arg1[%c0, %c0_0] : memref<256x90xbf16, #tpu.memory_space<vmem>>, vector<256x90xbf16>
    %c0_1 = arith.constant 0 : index
    %c0_2 = arith.constant 0 : index
    %1 = vector.load %arg2[%c0_1, %c0_2] : memref<90x24xbf16, #tpu.memory_space<vmem>>, vector<90x24xbf16>
    %cst = arith.constant dense<0.000000e+00> : vector<256x24xf32>
    %2 = tpu.matmul %0, %1, %cst {dimension_numbers = #tpu.dot_dimension_numbers<[1], [0], [0], [1], [0, 0, 1, 1], [], []>} : vector<256x90xbf16>, vector<90x24xbf16>, vector<256x24xf32> -> vector<256x24xf32>
    %c0_3 = arith.constant 0 : index
    %c0_4 = arith.constant 0 : index
    %3 = vector.load %arg3[%c0_3, %c0_4] : memref<1x24xf32, #tpu.memory_space<vmem>>, vector<1x24xf32>
    %4 = vector.broadcast %3 : vector<1x24xf32> to vector<256x24xf32>
    %5 = arith.mulf %2, %4 : vector<256x24xf32>
    %c0_5 = arith.constant 0 : index
    %c0_6 = arith.constant 0 : index
    %6 = vector.load %arg4[%c0_5, %c0_6] : memref<1x24xf32, #tpu.memory_space<vmem>>, vector<1x24xf32>
    %7 = vector.broadcast %6 : vector<1x24xf32> to vector<256x24xf32>
    %8 = arith.addf %5, %7 : vector<256x24xf32>
    %cst_7 = arith.constant 0.000000e+00 : f32
    %9 = vector.broadcast %cst_7 : f32 to vector<256x24xf32>
    %10 = arith.maximumf %8, %9 : vector<256x24xf32>
    %11 = arith.truncf %10 : vector<256x24xf32> to vector<256x24xbf16>
    %c0_8 = arith.constant 0 : index
    %c0_9 = arith.constant 0 : index
    %12 = vector.load %arg5[%c0_8, %c0_9] : memref<256x24xbf16, #tpu.memory_space<vmem>>, vector<256x24xbf16>
    tpu.vector_store %arg5[%c0_8, %c0_9], %11 {strides = array<i32>} : memref<256x24xbf16, #tpu.memory_space<vmem>>, vector<256x24xbf16>,
    return
  }
  func.func @transform_0(%arg0: i32) -> (i32, i32) {
    %c0_i32 = arith.constant 0 : i32
    %c0_i32_0 = arith.constant 0 : i32
    return %arg0, %c0_i32 : i32, i32
  }
  func.func @transform_1(%arg0: i32) -> (i32, i32) {
    %c0_i32 = arith.constant 0 : i32
    %c0_i32_0 = arith.constant 0 : i32
    %c0_i32_1 = arith.constant 0 : i32
    return %c0_i32, %c0_i32_0 : i32, i32
  }
  func.func @transform_2(%arg0: i32) -> (i32, i32) {
    %c0_i32 = arith.constant 0 : i32
    %c0_i32_0 = arith.constant 0 : i32
    %c0_i32_1 = arith.constant 0 : i32
    return %c0_i32, %c0_i32_0 : i32, i32
  }
  func.func @transform_3(%arg0: i32) -> (i32, i32) {
    %c0_i32 = arith.constant 0 : i32
    %c0_i32_0 = arith.constant 0 : i32
    %c0_i32_1 = arith.constant 0 : i32
    return %c0_i32, %c0_i32_0 : i32, i32
  }
  func.func @transform_4(%arg0: i32) -> (i32, i32) {
    %c0_i32 = arith.constant 0 : i32
    %c0_i32_0 = arith.constant 0 : i32
    return %arg0, %c0_i32 : i32, i32
  }
}

module attributes {stable_mosaic.version = 11 : i64} {
  func.func @_mm_affine_kernel(%arg0: i32, %arg1: memref<98x216xbf16, #tpu.memory_space<vmem>>, %arg2: memref<216x32xbf16, #tpu.memory_space<vmem>>, %arg3: memref<1x32xf32, #tpu.memory_space<vmem>>, %arg4: memref<1x32xf32, #tpu.memory_space<vmem>>, %arg5: memref<98x32xbf16, #tpu.memory_space<vmem>>) attributes {dimension_semantics = [#tpu.dimension_semantics<parallel>], iteration_bounds = array<i64: 1>, scalar_prefetch = 0 : i64, scratch_operands = 0 : i64, tpu.core_type = #tpu.core_type<tc>, window_params = [{transform_indices = @transform_0, window_bounds = array<i64: 98, 216>}, {pipeline_mode = #tpu.pipeline_mode<synchronous>, transform_indices = @transform_1, window_bounds = array<i64: 216, 32>}, {pipeline_mode = #tpu.pipeline_mode<synchronous>, transform_indices = @transform_2, window_bounds = array<i64: 1, 32>}, {pipeline_mode = #tpu.pipeline_mode<synchronous>, transform_indices = @transform_3, window_bounds = array<i64: 1, 32>}, {transform_indices = @transform_4, window_bounds = array<i64: 98, 32>}]} {
    %c0 = arith.constant 0 : index
    %c0_0 = arith.constant 0 : index
    %0 = vector.load %arg1[%c0, %c0_0] : memref<98x216xbf16, #tpu.memory_space<vmem>>, vector<98x216xbf16>
    %c0_1 = arith.constant 0 : index
    %c0_2 = arith.constant 0 : index
    %1 = vector.load %arg2[%c0_1, %c0_2] : memref<216x32xbf16, #tpu.memory_space<vmem>>, vector<216x32xbf16>
    %cst = arith.constant dense<0.000000e+00> : vector<98x32xf32>
    %2 = tpu.matmul %0, %1, %cst {dimension_numbers = #tpu.dot_dimension_numbers<[1], [0], [0], [1], [0, 0, 1, 1], [], []>} : vector<98x216xbf16>, vector<216x32xbf16>, vector<98x32xf32> -> vector<98x32xf32>
    %c0_3 = arith.constant 0 : index
    %c0_4 = arith.constant 0 : index
    %3 = vector.load %arg3[%c0_3, %c0_4] : memref<1x32xf32, #tpu.memory_space<vmem>>, vector<1x32xf32>
    %4 = vector.broadcast %3 : vector<1x32xf32> to vector<98x32xf32>
    %5 = arith.mulf %2, %4 : vector<98x32xf32>
    %c0_5 = arith.constant 0 : index
    %c0_6 = arith.constant 0 : index
    %6 = vector.load %arg4[%c0_5, %c0_6] : memref<1x32xf32, #tpu.memory_space<vmem>>, vector<1x32xf32>
    %7 = vector.broadcast %6 : vector<1x32xf32> to vector<98x32xf32>
    %8 = arith.addf %5, %7 : vector<98x32xf32>
    %cst_7 = arith.constant 0.000000e+00 : f32
    %9 = vector.broadcast %cst_7 : f32 to vector<98x32xf32>
    %10 = arith.maximumf %8, %9 : vector<98x32xf32>
    %11 = arith.truncf %10 : vector<98x32xf32> to vector<98x32xbf16>
    %c0_8 = arith.constant 0 : index
    %c0_9 = arith.constant 0 : index
    %12 = vector.load %arg5[%c0_8, %c0_9] : memref<98x32xbf16, #tpu.memory_space<vmem>>, vector<98x32xbf16>
    tpu.vector_store %arg5[%c0_8, %c0_9], %11 {strides = array<i32>} : memref<98x32xbf16, #tpu.memory_space<vmem>>, vector<98x32xbf16>,
    return
  }
  func.func @transform_0(%arg0: i32) -> (i32, i32) {
    %c0_i32 = arith.constant 0 : i32
    %c0_i32_0 = arith.constant 0 : i32
    return %arg0, %c0_i32 : i32, i32
  }
  func.func @transform_1(%arg0: i32) -> (i32, i32) {
    %c0_i32 = arith.constant 0 : i32
    %c0_i32_0 = arith.constant 0 : i32
    %c0_i32_1 = arith.constant 0 : i32
    return %c0_i32, %c0_i32_0 : i32, i32
  }
  func.func @transform_2(%arg0: i32) -> (i32, i32) {
    %c0_i32 = arith.constant 0 : i32
    %c0_i32_0 = arith.constant 0 : i32
    %c0_i32_1 = arith.constant 0 : i32
    return %c0_i32, %c0_i32_0 : i32, i32
  }
  func.func @transform_3(%arg0: i32) -> (i32, i32) {
    %c0_i32 = arith.constant 0 : i32
    %c0_i32_0 = arith.constant 0 : i32
    %c0_i32_1 = arith.constant 0 : i32
    return %c0_i32, %c0_i32_0 : i32, i32
  }
  func.func @transform_4(%arg0: i32) -> (i32, i32) {
    %c0_i32 = arith.constant 0 : i32
    %c0_i32_0 = arith.constant 0 : i32
    return %arg0, %c0_i32 : i32, i32
  }
}

module attributes {stable_mosaic.version = 11 : i64} {
  func.func @_mm_affine_kernel(%arg0: i32, %arg1: memref<98x32xbf16, #tpu.memory_space<vmem>>, %arg2: memref<32x12xbf16, #tpu.memory_space<vmem>>, %arg3: memref<1x12xf32, #tpu.memory_space<vmem>>, %arg4: memref<1x12xf32, #tpu.memory_space<vmem>>, %arg5: memref<98x12xbf16, #tpu.memory_space<vmem>>) attributes {dimension_semantics = [#tpu.dimension_semantics<parallel>], iteration_bounds = array<i64: 1>, scalar_prefetch = 0 : i64, scratch_operands = 0 : i64, tpu.core_type = #tpu.core_type<tc>, window_params = [{transform_indices = @transform_0, window_bounds = array<i64: 98, 32>}, {pipeline_mode = #tpu.pipeline_mode<synchronous>, transform_indices = @transform_1, window_bounds = array<i64: 32, 12>}, {pipeline_mode = #tpu.pipeline_mode<synchronous>, transform_indices = @transform_2, window_bounds = array<i64: 1, 12>}, {pipeline_mode = #tpu.pipeline_mode<synchronous>, transform_indices = @transform_3, window_bounds = array<i64: 1, 12>}, {transform_indices = @transform_4, window_bounds = array<i64: 98, 12>}]} {
    %c0 = arith.constant 0 : index
    %c0_0 = arith.constant 0 : index
    %0 = vector.load %arg1[%c0, %c0_0] : memref<98x32xbf16, #tpu.memory_space<vmem>>, vector<98x32xbf16>
    %c0_1 = arith.constant 0 : index
    %c0_2 = arith.constant 0 : index
    %1 = vector.load %arg2[%c0_1, %c0_2] : memref<32x12xbf16, #tpu.memory_space<vmem>>, vector<32x12xbf16>
    %cst = arith.constant dense<0.000000e+00> : vector<98x12xf32>
    %2 = tpu.matmul %0, %1, %cst {dimension_numbers = #tpu.dot_dimension_numbers<[1], [0], [0], [1], [0, 0, 1, 1], [], []>} : vector<98x32xbf16>, vector<32x12xbf16>, vector<98x12xf32> -> vector<98x12xf32>
    %c0_3 = arith.constant 0 : index
    %c0_4 = arith.constant 0 : index
    %3 = vector.load %arg3[%c0_3, %c0_4] : memref<1x12xf32, #tpu.memory_space<vmem>>, vector<1x12xf32>
    %4 = vector.broadcast %3 : vector<1x12xf32> to vector<98x12xf32>
    %5 = arith.mulf %2, %4 : vector<98x12xf32>
    %c0_5 = arith.constant 0 : index
    %c0_6 = arith.constant 0 : index
    %6 = vector.load %arg4[%c0_5, %c0_6] : memref<1x12xf32, #tpu.memory_space<vmem>>, vector<1x12xf32>
    %7 = vector.broadcast %6 : vector<1x12xf32> to vector<98x12xf32>
    %8 = arith.addf %5, %7 : vector<98x12xf32>
    %cst_7 = arith.constant 0.000000e+00 : f32
    %9 = vector.broadcast %cst_7 : f32 to vector<98x12xf32>
    %10 = arith.maximumf %8, %9 : vector<98x12xf32>
    %11 = arith.truncf %10 : vector<98x12xf32> to vector<98x12xbf16>
    %c0_8 = arith.constant 0 : index
    %c0_9 = arith.constant 0 : index
    %12 = vector.load %arg5[%c0_8, %c0_9] : memref<98x12xbf16, #tpu.memory_space<vmem>>, vector<98x12xbf16>
    tpu.vector_store %arg5[%c0_8, %c0_9], %11 {strides = array<i32>} : memref<98x12xbf16, #tpu.memory_space<vmem>>, vector<98x12xbf16>,
    return
  }
  func.func @transform_0(%arg0: i32) -> (i32, i32) {
    %c0_i32 = arith.constant 0 : i32
    %c0_i32_0 = arith.constant 0 : i32
    return %arg0, %c0_i32 : i32, i32
  }
  func.func @transform_1(%arg0: i32) -> (i32, i32) {
    %c0_i32 = arith.constant 0 : i32
    %c0_i32_0 = arith.constant 0 : i32
    %c0_i32_1 = arith.constant 0 : i32
    return %c0_i32, %c0_i32_0 : i32, i32
  }
  func.func @transform_2(%arg0: i32) -> (i32, i32) {
    %c0_i32 = arith.constant 0 : i32
    %c0_i32_0 = arith.constant 0 : i32
    %c0_i32_1 = arith.constant 0 : i32
    return %c0_i32, %c0_i32_0 : i32, i32
  }
  func.func @transform_3(%arg0: i32) -> (i32, i32) {
    %c0_i32 = arith.constant 0 : i32
    %c0_i32_0 = arith.constant 0 : i32
    %c0_i32_1 = arith.constant 0 : i32
    return %c0_i32, %c0_i32_0 : i32, i32
  }
  func.func @transform_4(%arg0: i32) -> (i32, i32) {
    %c0_i32 = arith.constant 0 : i32
    %c0_i32_0 = arith.constant 0 : i32
    return %arg0, %c0_i32 : i32, i32
  }
}

module attributes {stable_mosaic.version = 11 : i64} {
  func.func @_mm_affine_kernel(%arg0: i32, %arg1: memref<98x36xbf16, #tpu.memory_space<vmem>>, %arg2: memref<36x4xbf16, #tpu.memory_space<vmem>>, %arg3: memref<1x4xf32, #tpu.memory_space<vmem>>, %arg4: memref<1x4xf32, #tpu.memory_space<vmem>>, %arg5: memref<98x4xbf16, #tpu.memory_space<vmem>>) attributes {dimension_semantics = [#tpu.dimension_semantics<parallel>], iteration_bounds = array<i64: 1>, scalar_prefetch = 0 : i64, scratch_operands = 0 : i64, tpu.core_type = #tpu.core_type<tc>, window_params = [{transform_indices = @transform_0, window_bounds = array<i64: 98, 36>}, {pipeline_mode = #tpu.pipeline_mode<synchronous>, transform_indices = @transform_1, window_bounds = array<i64: 36, 4>}, {pipeline_mode = #tpu.pipeline_mode<synchronous>, transform_indices = @transform_2, window_bounds = array<i64: 1, 4>}, {pipeline_mode = #tpu.pipeline_mode<synchronous>, transform_indices = @transform_3, window_bounds = array<i64: 1, 4>}, {transform_indices = @transform_4, window_bounds = array<i64: 98, 4>}]} {
    %c0 = arith.constant 0 : index
    %c0_0 = arith.constant 0 : index
    %0 = vector.load %arg1[%c0, %c0_0] : memref<98x36xbf16, #tpu.memory_space<vmem>>, vector<98x36xbf16>
    %c0_1 = arith.constant 0 : index
    %c0_2 = arith.constant 0 : index
    %1 = vector.load %arg2[%c0_1, %c0_2] : memref<36x4xbf16, #tpu.memory_space<vmem>>, vector<36x4xbf16>
    %cst = arith.constant dense<0.000000e+00> : vector<98x4xf32>
    %2 = tpu.matmul %0, %1, %cst {dimension_numbers = #tpu.dot_dimension_numbers<[1], [0], [0], [1], [0, 0, 1, 1], [], []>} : vector<98x36xbf16>, vector<36x4xbf16>, vector<98x4xf32> -> vector<98x4xf32>
    %c0_3 = arith.constant 0 : index
    %c0_4 = arith.constant 0 : index
    %3 = vector.load %arg3[%c0_3, %c0_4] : memref<1x4xf32, #tpu.memory_space<vmem>>, vector<1x4xf32>
    %4 = vector.broadcast %3 : vector<1x4xf32> to vector<98x4xf32>
    %5 = arith.mulf %2, %4 : vector<98x4xf32>
    %c0_5 = arith.constant 0 : index
    %c0_6 = arith.constant 0 : index
    %6 = vector.load %arg4[%c0_5, %c0_6] : memref<1x4xf32, #tpu.memory_space<vmem>>, vector<1x4xf32>
    %7 = vector.broadcast %6 : vector<1x4xf32> to vector<98x4xf32>
    %8 = arith.addf %5, %7 : vector<98x4xf32>
    %cst_7 = arith.constant 0.000000e+00 : f32
    %9 = vector.broadcast %cst_7 : f32 to vector<98x4xf32>
    %10 = arith.maximumf %8, %9 : vector<98x4xf32>
    %11 = arith.truncf %10 : vector<98x4xf32> to vector<98x4xbf16>
    %c0_8 = arith.constant 0 : index
    %c0_9 = arith.constant 0 : index
    %12 = vector.load %arg5[%c0_8, %c0_9] : memref<98x4xbf16, #tpu.memory_space<vmem>>, vector<98x4xbf16>
    tpu.vector_store %arg5[%c0_8, %c0_9], %11 {strides = array<i32>} : memref<98x4xbf16, #tpu.memory_space<vmem>>, vector<98x4xbf16>,
    return
  }
  func.func @transform_0(%arg0: i32) -> (i32, i32) {
    %c0_i32 = arith.constant 0 : i32
    %c0_i32_0 = arith.constant 0 : i32
    return %arg0, %c0_i32 : i32, i32
  }
  func.func @transform_1(%arg0: i32) -> (i32, i32) {
    %c0_i32 = arith.constant 0 : i32
    %c0_i32_0 = arith.constant 0 : i32
    %c0_i32_1 = arith.constant 0 : i32
    return %c0_i32, %c0_i32_0 : i32, i32
  }
  func.func @transform_2(%arg0: i32) -> (i32, i32) {
    %c0_i32 = arith.constant 0 : i32
    %c0_i32_0 = arith.constant 0 : i32
    %c0_i32_1 = arith.constant 0 : i32
    return %c0_i32, %c0_i32_0 : i32, i32
  }
  func.func @transform_3(%arg0: i32) -> (i32, i32) {
    %c0_i32 = arith.constant 0 : i32
    %c0_i32_0 = arith.constant 0 : i32
    %c0_i32_1 = arith.constant 0 : i32
    return %c0_i32, %c0_i32_0 : i32, i32
  }
  func.func @transform_4(%arg0: i32) -> (i32, i32) {
    %c0_i32 = arith.constant 0 : i32
    %c0_i32_0 = arith.constant 0 : i32
    return %arg0, %c0_i32 : i32, i32
  }
}

module attributes {stable_mosaic.version = 11 : i64} {
  func.func @_mm_affine_res_kernel(%arg0: i32, %arg1: memref<98x12xbf16, #tpu.memory_space<vmem>>, %arg2: memref<12x32xbf16, #tpu.memory_space<vmem>>, %arg3: memref<1x32xf32, #tpu.memory_space<vmem>>, %arg4: memref<1x32xf32, #tpu.memory_space<vmem>>, %arg5: memref<98x32xbf16, #tpu.memory_space<vmem>>, %arg6: memref<98x32xbf16, #tpu.memory_space<vmem>>) attributes {dimension_semantics = [#tpu.dimension_semantics<parallel>], iteration_bounds = array<i64: 1>, scalar_prefetch = 0 : i64, scratch_operands = 0 : i64, tpu.core_type = #tpu.core_type<tc>, window_params = [{transform_indices = @transform_0, window_bounds = array<i64: 98, 12>}, {pipeline_mode = #tpu.pipeline_mode<synchronous>, transform_indices = @transform_1, window_bounds = array<i64: 12, 32>}, {pipeline_mode = #tpu.pipeline_mode<synchronous>, transform_indices = @transform_2, window_bounds = array<i64: 1, 32>}, {pipeline_mode = #tpu.pipeline_mode<synchronous>, transform_indices = @transform_3, window_bounds = array<i64: 1, 32>}, {transform_indices = @transform_4, window_bounds = array<i64: 98, 32>}, {transform_indices = @transform_5, window_bounds = array<i64: 98, 32>}]} {
    %c0 = arith.constant 0 : index
    %c0_0 = arith.constant 0 : index
    %0 = vector.load %arg1[%c0, %c0_0] : memref<98x12xbf16, #tpu.memory_space<vmem>>, vector<98x12xbf16>
    %c0_1 = arith.constant 0 : index
    %c0_2 = arith.constant 0 : index
    %1 = vector.load %arg2[%c0_1, %c0_2] : memref<12x32xbf16, #tpu.memory_space<vmem>>, vector<12x32xbf16>
    %cst = arith.constant dense<0.000000e+00> : vector<98x32xf32>
    %2 = tpu.matmul %0, %1, %cst {dimension_numbers = #tpu.dot_dimension_numbers<[1], [0], [0], [1], [0, 0, 1, 1], [], []>} : vector<98x12xbf16>, vector<12x32xbf16>, vector<98x32xf32> -> vector<98x32xf32>
    %c0_3 = arith.constant 0 : index
    %c0_4 = arith.constant 0 : index
    %3 = vector.load %arg3[%c0_3, %c0_4] : memref<1x32xf32, #tpu.memory_space<vmem>>, vector<1x32xf32>
    %4 = vector.broadcast %3 : vector<1x32xf32> to vector<98x32xf32>
    %5 = arith.mulf %2, %4 : vector<98x32xf32>
    %c0_5 = arith.constant 0 : index
    %c0_6 = arith.constant 0 : index
    %6 = vector.load %arg4[%c0_5, %c0_6] : memref<1x32xf32, #tpu.memory_space<vmem>>, vector<1x32xf32>
    %7 = vector.broadcast %6 : vector<1x32xf32> to vector<98x32xf32>
    %8 = arith.addf %5, %7 : vector<98x32xf32>
    %c0_7 = arith.constant 0 : index
    %c0_8 = arith.constant 0 : index
    %9 = vector.load %arg5[%c0_7, %c0_8] : memref<98x32xbf16, #tpu.memory_space<vmem>>, vector<98x32xbf16>
    %10 = arith.extf %9 : vector<98x32xbf16> to vector<98x32xf32>
    %11 = arith.addf %8, %10 : vector<98x32xf32>
    %cst_9 = arith.constant 0.000000e+00 : f32
    %12 = vector.broadcast %cst_9 : f32 to vector<98x32xf32>
    %13 = arith.maximumf %11, %12 : vector<98x32xf32>
    %14 = arith.truncf %13 : vector<98x32xf32> to vector<98x32xbf16>
    %c0_10 = arith.constant 0 : index
    %c0_11 = arith.constant 0 : index
    %15 = vector.load %arg6[%c0_10, %c0_11] : memref<98x32xbf16, #tpu.memory_space<vmem>>, vector<98x32xbf16>
    tpu.vector_store %arg6[%c0_10, %c0_11], %14 {strides = array<i32>} : memref<98x32xbf16, #tpu.memory_space<vmem>>, vector<98x32xbf16>,
    return
  }
  func.func @transform_0(%arg0: i32) -> (i32, i32) {
    %c0_i32 = arith.constant 0 : i32
    %c0_i32_0 = arith.constant 0 : i32
    return %arg0, %c0_i32 : i32, i32
  }
  func.func @transform_1(%arg0: i32) -> (i32, i32) {
    %c0_i32 = arith.constant 0 : i32
    %c0_i32_0 = arith.constant 0 : i32
    %c0_i32_1 = arith.constant 0 : i32
    return %c0_i32, %c0_i32_0 : i32, i32
  }
  func.func @transform_2(%arg0: i32) -> (i32, i32) {
    %c0_i32 = arith.constant 0 : i32
    %c0_i32_0 = arith.constant 0 : i32
    %c0_i32_1 = arith.constant 0 : i32
    return %c0_i32, %c0_i32_0 : i32, i32
  }
  func.func @transform_3(%arg0: i32) -> (i32, i32) {
    %c0_i32 = arith.constant 0 : i32
    %c0_i32_0 = arith.constant 0 : i32
    %c0_i32_1 = arith.constant 0 : i32
    return %c0_i32, %c0_i32_0 : i32, i32
  }
  func.func @transform_4(%arg0: i32) -> (i32, i32) {
    %c0_i32 = arith.constant 0 : i32
    %c0_i32_0 = arith.constant 0 : i32
    return %arg0, %c0_i32 : i32, i32
  }
  func.func @transform_5(%arg0: i32) -> (i32, i32) {
    %c0_i32 = arith.constant 0 : i32
    %c0_i32_0 = arith.constant 0 : i32
    return %arg0, %c0_i32 : i32, i32
  }
}

module attributes {stable_mosaic.version = 11 : i64} {
  func.func @_mm_affine_kernel(%arg0: i32, %arg1: memref<98x32xbf16, #tpu.memory_space<vmem>>, %arg2: memref<32x24xbf16, #tpu.memory_space<vmem>>, %arg3: memref<1x24xf32, #tpu.memory_space<vmem>>, %arg4: memref<1x24xf32, #tpu.memory_space<vmem>>, %arg5: memref<98x24xbf16, #tpu.memory_space<vmem>>) attributes {dimension_semantics = [#tpu.dimension_semantics<parallel>], iteration_bounds = array<i64: 1>, scalar_prefetch = 0 : i64, scratch_operands = 0 : i64, tpu.core_type = #tpu.core_type<tc>, window_params = [{transform_indices = @transform_0, window_bounds = array<i64: 98, 32>}, {pipeline_mode = #tpu.pipeline_mode<synchronous>, transform_indices = @transform_1, window_bounds = array<i64: 32, 24>}, {pipeline_mode = #tpu.pipeline_mode<synchronous>, transform_indices = @transform_2, window_bounds = array<i64: 1, 24>}, {pipeline_mode = #tpu.pipeline_mode<synchronous>, transform_indices = @transform_3, window_bounds = array<i64: 1, 24>}, {transform_indices = @transform_4, window_bounds = array<i64: 98, 24>}]} {
    %c0 = arith.constant 0 : index
    %c0_0 = arith.constant 0 : index
    %0 = vector.load %arg1[%c0, %c0_0] : memref<98x32xbf16, #tpu.memory_space<vmem>>, vector<98x32xbf16>
    %c0_1 = arith.constant 0 : index
    %c0_2 = arith.constant 0 : index
    %1 = vector.load %arg2[%c0_1, %c0_2] : memref<32x24xbf16, #tpu.memory_space<vmem>>, vector<32x24xbf16>
    %cst = arith.constant dense<0.000000e+00> : vector<98x24xf32>
    %2 = tpu.matmul %0, %1, %cst {dimension_numbers = #tpu.dot_dimension_numbers<[1], [0], [0], [1], [0, 0, 1, 1], [], []>} : vector<98x32xbf16>, vector<32x24xbf16>, vector<98x24xf32> -> vector<98x24xf32>
    %c0_3 = arith.constant 0 : index
    %c0_4 = arith.constant 0 : index
    %3 = vector.load %arg3[%c0_3, %c0_4] : memref<1x24xf32, #tpu.memory_space<vmem>>, vector<1x24xf32>
    %4 = vector.broadcast %3 : vector<1x24xf32> to vector<98x24xf32>
    %5 = arith.mulf %2, %4 : vector<98x24xf32>
    %c0_5 = arith.constant 0 : index
    %c0_6 = arith.constant 0 : index
    %6 = vector.load %arg4[%c0_5, %c0_6] : memref<1x24xf32, #tpu.memory_space<vmem>>, vector<1x24xf32>
    %7 = vector.broadcast %6 : vector<1x24xf32> to vector<98x24xf32>
    %8 = arith.addf %5, %7 : vector<98x24xf32>
    %cst_7 = arith.constant 0.000000e+00 : f32
    %9 = vector.broadcast %cst_7 : f32 to vector<98x24xf32>
    %10 = arith.maximumf %8, %9 : vector<98x24xf32>
    %11 = arith.truncf %10 : vector<98x24xf32> to vector<98x24xbf16>
    %c0_8 = arith.constant 0 : index
    %c0_9 = arith.constant 0 : index
    %12 = vector.load %arg5[%c0_8, %c0_9] : memref<98x24xbf16, #tpu.memory_space<vmem>>, vector<98x24xbf16>
    tpu.vector_store %arg5[%c0_8, %c0_9], %11 {strides = array<i32>} : memref<98x24xbf16, #tpu.memory_space<vmem>>, vector<98x24xbf16>,
    return
  }
  func.func @transform_0(%arg0: i32) -> (i32, i32) {
    %c0_i32 = arith.constant 0 : i32
    %c0_i32_0 = arith.constant 0 : i32
    return %arg0, %c0_i32 : i32, i32
  }
  func.func @transform_1(%arg0: i32) -> (i32, i32) {
    %c0_i32 = arith.constant 0 : i32
    %c0_i32_0 = arith.constant 0 : i32
    %c0_i32_1 = arith.constant 0 : i32
    return %c0_i32, %c0_i32_0 : i32, i32
  }
  func.func @transform_2(%arg0: i32) -> (i32, i32) {
    %c0_i32 = arith.constant 0 : i32
    %c0_i32_0 = arith.constant 0 : i32
    %c0_i32_1 = arith.constant 0 : i32
    return %c0_i32, %c0_i32_0 : i32, i32
  }
  func.func @transform_3(%arg0: i32) -> (i32, i32) {
    %c0_i32 = arith.constant 0 : i32
    %c0_i32_0 = arith.constant 0 : i32
    %c0_i32_1 = arith.constant 0 : i32
    return %c0_i32, %c0_i32_0 : i32, i32
  }
  func.func @transform_4(%arg0: i32) -> (i32, i32) {
    %c0_i32 = arith.constant 0 : i32
    %c0_i32_0 = arith.constant 0 : i32
    return %arg0, %c0_i32 : i32, i32
  }
}

module attributes {stable_mosaic.version = 11 : i64} {
  func.func @_mm_affine_kernel(%arg0: i32, %arg1: memref<18x288xbf16, #tpu.memory_space<vmem>>, %arg2: memref<288x48xbf16, #tpu.memory_space<vmem>>, %arg3: memref<1x48xf32, #tpu.memory_space<vmem>>, %arg4: memref<1x48xf32, #tpu.memory_space<vmem>>, %arg5: memref<18x48xbf16, #tpu.memory_space<vmem>>) attributes {dimension_semantics = [#tpu.dimension_semantics<parallel>], iteration_bounds = array<i64: 1>, scalar_prefetch = 0 : i64, scratch_operands = 0 : i64, tpu.core_type = #tpu.core_type<tc>, window_params = [{transform_indices = @transform_0, window_bounds = array<i64: 18, 288>}, {pipeline_mode = #tpu.pipeline_mode<synchronous>, transform_indices = @transform_1, window_bounds = array<i64: 288, 48>}, {pipeline_mode = #tpu.pipeline_mode<synchronous>, transform_indices = @transform_2, window_bounds = array<i64: 1, 48>}, {pipeline_mode = #tpu.pipeline_mode<synchronous>, transform_indices = @transform_3, window_bounds = array<i64: 1, 48>}, {transform_indices = @transform_4, window_bounds = array<i64: 18, 48>}]} {
    %c0 = arith.constant 0 : index
    %c0_0 = arith.constant 0 : index
    %0 = vector.load %arg1[%c0, %c0_0] : memref<18x288xbf16, #tpu.memory_space<vmem>>, vector<18x288xbf16>
    %c0_1 = arith.constant 0 : index
    %c0_2 = arith.constant 0 : index
    %1 = vector.load %arg2[%c0_1, %c0_2] : memref<288x48xbf16, #tpu.memory_space<vmem>>, vector<288x48xbf16>
    %cst = arith.constant dense<0.000000e+00> : vector<18x48xf32>
    %2 = tpu.matmul %0, %1, %cst {dimension_numbers = #tpu.dot_dimension_numbers<[1], [0], [0], [1], [0, 0, 1, 1], [], []>} : vector<18x288xbf16>, vector<288x48xbf16>, vector<18x48xf32> -> vector<18x48xf32>
    %c0_3 = arith.constant 0 : index
    %c0_4 = arith.constant 0 : index
    %3 = vector.load %arg3[%c0_3, %c0_4] : memref<1x48xf32, #tpu.memory_space<vmem>>, vector<1x48xf32>
    %4 = vector.broadcast %3 : vector<1x48xf32> to vector<18x48xf32>
    %5 = arith.mulf %2, %4 : vector<18x48xf32>
    %c0_5 = arith.constant 0 : index
    %c0_6 = arith.constant 0 : index
    %6 = vector.load %arg4[%c0_5, %c0_6] : memref<1x48xf32, #tpu.memory_space<vmem>>, vector<1x48xf32>
    %7 = vector.broadcast %6 : vector<1x48xf32> to vector<18x48xf32>
    %8 = arith.addf %5, %7 : vector<18x48xf32>
    %cst_7 = arith.constant 0.000000e+00 : f32
    %9 = vector.broadcast %cst_7 : f32 to vector<18x48xf32>
    %10 = arith.maximumf %8, %9 : vector<18x48xf32>
    %11 = arith.truncf %10 : vector<18x48xf32> to vector<18x48xbf16>
    %c0_8 = arith.constant 0 : index
    %c0_9 = arith.constant 0 : index
    %12 = vector.load %arg5[%c0_8, %c0_9] : memref<18x48xbf16, #tpu.memory_space<vmem>>, vector<18x48xbf16>
    tpu.vector_store %arg5[%c0_8, %c0_9], %11 {strides = array<i32>} : memref<18x48xbf16, #tpu.memory_space<vmem>>, vector<18x48xbf16>,
    return
  }
  func.func @transform_0(%arg0: i32) -> (i32, i32) {
    %c0_i32 = arith.constant 0 : i32
    %c0_i32_0 = arith.constant 0 : i32
    return %arg0, %c0_i32 : i32, i32
  }
  func.func @transform_1(%arg0: i32) -> (i32, i32) {
    %c0_i32 = arith.constant 0 : i32
    %c0_i32_0 = arith.constant 0 : i32
    %c0_i32_1 = arith.constant 0 : i32
    return %c0_i32, %c0_i32_0 : i32, i32
  }
  func.func @transform_2(%arg0: i32) -> (i32, i32) {
    %c0_i32 = arith.constant 0 : i32
    %c0_i32_0 = arith.constant 0 : i32
    %c0_i32_1 = arith.constant 0 : i32
    return %c0_i32, %c0_i32_0 : i32, i32
  }
  func.func @transform_3(%arg0: i32) -> (i32, i32) {
    %c0_i32 = arith.constant 0 : i32
    %c0_i32_0 = arith.constant 0 : i32
    %c0_i32_1 = arith.constant 0 : i32
    return %c0_i32, %c0_i32_0 : i32, i32
  }
  func.func @transform_4(%arg0: i32) -> (i32, i32) {
    %c0_i32 = arith.constant 0 : i32
    %c0_i32_0 = arith.constant 0 : i32
    return %arg0, %c0_i32 : i32, i32
  }
}

module attributes {stable_mosaic.version = 11 : i64} {
  func.func @_mm_affine_kernel(%arg0: i32, %arg1: memref<98x216xbf16, #tpu.memory_space<vmem>>, %arg2: memref<216x24xbf16, #tpu.memory_space<vmem>>, %arg3: memref<1x24xf32, #tpu.memory_space<vmem>>, %arg4: memref<1x24xf32, #tpu.memory_space<vmem>>, %arg5: memref<98x24xbf16, #tpu.memory_space<vmem>>) attributes {dimension_semantics = [#tpu.dimension_semantics<parallel>], iteration_bounds = array<i64: 1>, scalar_prefetch = 0 : i64, scratch_operands = 0 : i64, tpu.core_type = #tpu.core_type<tc>, window_params = [{transform_indices = @transform_0, window_bounds = array<i64: 98, 216>}, {pipeline_mode = #tpu.pipeline_mode<synchronous>, transform_indices = @transform_1, window_bounds = array<i64: 216, 24>}, {pipeline_mode = #tpu.pipeline_mode<synchronous>, transform_indices = @transform_2, window_bounds = array<i64: 1, 24>}, {pipeline_mode = #tpu.pipeline_mode<synchronous>, transform_indices = @transform_3, window_bounds = array<i64: 1, 24>}, {transform_indices = @transform_4, window_bounds = array<i64: 98, 24>}]} {
    %c0 = arith.constant 0 : index
    %c0_0 = arith.constant 0 : index
    %0 = vector.load %arg1[%c0, %c0_0] : memref<98x216xbf16, #tpu.memory_space<vmem>>, vector<98x216xbf16>
    %c0_1 = arith.constant 0 : index
    %c0_2 = arith.constant 0 : index
    %1 = vector.load %arg2[%c0_1, %c0_2] : memref<216x24xbf16, #tpu.memory_space<vmem>>, vector<216x24xbf16>
    %cst = arith.constant dense<0.000000e+00> : vector<98x24xf32>
    %2 = tpu.matmul %0, %1, %cst {dimension_numbers = #tpu.dot_dimension_numbers<[1], [0], [0], [1], [0, 0, 1, 1], [], []>} : vector<98x216xbf16>, vector<216x24xbf16>, vector<98x24xf32> -> vector<98x24xf32>
    %c0_3 = arith.constant 0 : index
    %c0_4 = arith.constant 0 : index
    %3 = vector.load %arg3[%c0_3, %c0_4] : memref<1x24xf32, #tpu.memory_space<vmem>>, vector<1x24xf32>
    %4 = vector.broadcast %3 : vector<1x24xf32> to vector<98x24xf32>
    %5 = arith.mulf %2, %4 : vector<98x24xf32>
    %c0_5 = arith.constant 0 : index
    %c0_6 = arith.constant 0 : index
    %6 = vector.load %arg4[%c0_5, %c0_6] : memref<1x24xf32, #tpu.memory_space<vmem>>, vector<1x24xf32>
    %7 = vector.broadcast %6 : vector<1x24xf32> to vector<98x24xf32>
    %8 = arith.addf %5, %7 : vector<98x24xf32>
    %cst_7 = arith.constant 0.000000e+00 : f32
    %9 = vector.broadcast %cst_7 : f32 to vector<98x24xf32>
    %10 = arith.maximumf %8, %9 : vector<98x24xf32>
    %11 = arith.truncf %10 : vector<98x24xf32> to vector<98x24xbf16>
    %c0_8 = arith.constant 0 : index
    %c0_9 = arith.constant 0 : index
    %12 = vector.load %arg5[%c0_8, %c0_9] : memref<98x24xbf16, #tpu.memory_space<vmem>>, vector<98x24xbf16>
    tpu.vector_store %arg5[%c0_8, %c0_9], %11 {strides = array<i32>} : memref<98x24xbf16, #tpu.memory_space<vmem>>, vector<98x24xbf16>,
    return
  }
  func.func @transform_0(%arg0: i32) -> (i32, i32) {
    %c0_i32 = arith.constant 0 : i32
    %c0_i32_0 = arith.constant 0 : i32
    return %arg0, %c0_i32 : i32, i32
  }
  func.func @transform_1(%arg0: i32) -> (i32, i32) {
    %c0_i32 = arith.constant 0 : i32
    %c0_i32_0 = arith.constant 0 : i32
    %c0_i32_1 = arith.constant 0 : i32
    return %c0_i32, %c0_i32_0 : i32, i32
  }
  func.func @transform_2(%arg0: i32) -> (i32, i32) {
    %c0_i32 = arith.constant 0 : i32
    %c0_i32_0 = arith.constant 0 : i32
    %c0_i32_1 = arith.constant 0 : i32
    return %c0_i32, %c0_i32_0 : i32, i32
  }
  func.func @transform_3(%arg0: i32) -> (i32, i32) {
    %c0_i32 = arith.constant 0 : i32
    %c0_i32_0 = arith.constant 0 : i32
    %c0_i32_1 = arith.constant 0 : i32
    return %c0_i32, %c0_i32_0 : i32, i32
  }
  func.func @transform_4(%arg0: i32) -> (i32, i32) {
    %c0_i32 = arith.constant 0 : i32
    %c0_i32_0 = arith.constant 0 : i32
    return %arg0, %c0_i32 : i32, i32
  }
}

module attributes {stable_mosaic.version = 11 : i64} {
  func.func @_mm_affine_kernel(%arg0: i32, %arg1: memref<18x216xbf16, #tpu.memory_space<vmem>>, %arg2: memref<216x32xbf16, #tpu.memory_space<vmem>>, %arg3: memref<1x32xf32, #tpu.memory_space<vmem>>, %arg4: memref<1x32xf32, #tpu.memory_space<vmem>>, %arg5: memref<18x32xbf16, #tpu.memory_space<vmem>>) attributes {dimension_semantics = [#tpu.dimension_semantics<parallel>], iteration_bounds = array<i64: 1>, scalar_prefetch = 0 : i64, scratch_operands = 0 : i64, tpu.core_type = #tpu.core_type<tc>, window_params = [{transform_indices = @transform_0, window_bounds = array<i64: 18, 216>}, {pipeline_mode = #tpu.pipeline_mode<synchronous>, transform_indices = @transform_1, window_bounds = array<i64: 216, 32>}, {pipeline_mode = #tpu.pipeline_mode<synchronous>, transform_indices = @transform_2, window_bounds = array<i64: 1, 32>}, {pipeline_mode = #tpu.pipeline_mode<synchronous>, transform_indices = @transform_3, window_bounds = array<i64: 1, 32>}, {transform_indices = @transform_4, window_bounds = array<i64: 18, 32>}]} {
    %c0 = arith.constant 0 : index
    %c0_0 = arith.constant 0 : index
    %0 = vector.load %arg1[%c0, %c0_0] : memref<18x216xbf16, #tpu.memory_space<vmem>>, vector<18x216xbf16>
    %c0_1 = arith.constant 0 : index
    %c0_2 = arith.constant 0 : index
    %1 = vector.load %arg2[%c0_1, %c0_2] : memref<216x32xbf16, #tpu.memory_space<vmem>>, vector<216x32xbf16>
    %cst = arith.constant dense<0.000000e+00> : vector<18x32xf32>
    %2 = tpu.matmul %0, %1, %cst {dimension_numbers = #tpu.dot_dimension_numbers<[1], [0], [0], [1], [0, 0, 1, 1], [], []>} : vector<18x216xbf16>, vector<216x32xbf16>, vector<18x32xf32> -> vector<18x32xf32>
    %c0_3 = arith.constant 0 : index
    %c0_4 = arith.constant 0 : index
    %3 = vector.load %arg3[%c0_3, %c0_4] : memref<1x32xf32, #tpu.memory_space<vmem>>, vector<1x32xf32>
    %4 = vector.broadcast %3 : vector<1x32xf32> to vector<18x32xf32>
    %5 = arith.mulf %2, %4 : vector<18x32xf32>
    %c0_5 = arith.constant 0 : index
    %c0_6 = arith.constant 0 : index
    %6 = vector.load %arg4[%c0_5, %c0_6] : memref<1x32xf32, #tpu.memory_space<vmem>>, vector<1x32xf32>
    %7 = vector.broadcast %6 : vector<1x32xf32> to vector<18x32xf32>
    %8 = arith.addf %5, %7 : vector<18x32xf32>
    %cst_7 = arith.constant 0.000000e+00 : f32
    %9 = vector.broadcast %cst_7 : f32 to vector<18x32xf32>
    %10 = arith.maximumf %8, %9 : vector<18x32xf32>
    %11 = arith.truncf %10 : vector<18x32xf32> to vector<18x32xbf16>
    %c0_8 = arith.constant 0 : index
    %c0_9 = arith.constant 0 : index
    %12 = vector.load %arg5[%c0_8, %c0_9] : memref<18x32xbf16, #tpu.memory_space<vmem>>, vector<18x32xbf16>
    tpu.vector_store %arg5[%c0_8, %c0_9], %11 {strides = array<i32>} : memref<18x32xbf16, #tpu.memory_space<vmem>>, vector<18x32xbf16>,
    return
  }
  func.func @transform_0(%arg0: i32) -> (i32, i32) {
    %c0_i32 = arith.constant 0 : i32
    %c0_i32_0 = arith.constant 0 : i32
    return %arg0, %c0_i32 : i32, i32
  }
  func.func @transform_1(%arg0: i32) -> (i32, i32) {
    %c0_i32 = arith.constant 0 : i32
    %c0_i32_0 = arith.constant 0 : i32
    %c0_i32_1 = arith.constant 0 : i32
    return %c0_i32, %c0_i32_0 : i32, i32
  }
  func.func @transform_2(%arg0: i32) -> (i32, i32) {
    %c0_i32 = arith.constant 0 : i32
    %c0_i32_0 = arith.constant 0 : i32
    %c0_i32_1 = arith.constant 0 : i32
    return %c0_i32, %c0_i32_0 : i32, i32
  }
  func.func @transform_3(%arg0: i32) -> (i32, i32) {
    %c0_i32 = arith.constant 0 : i32
    %c0_i32_0 = arith.constant 0 : i32
    %c0_i32_1 = arith.constant 0 : i32
    return %c0_i32, %c0_i32_0 : i32, i32
  }
  func.func @transform_4(%arg0: i32) -> (i32, i32) {
    %c0_i32 = arith.constant 0 : i32
    %c0_i32_0 = arith.constant 0 : i32
    return %arg0, %c0_i32 : i32, i32
  }
}

module attributes {stable_mosaic.version = 11 : i64} {
  func.func @_mm_affine_kernel(%arg0: i32, %arg1: memref<18x112xbf16, #tpu.memory_space<vmem>>, %arg2: memref<112x32xbf16, #tpu.memory_space<vmem>>, %arg3: memref<1x32xf32, #tpu.memory_space<vmem>>, %arg4: memref<1x32xf32, #tpu.memory_space<vmem>>, %arg5: memref<18x32xbf16, #tpu.memory_space<vmem>>) attributes {dimension_semantics = [#tpu.dimension_semantics<parallel>], iteration_bounds = array<i64: 1>, scalar_prefetch = 0 : i64, scratch_operands = 0 : i64, tpu.core_type = #tpu.core_type<tc>, window_params = [{transform_indices = @transform_0, window_bounds = array<i64: 18, 112>}, {pipeline_mode = #tpu.pipeline_mode<synchronous>, transform_indices = @transform_1, window_bounds = array<i64: 112, 32>}, {pipeline_mode = #tpu.pipeline_mode<synchronous>, transform_indices = @transform_2, window_bounds = array<i64: 1, 32>}, {pipeline_mode = #tpu.pipeline_mode<synchronous>, transform_indices = @transform_3, window_bounds = array<i64: 1, 32>}, {transform_indices = @transform_4, window_bounds = array<i64: 18, 32>}]} {
    %c0 = arith.constant 0 : index
    %c0_0 = arith.constant 0 : index
    %0 = vector.load %arg1[%c0, %c0_0] : memref<18x112xbf16, #tpu.memory_space<vmem>>, vector<18x112xbf16>
    %c0_1 = arith.constant 0 : index
    %c0_2 = arith.constant 0 : index
    %1 = vector.load %arg2[%c0_1, %c0_2] : memref<112x32xbf16, #tpu.memory_space<vmem>>, vector<112x32xbf16>
    %cst = arith.constant dense<0.000000e+00> : vector<18x32xf32>
    %2 = tpu.matmul %0, %1, %cst {dimension_numbers = #tpu.dot_dimension_numbers<[1], [0], [0], [1], [0, 0, 1, 1], [], []>} : vector<18x112xbf16>, vector<112x32xbf16>, vector<18x32xf32> -> vector<18x32xf32>
    %c0_3 = arith.constant 0 : index
    %c0_4 = arith.constant 0 : index
    %3 = vector.load %arg3[%c0_3, %c0_4] : memref<1x32xf32, #tpu.memory_space<vmem>>, vector<1x32xf32>
    %4 = vector.broadcast %3 : vector<1x32xf32> to vector<18x32xf32>
    %5 = arith.mulf %2, %4 : vector<18x32xf32>
    %c0_5 = arith.constant 0 : index
    %c0_6 = arith.constant 0 : index
    %6 = vector.load %arg4[%c0_5, %c0_6] : memref<1x32xf32, #tpu.memory_space<vmem>>, vector<1x32xf32>
    %7 = vector.broadcast %6 : vector<1x32xf32> to vector<18x32xf32>
    %8 = arith.addf %5, %7 : vector<18x32xf32>
    %cst_7 = arith.constant 0.000000e+00 : f32
    %9 = vector.broadcast %cst_7 : f32 to vector<18x32xf32>
    %10 = arith.maximumf %8, %9 : vector<18x32xf32>
    %11 = arith.truncf %10 : vector<18x32xf32> to vector<18x32xbf16>
    %c0_8 = arith.constant 0 : index
    %c0_9 = arith.constant 0 : index
    %12 = vector.load %arg5[%c0_8, %c0_9] : memref<18x32xbf16, #tpu.memory_space<vmem>>, vector<18x32xbf16>
    tpu.vector_store %arg5[%c0_8, %c0_9], %11 {strides = array<i32>} : memref<18x32xbf16, #tpu.memory_space<vmem>>, vector<18x32xbf16>,
    return
  }
  func.func @transform_0(%arg0: i32) -> (i32, i32) {
    %c0_i32 = arith.constant 0 : i32
    %c0_i32_0 = arith.constant 0 : i32
    return %arg0, %c0_i32 : i32, i32
  }
  func.func @transform_1(%arg0: i32) -> (i32, i32) {
    %c0_i32 = arith.constant 0 : i32
    %c0_i32_0 = arith.constant 0 : i32
    %c0_i32_1 = arith.constant 0 : i32
    return %c0_i32, %c0_i32_0 : i32, i32
  }
  func.func @transform_2(%arg0: i32) -> (i32, i32) {
    %c0_i32 = arith.constant 0 : i32
    %c0_i32_0 = arith.constant 0 : i32
    %c0_i32_1 = arith.constant 0 : i32
    return %c0_i32, %c0_i32_0 : i32, i32
  }
  func.func @transform_3(%arg0: i32) -> (i32, i32) {
    %c0_i32 = arith.constant 0 : i32
    %c0_i32_0 = arith.constant 0 : i32
    %c0_i32_1 = arith.constant 0 : i32
    return %c0_i32, %c0_i32_0 : i32, i32
  }
  func.func @transform_4(%arg0: i32) -> (i32, i32) {
    %c0_i32 = arith.constant 0 : i32
    %c0_i32_0 = arith.constant 0 : i32
    return %arg0, %c0_i32 : i32, i32
  }
}

module attributes {stable_mosaic.version = 11 : i64} {
  func.func @_mm_affine_kernel(%arg0: i32, %arg1: memref<18x112xbf16, #tpu.memory_space<vmem>>, %arg2: memref<112x16xbf16, #tpu.memory_space<vmem>>, %arg3: memref<1x16xf32, #tpu.memory_space<vmem>>, %arg4: memref<1x16xf32, #tpu.memory_space<vmem>>, %arg5: memref<18x16xbf16, #tpu.memory_space<vmem>>) attributes {dimension_semantics = [#tpu.dimension_semantics<parallel>], iteration_bounds = array<i64: 1>, scalar_prefetch = 0 : i64, scratch_operands = 0 : i64, tpu.core_type = #tpu.core_type<tc>, window_params = [{transform_indices = @transform_0, window_bounds = array<i64: 18, 112>}, {pipeline_mode = #tpu.pipeline_mode<synchronous>, transform_indices = @transform_1, window_bounds = array<i64: 112, 16>}, {pipeline_mode = #tpu.pipeline_mode<synchronous>, transform_indices = @transform_2, window_bounds = array<i64: 1, 16>}, {pipeline_mode = #tpu.pipeline_mode<synchronous>, transform_indices = @transform_3, window_bounds = array<i64: 1, 16>}, {transform_indices = @transform_4, window_bounds = array<i64: 18, 16>}]} {
    %c0 = arith.constant 0 : index
    %c0_0 = arith.constant 0 : index
    %0 = vector.load %arg1[%c0, %c0_0] : memref<18x112xbf16, #tpu.memory_space<vmem>>, vector<18x112xbf16>
    %c0_1 = arith.constant 0 : index
    %c0_2 = arith.constant 0 : index
    %1 = vector.load %arg2[%c0_1, %c0_2] : memref<112x16xbf16, #tpu.memory_space<vmem>>, vector<112x16xbf16>
    %cst = arith.constant dense<0.000000e+00> : vector<18x16xf32>
    %2 = tpu.matmul %0, %1, %cst {dimension_numbers = #tpu.dot_dimension_numbers<[1], [0], [0], [1], [0, 0, 1, 1], [], []>} : vector<18x112xbf16>, vector<112x16xbf16>, vector<18x16xf32> -> vector<18x16xf32>
    %c0_3 = arith.constant 0 : index
    %c0_4 = arith.constant 0 : index
    %3 = vector.load %arg3[%c0_3, %c0_4] : memref<1x16xf32, #tpu.memory_space<vmem>>, vector<1x16xf32>
    %4 = vector.broadcast %3 : vector<1x16xf32> to vector<18x16xf32>
    %5 = arith.mulf %2, %4 : vector<18x16xf32>
    %c0_5 = arith.constant 0 : index
    %c0_6 = arith.constant 0 : index
    %6 = vector.load %arg4[%c0_5, %c0_6] : memref<1x16xf32, #tpu.memory_space<vmem>>, vector<1x16xf32>
    %7 = vector.broadcast %6 : vector<1x16xf32> to vector<18x16xf32>
    %8 = arith.addf %5, %7 : vector<18x16xf32>
    %cst_7 = arith.constant 0.000000e+00 : f32
    %9 = vector.broadcast %cst_7 : f32 to vector<18x16xf32>
    %10 = arith.maximumf %8, %9 : vector<18x16xf32>
    %11 = arith.truncf %10 : vector<18x16xf32> to vector<18x16xbf16>
    %c0_8 = arith.constant 0 : index
    %c0_9 = arith.constant 0 : index
    %12 = vector.load %arg5[%c0_8, %c0_9] : memref<18x16xbf16, #tpu.memory_space<vmem>>, vector<18x16xbf16>
    tpu.vector_store %arg5[%c0_8, %c0_9], %11 {strides = array<i32>} : memref<18x16xbf16, #tpu.memory_space<vmem>>, vector<18x16xbf16>,
    return
  }
  func.func @transform_0(%arg0: i32) -> (i32, i32) {
    %c0_i32 = arith.constant 0 : i32
    %c0_i32_0 = arith.constant 0 : i32
    return %arg0, %c0_i32 : i32, i32
  }
  func.func @transform_1(%arg0: i32) -> (i32, i32) {
    %c0_i32 = arith.constant 0 : i32
    %c0_i32_0 = arith.constant 0 : i32
    %c0_i32_1 = arith.constant 0 : i32
    return %c0_i32, %c0_i32_0 : i32, i32
  }
  func.func @transform_2(%arg0: i32) -> (i32, i32) {
    %c0_i32 = arith.constant 0 : i32
    %c0_i32_0 = arith.constant 0 : i32
    %c0_i32_1 = arith.constant 0 : i32
    return %c0_i32, %c0_i32_0 : i32, i32
  }
  func.func @transform_3(%arg0: i32) -> (i32, i32) {
    %c0_i32 = arith.constant 0 : i32
    %c0_i32_0 = arith.constant 0 : i32
    %c0_i32_1 = arith.constant 0 : i32
    return %c0_i32, %c0_i32_0 : i32, i32
  }
  func.func @transform_4(%arg0: i32) -> (i32, i32) {
    %c0_i32 = arith.constant 0 : i32
    %c0_i32_0 = arith.constant 0 : i32
    return %arg0, %c0_i32 : i32, i32
  }
}

module attributes {stable_mosaic.version = 11 : i64} {
  func.func @_mm_affine_res_kernel(%arg0: i32, %arg1: memref<18x32xbf16, #tpu.memory_space<vmem>>, %arg2: memref<32x112xbf16, #tpu.memory_space<vmem>>, %arg3: memref<1x112xf32, #tpu.memory_space<vmem>>, %arg4: memref<1x112xf32, #tpu.memory_space<vmem>>, %arg5: memref<18x112xbf16, #tpu.memory_space<vmem>>, %arg6: memref<18x112xbf16, #tpu.memory_space<vmem>>) attributes {dimension_semantics = [#tpu.dimension_semantics<parallel>], iteration_bounds = array<i64: 1>, scalar_prefetch = 0 : i64, scratch_operands = 0 : i64, tpu.core_type = #tpu.core_type<tc>, window_params = [{transform_indices = @transform_0, window_bounds = array<i64: 18, 32>}, {pipeline_mode = #tpu.pipeline_mode<synchronous>, transform_indices = @transform_1, window_bounds = array<i64: 32, 112>}, {pipeline_mode = #tpu.pipeline_mode<synchronous>, transform_indices = @transform_2, window_bounds = array<i64: 1, 112>}, {pipeline_mode = #tpu.pipeline_mode<synchronous>, transform_indices = @transform_3, window_bounds = array<i64: 1, 112>}, {transform_indices = @transform_4, window_bounds = array<i64: 18, 112>}, {transform_indices = @transform_5, window_bounds = array<i64: 18, 112>}]} {
    %c0 = arith.constant 0 : index
    %c0_0 = arith.constant 0 : index
    %0 = vector.load %arg1[%c0, %c0_0] : memref<18x32xbf16, #tpu.memory_space<vmem>>, vector<18x32xbf16>
    %c0_1 = arith.constant 0 : index
    %c0_2 = arith.constant 0 : index
    %1 = vector.load %arg2[%c0_1, %c0_2] : memref<32x112xbf16, #tpu.memory_space<vmem>>, vector<32x112xbf16>
    %cst = arith.constant dense<0.000000e+00> : vector<18x112xf32>
    %2 = tpu.matmul %0, %1, %cst {dimension_numbers = #tpu.dot_dimension_numbers<[1], [0], [0], [1], [0, 0, 1, 1], [], []>} : vector<18x32xbf16>, vector<32x112xbf16>, vector<18x112xf32> -> vector<18x112xf32>
    %c0_3 = arith.constant 0 : index
    %c0_4 = arith.constant 0 : index
    %3 = vector.load %arg3[%c0_3, %c0_4] : memref<1x112xf32, #tpu.memory_space<vmem>>, vector<1x112xf32>
    %4 = vector.broadcast %3 : vector<1x112xf32> to vector<18x112xf32>
    %5 = arith.mulf %2, %4 : vector<18x112xf32>
    %c0_5 = arith.constant 0 : index
    %c0_6 = arith.constant 0 : index
    %6 = vector.load %arg4[%c0_5, %c0_6] : memref<1x112xf32, #tpu.memory_space<vmem>>, vector<1x112xf32>
    %7 = vector.broadcast %6 : vector<1x112xf32> to vector<18x112xf32>
    %8 = arith.addf %5, %7 : vector<18x112xf32>
    %c0_7 = arith.constant 0 : index
    %c0_8 = arith.constant 0 : index
    %9 = vector.load %arg5[%c0_7, %c0_8] : memref<18x112xbf16, #tpu.memory_space<vmem>>, vector<18x112xbf16>
    %10 = arith.extf %9 : vector<18x112xbf16> to vector<18x112xf32>
    %11 = arith.addf %8, %10 : vector<18x112xf32>
    %cst_9 = arith.constant 0.000000e+00 : f32
    %12 = vector.broadcast %cst_9 : f32 to vector<18x112xf32>
    %13 = arith.maximumf %11, %12 : vector<18x112xf32>
    %14 = arith.truncf %13 : vector<18x112xf32> to vector<18x112xbf16>
    %c0_10 = arith.constant 0 : index
    %c0_11 = arith.constant 0 : index
    %15 = vector.load %arg6[%c0_10, %c0_11] : memref<18x112xbf16, #tpu.memory_space<vmem>>, vector<18x112xbf16>
    tpu.vector_store %arg6[%c0_10, %c0_11], %14 {strides = array<i32>} : memref<18x112xbf16, #tpu.memory_space<vmem>>, vector<18x112xbf16>,
    return
  }
  func.func @transform_0(%arg0: i32) -> (i32, i32) {
    %c0_i32 = arith.constant 0 : i32
    %c0_i32_0 = arith.constant 0 : i32
    return %arg0, %c0_i32 : i32, i32
  }
  func.func @transform_1(%arg0: i32) -> (i32, i32) {
    %c0_i32 = arith.constant 0 : i32
    %c0_i32_0 = arith.constant 0 : i32
    %c0_i32_1 = arith.constant 0 : i32
    return %c0_i32, %c0_i32_0 : i32, i32
  }
  func.func @transform_2(%arg0: i32) -> (i32, i32) {
    %c0_i32 = arith.constant 0 : i32
    %c0_i32_0 = arith.constant 0 : i32
    %c0_i32_1 = arith.constant 0 : i32
    return %c0_i32, %c0_i32_0 : i32, i32
  }
  func.func @transform_3(%arg0: i32) -> (i32, i32) {
    %c0_i32 = arith.constant 0 : i32
    %c0_i32_0 = arith.constant 0 : i32
    %c0_i32_1 = arith.constant 0 : i32
    return %c0_i32, %c0_i32_0 : i32, i32
  }
  func.func @transform_4(%arg0: i32) -> (i32, i32) {
    %c0_i32 = arith.constant 0 : i32
    %c0_i32_0 = arith.constant 0 : i32
    return %arg0, %c0_i32 : i32, i32
  }
  func.func @transform_5(%arg0: i32) -> (i32, i32) {
    %c0_i32 = arith.constant 0 : i32
    %c0_i32_0 = arith.constant 0 : i32
    return %arg0, %c0_i32 : i32, i32
  }
}

module attributes {stable_mosaic.version = 11 : i64} {
  func.func @_mm_affine_kernel(%arg0: i32, %arg1: memref<18x112xbf16, #tpu.memory_space<vmem>>, %arg2: memref<112x96xbf16, #tpu.memory_space<vmem>>, %arg3: memref<1x96xf32, #tpu.memory_space<vmem>>, %arg4: memref<1x96xf32, #tpu.memory_space<vmem>>, %arg5: memref<18x96xbf16, #tpu.memory_space<vmem>>) attributes {dimension_semantics = [#tpu.dimension_semantics<parallel>], iteration_bounds = array<i64: 1>, scalar_prefetch = 0 : i64, scratch_operands = 0 : i64, tpu.core_type = #tpu.core_type<tc>, window_params = [{transform_indices = @transform_0, window_bounds = array<i64: 18, 112>}, {pipeline_mode = #tpu.pipeline_mode<synchronous>, transform_indices = @transform_1, window_bounds = array<i64: 112, 96>}, {pipeline_mode = #tpu.pipeline_mode<synchronous>, transform_indices = @transform_2, window_bounds = array<i64: 1, 96>}, {pipeline_mode = #tpu.pipeline_mode<synchronous>, transform_indices = @transform_3, window_bounds = array<i64: 1, 96>}, {transform_indices = @transform_4, window_bounds = array<i64: 18, 96>}]} {
    %c0 = arith.constant 0 : index
    %c0_0 = arith.constant 0 : index
    %0 = vector.load %arg1[%c0, %c0_0] : memref<18x112xbf16, #tpu.memory_space<vmem>>, vector<18x112xbf16>
    %c0_1 = arith.constant 0 : index
    %c0_2 = arith.constant 0 : index
    %1 = vector.load %arg2[%c0_1, %c0_2] : memref<112x96xbf16, #tpu.memory_space<vmem>>, vector<112x96xbf16>
    %cst = arith.constant dense<0.000000e+00> : vector<18x96xf32>
    %2 = tpu.matmul %0, %1, %cst {dimension_numbers = #tpu.dot_dimension_numbers<[1], [0], [0], [1], [0, 0, 1, 1], [], []>} : vector<18x112xbf16>, vector<112x96xbf16>, vector<18x96xf32> -> vector<18x96xf32>
    %c0_3 = arith.constant 0 : index
    %c0_4 = arith.constant 0 : index
    %3 = vector.load %arg3[%c0_3, %c0_4] : memref<1x96xf32, #tpu.memory_space<vmem>>, vector<1x96xf32>
    %4 = vector.broadcast %3 : vector<1x96xf32> to vector<18x96xf32>
    %5 = arith.mulf %2, %4 : vector<18x96xf32>
    %c0_5 = arith.constant 0 : index
    %c0_6 = arith.constant 0 : index
    %6 = vector.load %arg4[%c0_5, %c0_6] : memref<1x96xf32, #tpu.memory_space<vmem>>, vector<1x96xf32>
    %7 = vector.broadcast %6 : vector<1x96xf32> to vector<18x96xf32>
    %8 = arith.addf %5, %7 : vector<18x96xf32>
    %cst_7 = arith.constant 0.000000e+00 : f32
    %9 = vector.broadcast %cst_7 : f32 to vector<18x96xf32>
    %10 = arith.maximumf %8, %9 : vector<18x96xf32>
    %11 = arith.truncf %10 : vector<18x96xf32> to vector<18x96xbf16>
    %c0_8 = arith.constant 0 : index
    %c0_9 = arith.constant 0 : index
    %12 = vector.load %arg5[%c0_8, %c0_9] : memref<18x96xbf16, #tpu.memory_space<vmem>>, vector<18x96xbf16>
    tpu.vector_store %arg5[%c0_8, %c0_9], %11 {strides = array<i32>} : memref<18x96xbf16, #tpu.memory_space<vmem>>, vector<18x96xbf16>,
    return
  }
  func.func @transform_0(%arg0: i32) -> (i32, i32) {
    %c0_i32 = arith.constant 0 : i32
    %c0_i32_0 = arith.constant 0 : i32
    return %arg0, %c0_i32 : i32, i32
  }
  func.func @transform_1(%arg0: i32) -> (i32, i32) {
    %c0_i32 = arith.constant 0 : i32
    %c0_i32_0 = arith.constant 0 : i32
    %c0_i32_1 = arith.constant 0 : i32
    return %c0_i32, %c0_i32_0 : i32, i32
  }
  func.func @transform_2(%arg0: i32) -> (i32, i32) {
    %c0_i32 = arith.constant 0 : i32
    %c0_i32_0 = arith.constant 0 : i32
    %c0_i32_1 = arith.constant 0 : i32
    return %c0_i32, %c0_i32_0 : i32, i32
  }
  func.func @transform_3(%arg0: i32) -> (i32, i32) {
    %c0_i32 = arith.constant 0 : i32
    %c0_i32_0 = arith.constant 0 : i32
    %c0_i32_1 = arith.constant 0 : i32
    return %c0_i32, %c0_i32_0 : i32, i32
  }
  func.func @transform_4(%arg0: i32) -> (i32, i32) {
    %c0_i32 = arith.constant 0 : i32
    %c0_i32_0 = arith.constant 0 : i32
    return %arg0, %c0_i32 : i32, i32
  }
}

module attributes {stable_mosaic.version = 11 : i64} {
  func.func @_mm_affine_kernel(%arg0: i32, %arg1: memref<2x288xbf16, #tpu.memory_space<vmem>>, %arg2: memref<288x48xbf16, #tpu.memory_space<vmem>>, %arg3: memref<1x48xf32, #tpu.memory_space<vmem>>, %arg4: memref<1x48xf32, #tpu.memory_space<vmem>>, %arg5: memref<2x48xbf16, #tpu.memory_space<vmem>>) attributes {dimension_semantics = [#tpu.dimension_semantics<parallel>], iteration_bounds = array<i64: 1>, scalar_prefetch = 0 : i64, scratch_operands = 0 : i64, tpu.core_type = #tpu.core_type<tc>, window_params = [{transform_indices = @transform_0, window_bounds = array<i64: 2, 288>}, {pipeline_mode = #tpu.pipeline_mode<synchronous>, transform_indices = @transform_1, window_bounds = array<i64: 288, 48>}, {pipeline_mode = #tpu.pipeline_mode<synchronous>, transform_indices = @transform_2, window_bounds = array<i64: 1, 48>}, {pipeline_mode = #tpu.pipeline_mode<synchronous>, transform_indices = @transform_3, window_bounds = array<i64: 1, 48>}, {transform_indices = @transform_4, window_bounds = array<i64: 2, 48>}]} {
    %c0 = arith.constant 0 : index
    %c0_0 = arith.constant 0 : index
    %0 = vector.load %arg1[%c0, %c0_0] : memref<2x288xbf16, #tpu.memory_space<vmem>>, vector<2x288xbf16>
    %c0_1 = arith.constant 0 : index
    %c0_2 = arith.constant 0 : index
    %1 = vector.load %arg2[%c0_1, %c0_2] : memref<288x48xbf16, #tpu.memory_space<vmem>>, vector<288x48xbf16>
    %cst = arith.constant dense<0.000000e+00> : vector<2x48xf32>
    %2 = tpu.matmul %0, %1, %cst {dimension_numbers = #tpu.dot_dimension_numbers<[1], [0], [0], [1], [0, 0, 1, 1], [], []>} : vector<2x288xbf16>, vector<288x48xbf16>, vector<2x48xf32> -> vector<2x48xf32>
    %c0_3 = arith.constant 0 : index
    %c0_4 = arith.constant 0 : index
    %3 = vector.load %arg3[%c0_3, %c0_4] : memref<1x48xf32, #tpu.memory_space<vmem>>, vector<1x48xf32>
    %4 = vector.broadcast %3 : vector<1x48xf32> to vector<2x48xf32>
    %5 = arith.mulf %2, %4 : vector<2x48xf32>
    %c0_5 = arith.constant 0 : index
    %c0_6 = arith.constant 0 : index
    %6 = vector.load %arg4[%c0_5, %c0_6] : memref<1x48xf32, #tpu.memory_space<vmem>>, vector<1x48xf32>
    %7 = vector.broadcast %6 : vector<1x48xf32> to vector<2x48xf32>
    %8 = arith.addf %5, %7 : vector<2x48xf32>
    %cst_7 = arith.constant 0.000000e+00 : f32
    %9 = vector.broadcast %cst_7 : f32 to vector<2x48xf32>
    %10 = arith.maximumf %8, %9 : vector<2x48xf32>
    %11 = arith.truncf %10 : vector<2x48xf32> to vector<2x48xbf16>
    %c0_8 = arith.constant 0 : index
    %c0_9 = arith.constant 0 : index
    %12 = vector.load %arg5[%c0_8, %c0_9] : memref<2x48xbf16, #tpu.memory_space<vmem>>, vector<2x48xbf16>
    tpu.vector_store %arg5[%c0_8, %c0_9], %11 {strides = array<i32>} : memref<2x48xbf16, #tpu.memory_space<vmem>>, vector<2x48xbf16>,
    return
  }
  func.func @transform_0(%arg0: i32) -> (i32, i32) {
    %c0_i32 = arith.constant 0 : i32
    %c0_i32_0 = arith.constant 0 : i32
    return %arg0, %c0_i32 : i32, i32
  }
  func.func @transform_1(%arg0: i32) -> (i32, i32) {
    %c0_i32 = arith.constant 0 : i32
    %c0_i32_0 = arith.constant 0 : i32
    %c0_i32_1 = arith.constant 0 : i32
    return %c0_i32, %c0_i32_0 : i32, i32
  }
  func.func @transform_2(%arg0: i32) -> (i32, i32) {
    %c0_i32 = arith.constant 0 : i32
    %c0_i32_0 = arith.constant 0 : i32
    %c0_i32_1 = arith.constant 0 : i32
    return %c0_i32, %c0_i32_0 : i32, i32
  }
  func.func @transform_3(%arg0: i32) -> (i32, i32) {
    %c0_i32 = arith.constant 0 : i32
    %c0_i32_0 = arith.constant 0 : i32
    %c0_i32_1 = arith.constant 0 : i32
    return %c0_i32, %c0_i32_0 : i32, i32
  }
  func.func @transform_4(%arg0: i32) -> (i32, i32) {
    %c0_i32 = arith.constant 0 : i32
    %c0_i32_0 = arith.constant 0 : i32
    return %arg0, %c0_i32 : i32, i32
  }
}

module attributes {stable_mosaic.version = 11 : i64} {
  func.func @_mm_affine_kernel(%arg0: i32, %arg1: memref<2x288xbf16, #tpu.memory_space<vmem>>, %arg2: memref<288x32xbf16, #tpu.memory_space<vmem>>, %arg3: memref<1x32xf32, #tpu.memory_space<vmem>>, %arg4: memref<1x32xf32, #tpu.memory_space<vmem>>, %arg5: memref<2x32xbf16, #tpu.memory_space<vmem>>) attributes {dimension_semantics = [#tpu.dimension_semantics<parallel>], iteration_bounds = array<i64: 1>, scalar_prefetch = 0 : i64, scratch_operands = 0 : i64, tpu.core_type = #tpu.core_type<tc>, window_params = [{transform_indices = @transform_0, window_bounds = array<i64: 2, 288>}, {pipeline_mode = #tpu.pipeline_mode<synchronous>, transform_indices = @transform_1, window_bounds = array<i64: 288, 32>}, {pipeline_mode = #tpu.pipeline_mode<synchronous>, transform_indices = @transform_2, window_bounds = array<i64: 1, 32>}, {pipeline_mode = #tpu.pipeline_mode<synchronous>, transform_indices = @transform_3, window_bounds = array<i64: 1, 32>}, {transform_indices = @transform_4, window_bounds = array<i64: 2, 32>}]} {
    %c0 = arith.constant 0 : index
    %c0_0 = arith.constant 0 : index
    %0 = vector.load %arg1[%c0, %c0_0] : memref<2x288xbf16, #tpu.memory_space<vmem>>, vector<2x288xbf16>
    %c0_1 = arith.constant 0 : index
    %c0_2 = arith.constant 0 : index
    %1 = vector.load %arg2[%c0_1, %c0_2] : memref<288x32xbf16, #tpu.memory_space<vmem>>, vector<288x32xbf16>
    %cst = arith.constant dense<0.000000e+00> : vector<2x32xf32>
    %2 = tpu.matmul %0, %1, %cst {dimension_numbers = #tpu.dot_dimension_numbers<[1], [0], [0], [1], [0, 0, 1, 1], [], []>} : vector<2x288xbf16>, vector<288x32xbf16>, vector<2x32xf32> -> vector<2x32xf32>
    %c0_3 = arith.constant 0 : index
    %c0_4 = arith.constant 0 : index
    %3 = vector.load %arg3[%c0_3, %c0_4] : memref<1x32xf32, #tpu.memory_space<vmem>>, vector<1x32xf32>
    %4 = vector.broadcast %3 : vector<1x32xf32> to vector<2x32xf32>
    %5 = arith.mulf %2, %4 : vector<2x32xf32>
    %c0_5 = arith.constant 0 : index
    %c0_6 = arith.constant 0 : index
    %6 = vector.load %arg4[%c0_5, %c0_6] : memref<1x32xf32, #tpu.memory_space<vmem>>, vector<1x32xf32>
    %7 = vector.broadcast %6 : vector<1x32xf32> to vector<2x32xf32>
    %8 = arith.addf %5, %7 : vector<2x32xf32>
    %cst_7 = arith.constant 0.000000e+00 : f32
    %9 = vector.broadcast %cst_7 : f32 to vector<2x32xf32>
    %10 = arith.maximumf %8, %9 : vector<2x32xf32>
    %11 = arith.truncf %10 : vector<2x32xf32> to vector<2x32xbf16>
    %c0_8 = arith.constant 0 : index
    %c0_9 = arith.constant 0 : index
    %12 = vector.load %arg5[%c0_8, %c0_9] : memref<2x32xbf16, #tpu.memory_space<vmem>>, vector<2x32xbf16>
    tpu.vector_store %arg5[%c0_8, %c0_9], %11 {strides = array<i32>} : memref<2x32xbf16, #tpu.memory_space<vmem>>, vector<2x32xbf16>,
    return
  }
  func.func @transform_0(%arg0: i32) -> (i32, i32) {
    %c0_i32 = arith.constant 0 : i32
    %c0_i32_0 = arith.constant 0 : i32
    return %arg0, %c0_i32 : i32, i32
  }
  func.func @transform_1(%arg0: i32) -> (i32, i32) {
    %c0_i32 = arith.constant 0 : i32
    %c0_i32_0 = arith.constant 0 : i32
    %c0_i32_1 = arith.constant 0 : i32
    return %c0_i32, %c0_i32_0 : i32, i32
  }
  func.func @transform_2(%arg0: i32) -> (i32, i32) {
    %c0_i32 = arith.constant 0 : i32
    %c0_i32_0 = arith.constant 0 : i32
    %c0_i32_1 = arith.constant 0 : i32
    return %c0_i32, %c0_i32_0 : i32, i32
  }
  func.func @transform_3(%arg0: i32) -> (i32, i32) {
    %c0_i32 = arith.constant 0 : i32
    %c0_i32_0 = arith.constant 0 : i32
    %c0_i32_1 = arith.constant 0 : i32
    return %c0_i32, %c0_i32_0 : i32, i32
  }
  func.func @transform_4(%arg0: i32) -> (i32, i32) {
    %c0_i32 = arith.constant 0 : i32
    %c0_i32_0 = arith.constant 0 : i32
    return %arg0, %c0_i32 : i32, i32
  }
}

module attributes {stable_mosaic.version = 11 : i64} {
  func.func @_mm_affine_kernel(%arg0: i32, %arg1: memref<18x288xbf16, #tpu.memory_space<vmem>>, %arg2: memref<288x32xbf16, #tpu.memory_space<vmem>>, %arg3: memref<1x32xf32, #tpu.memory_space<vmem>>, %arg4: memref<1x32xf32, #tpu.memory_space<vmem>>, %arg5: memref<18x32xbf16, #tpu.memory_space<vmem>>) attributes {dimension_semantics = [#tpu.dimension_semantics<parallel>], iteration_bounds = array<i64: 1>, scalar_prefetch = 0 : i64, scratch_operands = 0 : i64, tpu.core_type = #tpu.core_type<tc>, window_params = [{transform_indices = @transform_0, window_bounds = array<i64: 18, 288>}, {pipeline_mode = #tpu.pipeline_mode<synchronous>, transform_indices = @transform_1, window_bounds = array<i64: 288, 32>}, {pipeline_mode = #tpu.pipeline_mode<synchronous>, transform_indices = @transform_2, window_bounds = array<i64: 1, 32>}, {pipeline_mode = #tpu.pipeline_mode<synchronous>, transform_indices = @transform_3, window_bounds = array<i64: 1, 32>}, {transform_indices = @transform_4, window_bounds = array<i64: 18, 32>}]} {
    %c0 = arith.constant 0 : index
    %c0_0 = arith.constant 0 : index
    %0 = vector.load %arg1[%c0, %c0_0] : memref<18x288xbf16, #tpu.memory_space<vmem>>, vector<18x288xbf16>
    %c0_1 = arith.constant 0 : index
    %c0_2 = arith.constant 0 : index
    %1 = vector.load %arg2[%c0_1, %c0_2] : memref<288x32xbf16, #tpu.memory_space<vmem>>, vector<288x32xbf16>
    %cst = arith.constant dense<0.000000e+00> : vector<18x32xf32>
    %2 = tpu.matmul %0, %1, %cst {dimension_numbers = #tpu.dot_dimension_numbers<[1], [0], [0], [1], [0, 0, 1, 1], [], []>} : vector<18x288xbf16>, vector<288x32xbf16>, vector<18x32xf32> -> vector<18x32xf32>
    %c0_3 = arith.constant 0 : index
    %c0_4 = arith.constant 0 : index
    %3 = vector.load %arg3[%c0_3, %c0_4] : memref<1x32xf32, #tpu.memory_space<vmem>>, vector<1x32xf32>
    %4 = vector.broadcast %3 : vector<1x32xf32> to vector<18x32xf32>
    %5 = arith.mulf %2, %4 : vector<18x32xf32>
    %c0_5 = arith.constant 0 : index
    %c0_6 = arith.constant 0 : index
    %6 = vector.load %arg4[%c0_5, %c0_6] : memref<1x32xf32, #tpu.memory_space<vmem>>, vector<1x32xf32>
    %7 = vector.broadcast %6 : vector<1x32xf32> to vector<18x32xf32>
    %8 = arith.addf %5, %7 : vector<18x32xf32>
    %cst_7 = arith.constant 0.000000e+00 : f32
    %9 = vector.broadcast %cst_7 : f32 to vector<18x32xf32>
    %10 = arith.maximumf %8, %9 : vector<18x32xf32>
    %11 = arith.truncf %10 : vector<18x32xf32> to vector<18x32xbf16>
    %c0_8 = arith.constant 0 : index
    %c0_9 = arith.constant 0 : index
    %12 = vector.load %arg5[%c0_8, %c0_9] : memref<18x32xbf16, #tpu.memory_space<vmem>>, vector<18x32xbf16>
    tpu.vector_store %arg5[%c0_8, %c0_9], %11 {strides = array<i32>} : memref<18x32xbf16, #tpu.memory_space<vmem>>, vector<18x32xbf16>,
    return
  }
  func.func @transform_0(%arg0: i32) -> (i32, i32) {
    %c0_i32 = arith.constant 0 : i32
    %c0_i32_0 = arith.constant 0 : i32
    return %arg0, %c0_i32 : i32, i32
  }
  func.func @transform_1(%arg0: i32) -> (i32, i32) {
    %c0_i32 = arith.constant 0 : i32
    %c0_i32_0 = arith.constant 0 : i32
    %c0_i32_1 = arith.constant 0 : i32
    return %c0_i32, %c0_i32_0 : i32, i32
  }
  func.func @transform_2(%arg0: i32) -> (i32, i32) {
    %c0_i32 = arith.constant 0 : i32
    %c0_i32_0 = arith.constant 0 : i32
    %c0_i32_1 = arith.constant 0 : i32
    return %c0_i32, %c0_i32_0 : i32, i32
  }
  func.func @transform_3(%arg0: i32) -> (i32, i32) {
    %c0_i32 = arith.constant 0 : i32
    %c0_i32_0 = arith.constant 0 : i32
    %c0_i32_1 = arith.constant 0 : i32
    return %c0_i32, %c0_i32_0 : i32, i32
  }
  func.func @transform_4(%arg0: i32) -> (i32, i32) {
    %c0_i32 = arith.constant 0 : i32
    %c0_i32_0 = arith.constant 0 : i32
    return %arg0, %c0_i32 : i32, i32
  }
}

module attributes {stable_mosaic.version = 11 : i64} {
  func.func @_mm_affine_kernel(%arg0: i32, %arg1: memref<2x224xbf16, #tpu.memory_space<vmem>>, %arg2: memref<224x48xbf16, #tpu.memory_space<vmem>>, %arg3: memref<1x48xf32, #tpu.memory_space<vmem>>, %arg4: memref<1x48xf32, #tpu.memory_space<vmem>>, %arg5: memref<2x48xbf16, #tpu.memory_space<vmem>>) attributes {dimension_semantics = [#tpu.dimension_semantics<parallel>], iteration_bounds = array<i64: 1>, scalar_prefetch = 0 : i64, scratch_operands = 0 : i64, tpu.core_type = #tpu.core_type<tc>, window_params = [{transform_indices = @transform_0, window_bounds = array<i64: 2, 224>}, {pipeline_mode = #tpu.pipeline_mode<synchronous>, transform_indices = @transform_1, window_bounds = array<i64: 224, 48>}, {pipeline_mode = #tpu.pipeline_mode<synchronous>, transform_indices = @transform_2, window_bounds = array<i64: 1, 48>}, {pipeline_mode = #tpu.pipeline_mode<synchronous>, transform_indices = @transform_3, window_bounds = array<i64: 1, 48>}, {transform_indices = @transform_4, window_bounds = array<i64: 2, 48>}]} {
    %c0 = arith.constant 0 : index
    %c0_0 = arith.constant 0 : index
    %0 = vector.load %arg1[%c0, %c0_0] : memref<2x224xbf16, #tpu.memory_space<vmem>>, vector<2x224xbf16>
    %c0_1 = arith.constant 0 : index
    %c0_2 = arith.constant 0 : index
    %1 = vector.load %arg2[%c0_1, %c0_2] : memref<224x48xbf16, #tpu.memory_space<vmem>>, vector<224x48xbf16>
    %cst = arith.constant dense<0.000000e+00> : vector<2x48xf32>
    %2 = tpu.matmul %0, %1, %cst {dimension_numbers = #tpu.dot_dimension_numbers<[1], [0], [0], [1], [0, 0, 1, 1], [], []>} : vector<2x224xbf16>, vector<224x48xbf16>, vector<2x48xf32> -> vector<2x48xf32>
    %c0_3 = arith.constant 0 : index
    %c0_4 = arith.constant 0 : index
    %3 = vector.load %arg3[%c0_3, %c0_4] : memref<1x48xf32, #tpu.memory_space<vmem>>, vector<1x48xf32>
    %4 = vector.broadcast %3 : vector<1x48xf32> to vector<2x48xf32>
    %5 = arith.mulf %2, %4 : vector<2x48xf32>
    %c0_5 = arith.constant 0 : index
    %c0_6 = arith.constant 0 : index
    %6 = vector.load %arg4[%c0_5, %c0_6] : memref<1x48xf32, #tpu.memory_space<vmem>>, vector<1x48xf32>
    %7 = vector.broadcast %6 : vector<1x48xf32> to vector<2x48xf32>
    %8 = arith.addf %5, %7 : vector<2x48xf32>
    %cst_7 = arith.constant 0.000000e+00 : f32
    %9 = vector.broadcast %cst_7 : f32 to vector<2x48xf32>
    %10 = arith.maximumf %8, %9 : vector<2x48xf32>
    %11 = arith.truncf %10 : vector<2x48xf32> to vector<2x48xbf16>
    %c0_8 = arith.constant 0 : index
    %c0_9 = arith.constant 0 : index
    %12 = vector.load %arg5[%c0_8, %c0_9] : memref<2x48xbf16, #tpu.memory_space<vmem>>, vector<2x48xbf16>
    tpu.vector_store %arg5[%c0_8, %c0_9], %11 {strides = array<i32>} : memref<2x48xbf16, #tpu.memory_space<vmem>>, vector<2x48xbf16>,
    return
  }
  func.func @transform_0(%arg0: i32) -> (i32, i32) {
    %c0_i32 = arith.constant 0 : i32
    %c0_i32_0 = arith.constant 0 : i32
    return %arg0, %c0_i32 : i32, i32
  }
  func.func @transform_1(%arg0: i32) -> (i32, i32) {
    %c0_i32 = arith.constant 0 : i32
    %c0_i32_0 = arith.constant 0 : i32
    %c0_i32_1 = arith.constant 0 : i32
    return %c0_i32, %c0_i32_0 : i32, i32
  }
  func.func @transform_2(%arg0: i32) -> (i32, i32) {
    %c0_i32 = arith.constant 0 : i32
    %c0_i32_0 = arith.constant 0 : i32
    %c0_i32_1 = arith.constant 0 : i32
    return %c0_i32, %c0_i32_0 : i32, i32
  }
  func.func @transform_3(%arg0: i32) -> (i32, i32) {
    %c0_i32 = arith.constant 0 : i32
    %c0_i32_0 = arith.constant 0 : i32
    %c0_i32_1 = arith.constant 0 : i32
    return %c0_i32, %c0_i32_0 : i32, i32
  }
  func.func @transform_4(%arg0: i32) -> (i32, i32) {
    %c0_i32 = arith.constant 0 : i32
    %c0_i32_0 = arith.constant 0 : i32
    return %arg0, %c0_i32 : i32, i32
  }
}

module attributes {stable_mosaic.version = 11 : i64} {
  func.func @_mm_affine_kernel(%arg0: i32, %arg1: memref<2x72xbf16, #tpu.memory_space<vmem>>, %arg2: memref<72x24xbf16, #tpu.memory_space<vmem>>, %arg3: memref<1x24xf32, #tpu.memory_space<vmem>>, %arg4: memref<1x24xf32, #tpu.memory_space<vmem>>, %arg5: memref<2x24xbf16, #tpu.memory_space<vmem>>) attributes {dimension_semantics = [#tpu.dimension_semantics<parallel>], iteration_bounds = array<i64: 1>, scalar_prefetch = 0 : i64, scratch_operands = 0 : i64, tpu.core_type = #tpu.core_type<tc>, window_params = [{transform_indices = @transform_0, window_bounds = array<i64: 2, 72>}, {pipeline_mode = #tpu.pipeline_mode<synchronous>, transform_indices = @transform_1, window_bounds = array<i64: 72, 24>}, {pipeline_mode = #tpu.pipeline_mode<synchronous>, transform_indices = @transform_2, window_bounds = array<i64: 1, 24>}, {pipeline_mode = #tpu.pipeline_mode<synchronous>, transform_indices = @transform_3, window_bounds = array<i64: 1, 24>}, {transform_indices = @transform_4, window_bounds = array<i64: 2, 24>}]} {
    %c0 = arith.constant 0 : index
    %c0_0 = arith.constant 0 : index
    %0 = vector.load %arg1[%c0, %c0_0] : memref<2x72xbf16, #tpu.memory_space<vmem>>, vector<2x72xbf16>
    %c0_1 = arith.constant 0 : index
    %c0_2 = arith.constant 0 : index
    %1 = vector.load %arg2[%c0_1, %c0_2] : memref<72x24xbf16, #tpu.memory_space<vmem>>, vector<72x24xbf16>
    %cst = arith.constant dense<0.000000e+00> : vector<2x24xf32>
    %2 = tpu.matmul %0, %1, %cst {dimension_numbers = #tpu.dot_dimension_numbers<[1], [0], [0], [1], [0, 0, 1, 1], [], []>} : vector<2x72xbf16>, vector<72x24xbf16>, vector<2x24xf32> -> vector<2x24xf32>
    %c0_3 = arith.constant 0 : index
    %c0_4 = arith.constant 0 : index
    %3 = vector.load %arg3[%c0_3, %c0_4] : memref<1x24xf32, #tpu.memory_space<vmem>>, vector<1x24xf32>
    %4 = vector.broadcast %3 : vector<1x24xf32> to vector<2x24xf32>
    %5 = arith.mulf %2, %4 : vector<2x24xf32>
    %c0_5 = arith.constant 0 : index
    %c0_6 = arith.constant 0 : index
    %6 = vector.load %arg4[%c0_5, %c0_6] : memref<1x24xf32, #tpu.memory_space<vmem>>, vector<1x24xf32>
    %7 = vector.broadcast %6 : vector<1x24xf32> to vector<2x24xf32>
    %8 = arith.addf %5, %7 : vector<2x24xf32>
    %cst_7 = arith.constant 0.000000e+00 : f32
    %9 = vector.broadcast %cst_7 : f32 to vector<2x24xf32>
    %10 = arith.maximumf %8, %9 : vector<2x24xf32>
    %11 = arith.truncf %10 : vector<2x24xf32> to vector<2x24xbf16>
    %c0_8 = arith.constant 0 : index
    %c0_9 = arith.constant 0 : index
    %12 = vector.load %arg5[%c0_8, %c0_9] : memref<2x24xbf16, #tpu.memory_space<vmem>>, vector<2x24xbf16>
    tpu.vector_store %arg5[%c0_8, %c0_9], %11 {strides = array<i32>} : memref<2x24xbf16, #tpu.memory_space<vmem>>, vector<2x24xbf16>,
    return
  }
  func.func @transform_0(%arg0: i32) -> (i32, i32) {
    %c0_i32 = arith.constant 0 : i32
    %c0_i32_0 = arith.constant 0 : i32
    return %arg0, %c0_i32 : i32, i32
  }
  func.func @transform_1(%arg0: i32) -> (i32, i32) {
    %c0_i32 = arith.constant 0 : i32
    %c0_i32_0 = arith.constant 0 : i32
    %c0_i32_1 = arith.constant 0 : i32
    return %c0_i32, %c0_i32_0 : i32, i32
  }
  func.func @transform_2(%arg0: i32) -> (i32, i32) {
    %c0_i32 = arith.constant 0 : i32
    %c0_i32_0 = arith.constant 0 : i32
    %c0_i32_1 = arith.constant 0 : i32
    return %c0_i32, %c0_i32_0 : i32, i32
  }
  func.func @transform_3(%arg0: i32) -> (i32, i32) {
    %c0_i32 = arith.constant 0 : i32
    %c0_i32_0 = arith.constant 0 : i32
    %c0_i32_1 = arith.constant 0 : i32
    return %c0_i32, %c0_i32_0 : i32, i32
  }
  func.func @transform_4(%arg0: i32) -> (i32, i32) {
    %c0_i32 = arith.constant 0 : i32
    %c0_i32_0 = arith.constant 0 : i32
    return %arg0, %c0_i32 : i32, i32
  }
}

module attributes {stable_mosaic.version = 11 : i64} {
  func.func @_mm_affine_res_kernel(%arg0: i32, %arg1: memref<2x48xbf16, #tpu.memory_space<vmem>>, %arg2: memref<48x224xbf16, #tpu.memory_space<vmem>>, %arg3: memref<1x224xf32, #tpu.memory_space<vmem>>, %arg4: memref<1x224xf32, #tpu.memory_space<vmem>>, %arg5: memref<2x224xbf16, #tpu.memory_space<vmem>>, %arg6: memref<2x224xbf16, #tpu.memory_space<vmem>>) attributes {dimension_semantics = [#tpu.dimension_semantics<parallel>], iteration_bounds = array<i64: 1>, scalar_prefetch = 0 : i64, scratch_operands = 0 : i64, tpu.core_type = #tpu.core_type<tc>, window_params = [{transform_indices = @transform_0, window_bounds = array<i64: 2, 48>}, {pipeline_mode = #tpu.pipeline_mode<synchronous>, transform_indices = @transform_1, window_bounds = array<i64: 48, 224>}, {pipeline_mode = #tpu.pipeline_mode<synchronous>, transform_indices = @transform_2, window_bounds = array<i64: 1, 224>}, {pipeline_mode = #tpu.pipeline_mode<synchronous>, transform_indices = @transform_3, window_bounds = array<i64: 1, 224>}, {transform_indices = @transform_4, window_bounds = array<i64: 2, 224>}, {transform_indices = @transform_5, window_bounds = array<i64: 2, 224>}]} {
    %c0 = arith.constant 0 : index
    %c0_0 = arith.constant 0 : index
    %0 = vector.load %arg1[%c0, %c0_0] : memref<2x48xbf16, #tpu.memory_space<vmem>>, vector<2x48xbf16>
    %c0_1 = arith.constant 0 : index
    %c0_2 = arith.constant 0 : index
    %1 = vector.load %arg2[%c0_1, %c0_2] : memref<48x224xbf16, #tpu.memory_space<vmem>>, vector<48x224xbf16>
    %cst = arith.constant dense<0.000000e+00> : vector<2x224xf32>
    %2 = tpu.matmul %0, %1, %cst {dimension_numbers = #tpu.dot_dimension_numbers<[1], [0], [0], [1], [0, 0, 1, 1], [], []>} : vector<2x48xbf16>, vector<48x224xbf16>, vector<2x224xf32> -> vector<2x224xf32>
    %c0_3 = arith.constant 0 : index
    %c0_4 = arith.constant 0 : index
    %3 = vector.load %arg3[%c0_3, %c0_4] : memref<1x224xf32, #tpu.memory_space<vmem>>, vector<1x224xf32>
    %4 = vector.broadcast %3 : vector<1x224xf32> to vector<2x224xf32>
    %5 = arith.mulf %2, %4 : vector<2x224xf32>
    %c0_5 = arith.constant 0 : index
    %c0_6 = arith.constant 0 : index
    %6 = vector.load %arg4[%c0_5, %c0_6] : memref<1x224xf32, #tpu.memory_space<vmem>>, vector<1x224xf32>
    %7 = vector.broadcast %6 : vector<1x224xf32> to vector<2x224xf32>
    %8 = arith.addf %5, %7 : vector<2x224xf32>
    %c0_7 = arith.constant 0 : index
    %c0_8 = arith.constant 0 : index
    %9 = vector.load %arg5[%c0_7, %c0_8] : memref<2x224xbf16, #tpu.memory_space<vmem>>, vector<2x224xbf16>
    %10 = arith.extf %9 : vector<2x224xbf16> to vector<2x224xf32>
    %11 = arith.addf %8, %10 : vector<2x224xf32>
    %cst_9 = arith.constant 0.000000e+00 : f32
    %12 = vector.broadcast %cst_9 : f32 to vector<2x224xf32>
    %13 = arith.maximumf %11, %12 : vector<2x224xf32>
    %14 = arith.truncf %13 : vector<2x224xf32> to vector<2x224xbf16>
    %c0_10 = arith.constant 0 : index
    %c0_11 = arith.constant 0 : index
    %15 = vector.load %arg6[%c0_10, %c0_11] : memref<2x224xbf16, #tpu.memory_space<vmem>>, vector<2x224xbf16>
    tpu.vector_store %arg6[%c0_10, %c0_11], %14 {strides = array<i32>} : memref<2x224xbf16, #tpu.memory_space<vmem>>, vector<2x224xbf16>,
    return
  }
  func.func @transform_0(%arg0: i32) -> (i32, i32) {
    %c0_i32 = arith.constant 0 : i32
    %c0_i32_0 = arith.constant 0 : i32
    return %arg0, %c0_i32 : i32, i32
  }
  func.func @transform_1(%arg0: i32) -> (i32, i32) {
    %c0_i32 = arith.constant 0 : i32
    %c0_i32_0 = arith.constant 0 : i32
    %c0_i32_1 = arith.constant 0 : i32
    return %c0_i32, %c0_i32_0 : i32, i32
  }
  func.func @transform_2(%arg0: i32) -> (i32, i32) {
    %c0_i32 = arith.constant 0 : i32
    %c0_i32_0 = arith.constant 0 : i32
    %c0_i32_1 = arith.constant 0 : i32
    return %c0_i32, %c0_i32_0 : i32, i32
  }
  func.func @transform_3(%arg0: i32) -> (i32, i32) {
    %c0_i32 = arith.constant 0 : i32
    %c0_i32_0 = arith.constant 0 : i32
    %c0_i32_1 = arith.constant 0 : i32
    return %c0_i32, %c0_i32_0 : i32, i32
  }
  func.func @transform_4(%arg0: i32) -> (i32, i32) {
    %c0_i32 = arith.constant 0 : i32
    %c0_i32_0 = arith.constant 0 : i32
    return %arg0, %c0_i32 : i32, i32
  }
  func.func @transform_5(%arg0: i32) -> (i32, i32) {
    %c0_i32 = arith.constant 0 : i32
    %c0_i32_0 = arith.constant 0 : i32
    return %arg0, %c0_i32 : i32, i32
  }
}

module attributes {stable_mosaic.version = 11 : i64} {
  func.func @_mm_affine_res_kernel(%arg0: i32, %arg1: memref<2x48xbf16, #tpu.memory_space<vmem>>, %arg2: memref<48x224xbf16, #tpu.memory_space<vmem>>, %arg3: memref<1x224xf32, #tpu.memory_space<vmem>>, %arg4: memref<1x224xf32, #tpu.memory_space<vmem>>, %arg5: memref<2x224xbf16, #tpu.memory_space<vmem>>, %arg6: memref<2x224xbf16, #tpu.memory_space<vmem>>) attributes {dimension_semantics = [#tpu.dimension_semantics<parallel>], iteration_bounds = array<i64: 1>, scalar_prefetch = 0 : i64, scratch_operands = 0 : i64, tpu.core_type = #tpu.core_type<tc>, window_params = [{transform_indices = @transform_0, window_bounds = array<i64: 2, 48>}, {pipeline_mode = #tpu.pipeline_mode<synchronous>, transform_indices = @transform_1, window_bounds = array<i64: 48, 224>}, {pipeline_mode = #tpu.pipeline_mode<synchronous>, transform_indices = @transform_2, window_bounds = array<i64: 1, 224>}, {pipeline_mode = #tpu.pipeline_mode<synchronous>, transform_indices = @transform_3, window_bounds = array<i64: 1, 224>}, {transform_indices = @transform_4, window_bounds = array<i64: 2, 224>}, {transform_indices = @transform_5, window_bounds = array<i64: 2, 224>}]} {
    %c0 = arith.constant 0 : index
    %c0_0 = arith.constant 0 : index
    %0 = vector.load %arg1[%c0, %c0_0] : memref<2x48xbf16, #tpu.memory_space<vmem>>, vector<2x48xbf16>
    %c0_1 = arith.constant 0 : index
    %c0_2 = arith.constant 0 : index
    %1 = vector.load %arg2[%c0_1, %c0_2] : memref<48x224xbf16, #tpu.memory_space<vmem>>, vector<48x224xbf16>
    %cst = arith.constant dense<0.000000e+00> : vector<2x224xf32>
    %2 = tpu.matmul %0, %1, %cst {dimension_numbers = #tpu.dot_dimension_numbers<[1], [0], [0], [1], [0, 0, 1, 1], [], []>} : vector<2x48xbf16>, vector<48x224xbf16>, vector<2x224xf32> -> vector<2x224xf32>
    %c0_3 = arith.constant 0 : index
    %c0_4 = arith.constant 0 : index
    %3 = vector.load %arg3[%c0_3, %c0_4] : memref<1x224xf32, #tpu.memory_space<vmem>>, vector<1x224xf32>
    %4 = vector.broadcast %3 : vector<1x224xf32> to vector<2x224xf32>
    %5 = arith.mulf %2, %4 : vector<2x224xf32>
    %c0_5 = arith.constant 0 : index
    %c0_6 = arith.constant 0 : index
    %6 = vector.load %arg4[%c0_5, %c0_6] : memref<1x224xf32, #tpu.memory_space<vmem>>, vector<1x224xf32>
    %7 = vector.broadcast %6 : vector<1x224xf32> to vector<2x224xf32>
    %8 = arith.addf %5, %7 : vector<2x224xf32>
    %c0_7 = arith.constant 0 : index
    %c0_8 = arith.constant 0 : index
    %9 = vector.load %arg5[%c0_7, %c0_8] : memref<2x224xbf16, #tpu.memory_space<vmem>>, vector<2x224xbf16>
    %10 = arith.extf %9 : vector<2x224xbf16> to vector<2x224xf32>
    %11 = arith.addf %8, %10 : vector<2x224xf32>
    %12 = arith.truncf %11 : vector<2x224xf32> to vector<2x224xbf16>
    %c0_9 = arith.constant 0 : index
    %c0_10 = arith.constant 0 : index
    %13 = vector.load %arg6[%c0_9, %c0_10] : memref<2x224xbf16, #tpu.memory_space<vmem>>, vector<2x224xbf16>
    tpu.vector_store %arg6[%c0_9, %c0_10], %12 {strides = array<i32>} : memref<2x224xbf16, #tpu.memory_space<vmem>>, vector<2x224xbf16>,
    return
  }
  func.func @transform_0(%arg0: i32) -> (i32, i32) {
    %c0_i32 = arith.constant 0 : i32
    %c0_i32_0 = arith.constant 0 : i32
    return %arg0, %c0_i32 : i32, i32
  }
  func.func @transform_1(%arg0: i32) -> (i32, i32) {
    %c0_i32 = arith.constant 0 : i32
    %c0_i32_0 = arith.constant 0 : i32
    %c0_i32_1 = arith.constant 0 : i32
    return %c0_i32, %c0_i32_0 : i32, i32
  }
  func.func @transform_2(%arg0: i32) -> (i32, i32) {
    %c0_i32 = arith.constant 0 : i32
    %c0_i32_0 = arith.constant 0 : i32
    %c0_i32_1 = arith.constant 0 : i32
    return %c0_i32, %c0_i32_0 : i32, i32
  }
  func.func @transform_3(%arg0: i32) -> (i32, i32) {
    %c0_i32 = arith.constant 0 : i32
    %c0_i32_0 = arith.constant 0 : i32
    %c0_i32_1 = arith.constant 0 : i32
    return %c0_i32, %c0_i32_0 : i32, i32
  }
  func.func @transform_4(%arg0: i32) -> (i32, i32) {
    %c0_i32 = arith.constant 0 : i32
    %c0_i32_0 = arith.constant 0 : i32
    return %arg0, %c0_i32 : i32, i32
  }
  func.func @transform_5(%arg0: i32) -> (i32, i32) {
    %c0_i32 = arith.constant 0 : i32
    %c0_i32_0 = arith.constant 0 : i32
    return %arg0, %c0_i32 : i32, i32
  }
}

module attributes {stable_mosaic.version = 11 : i64} {
  func.func @_gap_kernel(%arg0: memref<2x1x224xbf16, #tpu.memory_space<vmem>>, %arg1: memref<2x224xbf16, #tpu.memory_space<vmem>>) attributes {dimension_semantics = [], scalar_prefetch = 0 : i64, scratch_operands = 0 : i64, tpu.core_type = #tpu.core_type<tc>} {
    %c0 = arith.constant 0 : index
    %c0_0 = arith.constant 0 : index
    %c0_1 = arith.constant 0 : index
    %0 = vector.load %arg0[%c0, %c0_0, %c0_1] : memref<2x1x224xbf16, #tpu.memory_space<vmem>>, vector<2x1x224xbf16>
    %1 = arith.extf %0 : vector<2x1x224xbf16> to vector<2x1x224xf32>
    %cst = arith.constant dense<0.000000e+00> : vector<2x224xf32>
    %2 = vector.multi_reduction <add>, %1, %cst [1] : vector<2x1x224xf32> to vector<2x224xf32>
    %cst_2 = arith.constant 1.000000e+00 : f32
    %3 = vector.broadcast %cst_2 : f32 to vector<2x224xf32>
    %4 = arith.divf %2, %3 : vector<2x224xf32>
    %5 = arith.truncf %4 : vector<2x224xf32> to vector<2x224xbf16>
    %c0_3 = arith.constant 0 : index
    %c0_4 = arith.constant 0 : index
    %6 = vector.load %arg1[%c0_3, %c0_4] : memref<2x224xbf16, #tpu.memory_space<vmem>>, vector<2x224xbf16>
    tpu.vector_store %arg1[%c0_3, %c0_4], %5 {strides = array<i32>} : memref<2x224xbf16, #tpu.memory_space<vmem>>, vector<2x224xbf16>,
    return
  }
}

module attributes {stable_mosaic.version = 11 : i64} {
  func.func @_mm_affine_kernel(%arg0: i32, %arg1: memref<2x224xbf16, #tpu.memory_space<vmem>>, %arg2: memref<224x64xbf16, #tpu.memory_space<vmem>>, %arg3: memref<1x64xf32, #tpu.memory_space<vmem>>, %arg4: memref<1x64xf32, #tpu.memory_space<vmem>>, %arg5: memref<2x64xf32, #tpu.memory_space<vmem>>) attributes {dimension_semantics = [#tpu.dimension_semantics<parallel>], iteration_bounds = array<i64: 1>, scalar_prefetch = 0 : i64, scratch_operands = 0 : i64, tpu.core_type = #tpu.core_type<tc>, window_params = [{transform_indices = @transform_0, window_bounds = array<i64: 2, 224>}, {pipeline_mode = #tpu.pipeline_mode<synchronous>, transform_indices = @transform_1, window_bounds = array<i64: 224, 64>}, {pipeline_mode = #tpu.pipeline_mode<synchronous>, transform_indices = @transform_2, window_bounds = array<i64: 1, 64>}, {pipeline_mode = #tpu.pipeline_mode<synchronous>, transform_indices = @transform_3, window_bounds = array<i64: 1, 64>}, {transform_indices = @transform_4, window_bounds = array<i64: 2, 64>}]} {
    %c0 = arith.constant 0 : index
    %c0_0 = arith.constant 0 : index
    %0 = vector.load %arg1[%c0, %c0_0] : memref<2x224xbf16, #tpu.memory_space<vmem>>, vector<2x224xbf16>
    %c0_1 = arith.constant 0 : index
    %c0_2 = arith.constant 0 : index
    %1 = vector.load %arg2[%c0_1, %c0_2] : memref<224x64xbf16, #tpu.memory_space<vmem>>, vector<224x64xbf16>
    %cst = arith.constant dense<0.000000e+00> : vector<2x64xf32>
    %2 = tpu.matmul %0, %1, %cst {dimension_numbers = #tpu.dot_dimension_numbers<[1], [0], [0], [1], [0, 0, 1, 1], [], []>} : vector<2x224xbf16>, vector<224x64xbf16>, vector<2x64xf32> -> vector<2x64xf32>
    %c0_3 = arith.constant 0 : index
    %c0_4 = arith.constant 0 : index
    %3 = vector.load %arg3[%c0_3, %c0_4] : memref<1x64xf32, #tpu.memory_space<vmem>>, vector<1x64xf32>
    %4 = vector.broadcast %3 : vector<1x64xf32> to vector<2x64xf32>
    %5 = arith.mulf %2, %4 : vector<2x64xf32>
    %c0_5 = arith.constant 0 : index
    %c0_6 = arith.constant 0 : index
    %6 = vector.load %arg4[%c0_5, %c0_6] : memref<1x64xf32, #tpu.memory_space<vmem>>, vector<1x64xf32>
    %7 = vector.broadcast %6 : vector<1x64xf32> to vector<2x64xf32>
    %8 = arith.addf %5, %7 : vector<2x64xf32>
    %c0_7 = arith.constant 0 : index
    %c0_8 = arith.constant 0 : index
    %9 = vector.load %arg5[%c0_7, %c0_8] : memref<2x64xf32, #tpu.memory_space<vmem>>, vector<2x64xf32>
    tpu.vector_store %arg5[%c0_7, %c0_8], %8 {strides = array<i32>} : memref<2x64xf32, #tpu.memory_space<vmem>>, vector<2x64xf32>,
    return
  }
  func.func @transform_0(%arg0: i32) -> (i32, i32) {
    %c0_i32 = arith.constant 0 : i32
    %c0_i32_0 = arith.constant 0 : i32
    return %arg0, %c0_i32 : i32, i32
  }
  func.func @transform_1(%arg0: i32) -> (i32, i32) {
    %c0_i32 = arith.constant 0 : i32
    %c0_i32_0 = arith.constant 0 : i32
    %c0_i32_1 = arith.constant 0 : i32
    return %c0_i32, %c0_i32_0 : i32, i32
  }
  func.func @transform_2(%arg0: i32) -> (i32, i32) {
    %c0_i32 = arith.constant 0 : i32
    %c0_i32_0 = arith.constant 0 : i32
    %c0_i32_1 = arith.constant 0 : i32
    return %c0_i32, %c0_i32_0 : i32, i32
  }
  func.func @transform_3(%arg0: i32) -> (i32, i32) {
    %c0_i32 = arith.constant 0 : i32
    %c0_i32_0 = arith.constant 0 : i32
    %c0_i32_1 = arith.constant 0 : i32
    return %c0_i32, %c0_i32_0 : i32, i32
  }
  func.func @transform_4(%arg0: i32) -> (i32, i32) {
    %c0_i32 = arith.constant 0 : i32
    %c0_i32_0 = arith.constant 0 : i32
    return %arg0, %c0_i32 : i32, i32
  }
}

module attributes {stable_mosaic.version = 11 : i64} {
  func.func @_mm_affine_kernel(%arg0: i32, %arg1: memref<2x64xf32, #tpu.memory_space<vmem>>, %arg2: memref<64x32xf32, #tpu.memory_space<vmem>>, %arg3: memref<1x32xf32, #tpu.memory_space<vmem>>, %arg4: memref<1x32xf32, #tpu.memory_space<vmem>>, %arg5: memref<2x32xf32, #tpu.memory_space<vmem>>) attributes {dimension_semantics = [#tpu.dimension_semantics<parallel>], iteration_bounds = array<i64: 1>, scalar_prefetch = 0 : i64, scratch_operands = 0 : i64, tpu.core_type = #tpu.core_type<tc>, window_params = [{transform_indices = @transform_0, window_bounds = array<i64: 2, 64>}, {pipeline_mode = #tpu.pipeline_mode<synchronous>, transform_indices = @transform_1, window_bounds = array<i64: 64, 32>}, {pipeline_mode = #tpu.pipeline_mode<synchronous>, transform_indices = @transform_2, window_bounds = array<i64: 1, 32>}, {pipeline_mode = #tpu.pipeline_mode<synchronous>, transform_indices = @transform_3, window_bounds = array<i64: 1, 32>}, {transform_indices = @transform_4, window_bounds = array<i64: 2, 32>}]} {
    %c0 = arith.constant 0 : index
    %c0_0 = arith.constant 0 : index
    %0 = vector.load %arg1[%c0, %c0_0] : memref<2x64xf32, #tpu.memory_space<vmem>>, vector<2x64xf32>
    %c0_1 = arith.constant 0 : index
    %c0_2 = arith.constant 0 : index
    %1 = vector.load %arg2[%c0_1, %c0_2] : memref<64x32xf32, #tpu.memory_space<vmem>>, vector<64x32xf32>
    %cst = arith.constant dense<0.000000e+00> : vector<2x32xf32>
    %2 = tpu.matmul %0, %1, %cst {dimension_numbers = #tpu.dot_dimension_numbers<[1], [0], [0], [1], [0, 0, 1, 1], [], []>} : vector<2x64xf32>, vector<64x32xf32>, vector<2x32xf32> -> vector<2x32xf32>
    %c0_3 = arith.constant 0 : index
    %c0_4 = arith.constant 0 : index
    %3 = vector.load %arg3[%c0_3, %c0_4] : memref<1x32xf32, #tpu.memory_space<vmem>>, vector<1x32xf32>
    %4 = vector.broadcast %3 : vector<1x32xf32> to vector<2x32xf32>
    %5 = arith.mulf %2, %4 : vector<2x32xf32>
    %c0_5 = arith.constant 0 : index
    %c0_6 = arith.constant 0 : index
    %6 = vector.load %arg4[%c0_5, %c0_6] : memref<1x32xf32, #tpu.memory_space<vmem>>, vector<1x32xf32>
    %7 = vector.broadcast %6 : vector<1x32xf32> to vector<2x32xf32>
    %8 = arith.addf %5, %7 : vector<2x32xf32>
    %c0_7 = arith.constant 0 : index
    %c0_8 = arith.constant 0 : index
    %9 = vector.load %arg5[%c0_7, %c0_8] : memref<2x32xf32, #tpu.memory_space<vmem>>, vector<2x32xf32>
    tpu.vector_store %arg5[%c0_7, %c0_8], %8 {strides = array<i32>} : memref<2x32xf32, #tpu.memory_space<vmem>>, vector<2x32xf32>,
    return
  }
  func.func @transform_0(%arg0: i32) -> (i32, i32) {
    %c0_i32 = arith.constant 0 : i32
    %c0_i32_0 = arith.constant 0 : i32
    return %arg0, %c0_i32 : i32, i32
  }
  func.func @transform_1(%arg0: i32) -> (i32, i32) {
    %c0_i32 = arith.constant 0 : i32
    %c0_i32_0 = arith.constant 0 : i32
    %c0_i32_1 = arith.constant 0 : i32
    return %c0_i32, %c0_i32_0 : i32, i32
  }
  func.func @transform_2(%arg0: i32) -> (i32, i32) {
    %c0_i32 = arith.constant 0 : i32
    %c0_i32_0 = arith.constant 0 : i32
    %c0_i32_1 = arith.constant 0 : i32
    return %c0_i32, %c0_i32_0 : i32, i32
  }
  func.func @transform_3(%arg0: i32) -> (i32, i32) {
    %c0_i32 = arith.constant 0 : i32
    %c0_i32_0 = arith.constant 0 : i32
    %c0_i32_1 = arith.constant 0 : i32
    return %c0_i32, %c0_i32_0 : i32, i32
  }
  func.func @transform_4(%arg0: i32) -> (i32, i32) {
    %c0_i32 = arith.constant 0 : i32
    %c0_i32_0 = arith.constant 0 : i32
    return %arg0, %c0_i32 : i32, i32
  }
}

</mosaic_0001>

<bundles_post_ra>
// kernel: pretrained_facenet_forward.48
= control target key start
LH: loop header
LB: loop body
LE: loop exit
PB: predicated region body
PF: predicated region fallthrough
CT: control target
= control target key end

     0   :  { %s1579_s15 = smov 0   ;;  %s1581_s16 = smov 0   ;;  %s1932_s0 = inlined_call_operand.vmem [shape: bf16[3042,27], index: 0, kind: input, shape index: {}]   ;;  %s1933_s1 = inlined_call_operand.vmem [shape: bf16[27,4], index: 1, kind: input, shape index: {}]   ;;  %s1934_s2 = inlined_call_operand.vmem [shape: f32[1,4], index: 2, kind: input, shape index: {}]   ;;  %s1935_s3 = inlined_call_operand.vmem [shape: f32[1,4], index: 3, kind: input, shape index: {}]   ;;  %s1936_s4 = inlined_call_operand.vmem [shape: bf16[3042,4], index: 4, kind: output, shape index: {}]  }
   0x1   :  { %s1583_s17 = smov 0  }
   0x2 LB: > { %s1592_s18 = sadd.s32 4294967295, %s1519_s17   ;;  %s1594_s19 = sadd.s32 1, %s1519_s17   ;;  %s1519_s17 = sphi %s1583_s17, %s1943_s17   ;;  %s1515_s16 = sphi %s1581_s16, %s1942_s16   ;;  %s1511_s15 = sphi %s1579_s15, %s1941_s15  }
   0x3   : > { %s107_s20 = ssub.s32 %s1519_s17, %s1594_s19  ;;  %s110_s21 = sadd.s32 1, %s1515_s16 }
   0x4   : > { %p108_p0 = scmp.eq.s32.totalorder %s107_s20, 0  ;;  %p120_p1 = scmp.ne.s32.totalorder %s1515_s16, %s1511_s15 }
   0x5   : > { %p121_p2 = scmp.eq.s32.totalorder %s1592_s18, 11  ;;  %p1176_p3 = scmp.ge.s32.totalorder %s1519_s17, 1 }
   0x6   : > { %s1602_s22 = scalar_select %p108_p0, %s1515_s16, %s110_s21  }
   0x7   : > { %p1604_p4 = por %p121_p2, %p120_p1  ;;  %p171_p5 = scmp.lt.s32.totalorder %s1519_s17, 13 }
   0x9   : > { %p172_p6 = pnand %p1176_p3, %p171_p5 }
   0xa   : > { %v1447_v0 = vld [vmem:[%s1933_s1] sm:$0xff] (!%p172_p6)   ;;  %vm396_vm0 = vcmask (!%p172_p6), 1044480   ;;  %v1448_v1 = vld [vmem:[%s1933_s1 + $0x8] sm:$0x3f] (!%p172_p6)   ;;  %vm397_vm1 = vcmask (!%p172_p6), 1045504   ;;  %s1615_s28 = sshll.u32 (!%p172_p6), %s1592_s18, 5 }
   0xb   : > { %175 = sbr.rel (%p172_p6) target bundleno = 345 (0x159), region = 36  ;;  %1318 = vmatprep.subr.bf16.mxu0 (!%p172_p6), %v1447_v0  ;;  %1354 = vmatprep.subr.bf16.mxu1 (!%p172_p6), %v1447_v0  ;;  %v1553_v2 = vmov (!%p172_p6), 65535   ;;  %p205_p7 = scmp.lt.s32.totalorder (!%p172_p6), %s1615_s28, 380  ;;  %vm347_vm2 = vcmask (!%p172_p6), 220160   ;;  %v1659_v22 = vld [vmem:[%s1934_s2] ss:$0 sm:$0xff] (!%p172_p6) }
   0xc   : > { %1319 = vmatpush3.bf16.msra.mxu0 (!%p172_p6), %v1447_v0  ;;  %1356 = vmatpush3.bf16.msra.mxu1 (!%p172_p6), %v1447_v0  ;;  %v398_v3 = vsel (!%p172_p6), %vm396_vm0, 4294967295, %v1553_v2  ;;  %s197_s10 = sand.u32 (!%p172_p6), 1, %s1511_s15   ;;  %v1665_v24 = vld [vmem:[%s1935_s3] ss:$0 sm:$0xff] (!%p172_p6)  ;;  %vm802_vm3 = vcmask (!%p172_p6), 27648  }
   0xd   : > { %v399_v4 = vsel (!%p172_p6), %vm397_vm1, %v398_v3, 0  ;;  %s1177_s13 = sshll.u32 (!%p172_p6), %s197_s10, 7 }
   0xe   : > { %v401_v5 = vand.u32 (!%p172_p6), %v1448_v1, %v399_v4  ;;  %s1683_s14 = scalar_lea.vmem (!%p172_p6), [#allocation2], %s1177_s13  }
  0x10   : > { %1320 = vmatprep.subr.bf16.mxu0 (!%p172_p6), %v401_v5  ;;  %1355 = vmatprep.subr.bf16.mxu1 (!%p172_p6), %v401_v5 }
  0x11   : > { %1321 = vmatpush3.bf16.msra.mxu0 (!%p172_p6), %v401_v5  ;;  %1357 = vmatpush3.bf16.msra.mxu1 (!%p172_p6), %v401_v5 }
  0x12   : > { %s206_s29 = scalar_select %p205_p7, %s1615_s28, 380 }
  0x13   : > { %s843_s15 = ssub.s32 (%p1604_p4), 381, %s1615_s28  ;;  %s1297_s17 = sshll.u32 (%p1604_p4), %s1592_s18, 7 }
  0x14   : > { %s1179_s30 = sshll.u32 %s206_s29, 2  ;;  %p844_p8 = scmp.lt.s32.totalorder (%p1604_p4), %s843_s15, 32 }
  0x15   : > { %s1622_s7 = scalar_lea.vmem %s1932_s0, %s1179_s30  ;;  %s1804_s24 = scalar_lea.vmem (%p1604_p4), %s1936_s4, %s1297_s17  }
  0x16   : > { %v1449_v6 = vld [vmem:[%s1622_s7] sm:$0xff]   ;;  %v1451_v8 = vld [vmem:[%s1622_s7 + $0x8] sm:$0xff]   ;;  %v1453_v10 = vld [vmem:[%s1622_s7 + $0x10] sm:$0xff]  }
  0x17   : > { %v1450_v7 = vld [vmem:[%s1622_s7 + $0x40] sm:$0xff]   ;;  %1322 = vmatprep.mubr.msk.bf16.mxu0 %vm347_vm2, %v1449_v6  ;;  %v1452_v9 = vld [vmem:[%s1622_s7 + $0x48] sm:$0xff]   ;;  %v1454_v11 = vld [vmem:[%s1622_s7 + $0x50] sm:$0xff]  }
  0x18   : > { %1338 = vmatprep.mubr.msk.bf16.mxu1 %vm347_vm2, %v1450_v7  ;;  %1323 = vmatmul.mubr.msk.bf16.vlgmr.msra.gmra.mrb[0].mxu0 %vm347_vm2, %v1451_v8  ;;  %v1455_v12 = vld [vmem:[%s1622_s7 + $0x18] sm:$0xff]   ;;  %v1457_v14 = vld [vmem:[%s1622_s7 + $0x20] sm:$0xff]   ;;  %v1459_v16 = vld [vmem:[%s1622_s7 + $0x28] sm:$0xff]  }
  0x19   : > { %1339 = vmatmul.mubr.msk.bf16.vlgmr.msra.gmra.mrb[0].mxu1 %vm347_vm2, %v1452_v9  ;;  %1326 = vmatprep.mubr.msk.bf16.mxu0 %vm347_vm2, %v1453_v10  ;;  %v1456_v13 = vld [vmem:[%s1622_s7 + $0x58] sm:$0xff]   ;;  %v1458_v15 = vld [vmem:[%s1622_s7 + $0x60] sm:$0xff]   ;;  %v1460_v17 = vld [vmem:[%s1622_s7 + $0x68] sm:$0xff]  }
  0x1a   : > { %1342 = vmatprep.mubr.msk.bf16.mxu1 %vm347_vm2, %v1454_v11  ;;  %v1461_v18 = vld [vmem:[%s1622_s7 + $0x30] sm:$0xff]   ;;  %v1463_v20 = vld [vmem:[%s1622_s7 + $0x38] sm:$0xff]  }
  0x1b   : > { %v1462_v19 = vld [vmem:[%s1622_s7 + $0x70] sm:$0xff]   ;;  %v1464_v21 = vld [vmem:[%s1622_s7 + $0x78] sm:$0xff]  }
  0x20   : > { %1327 = vmatmul.mubr.msk.bf16.gmra.mrb[4].mxu0 %vm347_vm2, %v1455_v12 }
  0x21   : > { %1343 = vmatmul.mubr.msk.bf16.gmra.mrb[4].mxu1 %vm347_vm2, %v1456_v13  ;;  %1330 = vmatprep.mubr.msk.bf16.mxu0 %vm347_vm2, %v1457_v14 }
  0x22   : > { %1346 = vmatprep.mubr.msk.bf16.mxu1 %vm347_vm2, %v1458_v15 }
  0x28   : > { %1331 = vmatmul.mubr.msk.bf16.gmra.mrb[8].mxu0 %vm347_vm2, %v1459_v16 }
  0x29   : > { %1347 = vmatmul.mubr.msk.bf16.gmra.mrb[8].mxu1 %vm347_vm2, %v1460_v17  ;;  %1334 = vmatprep.mubr.msk.bf16.mxu0 %vm347_vm2, %v1461_v18 }
  0x2a   : > { %1350 = vmatprep.mubr.msk.bf16.mxu1 %vm347_vm2, %v1462_v19 }
  0x30   : > { %1335 = vmatmul.mubr.msk.bf16.gmra.mrb[12].mxu0 %vm347_vm2, %v1463_v20 }
  0x31   : > { %1351 = vmatmul.mubr.msk.bf16.gmra.mrb[12].mxu1 %vm347_vm2, %v1464_v21 }
  0xeb   : > { %v1324_v23 = vpop.f32.mrb[0].mxu0 }
  0xec   : > { %v573_v25 = vmul.f32 %v1324_v23, %v1659_v22  ;;  %v1340_v26 = vpop.f32.mrb[0].mxu1  ;;  %v437_v27 = vpop.f32.mrb[1].mxu0 }
  0xed   : > { %v589_v28 = vmul.f32 %v1340_v26, %v1659_v22  ;;  %v571_v29 = vmul.f32 %v1659_v22, %v437_v27  ;;  %v501_v30 = vpop.f32.mrb[1].mxu1  ;;  %v1325_v31 = vpop.f32.mrb[2].mxu0 }
  0xee   : > { %v612_v32 = vadd.f32 %v1665_v24, %v573_v25  ;;  %v587_v33 = vmul.f32 %v1659_v22, %v501_v30  ;;  %v574_v34 = vmul.f32 %v1325_v31, %v1659_v22  ;;  %v1341_v35 = vpop.f32.mrb[2].mxu1  ;;  %v440_v36 = vpop.f32.mrb[3].mxu0 }
  0xef   : > { %v628_v37 = vadd.f32 %v1665_v24, %v589_v28  ;;  %v610_v38 = vadd.f32 %v1665_v24, %v571_v29  ;;  %v590_v39 = vmul.f32 %v1341_v35, %v1659_v22  ;;  %v572_v40 = vmul.f32 %v1659_v22, %v440_v36  ;;  %v504_v41 = vpop.f32.mrb[3].mxu1 }
  0xf0   : > { %v644_v42 = vmax.f32 %v612_v32, 0.0  ;;  %v626_v43 = vadd.f32 %v1665_v24, %v587_v33  ;;  %v613_v44 = vadd.f32 %v1665_v24, %v574_v34  ;;  %v588_v45 = vmul.f32 %v1659_v22, %v504_v41 }
  0xf1   : > { %v660_v46 = vmax.f32 %v628_v37, 0.0  ;;  %v642_v47 = vmax.f32 %v610_v38, 0.0  ;;  %v629_v48 = vadd.f32 %v1665_v24, %v590_v39  ;;  %v611_v49 = vadd.f32 %v1665_v24, %v572_v40 }
  0xf2   : > { %v1267_v50 = vpack.c.bf16 %v644_v42, %v644_v42  ;;  %v658_v51 = vmax.f32 %v626_v43, 0.0  ;;  %v645_v52 = vmax.f32 %v613_v44, 0.0  ;;  %v627_v53 = vadd.f32 %v1665_v24, %v588_v45 }
  0xf3   : > { %v1283_v54 = vpack.c.bf16 %v660_v46, %v660_v46  ;;  %v1265_v55 = vpack.c.bf16 %v642_v47, %v642_v47  ;;  %v661_v56 = vmax.f32 %v629_v48, 0.0  ;;  %v643_v57 = vmax.f32 %v611_v49, 0.0  ;;  %v1328_v58 = vpop.f32.mrb[4].mxu0 }
  0xf4   : > { %805 = vst.msk [vmem:[%s1683_s14 + $0x8] sm:$0xf] %vm802_vm3, %v1267_v50  ;;  %v1281_v59 = vpack.c.bf16 %v658_v51, %v658_v51  ;;  %v1268_v60 = vpack.c.bf16 %v645_v52, %v645_v52  ;;  %v659_v61 = vmax.f32 %v627_v53, 0.0  ;;  %v577_v62 = vmul.f32 %v1328_v58, %v1659_v22  ;;  %v1344_v63 = vpop.f32.mrb[4].mxu1  ;;  %v453_v0 = vpop.f32.mrb[5].mxu0 }
  0xf5   : > { %821 = vst.msk [vmem:[%s1683_s14 + $0x48] sm:$0xf] %vm802_vm3, %v1283_v54  ;;  %803 = vst.msk [vmem:[%s1683_s14] sm:$0xf] %vm802_vm3, %v1265_v55  ;;  %v1284_v1 = vpack.c.bf16 %v661_v56, %v661_v56  ;;  %v1266_v2 = vpack.c.bf16 %v643_v57, %v643_v57  ;;  %v593_v3 = vmul.f32 %v1344_v63, %v1659_v22  ;;  %v517_v5 = vpop.f32.mrb[5].mxu1  ;;  %v1329_v6 = vpop.f32.mrb[6].mxu0 }
  0xf6   : > { %v575_v4 = vmul.f32 %v1659_v22, %v453_v0  ;;  %819 = vst.msk [vmem:[%s1683_s14 + $0x40] sm:$0xf] %vm802_vm3, %v1281_v59  ;;  %806 = vst.msk [vmem:[%s1683_s14 + $0xc] sm:$0xf] %vm802_vm3, %v1268_v60  ;;  %v1282_v7 = vpack.c.bf16 %v659_v61, %v659_v61  ;;  %v616_v8 = vadd.f32 %v1665_v24, %v577_v62  ;;  %v1345_v11 = vpop.f32.mrb[6].mxu1  ;;  %v456_v12 = vpop.f32.mrb[7].mxu0 }
  0xf7   : > { %v591_v9 = vmul.f32 %v1659_v22, %v517_v5  ;;  %v578_v10 = vmul.f32 %v1329_v6, %v1659_v22  ;;  %822 = vst.msk [vmem:[%s1683_s14 + $0x4c] sm:$0xf] %vm802_vm3, %v1284_v1  ;;  %804 = vst.msk [vmem:[%s1683_s14 + $0x4] sm:$0xf] %vm802_vm3, %v1266_v2  ;;  %v632_v13 = vadd.f32 %v1665_v24, %v593_v3  ;;  %v520_v17 = vpop.f32.mrb[7].mxu1 }
  0xf8   : > { %v614_v14 = vadd.f32 %v1665_v24, %v575_v4  ;;  %v594_v15 = vmul.f32 %v1345_v11, %v1659_v22  ;;  %v576_v16 = vmul.f32 %v1659_v22, %v456_v12  ;;  %820 = vst.msk [vmem:[%s1683_s14 + $0x44] sm:$0xf] %vm802_vm3, %v1282_v7  ;;  %v648_v18 = vmax.f32 %v616_v8, 0.0 }
  0xf9   : > { %v630_v19 = vadd.f32 %v1665_v24, %v591_v9  ;;  %v617_v20 = vadd.f32 %v1665_v24, %v578_v10  ;;  %v592_v21 = vmul.f32 %v1659_v22, %v520_v17  ;;  %v664_v23 = vmax.f32 %v632_v13, 0.0 }
  0xfa   : > { %v646_v25 = vmax.f32 %v614_v14, 0.0  ;;  %v633_v26 = vadd.f32 %v1665_v24, %v594_v15  ;;  %v615_v27 = vadd.f32 %v1665_v24, %v576_v16  ;;  %v1271_v28 = vpack.c.bf16 %v648_v18, %v648_v18 }
  0xfb   : > { %v662_v29 = vmax.f32 %v630_v19, 0.0  ;;  %v649_v30 = vmax.f32 %v617_v20, 0.0  ;;  %v631_v31 = vadd.f32 %v1665_v24, %v592_v21  ;;  %v1287_v32 = vpack.c.bf16 %v664_v23, %v664_v23  ;;  %v1332_v36 = vpop.f32.mrb[8].mxu0 }
  0xfc   : > { %v1269_v33 = vpack.c.bf16 %v646_v25, %v646_v25  ;;  %v665_v34 = vmax.f32 %v633_v26, 0.0  ;;  %v647_v35 = vmax.f32 %v615_v27, 0.0  ;;  %809 = vst.msk [vmem:[%s1683_s14 + $0x18] sm:$0xf] %vm802_vm3, %v1271_v28  ;;  %v581_v40 = vmul.f32 %v1332_v36, %v1659_v22  ;;  %v1348_v41 = vpop.f32.mrb[8].mxu1  ;;  %v469_v42 = vpop.f32.mrb[9].mxu0 }
  0xfd   : > { %v1285_v37 = vpack.c.bf16 %v662_v29, %v662_v29  ;;  %v1272_v38 = vpack.c.bf16 %v649_v30, %v649_v30  ;;  %v663_v39 = vmax.f32 %v631_v31, 0.0  ;;  %825 = vst.msk [vmem:[%s1683_s14 + $0x58] sm:$0xf] %vm802_vm3, %v1287_v32  ;;  %v597_v45 = vmul.f32 %v1348_v41, %v1659_v22  ;;  %v533_v47 = vpop.f32.mrb[9].mxu1  ;;  %v1333_v48 = vpop.f32.mrb[10].mxu0 }
  0xfe   : > { %807 = vst.msk [vmem:[%s1683_s14 + $0x10] sm:$0xf] %vm802_vm3, %v1269_v33  ;;  %v1288_v43 = vpack.c.bf16 %v665_v34, %v665_v34  ;;  %v1270_v44 = vpack.c.bf16 %v647_v35, %v647_v35  ;;  %v579_v46 = vmul.f32 %v1659_v22, %v469_v42  ;;  %v620_v50 = vadd.f32 %v1665_v24, %v581_v40  ;;  %v1349_v53 = vpop.f32.mrb[10].mxu1  ;;  %v472_v54 = vpop.f32.mrb[11].mxu0 }
  0xff   : > { %823 = vst.msk [vmem:[%s1683_s14 + $0x50] sm:$0xf] %vm802_vm3, %v1285_v37  ;;  %810 = vst.msk [vmem:[%s1683_s14 + $0x1c] sm:$0xf] %vm802_vm3, %v1272_v38  ;;  %v1286_v49 = vpack.c.bf16 %v663_v39, %v663_v39  ;;  %v595_v51 = vmul.f32 %v1659_v22, %v533_v47  ;;  %v582_v52 = vmul.f32 %v1333_v48, %v1659_v22  ;;  %v536_v59 = vpop.f32.mrb[11].mxu1 }
 0x100   : > { %826 = vst.msk [vmem:[%s1683_s14 + $0x5c] sm:$0xf] %vm802_vm3, %v1288_v43  ;;  %808 = vst.msk [vmem:[%s1683_s14 + $0x14] sm:$0xf] %vm802_vm3, %v1270_v44  ;;  %v636_v55 = vadd.f32 %v1665_v24, %v597_v45  ;;  %v618_v56 = vadd.f32 %v1665_v24, %v579_v46  ;;  %v598_v57 = vmul.f32 %v1349_v53, %v1659_v22  ;;  %v652_v60 = vmax.f32 %v620_v50, 0.0 }
 0x101   : > { %v580_v58 = vmul.f32 %v1659_v22, %v472_v54  ;;  %824 = vst.msk [vmem:[%s1683_s14 + $0x54] sm:$0xf] %vm802_vm3, %v1286_v49  ;;  %v634_v61 = vadd.f32 %v1665_v24, %v595_v51  ;;  %v621_v62 = vadd.f32 %v1665_v24, %v582_v52  ;;  %v596_v63 = vmul.f32 %v1659_v22, %v536_v59 }
 0x102   : > { %v668_v0 = vmax.f32 %v636_v55, 0.0  ;;  %v650_v1 = vmax.f32 %v618_v56, 0.0  ;;  %v637_v2 = vadd.f32 %v1665_v24, %v598_v57  ;;  %v1275_v4 = vpack.c.bf16 %v652_v60, %v652_v60 }
 0x103   : > { %v619_v3 = vadd.f32 %v1665_v24, %v580_v58  ;;  %v666_v5 = vmax.f32 %v634_v61, 0.0  ;;  %v653_v6 = vmax.f32 %v621_v62, 0.0  ;;  %v635_v7 = vadd.f32 %v1665_v24, %v596_v63  ;;  %v1336_v12 = vpop.f32.mrb[12].mxu0 }
 0x104   : > { %v1291_v8 = vpack.c.bf16 %v668_v0, %v668_v0  ;;  %v1273_v9 = vpack.c.bf16 %v650_v1, %v650_v1  ;;  %v669_v10 = vmax.f32 %v637_v2, 0.0  ;;  %813 = vst.msk [vmem:[%s1683_s14 + $0x28] sm:$0xf] %vm802_vm3, %v1275_v4  ;;  %v585_v16 = vmul.f32 %v1336_v12, %v1659_v22  ;;  %v1352_v17 = vpop.f32.mrb[12].mxu1  ;;  %v485_v18 = vpop.f32.mrb[13].mxu0 }
 0x105   : > { %v651_v11 = vmax.f32 %v619_v3, 0.0  ;;  %v1289_v13 = vpack.c.bf16 %v666_v5, %v666_v5  ;;  %v1276_v14 = vpack.c.bf16 %v653_v6, %v653_v6  ;;  %v667_v15 = vmax.f32 %v635_v7, 0.0  ;;  %v549_v25 = vpop.f32.mrb[13].mxu1  ;;  %v1337_v26 = vpop.f32.mrb[14].mxu0 }
 0x106   : > { %829 = vst.msk [vmem:[%s1683_s14 + $0x68] sm:$0xf] %vm802_vm3, %v1291_v8  ;;  %811 = vst.msk [vmem:[%s1683_s14 + $0x20] sm:$0xf] %vm802_vm3, %v1273_v9  ;;  %v1292_v19 = vpack.c.bf16 %v669_v10, %v669_v10  ;;  %v601_v21 = vmul.f32 %v1352_v17, %v1659_v22  ;;  %v583_v23 = vmul.f32 %v1659_v22, %v485_v18  ;;  %v1353_v31 = vpop.f32.mrb[14].mxu1  ;;  %v488_v32 = vpop.f32.mrb[15].mxu0 }
 0x107   : > { %v1274_v20 = vpack.c.bf16 %v651_v11, %v651_v11  ;;  %827 = vst.msk [vmem:[%s1683_s14 + $0x60] sm:$0xf] %vm802_vm3, %v1289_v13  ;;  %814 = vst.msk [vmem:[%s1683_s14 + $0x2c] sm:$0xf] %vm802_vm3, %v1276_v14  ;;  %v1290_v27 = vpack.c.bf16 %v667_v15, %v667_v15  ;;  %v624_v28 = vadd.f32 %v1665_v24, %v585_v16  ;;  %v552_v37 = vpop.f32.mrb[15].mxu1 }
 0x108   : > { %v599_v29 = vmul.f32 %v1659_v22, %v549_v25  ;;  %v586_v30 = vmul.f32 %v1337_v26, %v1659_v22  ;;  %830 = vst.msk [vmem:[%s1683_s14 + $0x6c] sm:$0xf] %vm802_vm3, %v1292_v19  ;;  %v640_v33 = vadd.f32 %v1665_v24, %v601_v21  ;;  %v622_v34 = vadd.f32 %v1665_v24, %v583_v23 }
 0x109   : > { %812 = vst.msk [vmem:[%s1683_s14 + $0x24] sm:$0xf] %vm802_vm3, %v1274_v20  ;;  %v602_v35 = vmul.f32 %v1353_v31, %v1659_v22  ;;  %v584_v36 = vmul.f32 %v1659_v22, %v488_v32  ;;  %828 = vst.msk [vmem:[%s1683_s14 + $0x64] sm:$0xf] %vm802_vm3, %v1290_v27  ;;  %v656_v38 = vmax.f32 %v624_v28, 0.0  ;;  %v600_v41 = vmul.f32 %v1659_v22, %v552_v37 }
 0x10a   : > { %v638_v39 = vadd.f32 %v1665_v24, %v599_v29  ;;  %v625_v40 = vadd.f32 %v1665_v24, %v586_v30  ;;  %v672_v42 = vmax.f32 %v640_v33, 0.0  ;;  %v654_v43 = vmax.f32 %v622_v34, 0.0 }
 0x10b   : > { %v641_v44 = vadd.f32 %v1665_v24, %v602_v35  ;;  %v623_v45 = vadd.f32 %v1665_v24, %v584_v36  ;;  %v1279_v46 = vpack.c.bf16 %v656_v38, %v656_v38  ;;  %v639_v49 = vadd.f32 %v1665_v24, %v600_v41 }
 0x10c   : > { %v670_v47 = vmax.f32 %v638_v39, 0.0  ;;  %v657_v48 = vmax.f32 %v625_v40, 0.0  ;;  %v1295_v50 = vpack.c.bf16 %v672_v42, %v672_v42  ;;  %v1277_v51 = vpack.c.bf16 %v654_v43, %v654_v43  ;;  %841 = sbr.rel (!%p1604_p4) target bundleno = 345 (0x159), region = 40 }
 0x10d   : > { %v673_v22 = vmax.f32 %v641_v44, 0.0  ;;  %v655_v52 = vmax.f32 %v623_v45, 0.0  ;;  %817 = vst.msk [vmem:[%s1683_s14 + $0x38] sm:$0xf] %vm802_vm3, %v1279_v46  ;;  %v671_v55 = vmax.f32 %v639_v49, 0.0 }
 0x10e   : > { %v1293_v53 = vpack.c.bf16 %v670_v47, %v670_v47  ;;  %v1280_v54 = vpack.c.bf16 %v657_v48, %v657_v48  ;;  %833 = vst.msk [vmem:[%s1683_s14 + $0x78] sm:$0xf] %vm802_vm3, %v1295_v50  ;;  %815 = vst.msk [vmem:[%s1683_s14 + $0x30] sm:$0xf] %vm802_vm3, %v1277_v51 }
 0x10f   : > { %v1296_v56 = vpack.c.bf16 %v673_v22, %v673_v22  ;;  %v1278_v57 = vpack.c.bf16 %v655_v52, %v655_v52  ;;  %v1294_v24 = vpack.c.bf16 %v671_v55, %v671_v55 }
 0x110   : > { %831 = vst.msk [vmem:[%s1683_s14 + $0x70] sm:$0xf] %vm802_vm3, %v1293_v53  ;;  %818 = vst.msk [vmem:[%s1683_s14 + $0x3c] sm:$0xf] %vm802_vm3, %v1280_v54 }
 0x111   : > { %834 = vst.msk [vmem:[%s1683_s14 + $0x7c] sm:$0xf] %vm802_vm3, %v1296_v56  ;;  %816 = vst.msk [vmem:[%s1683_s14 + $0x34] sm:$0xf] %vm802_vm3, %v1278_v57 }
 0x112   : > { %832 = vst.msk [vmem:[%s1683_s14 + $0x74] sm:$0xf] %vm802_vm3, %v1294_v24 }
 0x113   : > { %s1945_s15 = smov (!%p844_p8, %s843_s15), 32 }
 0x114   : > { %s1250_s25 = sshll.u32 %s1945_s15, 6 }
 0x115   : > { %p1253_p9 = scmp.eq.s32.totalorder %s1250_s25, 0 }
 0x116   : > { %s1810_s26 = sshrl.u32 (!%p1253_p9), %s1945_s15, 5 }
 0x117   : > { %852 = sbr.rel (%p1253_p9) target bundleno = 345 (0x159), region = 44  ;;  %p1254_p10 = scmp.le.s32.totalorder (!%p1253_p9), %s1810_s26, 0 }
 0x11e   : > { %1129 = sbr.rel (%p1254_p10) target bundleno = 324 (0x144), region = 116  ;;  %s1938_s18 = smov (!%p1254_p10), %s1804_s24 }
 0x11f   : > { %s1939_s23 = smov (!%p1254_p10), %s1683_s14  ;;  %s1819_s27 = smov (!%p1254_p10), 0  }
 0x120   : > { %s1821_s28 = smov (!%p1254_p10), 0  }
 0x125 LB: >> { %v868_v58 = vld [vmem:[%s1527_s23] sm:$0xf]  ;;  %v870_v59 = vld [vmem:[%s1527_s23 + $0x4] sm:$0xf]  ;;  %v872_v60 = vld [vmem:[%s1527_s23 + $0x8] sm:$0xf]  ;;  %s1535_s28 = sphi %s1821_s28, %s862_s28   ;;  %s1531_s27 = sphi %s1819_s27, %s1940_s27   ;;  %s1527_s23 = sphi %s1939_s23, %s937_s23   ;;  %s1523_s18 = sphi %s1938_s18, %s938_s18  }
 0x126   : >> { %869 = vst [vmem:[%s1523_s18] sm:$0xf] %v868_v58  ;;  %871 = vst [vmem:[%s1523_s18 + $0x4] sm:$0xf] %v870_v59  ;;  %v874_v61 = vld [vmem:[%s1527_s23 + $0xc] sm:$0xf]  ;;  %s932_s29 = sadd.s32 1, %s1531_s27 }
 0x127   : >> { %873 = vst [vmem:[%s1523_s18 + $0x8] sm:$0xf] %v872_v60  ;;  %v876_v62 = vld [vmem:[%s1527_s23 + $0x10] sm:$0xf]  ;;  %v878_v63 = vld [vmem:[%s1527_s23 + $0x14] sm:$0xf]  ;;  %p933_p11 = scmp.ge.s32.totalorder %s932_s29, %s1810_s26 }
 0x128   : >> { %875 = vst [vmem:[%s1523_s18 + $0xc] sm:$0xf] %v874_v61  ;;  %877 = vst [vmem:[%s1523_s18 + $0x10] sm:$0xf] %v876_v62  ;;  %v880_v0 = vld [vmem:[%s1527_s23 + $0x18] sm:$0xf] }
 0x129   : >> { %879 = vst [vmem:[%s1523_s18 + $0x14] sm:$0xf] %v878_v63  ;;  %v882_v1 = vld [vmem:[%s1527_s23 + $0x1c] sm:$0xf]  ;;  %v884_v2 = vld [vmem:[%s1527_s23 + $0x20] sm:$0xf] }
 0x12a   : >> { %881 = vst [vmem:[%s1523_s18 + $0x18] sm:$0xf] %v880_v0  ;;  %883 = vst [vmem:[%s1523_s18 + $0x1c] sm:$0xf] %v882_v1  ;;  %v886_v3 = vld [vmem:[%s1527_s23 + $0x24] sm:$0xf] }
 0x12b   : >> { %885 = vst [vmem:[%s1523_s18 + $0x20] sm:$0xf] %v884_v2  ;;  %v888_v4 = vld [vmem:[%s1527_s23 + $0x28] sm:$0xf]  ;;  %v890_v5 = vld [vmem:[%s1527_s23 + $0x2c] sm:$0xf] }
 0x12c   : >> { %887 = vst [vmem:[%s1523_s18 + $0x24] sm:$0xf] %v886_v3  ;;  %889 = vst [vmem:[%s1523_s18 + $0x28] sm:$0xf] %v888_v4  ;;  %v892_v6 = vld [vmem:[%s1527_s23 + $0x30] sm:$0xf] }
 0x12d   : >> { %891 = vst [vmem:[%s1523_s18 + $0x2c] sm:$0xf] %v890_v5  ;;  %v894_v7 = vld [vmem:[%s1527_s23 + $0x34] sm:$0xf]  ;;  %v896_v8 = vld [vmem:[%s1527_s23 + $0x38] sm:$0xf] }
 0x12e   : >> { %893 = vst [vmem:[%s1523_s18 + $0x30] sm:$0xf] %v892_v6  ;;  %895 = vst [vmem:[%s1523_s18 + $0x34] sm:$0xf] %v894_v7  ;;  %v898_v9 = vld [vmem:[%s1527_s23 + $0x3c] sm:$0xf] }
 0x12f   : >> { %897 = vst [vmem:[%s1523_s18 + $0x38] sm:$0xf] %v896_v8  ;;  %v900_v10 = vld [vmem:[%s1527_s23 + $0x40] sm:$0xf]  ;;  %v902_v11 = vld [vmem:[%s1527_s23 + $0x44] sm:$0xf] }
 0x130   : >> { %899 = vst [vmem:[%s1523_s18 + $0x3c] sm:$0xf] %v898_v9  ;;  %901 = vst [vmem:[%s1523_s18 + $0x40] sm:$0xf] %v900_v10  ;;  %v904_v12 = vld [vmem:[%s1527_s23 + $0x48] sm:$0xf] }
 0x131   : >> { %903 = vst [vmem:[%s1523_s18 + $0x44] sm:$0xf] %v902_v11  ;;  %v906_v13 = vld [vmem:[%s1527_s23 + $0x4c] sm:$0xf]  ;;  %v908_v14 = vld [vmem:[%s1527_s23 + $0x50] sm:$0xf] }
 0x132   : >> { %905 = vst [vmem:[%s1523_s18 + $0x48] sm:$0xf] %v904_v12  ;;  %907 = vst [vmem:[%s1523_s18 + $0x4c] sm:$0xf] %v906_v13  ;;  %v910_v15 = vld [vmem:[%s1527_s23 + $0x54] sm:$0xf] }
 0x133   : >> { %909 = vst [vmem:[%s1523_s18 + $0x50] sm:$0xf] %v908_v14  ;;  %v912_v16 = vld [vmem:[%s1527_s23 + $0x58] sm:$0xf]  ;;  %v914_v17 = vld [vmem:[%s1527_s23 + $0x5c] sm:$0xf] }
 0x134   : >> { %911 = vst [vmem:[%s1523_s18 + $0x54] sm:$0xf] %v910_v15  ;;  %913 = vst [vmem:[%s1523_s18 + $0x58] sm:$0xf] %v912_v16  ;;  %v916_v18 = vld [vmem:[%s1527_s23 + $0x60] sm:$0xf] }
 0x135   : >> { %915 = vst [vmem:[%s1523_s18 + $0x5c] sm:$0xf] %v914_v17  ;;  %v918_v19 = vld [vmem:[%s1527_s23 + $0x64] sm:$0xf]  ;;  %v920_v20 = vld [vmem:[%s1527_s23 + $0x68] sm:$0xf] }
 0x136   : >> { %917 = vst [vmem:[%s1523_s18 + $0x60] sm:$0xf] %v916_v18  ;;  %919 = vst [vmem:[%s1523_s18 + $0x64] sm:$0xf] %v918_v19  ;;  %v922_v21 = vld [vmem:[%s1527_s23 + $0x6c] sm:$0xf] }
 0x137   : >> { %921 = vst [vmem:[%s1523_s18 + $0x68] sm:$0xf] %v920_v20  ;;  %v924_v23 = vld [vmem:[%s1527_s23 + $0x70] sm:$0xf]  ;;  %v926_v25 = vld [vmem:[%s1527_s23 + $0x74] sm:$0xf] }
 0x138   : >> { %923 = vst [vmem:[%s1523_s18 + $0x6c] sm:$0xf] %v922_v21  ;;  %925 = vst [vmem:[%s1523_s18 + $0x70] sm:$0xf] %v924_v23  ;;  %v928_v26 = vld [vmem:[%s1527_s23 + $0x78] sm:$0xf] }
 0x139   : >> { %927 = vst [vmem:[%s1523_s18 + $0x74] sm:$0xf] %v926_v25  ;;  %v930_v27 = vld [vmem:[%s1527_s23 + $0x7c] sm:$0xf]  ;;  %929 = vst [vmem:[%s1523_s18 + $0x78] sm:$0xf] %v928_v26 }
 0x13a   : >> { %931 = vst [vmem:[%s1523_s18 + $0x7c] sm:$0xf] %v930_v27  ;;  %s1947_s29 = smov (%p933_p11, %s932_s29), 0  ;;  %s862_s28 = sadd.s32 1, %s1535_s28  }
 0x13b   : >> { %s1255_s30 = sshll.u32 %s1947_s29, 7  ;;  %p861_p12 = scmp.ge.s32.totalorder %s862_s28, %s1810_s26 }
 0x13c   : >> { %s937_s23 = scalar_lea.vmem %s1683_s14, %s1255_s30 [#allocation2]   ;;  %s938_s18 = scalar_lea.vmem %s1804_s24, %s1255_s30  }
 0x13d   : >> { %s1940_s27 = smov %s1947_s29  ;;  %864 = sbr.rel (!%p861_p12) target bundleno = 293 (0x125), region = 122 }
 0x144 PF: > { %s1914_s5 = sand.u32 31, %s1945_s15   ;;  %s1298_s6 = sshll.u32 %s1810_s26, 7 }
 0x145   : > { %s943_s7 = scalar_lea.vmem %s1683_s14, %s1298_s6 [#allocation2]   ;;  %s945_s8 = scalar_lea.vmem %s1804_s24, %s1298_s6  }
 0x146   : > { %p1260_p13 = scmp.le.s32.totalorder %s1914_s5, 0 }
 0x147   : > { %s1537_s9 = smov (!%p1260_p13), %s945_s8   ;;  %s1541_s10 = smov (!%p1260_p13), %s943_s7  }
 0x148   : > { %1143 = sbr.rel (%p1260_p13) target bundleno = 345 (0x159), region = 127  ;;  %s1545_s11 = smov (!%p1260_p13), 0  }
 0x149   : > { %s1549_s12 = smov (!%p1260_p13), 0  }
 0x14f LB: >> { %v955_v28 = vld [vmem:[%s1543_s10] sm:$0xf]  ;;  %s957_s13 = sadd.s32 1, %s1547_s11  ;;  %s949_s12 = sadd.s32 1, %s1551_s12   ;;  %s1551_s12 = sphi %s1549_s12, %s949_s12   ;;  %s1547_s11 = sphi %s1545_s11, %s1546_s11   ;;  %s1543_s10 = sphi %s1541_s10, %s962_s10   ;;  %s1539_s9 = sphi %s1537_s9, %s963_s9  }
 0x150   : >> { %956 = vst [vmem:[%s1539_s9] sm:$0xf] %v955_v28  ;;  %p958_p0 = scmp.ge.s32.totalorder %s957_s13, %s1914_s5  ;;  %p948_p1 = scmp.ge.s32.totalorder %s949_s12, %s1914_s5 }
 0x152   : >> { %s1949_s13 = smov (%p958_p0, %s957_s13), 0  ;;  %951 = sbr.rel (!%p948_p1) target bundleno = 335 (0x14f), region = 133 }
 0x153   : >> { %s1261_s14 = sshll.u32 %s1949_s13, 2  ;;  %s1546_s11 = smov %s1949_s13  }
 0x154   : >> { %s962_s10 = scalar_lea.vmem %s943_s7, %s1261_s14 [#allocation2]   ;;  %s963_s9 = scalar_lea.vmem %s945_s8, %s1261_s14  }
 0x159 PF: > { %p11_p2 = scmp.ge.s32.totalorder %s1594_s19, 14   ;;  %s1941_s15 = smov %s1515_s16 }
 0x15a   : > { %s1942_s16 = smov %s1602_s22  ;;  %s1943_s17 = smov %s1594_s19 }
 0x15b   :  { %13 = sbr.rel (!%p11_p2) target bundleno = 2 (0x2), region = 144 }

// kernel: pretrained_facenet_forward.49
= control target key start
LH: loop header
LB: loop body
LE: loop exit
PB: predicated region body
PF: predicated region fallthrough
CT: control target
= control target key end

     0   :  { %s1588_s15 = smov 0   ;;  %s1590_s16 = smov 0   ;;  %s1944_s0 = inlined_call_operand.vmem [shape: bf16[2738,36], index: 0, kind: input, shape index: {}]   ;;  %s1945_s1 = inlined_call_operand.vmem [shape: bf16[36,4], index: 1, kind: input, shape index: {}]   ;;  %s1946_s2 = inlined_call_operand.vmem [shape: f32[1,4], index: 2, kind: input, shape index: {}]   ;;  %s1947_s3 = inlined_call_operand.vmem [shape: f32[1,4], index: 3, kind: input, shape index: {}]   ;;  %s1948_s4 = inlined_call_operand.vmem [shape: bf16[2738,4], index: 4, kind: output, shape index: {}]  }
   0x1   :  { %s1592_s17 = smov 0  }
   0x2 LB: > { %s1601_s18 = sadd.s32 4294967295, %s1529_s17   ;;  %s1603_s19 = sadd.s32 1, %s1529_s17   ;;  %s1529_s17 = sphi %s1592_s17, %s1955_s17   ;;  %s1525_s16 = sphi %s1590_s16, %s1954_s16   ;;  %s1521_s15 = sphi %s1588_s15, %s1953_s15  }
   0x3   : > { %s107_s20 = ssub.s32 %s1529_s17, %s1603_s19  ;;  %s110_s21 = sadd.s32 1, %s1525_s16 }
   0x4   : > { %p108_p0 = scmp.eq.s32.totalorder %s107_s20, 0  ;;  %p120_p1 = scmp.ne.s32.totalorder %s1525_s16, %s1521_s15 }
   0x5   : > { %p121_p2 = scmp.eq.s32.totalorder %s1601_s18, 10  ;;  %p1178_p3 = scmp.ge.s32.totalorder %s1529_s17, 1 }
   0x6   : > { %s1611_s22 = scalar_select %p108_p0, %s1525_s16, %s110_s21  }
   0x7   : > { %p1613_p4 = por %p121_p2, %p120_p1  ;;  %p171_p5 = scmp.lt.s32.totalorder %s1529_s17, 12 }
   0x9   : > { %p172_p6 = pnand %p1178_p3, %p171_p5 }
   0xa   : > { %v1456_v0 = vld [vmem:[%s1945_s1] sm:$0xff] (!%p172_p6)   ;;  %v1457_v1 = vld [vmem:[%s1945_s1 + $0x8] sm:$0xff] (!%p172_p6)   ;;  %s1624_s28 = sshll.u32 (!%p172_p6), %s1601_s18, 5  ;;  %v1458_v2 = vld [vmem:[%s1945_s1 + $0x10] ss:$0 sps:$4 sm:$0x33] (!%p172_p6)  }
   0xb   : > { %175 = sbr.rel (%p172_p6) target bundleno = 345 (0x159), region = 36  ;;  %1322 = vmatprep.subr.bf16.mxu0 (!%p172_p6), %v1456_v0  ;;  %1360 = vmatprep.subr.bf16.mxu1 (!%p172_p6), %v1456_v0  ;;  %p205_p7 = scmp.lt.s32.totalorder (!%p172_p6), %s1624_s28, 342  ;;  %vm401_vm0 = vcmask (!%p172_p6), 1041408   ;;  %vm352_vm1 = vcmask (!%p172_p6), 293888   ;;  %v1671_v20 = vld [vmem:[%s1946_s2] ss:$0 sm:$0xff] (!%p172_p6) }
   0xc   : > { %1323 = vmatpush3.bf16.msra.mxu0 (!%p172_p6), %v1456_v0  ;;  %1363 = vmatpush3.bf16.msra.mxu1 (!%p172_p6), %v1456_v0  ;;  %v403_v3 = vsel (!%p172_p6), %vm401_vm0, %v1458_v2, 0  ;;  %s197_s12 = sand.u32 (!%p172_p6), 1, %s1521_s15   ;;  %v1677_v22 = vld [vmem:[%s1947_s3] ss:$0 sm:$0xff] (!%p172_p6)  ;;  %vm804_vm2 = vcmask (!%p172_p6), 27648  }
   0xd   : > { %1324 = vmatprep.subr.bf16.mxu0 (!%p172_p6), %v1457_v1  ;;  %1361 = vmatprep.subr.bf16.mxu1 (!%p172_p6), %v1457_v1  ;;  %s1179_s15 = sshll.u32 (!%p172_p6), %s197_s12, 7 }
   0xe   : > { %s1695_s17 = scalar_lea.vmem (!%p172_p6), [#allocation2], %s1179_s15  }
  0x10   : > { %1325 = vmatpush3.bf16.msra.mxu0 (!%p172_p6), %v1457_v1  ;;  %1364 = vmatpush3.bf16.msra.mxu1 (!%p172_p6), %v1457_v1 }
  0x11   : > { %1366 = vmatprep.subr.msk.bf16.mxu0 (!%p172_p6), %vm401_vm0, %v1458_v2  ;;  %1367 = vmatprep.subr.msk.bf16.mxu1 (!%p172_p6), %vm401_vm0, %v1458_v2 }
  0x12   : > { %s206_s5 = scalar_select %p205_p7, %s1624_s28, 342 }
  0x13   : > { %s845_s20 = ssub.s32 (%p1613_p4), 343, %s1624_s28  ;;  %s1300_s21 = sshll.u32 (%p1613_p4), %s1601_s18, 7 }
  0x14   : > { %s1181_s6 = sshll.u32 %s206_s5, 2  ;;  %1327 = vmatpush3.bf16.msra.mxu0 %v403_v3  ;;  %1365 = vmatpush3.bf16.msra.mxu1 %v403_v3  ;;  %p846_p8 = scmp.lt.s32.totalorder (%p1613_p4), %s845_s20, 32 }
  0x15   : > { %s1634_s9 = scalar_lea.vmem %s1944_s0, %s1181_s6  ;;  %s1816_s26 = scalar_lea.vmem (%p1613_p4), %s1948_s4, %s1300_s21  }
  0x16   : > { %v1459_v4 = vld [vmem:[%s1634_s9] sm:$0xff]   ;;  %v1461_v6 = vld [vmem:[%s1634_s9 + $0x8] sm:$0xff]   ;;  %v1463_v8 = vld [vmem:[%s1634_s9 + $0x10] sm:$0xff]  }
  0x17   : > { %v1460_v5 = vld [vmem:[%s1634_s9 + $0x40] sm:$0xff]   ;;  %1328 = vmatprep.mubr.msk.bf16.mxu0 %vm352_vm1, %v1459_v4  ;;  %v1462_v7 = vld [vmem:[%s1634_s9 + $0x48] sm:$0xff]   ;;  %v1464_v9 = vld [vmem:[%s1634_s9 + $0x50] sm:$0xff]  }
  0x18   : > { %1344 = vmatprep.mubr.msk.bf16.mxu1 %vm352_vm1, %v1460_v5  ;;  %1329 = vmatmul.mubr.msk.bf16.vlgmr.msra.gmra.mrb[0].mxu0 %vm352_vm1, %v1461_v6  ;;  %v1465_v10 = vld [vmem:[%s1634_s9 + $0x18] sm:$0xff]   ;;  %v1467_v12 = vld [vmem:[%s1634_s9 + $0x20] sm:$0xff]   ;;  %v1469_v14 = vld [vmem:[%s1634_s9 + $0x28] sm:$0xff]  }
  0x19   : > { %1345 = vmatmul.mubr.msk.bf16.vlgmr.msra.gmra.mrb[0].mxu1 %vm352_vm1, %v1462_v7  ;;  %1332 = vmatprep.mubr.msk.bf16.mxu0 %vm352_vm1, %v1463_v8  ;;  %v1466_v11 = vld [vmem:[%s1634_s9 + $0x58] sm:$0xff]   ;;  %v1468_v13 = vld [vmem:[%s1634_s9 + $0x60] sm:$0xff]   ;;  %v1470_v15 = vld [vmem:[%s1634_s9 + $0x68] sm:$0xff]  }
  0x1a   : > { %1348 = vmatprep.mubr.msk.bf16.mxu1 %vm352_vm1, %v1464_v9  ;;  %v1471_v16 = vld [vmem:[%s1634_s9 + $0x30] sm:$0xff]   ;;  %v1473_v18 = vld [vmem:[%s1634_s9 + $0x38] sm:$0xff]  }
  0x1b   : > { %v1472_v17 = vld [vmem:[%s1634_s9 + $0x70] sm:$0xff]   ;;  %v1474_v19 = vld [vmem:[%s1634_s9 + $0x78] sm:$0xff]  }
  0x20   : > { %1333 = vmatmul.mubr.msk.bf16.gmra.mrb[4].mxu0 %vm352_vm1, %v1465_v10 }
  0x21   : > { %1349 = vmatmul.mubr.msk.bf16.gmra.mrb[4].mxu1 %vm352_vm1, %v1466_v11  ;;  %1336 = vmatprep.mubr.msk.bf16.mxu0 %vm352_vm1, %v1467_v12 }
  0x22   : > { %1352 = vmatprep.mubr.msk.bf16.mxu1 %vm352_vm1, %v1468_v13 }
  0x28   : > { %1337 = vmatmul.mubr.msk.bf16.gmra.mrb[8].mxu0 %vm352_vm1, %v1469_v14 }
  0x29   : > { %1353 = vmatmul.mubr.msk.bf16.gmra.mrb[8].mxu1 %vm352_vm1, %v1470_v15  ;;  %1340 = vmatprep.mubr.msk.bf16.mxu0 %vm352_vm1, %v1471_v16 }
  0x2a   : > { %1356 = vmatprep.mubr.msk.bf16.mxu1 %vm352_vm1, %v1472_v17 }
  0x30   : > { %1341 = vmatmul.mubr.msk.bf16.gmra.mrb[12].mxu0 %vm352_vm1, %v1473_v18 }
  0x31   : > { %1357 = vmatmul.mubr.msk.bf16.gmra.mrb[12].mxu1 %vm352_vm1, %v1474_v19 }
  0xeb   : > { %v1330_v21 = vpop.f32.mrb[0].mxu0 }
  0xec   : > { %v1346_v23 = vpop.f32.mrb[0].mxu1  ;;  %v575_v24 = vmul.f32 %v1330_v21, %v1671_v20  ;;  %v439_v26 = vpop.f32.mrb[1].mxu0 }
  0xed   : > { %v591_v25 = vmul.f32 %v1346_v23, %v1671_v20  ;;  %v503_v27 = vpop.f32.mrb[1].mxu1  ;;  %v573_v28 = vmul.f32 %v1671_v20, %v439_v26  ;;  %v1331_v30 = vpop.f32.mrb[2].mxu0 }
  0xee   : > { %v589_v29 = vmul.f32 %v1671_v20, %v503_v27  ;;  %v1347_v31 = vpop.f32.mrb[2].mxu1  ;;  %v614_v32 = vadd.f32 %v1677_v22, %v575_v24  ;;  %v576_v34 = vmul.f32 %v1331_v30, %v1671_v20  ;;  %v442_v36 = vpop.f32.mrb[3].mxu0 }
  0xef   : > { %v630_v33 = vadd.f32 %v1677_v22, %v591_v25  ;;  %v592_v35 = vmul.f32 %v1347_v31, %v1671_v20  ;;  %v506_v37 = vpop.f32.mrb[3].mxu1  ;;  %v612_v38 = vadd.f32 %v1677_v22, %v573_v28  ;;  %v574_v40 = vmul.f32 %v1671_v20, %v442_v36 }
  0xf0   : > { %v628_v39 = vadd.f32 %v1677_v22, %v589_v29  ;;  %v590_v41 = vmul.f32 %v1671_v20, %v506_v37  ;;  %v646_v42 = vmax.f32 %v614_v32, 0.0  ;;  %v615_v44 = vadd.f32 %v1677_v22, %v576_v34 }
  0xf1   : > { %v662_v43 = vmax.f32 %v630_v33, 0.0  ;;  %v631_v45 = vadd.f32 %v1677_v22, %v592_v35  ;;  %v644_v46 = vmax.f32 %v612_v38, 0.0  ;;  %v613_v48 = vadd.f32 %v1677_v22, %v574_v40 }
  0xf2   : > { %v660_v47 = vmax.f32 %v628_v39, 0.0  ;;  %v629_v49 = vadd.f32 %v1677_v22, %v590_v41  ;;  %v1270_v50 = vpack.c.bf16 %v646_v42, %v646_v42  ;;  %v647_v52 = vmax.f32 %v615_v44, 0.0 }
  0xf3   : > { %v1286_v51 = vpack.c.bf16 %v662_v43, %v662_v43  ;;  %v663_v53 = vmax.f32 %v631_v45, 0.0  ;;  %v1268_v54 = vpack.c.bf16 %v644_v46, %v644_v46  ;;  %v645_v56 = vmax.f32 %v613_v48, 0.0  ;;  %v1334_v58 = vpop.f32.mrb[4].mxu0 }
  0xf4   : > { %v1284_v55 = vpack.c.bf16 %v660_v47, %v660_v47  ;;  %v661_v57 = vmax.f32 %v629_v49, 0.0  ;;  %v1350_v59 = vpop.f32.mrb[4].mxu1  ;;  %807 = vst.msk [vmem:[%s1695_s17 + $0x8] sm:$0xf] %vm804_vm2, %v1270_v50  ;;  %v1271_v60 = vpack.c.bf16 %v647_v52, %v647_v52  ;;  %v579_v62 = vmul.f32 %v1334_v58, %v1671_v20  ;;  %v455_v0 = vpop.f32.mrb[5].mxu0 }
  0xf5   : > { %823 = vst.msk [vmem:[%s1695_s17 + $0x48] sm:$0xf] %vm804_vm2, %v1286_v51  ;;  %v1287_v61 = vpack.c.bf16 %v663_v53, %v663_v53  ;;  %v595_v63 = vmul.f32 %v1350_v59, %v1671_v20  ;;  %v519_v1 = vpop.f32.mrb[5].mxu1  ;;  %805 = vst.msk [vmem:[%s1695_s17] sm:$0xf] %vm804_vm2, %v1268_v54  ;;  %v1269_v2 = vpack.c.bf16 %v645_v56, %v645_v56  ;;  %v1335_v6 = vpop.f32.mrb[6].mxu0 }
  0xf6   : > { %821 = vst.msk [vmem:[%s1695_s17 + $0x40] sm:$0xf] %vm804_vm2, %v1284_v55  ;;  %v1285_v3 = vpack.c.bf16 %v661_v57, %v661_v57  ;;  %v577_v4 = vmul.f32 %v1671_v20, %v455_v0  ;;  %v593_v5 = vmul.f32 %v1671_v20, %v519_v1  ;;  %v1351_v7 = vpop.f32.mrb[6].mxu1  ;;  %808 = vst.msk [vmem:[%s1695_s17 + $0xc] sm:$0xf] %vm804_vm2, %v1271_v60  ;;  %v458_v12 = vpop.f32.mrb[7].mxu0 }
  0xf7   : > { %824 = vst.msk [vmem:[%s1695_s17 + $0x4c] sm:$0xf] %vm804_vm2, %v1287_v61  ;;  %v618_v8 = vadd.f32 %v1677_v22, %v579_v62  ;;  %v634_v9 = vadd.f32 %v1677_v22, %v595_v63  ;;  %v580_v10 = vmul.f32 %v1335_v6, %v1671_v20  ;;  %v596_v11 = vmul.f32 %v1351_v7, %v1671_v20  ;;  %v522_v13 = vpop.f32.mrb[7].mxu1 }
  0xf8   : > { %806 = vst.msk [vmem:[%s1695_s17 + $0x4] sm:$0xf] %vm804_vm2, %v1269_v2  ;;  %822 = vst.msk [vmem:[%s1695_s17 + $0x44] sm:$0xf] %vm804_vm2, %v1285_v3  ;;  %v616_v14 = vadd.f32 %v1677_v22, %v577_v4  ;;  %v632_v15 = vadd.f32 %v1677_v22, %v593_v5  ;;  %v578_v16 = vmul.f32 %v1671_v20, %v458_v12 }
  0xf9   : > { %v594_v17 = vmul.f32 %v1671_v20, %v522_v13  ;;  %v650_v18 = vmax.f32 %v618_v8, 0.0  ;;  %v666_v19 = vmax.f32 %v634_v9, 0.0  ;;  %v619_v21 = vadd.f32 %v1677_v22, %v580_v10 }
  0xfa   : > { %v635_v23 = vadd.f32 %v1677_v22, %v596_v11  ;;  %v648_v24 = vmax.f32 %v616_v14, 0.0  ;;  %v664_v25 = vmax.f32 %v632_v15, 0.0  ;;  %v617_v26 = vadd.f32 %v1677_v22, %v578_v16 }
  0xfb   : > { %v633_v27 = vadd.f32 %v1677_v22, %v594_v17  ;;  %v1274_v28 = vpack.c.bf16 %v650_v18, %v650_v18  ;;  %v1290_v29 = vpack.c.bf16 %v666_v19, %v666_v19  ;;  %v651_v30 = vmax.f32 %v619_v21, 0.0  ;;  %v1338_v36 = vpop.f32.mrb[8].mxu0 }
  0xfc   : > { %v667_v31 = vmax.f32 %v635_v23, 0.0  ;;  %v1272_v32 = vpack.c.bf16 %v648_v24, %v648_v24  ;;  %v1288_v33 = vpack.c.bf16 %v664_v25, %v664_v25  ;;  %v649_v34 = vmax.f32 %v617_v26, 0.0  ;;  %v1354_v37 = vpop.f32.mrb[8].mxu1  ;;  %v471_v42 = vpop.f32.mrb[9].mxu0 }
  0xfd   : > { %v665_v35 = vmax.f32 %v633_v27, 0.0  ;;  %811 = vst.msk [vmem:[%s1695_s17 + $0x18] sm:$0xf] %vm804_vm2, %v1274_v28  ;;  %827 = vst.msk [vmem:[%s1695_s17 + $0x58] sm:$0xf] %vm804_vm2, %v1290_v29  ;;  %v1275_v38 = vpack.c.bf16 %v651_v30, %v651_v30  ;;  %v583_v40 = vmul.f32 %v1338_v36, %v1671_v20  ;;  %v599_v41 = vmul.f32 %v1354_v37, %v1671_v20  ;;  %v535_v43 = vpop.f32.mrb[9].mxu1 }
  0xfe   : > { %v1291_v39 = vpack.c.bf16 %v667_v31, %v667_v31  ;;  %809 = vst.msk [vmem:[%s1695_s17 + $0x10] sm:$0xf] %vm804_vm2, %v1272_v32  ;;  %825 = vst.msk [vmem:[%s1695_s17 + $0x50] sm:$0xf] %vm804_vm2, %v1288_v33  ;;  %v1273_v44 = vpack.c.bf16 %v649_v34, %v649_v34  ;;  %v581_v46 = vmul.f32 %v1671_v20, %v471_v42  ;;  %v1339_v48 = vpop.f32.mrb[10].mxu0  ;;  %v1355_v49 = vpop.f32.mrb[10].mxu1 }
  0xff   : > { %v1289_v45 = vpack.c.bf16 %v665_v35, %v665_v35  ;;  %v597_v47 = vmul.f32 %v1671_v20, %v535_v43  ;;  %812 = vst.msk [vmem:[%s1695_s17 + $0x1c] sm:$0xf] %vm804_vm2, %v1275_v38  ;;  %v622_v50 = vadd.f32 %v1677_v22, %v583_v40  ;;  %v638_v51 = vadd.f32 %v1677_v22, %v599_v41  ;;  %v474_v54 = vpop.f32.mrb[11].mxu0  ;;  %v538_v55 = vpop.f32.mrb[11].mxu1 }
 0x100   : > { %828 = vst.msk [vmem:[%s1695_s17 + $0x5c] sm:$0xf] %vm804_vm2, %v1291_v39  ;;  %v584_v52 = vmul.f32 %v1339_v48, %v1671_v20  ;;  %v600_v53 = vmul.f32 %v1355_v49, %v1671_v20  ;;  %810 = vst.msk [vmem:[%s1695_s17 + $0x14] sm:$0xf] %vm804_vm2, %v1273_v44  ;;  %v620_v56 = vadd.f32 %v1677_v22, %v581_v46 }
 0x101   : > { %826 = vst.msk [vmem:[%s1695_s17 + $0x54] sm:$0xf] %vm804_vm2, %v1289_v45  ;;  %v636_v57 = vadd.f32 %v1677_v22, %v597_v47  ;;  %v582_v58 = vmul.f32 %v1671_v20, %v474_v54  ;;  %v598_v59 = vmul.f32 %v1671_v20, %v538_v55  ;;  %v654_v60 = vmax.f32 %v622_v50, 0.0 }
 0x102   : > { %v670_v61 = vmax.f32 %v638_v51, 0.0  ;;  %v623_v62 = vadd.f32 %v1677_v22, %v584_v52  ;;  %v639_v63 = vadd.f32 %v1677_v22, %v600_v53  ;;  %v652_v0 = vmax.f32 %v620_v56, 0.0 }
 0x103   : > { %v668_v1 = vmax.f32 %v636_v57, 0.0  ;;  %v621_v2 = vadd.f32 %v1677_v22, %v582_v58  ;;  %v637_v3 = vadd.f32 %v1677_v22, %v598_v59  ;;  %v1278_v4 = vpack.c.bf16 %v654_v60, %v654_v60  ;;  %v1342_v12 = vpop.f32.mrb[12].mxu0 }
 0x104   : > { %v1294_v5 = vpack.c.bf16 %v670_v61, %v670_v61  ;;  %v655_v6 = vmax.f32 %v623_v62, 0.0  ;;  %v671_v7 = vmax.f32 %v639_v63, 0.0  ;;  %v1276_v8 = vpack.c.bf16 %v652_v0, %v652_v0  ;;  %v1358_v13 = vpop.f32.mrb[12].mxu1  ;;  %v487_v18 = vpop.f32.mrb[13].mxu0 }
 0x105   : > { %v1292_v9 = vpack.c.bf16 %v668_v1, %v668_v1  ;;  %v653_v10 = vmax.f32 %v621_v2, 0.0  ;;  %v669_v11 = vmax.f32 %v637_v3, 0.0  ;;  %815 = vst.msk [vmem:[%s1695_s17 + $0x28] sm:$0xf] %vm804_vm2, %v1278_v4  ;;  %v587_v16 = vmul.f32 %v1342_v12, %v1671_v20  ;;  %v551_v19 = vpop.f32.mrb[13].mxu1  ;;  %v1343_v26 = vpop.f32.mrb[14].mxu0 }
 0x106   : > { %831 = vst.msk [vmem:[%s1695_s17 + $0x68] sm:$0xf] %vm804_vm2, %v1294_v5  ;;  %v1279_v14 = vpack.c.bf16 %v655_v6, %v655_v6  ;;  %v1295_v15 = vpack.c.bf16 %v671_v7, %v671_v7  ;;  %v603_v17 = vmul.f32 %v1358_v13, %v1671_v20  ;;  %813 = vst.msk [vmem:[%s1695_s17 + $0x20] sm:$0xf] %vm804_vm2, %v1276_v8  ;;  %v1359_v27 = vpop.f32.mrb[14].mxu1  ;;  %v490_v32 = vpop.f32.mrb[15].mxu0 }
 0x107   : > { %829 = vst.msk [vmem:[%s1695_s17 + $0x60] sm:$0xf] %vm804_vm2, %v1292_v9  ;;  %v1277_v21 = vpack.c.bf16 %v653_v10, %v653_v10  ;;  %v1293_v23 = vpack.c.bf16 %v669_v11, %v669_v11  ;;  %v585_v24 = vmul.f32 %v1671_v20, %v487_v18  ;;  %v601_v25 = vmul.f32 %v1671_v20, %v551_v19  ;;  %v554_v33 = vpop.f32.mrb[15].mxu1 }
 0x108   : > { %816 = vst.msk [vmem:[%s1695_s17 + $0x2c] sm:$0xf] %vm804_vm2, %v1279_v14  ;;  %832 = vst.msk [vmem:[%s1695_s17 + $0x6c] sm:$0xf] %vm804_vm2, %v1295_v15  ;;  %v626_v28 = vadd.f32 %v1677_v22, %v587_v16  ;;  %v642_v29 = vadd.f32 %v1677_v22, %v603_v17  ;;  %v588_v30 = vmul.f32 %v1343_v26, %v1671_v20 }
 0x109   : > { %v604_v31 = vmul.f32 %v1359_v27, %v1671_v20  ;;  %814 = vst.msk [vmem:[%s1695_s17 + $0x24] sm:$0xf] %vm804_vm2, %v1277_v21  ;;  %830 = vst.msk [vmem:[%s1695_s17 + $0x64] sm:$0xf] %vm804_vm2, %v1293_v23  ;;  %v624_v34 = vadd.f32 %v1677_v22, %v585_v24  ;;  %v640_v35 = vadd.f32 %v1677_v22, %v601_v25 }
 0x10a   : > { %v586_v36 = vmul.f32 %v1671_v20, %v490_v32  ;;  %v602_v37 = vmul.f32 %v1671_v20, %v554_v33  ;;  %v658_v38 = vmax.f32 %v626_v28, 0.0  ;;  %v674_v39 = vmax.f32 %v642_v29, 0.0 }
 0x10b   : > { %v627_v40 = vadd.f32 %v1677_v22, %v588_v30  ;;  %v643_v41 = vadd.f32 %v1677_v22, %v604_v31  ;;  %v656_v42 = vmax.f32 %v624_v34, 0.0  ;;  %v672_v43 = vmax.f32 %v640_v35, 0.0 }
 0x10c   : > { %v625_v44 = vadd.f32 %v1677_v22, %v586_v36  ;;  %v641_v45 = vadd.f32 %v1677_v22, %v602_v37  ;;  %v1282_v46 = vpack.c.bf16 %v658_v38, %v658_v38  ;;  %v1298_v47 = vpack.c.bf16 %v674_v39, %v674_v39  ;;  %843 = sbr.rel (!%p1613_p4) target bundleno = 345 (0x159), region = 40 }
 0x10d   : > { %v659_v20 = vmax.f32 %v627_v40, 0.0  ;;  %v675_v48 = vmax.f32 %v643_v41, 0.0  ;;  %v1280_v49 = vpack.c.bf16 %v656_v42, %v656_v42  ;;  %v1296_v50 = vpack.c.bf16 %v672_v43, %v672_v43 }
 0x10e   : > { %v657_v51 = vmax.f32 %v625_v44, 0.0  ;;  %v673_v52 = vmax.f32 %v641_v45, 0.0  ;;  %819 = vst.msk [vmem:[%s1695_s17 + $0x38] sm:$0xf] %vm804_vm2, %v1282_v46  ;;  %835 = vst.msk [vmem:[%s1695_s17 + $0x78] sm:$0xf] %vm804_vm2, %v1298_v47 }
 0x10f   : > { %v1283_v53 = vpack.c.bf16 %v659_v20, %v659_v20  ;;  %v1299_v54 = vpack.c.bf16 %v675_v48, %v675_v48  ;;  %817 = vst.msk [vmem:[%s1695_s17 + $0x30] sm:$0xf] %vm804_vm2, %v1280_v49  ;;  %833 = vst.msk [vmem:[%s1695_s17 + $0x70] sm:$0xf] %vm804_vm2, %v1296_v50 }
 0x110   : > { %v1281_v22 = vpack.c.bf16 %v657_v51, %v657_v51  ;;  %v1297_v55 = vpack.c.bf16 %v673_v52, %v673_v52 }
 0x111   : > { %820 = vst.msk [vmem:[%s1695_s17 + $0x3c] sm:$0xf] %vm804_vm2, %v1283_v53  ;;  %836 = vst.msk [vmem:[%s1695_s17 + $0x7c] sm:$0xf] %vm804_vm2, %v1299_v54 }
 0x112   : > { %818 = vst.msk [vmem:[%s1695_s17 + $0x34] sm:$0xf] %vm804_vm2, %v1281_v22  ;;  %834 = vst.msk [vmem:[%s1695_s17 + $0x74] sm:$0xf] %vm804_vm2, %v1297_v55 }
 0x113   : > { %s1957_s20 = smov (!%p846_p8, %s845_s20), 32 }
 0x114   : > { %s1253_s27 = sshll.u32 %s1957_s20, 6 }
 0x115   : > { %p1256_p9 = scmp.eq.s32.totalorder %s1253_s27, 0 }
 0x116   : > { %s1822_s29 = sshrl.u32 (!%p1256_p9), %s1957_s20, 5 }
 0x117   : > { %854 = sbr.rel (%p1256_p9) target bundleno = 345 (0x159), region = 44  ;;  %p1257_p10 = scmp.le.s32.totalorder (!%p1256_p9), %s1822_s29, 0 }
 0x11e   : > { %1131 = sbr.rel (%p1257_p10) target bundleno = 324 (0x144), region = 116  ;;  %s1950_s18 = smov (!%p1257_p10), %s1816_s26 }
 0x11f   : > { %s1951_s23 = smov (!%p1257_p10), %s1695_s17  ;;  %s1831_s28 = smov (!%p1257_p10), 0  }
 0x120   : > { %s1833_s30 = smov (!%p1257_p10), 0  }
 0x125 LB: >> { %v870_v56 = vld [vmem:[%s1537_s23] sm:$0xf]  ;;  %v872_v57 = vld [vmem:[%s1537_s23 + $0x4] sm:$0xf]  ;;  %v874_v58 = vld [vmem:[%s1537_s23 + $0x8] sm:$0xf]  ;;  %s1545_s30 = sphi %s1833_s30, %s864_s30   ;;  %s1541_s28 = sphi %s1831_s28, %s1952_s28   ;;  %s1537_s23 = sphi %s1951_s23, %s939_s23   ;;  %s1533_s18 = sphi %s1950_s18, %s940_s18  }
 0x126   : >> { %871 = vst [vmem:[%s1533_s18] sm:$0xf] %v870_v56  ;;  %873 = vst [vmem:[%s1533_s18 + $0x4] sm:$0xf] %v872_v57  ;;  %v876_v59 = vld [vmem:[%s1537_s23 + $0xc] sm:$0xf]  ;;  %s934_s5 = sadd.s32 1, %s1541_s28 }
 0x127   : >> { %875 = vst [vmem:[%s1533_s18 + $0x8] sm:$0xf] %v874_v58  ;;  %v878_v60 = vld [vmem:[%s1537_s23 + $0x10] sm:$0xf]  ;;  %v880_v61 = vld [vmem:[%s1537_s23 + $0x14] sm:$0xf]  ;;  %p935_p11 = scmp.ge.s32.totalorder %s934_s5, %s1822_s29 }
 0x128   : >> { %877 = vst [vmem:[%s1533_s18 + $0xc] sm:$0xf] %v876_v59  ;;  %879 = vst [vmem:[%s1533_s18 + $0x10] sm:$0xf] %v878_v60  ;;  %v882_v62 = vld [vmem:[%s1537_s23 + $0x18] sm:$0xf] }
 0x129   : >> { %881 = vst [vmem:[%s1533_s18 + $0x14] sm:$0xf] %v880_v61  ;;  %v884_v63 = vld [vmem:[%s1537_s23 + $0x1c] sm:$0xf]  ;;  %v886_v0 = vld [vmem:[%s1537_s23 + $0x20] sm:$0xf] }
 0x12a   : >> { %883 = vst [vmem:[%s1533_s18 + $0x18] sm:$0xf] %v882_v62  ;;  %885 = vst [vmem:[%s1533_s18 + $0x1c] sm:$0xf] %v884_v63  ;;  %v888_v1 = vld [vmem:[%s1537_s23 + $0x24] sm:$0xf] }
 0x12b   : >> { %887 = vst [vmem:[%s1533_s18 + $0x20] sm:$0xf] %v886_v0  ;;  %v890_v2 = vld [vmem:[%s1537_s23 + $0x28] sm:$0xf]  ;;  %v892_v3 = vld [vmem:[%s1537_s23 + $0x2c] sm:$0xf] }
 0x12c   : >> { %889 = vst [vmem:[%s1533_s18 + $0x24] sm:$0xf] %v888_v1  ;;  %891 = vst [vmem:[%s1533_s18 + $0x28] sm:$0xf] %v890_v2  ;;  %v894_v4 = vld [vmem:[%s1537_s23 + $0x30] sm:$0xf] }
 0x12d   : >> { %893 = vst [vmem:[%s1533_s18 + $0x2c] sm:$0xf] %v892_v3  ;;  %v896_v5 = vld [vmem:[%s1537_s23 + $0x34] sm:$0xf]  ;;  %v898_v6 = vld [vmem:[%s1537_s23 + $0x38] sm:$0xf] }
 0x12e   : >> { %895 = vst [vmem:[%s1533_s18 + $0x30] sm:$0xf] %v894_v4  ;;  %897 = vst [vmem:[%s1533_s18 + $0x34] sm:$0xf] %v896_v5  ;;  %v900_v7 = vld [vmem:[%s1537_s23 + $0x3c] sm:$0xf] }
 0x12f   : >> { %899 = vst [vmem:[%s1533_s18 + $0x38] sm:$0xf] %v898_v6  ;;  %v902_v8 = vld [vmem:[%s1537_s23 + $0x40] sm:$0xf]  ;;  %v904_v9 = vld [vmem:[%s1537_s23 + $0x44] sm:$0xf] }
 0x130   : >> { %901 = vst [vmem:[%s1533_s18 + $0x3c] sm:$0xf] %v900_v7  ;;  %903 = vst [vmem:[%s1533_s18 + $0x40] sm:$0xf] %v902_v8  ;;  %v906_v10 = vld [vmem:[%s1537_s23 + $0x48] sm:$0xf] }
 0x131   : >> { %905 = vst [vmem:[%s1533_s18 + $0x44] sm:$0xf] %v904_v9  ;;  %v908_v11 = vld [vmem:[%s1537_s23 + $0x4c] sm:$0xf]  ;;  %v910_v12 = vld [vmem:[%s1537_s23 + $0x50] sm:$0xf] }
 0x132   : >> { %907 = vst [vmem:[%s1533_s18 + $0x48] sm:$0xf] %v906_v10  ;;  %909 = vst [vmem:[%s1533_s18 + $0x4c] sm:$0xf] %v908_v11  ;;  %v912_v13 = vld [vmem:[%s1537_s23 + $0x54] sm:$0xf] }
 0x133   : >> { %911 = vst [vmem:[%s1533_s18 + $0x50] sm:$0xf] %v910_v12  ;;  %v914_v14 = vld [vmem:[%s1537_s23 + $0x58] sm:$0xf]  ;;  %v916_v15 = vld [vmem:[%s1537_s23 + $0x5c] sm:$0xf] }
 0x134   : >> { %913 = vst [vmem:[%s1533_s18 + $0x54] sm:$0xf] %v912_v13  ;;  %915 = vst [vmem:[%s1533_s18 + $0x58] sm:$0xf] %v914_v14  ;;  %v918_v16 = vld [vmem:[%s1537_s23 + $0x60] sm:$0xf] }
 0x135   : >> { %917 = vst [vmem:[%s1533_s18 + $0x5c] sm:$0xf] %v916_v15  ;;  %v920_v17 = vld [vmem:[%s1537_s23 + $0x64] sm:$0xf]  ;;  %v922_v18 = vld [vmem:[%s1537_s23 + $0x68] sm:$0xf] }
 0x136   : >> { %919 = vst [vmem:[%s1533_s18 + $0x60] sm:$0xf] %v918_v16  ;;  %921 = vst [vmem:[%s1533_s18 + $0x64] sm:$0xf] %v920_v17  ;;  %v924_v19 = vld [vmem:[%s1537_s23 + $0x6c] sm:$0xf] }
 0x137   : >> { %923 = vst [vmem:[%s1533_s18 + $0x68] sm:$0xf] %v922_v18  ;;  %v926_v21 = vld [vmem:[%s1537_s23 + $0x70] sm:$0xf]  ;;  %v928_v23 = vld [vmem:[%s1537_s23 + $0x74] sm:$0xf] }
 0x138   : >> { %925 = vst [vmem:[%s1533_s18 + $0x6c] sm:$0xf] %v924_v19  ;;  %927 = vst [vmem:[%s1533_s18 + $0x70] sm:$0xf] %v926_v21  ;;  %v930_v24 = vld [vmem:[%s1537_s23 + $0x78] sm:$0xf] }
 0x139   : >> { %929 = vst [vmem:[%s1533_s18 + $0x74] sm:$0xf] %v928_v23  ;;  %v932_v25 = vld [vmem:[%s1537_s23 + $0x7c] sm:$0xf]  ;;  %931 = vst [vmem:[%s1533_s18 + $0x78] sm:$0xf] %v930_v24 }
 0x13a   : >> { %933 = vst [vmem:[%s1533_s18 + $0x7c] sm:$0xf] %v932_v25  ;;  %s1959_s5 = smov (%p935_p11, %s934_s5), 0  ;;  %s864_s30 = sadd.s32 1, %s1545_s30  }
 0x13b   : >> { %s1258_s6 = sshll.u32 %s1959_s5, 7  ;;  %p863_p12 = scmp.ge.s32.totalorder %s864_s30, %s1822_s29 }
 0x13c   : >> { %s939_s23 = scalar_lea.vmem %s1695_s17, %s1258_s6 [#allocation2]   ;;  %s940_s18 = scalar_lea.vmem %s1816_s26, %s1258_s6  }
 0x13d   : >> { %s1952_s28 = smov %s1959_s5  ;;  %866 = sbr.rel (!%p863_p12) target bundleno = 293 (0x125), region = 122 }
 0x144 PF: > { %s1926_s7 = sand.u32 31, %s1957_s20   ;;  %s1301_s8 = sshll.u32 %s1822_s29, 7 }
 0x145   : > { %s945_s9 = scalar_lea.vmem %s1695_s17, %s1301_s8 [#allocation2]   ;;  %s947_s10 = scalar_lea.vmem %s1816_s26, %s1301_s8  }
 0x146   : > { %p1263_p13 = scmp.le.s32.totalorder %s1926_s7, 0 }
 0x147   : > { %s1547_s11 = smov (!%p1263_p13), %s947_s10   ;;  %s1551_s12 = smov (!%p1263_p13), %s945_s9  }
 0x148   : > { %1145 = sbr.rel (%p1263_p13) target bundleno = 345 (0x159), region = 127  ;;  %s1555_s13 = smov (!%p1263_p13), 0  }
 0x149   : > { %s1559_s14 = smov (!%p1263_p13), 0  }
 0x14f LB: >> { %v957_v26 = vld [vmem:[%s1553_s12] sm:$0xf]  ;;  %s959_s15 = sadd.s32 1, %s1557_s13  ;;  %s951_s14 = sadd.s32 1, %s1561_s14   ;;  %s1561_s14 = sphi %s1559_s14, %s951_s14   ;;  %s1557_s13 = sphi %s1555_s13, %s1556_s13   ;;  %s1553_s12 = sphi %s1551_s12, %s964_s12   ;;  %s1549_s11 = sphi %s1547_s11, %s965_s11  }
 0x150   : >> { %958 = vst [vmem:[%s1549_s11] sm:$0xf] %v957_v26  ;;  %p960_p0 = scmp.ge.s32.totalorder %s959_s15, %s1926_s7  ;;  %p950_p1 = scmp.ge.s32.totalorder %s951_s14, %s1926_s7 }
 0x152   : >> { %s1961_s15 = smov (%p960_p0, %s959_s15), 0  ;;  %953 = sbr.rel (!%p950_p1) target bundleno = 335 (0x14f), region = 133 }
 0x153   : >> { %s1264_s17 = sshll.u32 %s1961_s15, 2  ;;  %s1556_s13 = smov %s1961_s15  }
 0x154   : >> { %s964_s12 = scalar_lea.vmem %s945_s9, %s1264_s17 [#allocation2]   ;;  %s965_s11 = scalar_lea.vmem %s947_s10, %s1264_s17  }
 0x159 PF: > { %p11_p2 = scmp.ge.s32.totalorder %s1603_s19, 13   ;;  %s1953_s15 = smov %s1525_s16 }
 0x15a   : > { %s1954_s16 = smov %s1611_s22  ;;  %s1955_s17 = smov %s1603_s19 }
 0x15b   :  { %13 = sbr.rel (!%p11_p2) target bundleno = 2 (0x2), region = 144 }

// kernel: pretrained_facenet_forward.50
= control target key start
LH: loop header
LB: loop body
LE: loop exit
PB: predicated region body
PF: predicated region fallthrough
CT: control target
= control target key end

     0   :  { %s1588_s15 = smov 0   ;;  %s1590_s16 = smov 0   ;;  %s1944_s0 = inlined_call_operand.vmem [shape: bf16[2738,36], index: 0, kind: input, shape index: {}]   ;;  %s1945_s1 = inlined_call_operand.vmem [shape: bf16[36,8], index: 1, kind: input, shape index: {}]   ;;  %s1946_s2 = inlined_call_operand.vmem [shape: f32[1,8], index: 2, kind: input, shape index: {}]   ;;  %s1947_s3 = inlined_call_operand.vmem [shape: f32[1,8], index: 3, kind: input, shape index: {}]   ;;  %s1948_s4 = inlined_call_operand.vmem [shape: bf16[2738,8], index: 4, kind: output, shape index: {}]  }
   0x1   :  { %s1592_s17 = smov 0  }
   0x2 LB: > { %s1601_s18 = sadd.s32 4294967295, %s1529_s17   ;;  %s1603_s19 = sadd.s32 1, %s1529_s17   ;;  %s1529_s17 = sphi %s1592_s17, %s1955_s17   ;;  %s1525_s16 = sphi %s1590_s16, %s1954_s16   ;;  %s1521_s15 = sphi %s1588_s15, %s1953_s15  }
   0x3   : > { %s107_s20 = ssub.s32 %s1529_s17, %s1603_s19  ;;  %s110_s21 = sadd.s32 1, %s1525_s16 }
   0x4   : > { %p108_p0 = scmp.eq.s32.totalorder %s107_s20, 0  ;;  %p120_p1 = scmp.ne.s32.totalorder %s1525_s16, %s1521_s15 }
   0x5   : > { %p121_p2 = scmp.eq.s32.totalorder %s1601_s18, 10  ;;  %p1178_p3 = scmp.ge.s32.totalorder %s1529_s17, 1 }
   0x6   : > { %s1611_s22 = scalar_select %p108_p0, %s1525_s16, %s110_s21  }
   0x7   : > { %p1613_p4 = por %p121_p2, %p120_p1  ;;  %p171_p5 = scmp.lt.s32.totalorder %s1529_s17, 12 }
   0x9   : > { %p172_p6 = pnand %p1178_p3, %p171_p5 }
   0xa   : > { %v1456_v0 = vld [vmem:[%s1945_s1] sm:$0xff] (!%p172_p6)   ;;  %v1457_v1 = vld [vmem:[%s1945_s1 + $0x8] sm:$0xff] (!%p172_p6)   ;;  %s1624_s28 = sshll.u32 (!%p172_p6), %s1601_s18, 5  ;;  %v1458_v2 = vld [vmem:[%s1945_s1 + $0x10] ss:$0 sps:$4 sm:$0x33] (!%p172_p6)  }
   0xb   : > { %175 = sbr.rel (%p172_p6) target bundleno = 345 (0x159), region = 36  ;;  %1322 = vmatprep.subr.bf16.mxu0 (!%p172_p6), %v1456_v0  ;;  %1360 = vmatprep.subr.bf16.mxu1 (!%p172_p6), %v1456_v0  ;;  %p205_p7 = scmp.lt.s32.totalorder (!%p172_p6), %s1624_s28, 342  ;;  %vm401_vm0 = vcmask (!%p172_p6), 1041408   ;;  %vm352_vm1 = vcmask (!%p172_p6), 293888   ;;  %v1671_v20 = vld [vmem:[%s1946_s2] ss:$0 sm:$0xff] (!%p172_p6) }
   0xc   : > { %1323 = vmatpush3.bf16.msra.mxu0 (!%p172_p6), %v1456_v0  ;;  %1363 = vmatpush3.bf16.msra.mxu1 (!%p172_p6), %v1456_v0  ;;  %v403_v3 = vsel (!%p172_p6), %vm401_vm0, %v1458_v2, 0  ;;  %s197_s12 = sand.u32 (!%p172_p6), 1, %s1521_s15   ;;  %v1677_v22 = vld [vmem:[%s1947_s3] ss:$0 sm:$0xff] (!%p172_p6)  ;;  %vm804_vm2 = vcmask (!%p172_p6), 60416  }
   0xd   : > { %1324 = vmatprep.subr.bf16.mxu0 (!%p172_p6), %v1457_v1  ;;  %1361 = vmatprep.subr.bf16.mxu1 (!%p172_p6), %v1457_v1  ;;  %s1179_s15 = sshll.u32 (!%p172_p6), %s197_s12, 7 }
   0xe   : > { %s1695_s17 = scalar_lea.vmem (!%p172_p6), [#allocation2], %s1179_s15  }
  0x10   : > { %1325 = vmatpush3.bf16.msra.mxu0 (!%p172_p6), %v1457_v1  ;;  %1364 = vmatpush3.bf16.msra.mxu1 (!%p172_p6), %v1457_v1 }
  0x11   : > { %1366 = vmatprep.subr.msk.bf16.mxu0 (!%p172_p6), %vm401_vm0, %v1458_v2  ;;  %1367 = vmatprep.subr.msk.bf16.mxu1 (!%p172_p6), %vm401_vm0, %v1458_v2 }
  0x12   : > { %s206_s5 = scalar_select %p205_p7, %s1624_s28, 342 }
  0x13   : > { %s845_s20 = ssub.s32 (%p1613_p4), 343, %s1624_s28  ;;  %s1300_s21 = sshll.u32 (%p1613_p4), %s1601_s18, 7 }
  0x14   : > { %s1181_s6 = sshll.u32 %s206_s5, 2  ;;  %1327 = vmatpush3.bf16.msra.mxu0 %v403_v3  ;;  %1365 = vmatpush3.bf16.msra.mxu1 %v403_v3  ;;  %p846_p8 = scmp.lt.s32.totalorder (%p1613_p4), %s845_s20, 32 }
  0x15   : > { %s1634_s9 = scalar_lea.vmem %s1944_s0, %s1181_s6  ;;  %s1816_s26 = scalar_lea.vmem (%p1613_p4), %s1948_s4, %s1300_s21  }
  0x16   : > { %v1459_v4 = vld [vmem:[%s1634_s9] sm:$0xff]   ;;  %v1461_v6 = vld [vmem:[%s1634_s9 + $0x8] sm:$0xff]   ;;  %v1463_v8 = vld [vmem:[%s1634_s9 + $0x10] sm:$0xff]  }
  0x17   : > { %v1460_v5 = vld [vmem:[%s1634_s9 + $0x40] sm:$0xff]   ;;  %1328 = vmatprep.mubr.msk.bf16.mxu0 %vm352_vm1, %v1459_v4  ;;  %v1462_v7 = vld [vmem:[%s1634_s9 + $0x48] sm:$0xff]   ;;  %v1464_v9 = vld [vmem:[%s1634_s9 + $0x50] sm:$0xff]  }
  0x18   : > { %1344 = vmatprep.mubr.msk.bf16.mxu1 %vm352_vm1, %v1460_v5  ;;  %1329 = vmatmul.mubr.msk.bf16.vlgmr.msra.gmra.mrb[0].mxu0 %vm352_vm1, %v1461_v6  ;;  %v1465_v10 = vld [vmem:[%s1634_s9 + $0x18] sm:$0xff]   ;;  %v1467_v12 = vld [vmem:[%s1634_s9 + $0x20] sm:$0xff]   ;;  %v1469_v14 = vld [vmem:[%s1634_s9 + $0x28] sm:$0xff]  }
  0x19   : > { %1345 = vmatmul.mubr.msk.bf16.vlgmr.msra.gmra.mrb[0].mxu1 %vm352_vm1, %v1462_v7  ;;  %1332 = vmatprep.mubr.msk.bf16.mxu0 %vm352_vm1, %v1463_v8  ;;  %v1466_v11 = vld [vmem:[%s1634_s9 + $0x58] sm:$0xff]   ;;  %v1468_v13 = vld [vmem:[%s1634_s9 + $0x60] sm:$0xff]   ;;  %v1470_v15 = vld [vmem:[%s1634_s9 + $0x68] sm:$0xff]  }
  0x1a   : > { %1348 = vmatprep.mubr.msk.bf16.mxu1 %vm352_vm1, %v1464_v9  ;;  %v1471_v16 = vld [vmem:[%s1634_s9 + $0x30] sm:$0xff]   ;;  %v1473_v18 = vld [vmem:[%s1634_s9 + $0x38] sm:$0xff]  }
  0x1b   : > { %v1472_v17 = vld [vmem:[%s1634_s9 + $0x70] sm:$0xff]   ;;  %v1474_v19 = vld [vmem:[%s1634_s9 + $0x78] sm:$0xff]  }
  0x20   : > { %1333 = vmatmul.mubr.msk.bf16.gmra.mrb[4].mxu0 %vm352_vm1, %v1465_v10 }
  0x21   : > { %1349 = vmatmul.mubr.msk.bf16.gmra.mrb[4].mxu1 %vm352_vm1, %v1466_v11  ;;  %1336 = vmatprep.mubr.msk.bf16.mxu0 %vm352_vm1, %v1467_v12 }
  0x22   : > { %1352 = vmatprep.mubr.msk.bf16.mxu1 %vm352_vm1, %v1468_v13 }
  0x28   : > { %1337 = vmatmul.mubr.msk.bf16.gmra.mrb[8].mxu0 %vm352_vm1, %v1469_v14 }
  0x29   : > { %1353 = vmatmul.mubr.msk.bf16.gmra.mrb[8].mxu1 %vm352_vm1, %v1470_v15  ;;  %1340 = vmatprep.mubr.msk.bf16.mxu0 %vm352_vm1, %v1471_v16 }
  0x2a   : > { %1356 = vmatprep.mubr.msk.bf16.mxu1 %vm352_vm1, %v1472_v17 }
  0x30   : > { %1341 = vmatmul.mubr.msk.bf16.gmra.mrb[12].mxu0 %vm352_vm1, %v1473_v18 }
  0x31   : > { %1357 = vmatmul.mubr.msk.bf16.gmra.mrb[12].mxu1 %vm352_vm1, %v1474_v19 }
  0xeb   : > { %v1330_v21 = vpop.f32.mrb[0].mxu0 }
  0xec   : > { %v1346_v23 = vpop.f32.mrb[0].mxu1  ;;  %v575_v24 = vmul.f32 %v1330_v21, %v1671_v20  ;;  %v439_v26 = vpop.f32.mrb[1].mxu0 }
  0xed   : > { %v591_v25 = vmul.f32 %v1346_v23, %v1671_v20  ;;  %v503_v27 = vpop.f32.mrb[1].mxu1  ;;  %v573_v28 = vmul.f32 %v1671_v20, %v439_v26  ;;  %v1331_v30 = vpop.f32.mrb[2].mxu0 }
  0xee   : > { %v589_v29 = vmul.f32 %v1671_v20, %v503_v27  ;;  %v1347_v31 = vpop.f32.mrb[2].mxu1  ;;  %v614_v32 = vadd.f32 %v1677_v22, %v575_v24  ;;  %v576_v34 = vmul.f32 %v1331_v30, %v1671_v20  ;;  %v442_v36 = vpop.f32.mrb[3].mxu0 }
  0xef   : > { %v630_v33 = vadd.f32 %v1677_v22, %v591_v25  ;;  %v592_v35 = vmul.f32 %v1347_v31, %v1671_v20  ;;  %v506_v37 = vpop.f32.mrb[3].mxu1  ;;  %v612_v38 = vadd.f32 %v1677_v22, %v573_v28  ;;  %v574_v40 = vmul.f32 %v1671_v20, %v442_v36 }
  0xf0   : > { %v628_v39 = vadd.f32 %v1677_v22, %v589_v29  ;;  %v590_v41 = vmul.f32 %v1671_v20, %v506_v37  ;;  %v646_v42 = vmax.f32 %v614_v32, 0.0  ;;  %v615_v44 = vadd.f32 %v1677_v22, %v576_v34 }
  0xf1   : > { %v662_v43 = vmax.f32 %v630_v33, 0.0  ;;  %v631_v45 = vadd.f32 %v1677_v22, %v592_v35  ;;  %v644_v46 = vmax.f32 %v612_v38, 0.0  ;;  %v613_v48 = vadd.f32 %v1677_v22, %v574_v40 }
  0xf2   : > { %v660_v47 = vmax.f32 %v628_v39, 0.0  ;;  %v629_v49 = vadd.f32 %v1677_v22, %v590_v41  ;;  %v1270_v50 = vpack.c.bf16 %v646_v42, %v646_v42  ;;  %v647_v52 = vmax.f32 %v615_v44, 0.0 }
  0xf3   : > { %v1286_v51 = vpack.c.bf16 %v662_v43, %v662_v43  ;;  %v663_v53 = vmax.f32 %v631_v45, 0.0  ;;  %v1268_v54 = vpack.c.bf16 %v644_v46, %v644_v46  ;;  %v645_v56 = vmax.f32 %v613_v48, 0.0  ;;  %v1334_v58 = vpop.f32.mrb[4].mxu0 }
  0xf4   : > { %v1284_v55 = vpack.c.bf16 %v660_v47, %v660_v47  ;;  %v661_v57 = vmax.f32 %v629_v49, 0.0  ;;  %v1350_v59 = vpop.f32.mrb[4].mxu1  ;;  %807 = vst.msk [vmem:[%s1695_s17 + $0x8] sm:$0xf] %vm804_vm2, %v1270_v50  ;;  %v1271_v60 = vpack.c.bf16 %v647_v52, %v647_v52  ;;  %v579_v62 = vmul.f32 %v1334_v58, %v1671_v20  ;;  %v455_v0 = vpop.f32.mrb[5].mxu0 }
  0xf5   : > { %823 = vst.msk [vmem:[%s1695_s17 + $0x48] sm:$0xf] %vm804_vm2, %v1286_v51  ;;  %v1287_v61 = vpack.c.bf16 %v663_v53, %v663_v53  ;;  %v595_v63 = vmul.f32 %v1350_v59, %v1671_v20  ;;  %v519_v1 = vpop.f32.mrb[5].mxu1  ;;  %805 = vst.msk [vmem:[%s1695_s17] sm:$0xf] %vm804_vm2, %v1268_v54  ;;  %v1269_v2 = vpack.c.bf16 %v645_v56, %v645_v56  ;;  %v1335_v6 = vpop.f32.mrb[6].mxu0 }
  0xf6   : > { %821 = vst.msk [vmem:[%s1695_s17 + $0x40] sm:$0xf] %vm804_vm2, %v1284_v55  ;;  %v1285_v3 = vpack.c.bf16 %v661_v57, %v661_v57  ;;  %v577_v4 = vmul.f32 %v1671_v20, %v455_v0  ;;  %v593_v5 = vmul.f32 %v1671_v20, %v519_v1  ;;  %v1351_v7 = vpop.f32.mrb[6].mxu1  ;;  %808 = vst.msk [vmem:[%s1695_s17 + $0xc] sm:$0xf] %vm804_vm2, %v1271_v60  ;;  %v458_v12 = vpop.f32.mrb[7].mxu0 }
  0xf7   : > { %824 = vst.msk [vmem:[%s1695_s17 + $0x4c] sm:$0xf] %vm804_vm2, %v1287_v61  ;;  %v618_v8 = vadd.f32 %v1677_v22, %v579_v62  ;;  %v634_v9 = vadd.f32 %v1677_v22, %v595_v63  ;;  %v580_v10 = vmul.f32 %v1335_v6, %v1671_v20  ;;  %v596_v11 = vmul.f32 %v1351_v7, %v1671_v20  ;;  %v522_v13 = vpop.f32.mrb[7].mxu1 }
  0xf8   : > { %806 = vst.msk [vmem:[%s1695_s17 + $0x4] sm:$0xf] %vm804_vm2, %v1269_v2  ;;  %822 = vst.msk [vmem:[%s1695_s17 + $0x44] sm:$0xf] %vm804_vm2, %v1285_v3  ;;  %v616_v14 = vadd.f32 %v1677_v22, %v577_v4  ;;  %v632_v15 = vadd.f32 %v1677_v22, %v593_v5  ;;  %v578_v16 = vmul.f32 %v1671_v20, %v458_v12 }
  0xf9   : > { %v594_v17 = vmul.f32 %v1671_v20, %v522_v13  ;;  %v650_v18 = vmax.f32 %v618_v8, 0.0  ;;  %v666_v19 = vmax.f32 %v634_v9, 0.0  ;;  %v619_v21 = vadd.f32 %v1677_v22, %v580_v10 }
  0xfa   : > { %v635_v23 = vadd.f32 %v1677_v22, %v596_v11  ;;  %v648_v24 = vmax.f32 %v616_v14, 0.0  ;;  %v664_v25 = vmax.f32 %v632_v15, 0.0  ;;  %v617_v26 = vadd.f32 %v1677_v22, %v578_v16 }
  0xfb   : > { %v633_v27 = vadd.f32 %v1677_v22, %v594_v17  ;;  %v1274_v28 = vpack.c.bf16 %v650_v18, %v650_v18  ;;  %v1290_v29 = vpack.c.bf16 %v666_v19, %v666_v19  ;;  %v651_v30 = vmax.f32 %v619_v21, 0.0  ;;  %v1338_v36 = vpop.f32.mrb[8].mxu0 }
  0xfc   : > { %v667_v31 = vmax.f32 %v635_v23, 0.0  ;;  %v1272_v32 = vpack.c.bf16 %v648_v24, %v648_v24  ;;  %v1288_v33 = vpack.c.bf16 %v664_v25, %v664_v25  ;;  %v649_v34 = vmax.f32 %v617_v26, 0.0  ;;  %v1354_v37 = vpop.f32.mrb[8].mxu1  ;;  %v471_v42 = vpop.f32.mrb[9].mxu0 }
  0xfd   : > { %v665_v35 = vmax.f32 %v633_v27, 0.0  ;;  %811 = vst.msk [vmem:[%s1695_s17 + $0x18] sm:$0xf] %vm804_vm2, %v1274_v28  ;;  %827 = vst.msk [vmem:[%s1695_s17 + $0x58] sm:$0xf] %vm804_vm2, %v1290_v29  ;;  %v1275_v38 = vpack.c.bf16 %v651_v30, %v651_v30  ;;  %v583_v40 = vmul.f32 %v1338_v36, %v1671_v20  ;;  %v599_v41 = vmul.f32 %v1354_v37, %v1671_v20  ;;  %v535_v43 = vpop.f32.mrb[9].mxu1 }
  0xfe   : > { %v1291_v39 = vpack.c.bf16 %v667_v31, %v667_v31  ;;  %809 = vst.msk [vmem:[%s1695_s17 + $0x10] sm:$0xf] %vm804_vm2, %v1272_v32  ;;  %825 = vst.msk [vmem:[%s1695_s17 + $0x50] sm:$0xf] %vm804_vm2, %v1288_v33  ;;  %v1273_v44 = vpack.c.bf16 %v649_v34, %v649_v34  ;;  %v581_v46 = vmul.f32 %v1671_v20, %v471_v42  ;;  %v1339_v48 = vpop.f32.mrb[10].mxu0  ;;  %v1355_v49 = vpop.f32.mrb[10].mxu1 }
  0xff   : > { %v1289_v45 = vpack.c.bf16 %v665_v35, %v665_v35  ;;  %v597_v47 = vmul.f32 %v1671_v20, %v535_v43  ;;  %812 = vst.msk [vmem:[%s1695_s17 + $0x1c] sm:$0xf] %vm804_vm2, %v1275_v38  ;;  %v622_v50 = vadd.f32 %v1677_v22, %v583_v40  ;;  %v638_v51 = vadd.f32 %v1677_v22, %v599_v41  ;;  %v474_v54 = vpop.f32.mrb[11].mxu0  ;;  %v538_v55 = vpop.f32.mrb[11].mxu1 }
 0x100   : > { %828 = vst.msk [vmem:[%s1695_s17 + $0x5c] sm:$0xf] %vm804_vm2, %v1291_v39  ;;  %v584_v52 = vmul.f32 %v1339_v48, %v1671_v20  ;;  %v600_v53 = vmul.f32 %v1355_v49, %v1671_v20  ;;  %810 = vst.msk [vmem:[%s1695_s17 + $0x14] sm:$0xf] %vm804_vm2, %v1273_v44  ;;  %v620_v56 = vadd.f32 %v1677_v22, %v581_v46 }
 0x101   : > { %826 = vst.msk [vmem:[%s1695_s17 + $0x54] sm:$0xf] %vm804_vm2, %v1289_v45  ;;  %v636_v57 = vadd.f32 %v1677_v22, %v597_v47  ;;  %v582_v58 = vmul.f32 %v1671_v20, %v474_v54  ;;  %v598_v59 = vmul.f32 %v1671_v20, %v538_v55  ;;  %v654_v60 = vmax.f32 %v622_v50, 0.0 }
 0x102   : > { %v670_v61 = vmax.f32 %v638_v51, 0.0  ;;  %v623_v62 = vadd.f32 %v1677_v22, %v584_v52  ;;  %v639_v63 = vadd.f32 %v1677_v22, %v600_v53  ;;  %v652_v0 = vmax.f32 %v620_v56, 0.0 }
 0x103   : > { %v668_v1 = vmax.f32 %v636_v57, 0.0  ;;  %v621_v2 = vadd.f32 %v1677_v22, %v582_v58  ;;  %v637_v3 = vadd.f32 %v1677_v22, %v598_v59  ;;  %v1278_v4 = vpack.c.bf16 %v654_v60, %v654_v60  ;;  %v1342_v12 = vpop.f32.mrb[12].mxu0 }
 0x104   : > { %v1294_v5 = vpack.c.bf16 %v670_v61, %v670_v61  ;;  %v655_v6 = vmax.f32 %v623_v62, 0.0  ;;  %v671_v7 = vmax.f32 %v639_v63, 0.0  ;;  %v1276_v8 = vpack.c.bf16 %v652_v0, %v652_v0  ;;  %v1358_v13 = vpop.f32.mrb[12].mxu1  ;;  %v487_v18 = vpop.f32.mrb[13].mxu0 }
 0x105   : > { %v1292_v9 = vpack.c.bf16 %v668_v1, %v668_v1  ;;  %v653_v10 = vmax.f32 %v621_v2, 0.0  ;;  %v669_v11 = vmax.f32 %v637_v3, 0.0  ;;  %815 = vst.msk [vmem:[%s1695_s17 + $0x28] sm:$0xf] %vm804_vm2, %v1278_v4  ;;  %v587_v16 = vmul.f32 %v1342_v12, %v1671_v20  ;;  %v551_v19 = vpop.f32.mrb[13].mxu1  ;;  %v1343_v26 = vpop.f32.mrb[14].mxu0 }
 0x106   : > { %831 = vst.msk [vmem:[%s1695_s17 + $0x68] sm:$0xf] %vm804_vm2, %v1294_v5  ;;  %v1279_v14 = vpack.c.bf16 %v655_v6, %v655_v6  ;;  %v1295_v15 = vpack.c.bf16 %v671_v7, %v671_v7  ;;  %v603_v17 = vmul.f32 %v1358_v13, %v1671_v20  ;;  %813 = vst.msk [vmem:[%s1695_s17 + $0x20] sm:$0xf] %vm804_vm2, %v1276_v8  ;;  %v1359_v27 = vpop.f32.mrb[14].mxu1  ;;  %v490_v32 = vpop.f32.mrb[15].mxu0 }
 0x107   : > { %829 = vst.msk [vmem:[%s1695_s17 + $0x60] sm:$0xf] %vm804_vm2, %v1292_v9  ;;  %v1277_v21 = vpack.c.bf16 %v653_v10, %v653_v10  ;;  %v1293_v23 = vpack.c.bf16 %v669_v11, %v669_v11  ;;  %v585_v24 = vmul.f32 %v1671_v20, %v487_v18  ;;  %v601_v25 = vmul.f32 %v1671_v20, %v551_v19  ;;  %v554_v33 = vpop.f32.mrb[15].mxu1 }
 0x108   : > { %816 = vst.msk [vmem:[%s1695_s17 + $0x2c] sm:$0xf] %vm804_vm2, %v1279_v14  ;;  %832 = vst.msk [vmem:[%s1695_s17 + $0x6c] sm:$0xf] %vm804_vm2, %v1295_v15  ;;  %v626_v28 = vadd.f32 %v1677_v22, %v587_v16  ;;  %v642_v29 = vadd.f32 %v1677_v22, %v603_v17  ;;  %v588_v30 = vmul.f32 %v1343_v26, %v1671_v20 }
 0x109   : > { %v604_v31 = vmul.f32 %v1359_v27, %v1671_v20  ;;  %814 = vst.msk [vmem:[%s1695_s17 + $0x24] sm:$0xf] %vm804_vm2, %v1277_v21  ;;  %830 = vst.msk [vmem:[%s1695_s17 + $0x64] sm:$0xf] %vm804_vm2, %v1293_v23  ;;  %v624_v34 = vadd.f32 %v1677_v22, %v585_v24  ;;  %v640_v35 = vadd.f32 %v1677_v22, %v601_v25 }
 0x10a   : > { %v586_v36 = vmul.f32 %v1671_v20, %v490_v32  ;;  %v602_v37 = vmul.f32 %v1671_v20, %v554_v33  ;;  %v658_v38 = vmax.f32 %v626_v28, 0.0  ;;  %v674_v39 = vmax.f32 %v642_v29, 0.0 }
 0x10b   : > { %v627_v40 = vadd.f32 %v1677_v22, %v588_v30  ;;  %v643_v41 = vadd.f32 %v1677_v22, %v604_v31  ;;  %v656_v42 = vmax.f32 %v624_v34, 0.0  ;;  %v672_v43 = vmax.f32 %v640_v35, 0.0 }
 0x10c   : > { %v625_v44 = vadd.f32 %v1677_v22, %v586_v36  ;;  %v641_v45 = vadd.f32 %v1677_v22, %v602_v37  ;;  %v1282_v46 = vpack.c.bf16 %v658_v38, %v658_v38  ;;  %v1298_v47 = vpack.c.bf16 %v674_v39, %v674_v39  ;;  %843 = sbr.rel (!%p1613_p4) target bundleno = 345 (0x159), region = 40 }
 0x10d   : > { %v659_v20 = vmax.f32 %v627_v40, 0.0  ;;  %v675_v48 = vmax.f32 %v643_v41, 0.0  ;;  %v1280_v49 = vpack.c.bf16 %v656_v42, %v656_v42  ;;  %v1296_v50 = vpack.c.bf16 %v672_v43, %v672_v43 }
 0x10e   : > { %v657_v51 = vmax.f32 %v625_v44, 0.0  ;;  %v673_v52 = vmax.f32 %v641_v45, 0.0  ;;  %819 = vst.msk [vmem:[%s1695_s17 + $0x38] sm:$0xf] %vm804_vm2, %v1282_v46  ;;  %835 = vst.msk [vmem:[%s1695_s17 + $0x78] sm:$0xf] %vm804_vm2, %v1298_v47 }
 0x10f   : > { %v1283_v53 = vpack.c.bf16 %v659_v20, %v659_v20  ;;  %v1299_v54 = vpack.c.bf16 %v675_v48, %v675_v48  ;;  %817 = vst.msk [vmem:[%s1695_s17 + $0x30] sm:$0xf] %vm804_vm2, %v1280_v49  ;;  %833 = vst.msk [vmem:[%s1695_s17 + $0x70] sm:$0xf] %vm804_vm2, %v1296_v50 }
 0x110   : > { %v1281_v22 = vpack.c.bf16 %v657_v51, %v657_v51  ;;  %v1297_v55 = vpack.c.bf16 %v673_v52, %v673_v52 }
 0x111   : > { %820 = vst.msk [vmem:[%s1695_s17 + $0x3c] sm:$0xf] %vm804_vm2, %v1283_v53  ;;  %836 = vst.msk [vmem:[%s1695_s17 + $0x7c] sm:$0xf] %vm804_vm2, %v1299_v54 }
 0x112   : > { %818 = vst.msk [vmem:[%s1695_s17 + $0x34] sm:$0xf] %vm804_vm2, %v1281_v22  ;;  %834 = vst.msk [vmem:[%s1695_s17 + $0x74] sm:$0xf] %vm804_vm2, %v1297_v55 }
 0x113   : > { %s1957_s20 = smov (!%p846_p8, %s845_s20), 32 }
 0x114   : > { %s1253_s27 = sshll.u32 %s1957_s20, 6 }
 0x115   : > { %p1256_p9 = scmp.eq.s32.totalorder %s1253_s27, 0 }
 0x116   : > { %s1822_s29 = sshrl.u32 (!%p1256_p9), %s1957_s20, 5 }
 0x117   : > { %854 = sbr.rel (%p1256_p9) target bundleno = 345 (0x159), region = 44  ;;  %p1257_p10 = scmp.le.s32.totalorder (!%p1256_p9), %s1822_s29, 0 }
 0x11e   : > { %1131 = sbr.rel (%p1257_p10) target bundleno = 324 (0x144), region = 116  ;;  %s1950_s18 = smov (!%p1257_p10), %s1816_s26 }
 0x11f   : > { %s1951_s23 = smov (!%p1257_p10), %s1695_s17  ;;  %s1831_s28 = smov (!%p1257_p10), 0  }
 0x120   : > { %s1833_s30 = smov (!%p1257_p10), 0  }
 0x125 LB: >> { %v870_v56 = vld [vmem:[%s1537_s23] sm:$0xf]  ;;  %v872_v57 = vld [vmem:[%s1537_s23 + $0x4] sm:$0xf]  ;;  %v874_v58 = vld [vmem:[%s1537_s23 + $0x8] sm:$0xf]  ;;  %s1545_s30 = sphi %s1833_s30, %s864_s30   ;;  %s1541_s28 = sphi %s1831_s28, %s1952_s28   ;;  %s1537_s23 = sphi %s1951_s23, %s939_s23   ;;  %s1533_s18 = sphi %s1950_s18, %s940_s18  }
 0x126   : >> { %871 = vst [vmem:[%s1533_s18] sm:$0xf] %v870_v56  ;;  %873 = vst [vmem:[%s1533_s18 + $0x4] sm:$0xf] %v872_v57  ;;  %v876_v59 = vld [vmem:[%s1537_s23 + $0xc] sm:$0xf]  ;;  %s934_s5 = sadd.s32 1, %s1541_s28 }
 0x127   : >> { %875 = vst [vmem:[%s1533_s18 + $0x8] sm:$0xf] %v874_v58  ;;  %v878_v60 = vld [vmem:[%s1537_s23 + $0x10] sm:$0xf]  ;;  %v880_v61 = vld [vmem:[%s1537_s23 + $0x14] sm:$0xf]  ;;  %p935_p11 = scmp.ge.s32.totalorder %s934_s5, %s1822_s29 }
 0x128   : >> { %877 = vst [vmem:[%s1533_s18 + $0xc] sm:$0xf] %v876_v59  ;;  %879 = vst [vmem:[%s1533_s18 + $0x10] sm:$0xf] %v878_v60  ;;  %v882_v62 = vld [vmem:[%s1537_s23 + $0x18] sm:$0xf] }
 0x129   : >> { %881 = vst [vmem:[%s1533_s18 + $0x14] sm:$0xf] %v880_v61  ;;  %v884_v63 = vld [vmem:[%s1537_s23 + $0x1c] sm:$0xf]  ;;  %v886_v0 = vld [vmem:[%s1537_s23 + $0x20] sm:$0xf] }
 0x12a   : >> { %883 = vst [vmem:[%s1533_s18 + $0x18] sm:$0xf] %v882_v62  ;;  %885 = vst [vmem:[%s1533_s18 + $0x1c] sm:$0xf] %v884_v63  ;;  %v888_v1 = vld [vmem:[%s1537_s23 + $0x24] sm:$0xf] }
 0x12b   : >> { %887 = vst [vmem:[%s1533_s18 + $0x20] sm:$0xf] %v886_v0  ;;  %v890_v2 = vld [vmem:[%s1537_s23 + $0x28] sm:$0xf]  ;;  %v892_v3 = vld [vmem:[%s1537_s23 + $0x2c] sm:$0xf] }
 0x12c   : >> { %889 = vst [vmem:[%s1533_s18 + $0x24] sm:$0xf] %v888_v1  ;;  %891 = vst [vmem:[%s1533_s18 + $0x28] sm:$0xf] %v890_v2  ;;  %v894_v4 = vld [vmem:[%s1537_s23 + $0x30] sm:$0xf] }
 0x12d   : >> { %893 = vst [vmem:[%s1533_s18 + $0x2c] sm:$0xf] %v892_v3  ;;  %v896_v5 = vld [vmem:[%s1537_s23 + $0x34] sm:$0xf]  ;;  %v898_v6 = vld [vmem:[%s1537_s23 + $0x38] sm:$0xf] }
 0x12e   : >> { %895 = vst [vmem:[%s1533_s18 + $0x30] sm:$0xf] %v894_v4  ;;  %897 = vst [vmem:[%s1533_s18 + $0x34] sm:$0xf] %v896_v5  ;;  %v900_v7 = vld [vmem:[%s1537_s23 + $0x3c] sm:$0xf] }
 0x12f   : >> { %899 = vst [vmem:[%s1533_s18 + $0x38] sm:$0xf] %v898_v6  ;;  %v902_v8 = vld [vmem:[%s1537_s23 + $0x40] sm:$0xf]  ;;  %v904_v9 = vld [vmem:[%s1537_s23 + $0x44] sm:$0xf] }
 0x130   : >> { %901 = vst [vmem:[%s1533_s18 + $0x3c] sm:$0xf] %v900_v7  ;;  %903 = vst [vmem:[%s1533_s18 + $0x40] sm:$0xf] %v902_v8  ;;  %v906_v10 = vld [vmem:[%s1537_s23 + $0x48] sm:$0xf] }
 0x131   : >> { %905 = vst [vmem:[%s1533_s18 + $0x44] sm:$0xf] %v904_v9  ;;  %v908_v11 = vld [vmem:[%s1537_s23 + $0x4c] sm:$0xf]  ;;  %v910_v12 = vld [vmem:[%s1537_s23 + $0x50] sm:$0xf] }
 0x132   : >> { %907 = vst [vmem:[%s1533_s18 + $0x48] sm:$0xf] %v906_v10  ;;  %909 = vst [vmem:[%s1533_s18 + $0x4c] sm:$0xf] %v908_v11  ;;  %v912_v13 = vld [vmem:[%s1537_s23 + $0x54] sm:$0xf] }
 0x133   : >> { %911 = vst [vmem:[%s1533_s18 + $0x50] sm:$0xf] %v910_v12  ;;  %v914_v14 = vld [vmem:[%s1537_s23 + $0x58] sm:$0xf]  ;;  %v916_v15 = vld [vmem:[%s1537_s23 + $0x5c] sm:$0xf] }
 0x134   : >> { %913 = vst [vmem:[%s1533_s18 + $0x54] sm:$0xf] %v912_v13  ;;  %915 = vst [vmem:[%s1533_s18 + $0x58] sm:$0xf] %v914_v14  ;;  %v918_v16 = vld [vmem:[%s1537_s23 + $0x60] sm:$0xf] }
 0x135   : >> { %917 = vst [vmem:[%s1533_s18 + $0x5c] sm:$0xf] %v916_v15  ;;  %v920_v17 = vld [vmem:[%s1537_s23 + $0x64] sm:$0xf]  ;;  %v922_v18 = vld [vmem:[%s1537_s23 + $0x68] sm:$0xf] }
 0x136   : >> { %919 = vst [vmem:[%s1533_s18 + $0x60] sm:$0xf] %v918_v16  ;;  %921 = vst [vmem:[%s1533_s18 + $0x64] sm:$0xf] %v920_v17  ;;  %v924_v19 = vld [vmem:[%s1537_s23 + $0x6c] sm:$0xf] }
 0x137   : >> { %923 = vst [vmem:[%s1533_s18 + $0x68] sm:$0xf] %v922_v18  ;;  %v926_v21 = vld [vmem:[%s1537_s23 + $0x70] sm:$0xf]  ;;  %v928_v23 = vld [vmem:[%s1537_s23 + $0x74] sm:$0xf] }
 0x138   : >> { %925 = vst [vmem:[%s1533_s18 + $0x6c] sm:$0xf] %v924_v19  ;;  %927 = vst [vmem:[%s1533_s18 + $0x70] sm:$0xf] %v926_v21  ;;  %v930_v24 = vld [vmem:[%s1537_s23 + $0x78] sm:$0xf] }
 0x139   : >> { %929 = vst [vmem:[%s1533_s18 + $0x74] sm:$0xf] %v928_v23  ;;  %v932_v25 = vld [vmem:[%s1537_s23 + $0x7c] sm:$0xf]  ;;  %931 = vst [vmem:[%s1533_s18 + $0x78] sm:$0xf] %v930_v24 }
 0x13a   : >> { %933 = vst [vmem:[%s1533_s18 + $0x7c] sm:$0xf] %v932_v25  ;;  %s1959_s5 = smov (%p935_p11, %s934_s5), 0  ;;  %s864_s30 = sadd.s32 1, %s1545_s30  }
 0x13b   : >> { %s1258_s6 = sshll.u32 %s1959_s5, 7  ;;  %p863_p12 = scmp.ge.s32.totalorder %s864_s30, %s1822_s29 }
 0x13c   : >> { %s939_s23 = scalar_lea.vmem %s1695_s17, %s1258_s6 [#allocation2]   ;;  %s940_s18 = scalar_lea.vmem %s1816_s26, %s1258_s6  }
 0x13d   : >> { %s1952_s28 = smov %s1959_s5  ;;  %866 = sbr.rel (!%p863_p12) target bundleno = 293 (0x125), region = 122 }
 0x144 PF: > { %s1926_s7 = sand.u32 31, %s1957_s20   ;;  %s1301_s8 = sshll.u32 %s1822_s29, 7 }
 0x145   : > { %s945_s9 = scalar_lea.vmem %s1695_s17, %s1301_s8 [#allocation2]   ;;  %s947_s10 = scalar_lea.vmem %s1816_s26, %s1301_s8  }
 0x146   : > { %p1263_p13 = scmp.le.s32.totalorder %s1926_s7, 0 }
 0x147   : > { %s1547_s11 = smov (!%p1263_p13), %s947_s10   ;;  %s1551_s12 = smov (!%p1263_p13), %s945_s9  }
 0x148   : > { %1145 = sbr.rel (%p1263_p13) target bundleno = 345 (0x159), region = 127  ;;  %s1555_s13 = smov (!%p1263_p13), 0  }
 0x149   : > { %s1559_s14 = smov (!%p1263_p13), 0  }
 0x14f LB: >> { %v957_v26 = vld [vmem:[%s1553_s12] sm:$0xf]  ;;  %s959_s15 = sadd.s32 1, %s1557_s13  ;;  %s951_s14 = sadd.s32 1, %s1561_s14   ;;  %s1561_s14 = sphi %s1559_s14, %s951_s14   ;;  %s1557_s13 = sphi %s1555_s13, %s1556_s13   ;;  %s1553_s12 = sphi %s1551_s12, %s964_s12   ;;  %s1549_s11 = sphi %s1547_s11, %s965_s11  }
 0x150   : >> { %958 = vst [vmem:[%s1549_s11] sm:$0xf] %v957_v26  ;;  %p960_p0 = scmp.ge.s32.totalorder %s959_s15, %s1926_s7  ;;  %p950_p1 = scmp.ge.s32.totalorder %s951_s14, %s1926_s7 }
 0x152   : >> { %s1961_s15 = smov (%p960_p0, %s959_s15), 0  ;;  %953 = sbr.rel (!%p950_p1) target bundleno = 335 (0x14f), region = 133 }
 0x153   : >> { %s1264_s17 = sshll.u32 %s1961_s15, 2  ;;  %s1556_s13 = smov %s1961_s15  }
 0x154   : >> { %s964_s12 = scalar_lea.vmem %s945_s9, %s1264_s17 [#allocation2]   ;;  %s965_s11 = scalar_lea.vmem %s947_s10, %s1264_s17  }
 0x159 PF: > { %p11_p2 = scmp.ge.s32.totalorder %s1603_s19, 13   ;;  %s1953_s15 = smov %s1525_s16 }
 0x15a   : > { %s1954_s16 = smov %s1611_s22  ;;  %s1955_s17 = smov %s1603_s19 }
 0x15b   :  { %13 = sbr.rel (!%p11_p2) target bundleno = 2 (0x2), region = 144 }

// kernel: pretrained_facenet_forward.51
= control target key start
LH: loop header
LB: loop body
LE: loop exit
PB: predicated region body
PF: predicated region fallthrough
CT: control target
= control target key end

     0   :  { %s1553_s15 = smov 0   ;;  %s1555_s16 = smov 0   ;;  %s1903_s0 = inlined_call_operand.vmem [shape: bf16[648,8], index: 0, kind: input, shape index: {}]   ;;  %s1904_s1 = inlined_call_operand.vmem [shape: bf16[8,10], index: 1, kind: input, shape index: {}]   ;;  %s1905_s2 = inlined_call_operand.vmem [shape: f32[1,10], index: 2, kind: input, shape index: {}]   ;;  %s1906_s3 = inlined_call_operand.vmem [shape: f32[1,10], index: 3, kind: input, shape index: {}]   ;;  %s1907_s4 = inlined_call_operand.vmem [shape: bf16[648,10], index: 4, kind: output, shape index: {}]  }
   0x1   :  { %s1557_s17 = smov 0  }
   0x2 LB: > { %s1566_s18 = sadd.s32 4294967295, %s1494_s17   ;;  %s1568_s19 = sadd.s32 1, %s1494_s17   ;;  %s1494_s17 = sphi %s1557_s17, %s1914_s17   ;;  %s1490_s16 = sphi %s1555_s16, %s1913_s16   ;;  %s1486_s15 = sphi %s1553_s15, %s1912_s15  }
   0x3   : > { %s107_s20 = ssub.s32 %s1494_s17, %s1568_s19  ;;  %s110_s21 = sadd.s32 1, %s1490_s16 }
   0x4   : > { %p108_p0 = scmp.eq.s32.totalorder %s107_s20, 0  ;;  %p120_p1 = scmp.ne.s32.totalorder %s1490_s16, %s1486_s15 }
   0x5   : > { %p121_p2 = scmp.eq.s32.totalorder %s1566_s18, 2  ;;  %p1159_p3 = scmp.ge.s32.totalorder %s1494_s17, 1 }
   0x6   : > { %s1576_s22 = scalar_select %p108_p0, %s1490_s16, %s110_s21  }
   0x7   : > { %p1578_p4 = por %p121_p2, %p120_p1  ;;  %p171_p5 = scmp.lt.s32.totalorder %s1494_s17, 4 }
   0x9   : > { %p172_p6 = pnand %p1159_p3, %p171_p5 }
   0xa   : > { %v252_v0 = vld [vmem:[%s1904_s1] sm:$0xf] (!%p172_p6)  ;;  %vm382_vm0 = vcmask (!%p172_p6), 1043456   ;;  %s1586_s26 = sshll.u32 (!%p172_p6), %s1566_s18, 5  ;;  %vm333_vm1 = vcmask (!%p172_p6), 64512   ;;  %s197_s8 = sand.u32 (!%p172_p6), 1, %s1486_s15  }
   0xb   : > { %175 = sbr.rel (%p172_p6) target bundleno = 345 (0x159), region = 36  ;;  %1334 = vmatprep.subr.msk.bf16.mxu0 (!%p172_p6), %vm382_vm0, %v252_v0  ;;  %1335 = vmatprep.subr.msk.bf16.mxu1 (!%p172_p6), %vm382_vm0, %v252_v0  ;;  %v384_v1 = vsel (!%p172_p6), %vm382_vm0, %v252_v0, 0  ;;  %p205_p7 = scmp.lt.s32.totalorder (!%p172_p6), %s1586_s26, 80  ;;  %v1630_v18 = vld [vmem:[%s1905_s2] ss:$0 sm:$0xff] (!%p172_p6)  ;;  %vm785_vm2 = vcmask (!%p172_p6), 76800  }
   0xc   : > { %1299 = vmatpush3.bf16.msra.mxu0 (!%p172_p6), %v384_v1  ;;  %1333 = vmatpush3.bf16.msra.mxu1 (!%p172_p6), %v384_v1  ;;  %v1636_v20 = vld [vmem:[%s1906_s3] ss:$0 sm:$0xff] (!%p172_p6)  ;;  %s1160_s11 = sshll.u32 (!%p172_p6), %s197_s8, 7 }
   0xd   : > { %s1654_s12 = scalar_lea.vmem (!%p172_p6), [#allocation2], %s1160_s11  }
  0x12   : > { %s206_s27 = scalar_select %p205_p7, %s1586_s26, 80 }
  0x13   : > { %s826_s13 = ssub.s32 (%p1578_p4), 81, %s1586_s26  ;;  %s1278_s14 = sshll.u32 (%p1578_p4), %s1566_s18, 7 }
  0x14   : > { %s1162_s28 = sshll.u32 %s206_s27, 2  ;;  %p827_p8 = scmp.lt.s32.totalorder (%p1578_p4), %s826_s13, 32 }
  0x15   : > { %s1593_s5 = scalar_lea.vmem %s1903_s0, %s1162_s28  ;;  %s1775_s20 = scalar_lea.vmem (%p1578_p4), %s1907_s4, %s1278_s14  }
  0x16   : > { %v1424_v2 = vld [vmem:[%s1593_s5] sm:$0xff]   ;;  %v1426_v4 = vld [vmem:[%s1593_s5 + $0x8] sm:$0xff]   ;;  %v1428_v6 = vld [vmem:[%s1593_s5 + $0x10] sm:$0xff]  }
  0x17   : > { %v1425_v3 = vld [vmem:[%s1593_s5 + $0x40] sm:$0xff]   ;;  %1300 = vmatprep.mubr.msk.bf16.mxu0 %vm333_vm1, %v1424_v2  ;;  %v1427_v5 = vld [vmem:[%s1593_s5 + $0x48] sm:$0xff]   ;;  %v1429_v7 = vld [vmem:[%s1593_s5 + $0x50] sm:$0xff]  }
  0x18   : > { %1316 = vmatprep.mubr.msk.bf16.mxu1 %vm333_vm1, %v1425_v3  ;;  %1301 = vmatmul.mubr.msk.bf16.vlgmr.msra.gmra.mrb[0].mxu0 %vm333_vm1, %v1426_v4  ;;  %v1430_v8 = vld [vmem:[%s1593_s5 + $0x18] sm:$0xff]   ;;  %v1432_v10 = vld [vmem:[%s1593_s5 + $0x20] sm:$0xff]   ;;  %v1434_v12 = vld [vmem:[%s1593_s5 + $0x28] sm:$0xff]  }
  0x19   : > { %1317 = vmatmul.mubr.msk.bf16.vlgmr.msra.gmra.mrb[0].mxu1 %vm333_vm1, %v1427_v5  ;;  %1304 = vmatprep.mubr.msk.bf16.mxu0 %vm333_vm1, %v1428_v6  ;;  %v1431_v9 = vld [vmem:[%s1593_s5 + $0x58] sm:$0xff]   ;;  %v1433_v11 = vld [vmem:[%s1593_s5 + $0x60] sm:$0xff]   ;;  %v1435_v13 = vld [vmem:[%s1593_s5 + $0x68] sm:$0xff]  }
  0x1a   : > { %1320 = vmatprep.mubr.msk.bf16.mxu1 %vm333_vm1, %v1429_v7  ;;  %v1436_v14 = vld [vmem:[%s1593_s5 + $0x30] sm:$0xff]   ;;  %v1438_v16 = vld [vmem:[%s1593_s5 + $0x38] sm:$0xff]  }
  0x1b   : > { %v1437_v15 = vld [vmem:[%s1593_s5 + $0x70] sm:$0xff]   ;;  %v1439_v17 = vld [vmem:[%s1593_s5 + $0x78] sm:$0xff]  }
  0x20   : > { %1305 = vmatmul.mubr.msk.bf16.gmra.mrb[4].mxu0 %vm333_vm1, %v1430_v8 }
  0x21   : > { %1321 = vmatmul.mubr.msk.bf16.gmra.mrb[4].mxu1 %vm333_vm1, %v1431_v9  ;;  %1308 = vmatprep.mubr.msk.bf16.mxu0 %vm333_vm1, %v1432_v10 }
  0x22   : > { %1324 = vmatprep.mubr.msk.bf16.mxu1 %vm333_vm1, %v1433_v11 }
  0x28   : > { %1309 = vmatmul.mubr.msk.bf16.gmra.mrb[8].mxu0 %vm333_vm1, %v1434_v12 }
  0x29   : > { %1325 = vmatmul.mubr.msk.bf16.gmra.mrb[8].mxu1 %vm333_vm1, %v1435_v13  ;;  %1312 = vmatprep.mubr.msk.bf16.mxu0 %vm333_vm1, %v1436_v14 }
  0x2a   : > { %1328 = vmatprep.mubr.msk.bf16.mxu1 %vm333_vm1, %v1437_v15 }
  0x30   : > { %1313 = vmatmul.mubr.msk.bf16.gmra.mrb[12].mxu0 %vm333_vm1, %v1438_v16 }
  0x31   : > { %1329 = vmatmul.mubr.msk.bf16.gmra.mrb[12].mxu1 %vm333_vm1, %v1439_v17 }
  0xeb   : > { %v1302_v19 = vpop.f32.mrb[0].mxu0 }
  0xec   : > { %v556_v21 = vmul.f32 %v1302_v19, %v1630_v18  ;;  %v1318_v22 = vpop.f32.mrb[0].mxu1  ;;  %v420_v23 = vpop.f32.mrb[1].mxu0 }
  0xed   : > { %v572_v24 = vmul.f32 %v1318_v22, %v1630_v18  ;;  %v554_v25 = vmul.f32 %v1630_v18, %v420_v23  ;;  %v484_v26 = vpop.f32.mrb[1].mxu1  ;;  %v1303_v27 = vpop.f32.mrb[2].mxu0 }
  0xee   : > { %v595_v28 = vadd.f32 %v1636_v20, %v556_v21  ;;  %v570_v29 = vmul.f32 %v1630_v18, %v484_v26  ;;  %v557_v30 = vmul.f32 %v1303_v27, %v1630_v18  ;;  %v1319_v31 = vpop.f32.mrb[2].mxu1  ;;  %v423_v32 = vpop.f32.mrb[3].mxu0 }
  0xef   : > { %v611_v33 = vadd.f32 %v1636_v20, %v572_v24  ;;  %v593_v34 = vadd.f32 %v1636_v20, %v554_v25  ;;  %v573_v35 = vmul.f32 %v1319_v31, %v1630_v18  ;;  %v555_v36 = vmul.f32 %v1630_v18, %v423_v32  ;;  %v487_v37 = vpop.f32.mrb[3].mxu1 }
  0xf0   : > { %v627_v38 = vmax.f32 %v595_v28, 0.0  ;;  %v609_v39 = vadd.f32 %v1636_v20, %v570_v29  ;;  %v596_v40 = vadd.f32 %v1636_v20, %v557_v30  ;;  %v571_v41 = vmul.f32 %v1630_v18, %v487_v37 }
  0xf1   : > { %v643_v42 = vmax.f32 %v611_v33, 0.0  ;;  %v625_v43 = vmax.f32 %v593_v34, 0.0  ;;  %v612_v44 = vadd.f32 %v1636_v20, %v573_v35  ;;  %v594_v45 = vadd.f32 %v1636_v20, %v555_v36 }
  0xf2   : > { %v1248_v46 = vpack.c.bf16 %v627_v38, %v627_v38  ;;  %v641_v47 = vmax.f32 %v609_v39, 0.0  ;;  %v628_v48 = vmax.f32 %v596_v40, 0.0  ;;  %v610_v49 = vadd.f32 %v1636_v20, %v571_v41 }
  0xf3   : > { %v1264_v50 = vpack.c.bf16 %v643_v42, %v643_v42  ;;  %v1246_v51 = vpack.c.bf16 %v625_v43, %v625_v43  ;;  %v644_v52 = vmax.f32 %v612_v44, 0.0  ;;  %v626_v53 = vmax.f32 %v594_v45, 0.0  ;;  %v1306_v54 = vpop.f32.mrb[4].mxu0 }
  0xf4   : > { %788 = vst.msk [vmem:[%s1654_s12 + $0x8] sm:$0xf] %vm785_vm2, %v1248_v46  ;;  %v1262_v55 = vpack.c.bf16 %v641_v47, %v641_v47  ;;  %v1249_v56 = vpack.c.bf16 %v628_v48, %v628_v48  ;;  %v642_v57 = vmax.f32 %v610_v49, 0.0  ;;  %v560_v58 = vmul.f32 %v1306_v54, %v1630_v18  ;;  %v1322_v59 = vpop.f32.mrb[4].mxu1  ;;  %v436_v60 = vpop.f32.mrb[5].mxu0 }
  0xf5   : > { %804 = vst.msk [vmem:[%s1654_s12 + $0x48] sm:$0xf] %vm785_vm2, %v1264_v50  ;;  %786 = vst.msk [vmem:[%s1654_s12] sm:$0xf] %vm785_vm2, %v1246_v51  ;;  %v1265_v61 = vpack.c.bf16 %v644_v52, %v644_v52  ;;  %v1247_v62 = vpack.c.bf16 %v626_v53, %v626_v53  ;;  %v576_v63 = vmul.f32 %v1322_v59, %v1630_v18  ;;  %v500_v1 = vpop.f32.mrb[5].mxu1  ;;  %v1307_v2 = vpop.f32.mrb[6].mxu0 }
  0xf6   : > { %v558_v0 = vmul.f32 %v1630_v18, %v436_v60  ;;  %802 = vst.msk [vmem:[%s1654_s12 + $0x40] sm:$0xf] %vm785_vm2, %v1262_v55  ;;  %789 = vst.msk [vmem:[%s1654_s12 + $0xc] sm:$0xf] %vm785_vm2, %v1249_v56  ;;  %v1263_v3 = vpack.c.bf16 %v642_v57, %v642_v57  ;;  %v599_v4 = vadd.f32 %v1636_v20, %v560_v58  ;;  %v1323_v7 = vpop.f32.mrb[6].mxu1  ;;  %v439_v8 = vpop.f32.mrb[7].mxu0 }
  0xf7   : > { %v574_v5 = vmul.f32 %v1630_v18, %v500_v1  ;;  %v561_v6 = vmul.f32 %v1307_v2, %v1630_v18  ;;  %805 = vst.msk [vmem:[%s1654_s12 + $0x4c] sm:$0xf] %vm785_vm2, %v1265_v61  ;;  %787 = vst.msk [vmem:[%s1654_s12 + $0x4] sm:$0xf] %vm785_vm2, %v1247_v62  ;;  %v615_v9 = vadd.f32 %v1636_v20, %v576_v63  ;;  %v503_v13 = vpop.f32.mrb[7].mxu1 }
  0xf8   : > { %v597_v10 = vadd.f32 %v1636_v20, %v558_v0  ;;  %v577_v11 = vmul.f32 %v1323_v7, %v1630_v18  ;;  %v559_v12 = vmul.f32 %v1630_v18, %v439_v8  ;;  %803 = vst.msk [vmem:[%s1654_s12 + $0x44] sm:$0xf] %vm785_vm2, %v1263_v3  ;;  %v631_v14 = vmax.f32 %v599_v4, 0.0 }
  0xf9   : > { %v613_v15 = vadd.f32 %v1636_v20, %v574_v5  ;;  %v600_v16 = vadd.f32 %v1636_v20, %v561_v6  ;;  %v575_v17 = vmul.f32 %v1630_v18, %v503_v13  ;;  %v647_v19 = vmax.f32 %v615_v9, 0.0 }
  0xfa   : > { %v629_v21 = vmax.f32 %v597_v10, 0.0  ;;  %v616_v22 = vadd.f32 %v1636_v20, %v577_v11  ;;  %v598_v23 = vadd.f32 %v1636_v20, %v559_v12  ;;  %v1252_v24 = vpack.c.bf16 %v631_v14, %v631_v14 }
  0xfb   : > { %v645_v25 = vmax.f32 %v613_v15, 0.0  ;;  %v632_v26 = vmax.f32 %v600_v16, 0.0  ;;  %v614_v27 = vadd.f32 %v1636_v20, %v575_v17  ;;  %v1268_v28 = vpack.c.bf16 %v647_v19, %v647_v19  ;;  %v1310_v32 = vpop.f32.mrb[8].mxu0 }
  0xfc   : > { %v1250_v29 = vpack.c.bf16 %v629_v21, %v629_v21  ;;  %v648_v30 = vmax.f32 %v616_v22, 0.0  ;;  %v630_v31 = vmax.f32 %v598_v23, 0.0  ;;  %792 = vst.msk [vmem:[%s1654_s12 + $0x18] sm:$0xf] %vm785_vm2, %v1252_v24  ;;  %v564_v36 = vmul.f32 %v1310_v32, %v1630_v18  ;;  %v1326_v37 = vpop.f32.mrb[8].mxu1  ;;  %v452_v38 = vpop.f32.mrb[9].mxu0 }
  0xfd   : > { %v1266_v33 = vpack.c.bf16 %v645_v25, %v645_v25  ;;  %v1253_v34 = vpack.c.bf16 %v632_v26, %v632_v26  ;;  %v646_v35 = vmax.f32 %v614_v27, 0.0  ;;  %808 = vst.msk [vmem:[%s1654_s12 + $0x58] sm:$0xf] %vm785_vm2, %v1268_v28  ;;  %v580_v41 = vmul.f32 %v1326_v37, %v1630_v18  ;;  %v516_v43 = vpop.f32.mrb[9].mxu1  ;;  %v1311_v44 = vpop.f32.mrb[10].mxu0 }
  0xfe   : > { %790 = vst.msk [vmem:[%s1654_s12 + $0x10] sm:$0xf] %vm785_vm2, %v1250_v29  ;;  %v1269_v39 = vpack.c.bf16 %v648_v30, %v648_v30  ;;  %v1251_v40 = vpack.c.bf16 %v630_v31, %v630_v31  ;;  %v562_v42 = vmul.f32 %v1630_v18, %v452_v38  ;;  %v603_v46 = vadd.f32 %v1636_v20, %v564_v36  ;;  %v1327_v49 = vpop.f32.mrb[10].mxu1  ;;  %v455_v50 = vpop.f32.mrb[11].mxu0 }
  0xff   : > { %806 = vst.msk [vmem:[%s1654_s12 + $0x50] sm:$0xf] %vm785_vm2, %v1266_v33  ;;  %793 = vst.msk [vmem:[%s1654_s12 + $0x1c] sm:$0xf] %vm785_vm2, %v1253_v34  ;;  %v1267_v45 = vpack.c.bf16 %v646_v35, %v646_v35  ;;  %v578_v47 = vmul.f32 %v1630_v18, %v516_v43  ;;  %v565_v48 = vmul.f32 %v1311_v44, %v1630_v18  ;;  %v519_v55 = vpop.f32.mrb[11].mxu1 }
 0x100   : > { %809 = vst.msk [vmem:[%s1654_s12 + $0x5c] sm:$0xf] %vm785_vm2, %v1269_v39  ;;  %791 = vst.msk [vmem:[%s1654_s12 + $0x14] sm:$0xf] %vm785_vm2, %v1251_v40  ;;  %v619_v51 = vadd.f32 %v1636_v20, %v580_v41  ;;  %v601_v52 = vadd.f32 %v1636_v20, %v562_v42  ;;  %v581_v53 = vmul.f32 %v1327_v49, %v1630_v18  ;;  %v635_v56 = vmax.f32 %v603_v46, 0.0 }
 0x101   : > { %v563_v54 = vmul.f32 %v1630_v18, %v455_v50  ;;  %807 = vst.msk [vmem:[%s1654_s12 + $0x54] sm:$0xf] %vm785_vm2, %v1267_v45  ;;  %v617_v57 = vadd.f32 %v1636_v20, %v578_v47  ;;  %v604_v58 = vadd.f32 %v1636_v20, %v565_v48  ;;  %v579_v59 = vmul.f32 %v1630_v18, %v519_v55 }
 0x102   : > { %v651_v60 = vmax.f32 %v619_v51, 0.0  ;;  %v633_v61 = vmax.f32 %v601_v52, 0.0  ;;  %v620_v62 = vadd.f32 %v1636_v20, %v581_v53  ;;  %v1256_v0 = vpack.c.bf16 %v635_v56, %v635_v56 }
 0x103   : > { %v602_v63 = vadd.f32 %v1636_v20, %v563_v54  ;;  %v649_v1 = vmax.f32 %v617_v57, 0.0  ;;  %v636_v2 = vmax.f32 %v604_v58, 0.0  ;;  %v618_v3 = vadd.f32 %v1636_v20, %v579_v59  ;;  %v1314_v8 = vpop.f32.mrb[12].mxu0 }
 0x104   : > { %v1272_v4 = vpack.c.bf16 %v651_v60, %v651_v60  ;;  %v1254_v5 = vpack.c.bf16 %v633_v61, %v633_v61  ;;  %v652_v6 = vmax.f32 %v620_v62, 0.0  ;;  %796 = vst.msk [vmem:[%s1654_s12 + $0x28] sm:$0xf] %vm785_vm2, %v1256_v0  ;;  %v568_v12 = vmul.f32 %v1314_v8, %v1630_v18  ;;  %v1330_v13 = vpop.f32.mrb[12].mxu1  ;;  %v468_v14 = vpop.f32.mrb[13].mxu0 }
 0x105   : > { %v634_v7 = vmax.f32 %v602_v63, 0.0  ;;  %v1270_v9 = vpack.c.bf16 %v649_v1, %v649_v1  ;;  %v1257_v10 = vpack.c.bf16 %v636_v2, %v636_v2  ;;  %v650_v11 = vmax.f32 %v618_v3, 0.0  ;;  %v532_v21 = vpop.f32.mrb[13].mxu1  ;;  %v1315_v22 = vpop.f32.mrb[14].mxu0 }
 0x106   : > { %812 = vst.msk [vmem:[%s1654_s12 + $0x68] sm:$0xf] %vm785_vm2, %v1272_v4  ;;  %794 = vst.msk [vmem:[%s1654_s12 + $0x20] sm:$0xf] %vm785_vm2, %v1254_v5  ;;  %v1273_v15 = vpack.c.bf16 %v652_v6, %v652_v6  ;;  %v584_v17 = vmul.f32 %v1330_v13, %v1630_v18  ;;  %v566_v19 = vmul.f32 %v1630_v18, %v468_v14  ;;  %v1331_v27 = vpop.f32.mrb[14].mxu1  ;;  %v471_v28 = vpop.f32.mrb[15].mxu0 }
 0x107   : > { %v1255_v16 = vpack.c.bf16 %v634_v7, %v634_v7  ;;  %810 = vst.msk [vmem:[%s1654_s12 + $0x60] sm:$0xf] %vm785_vm2, %v1270_v9  ;;  %797 = vst.msk [vmem:[%s1654_s12 + $0x2c] sm:$0xf] %vm785_vm2, %v1257_v10  ;;  %v1271_v23 = vpack.c.bf16 %v650_v11, %v650_v11  ;;  %v607_v24 = vadd.f32 %v1636_v20, %v568_v12  ;;  %v535_v33 = vpop.f32.mrb[15].mxu1 }
 0x108   : > { %v582_v25 = vmul.f32 %v1630_v18, %v532_v21  ;;  %v569_v26 = vmul.f32 %v1315_v22, %v1630_v18  ;;  %813 = vst.msk [vmem:[%s1654_s12 + $0x6c] sm:$0xf] %vm785_vm2, %v1273_v15  ;;  %v623_v29 = vadd.f32 %v1636_v20, %v584_v17  ;;  %v605_v30 = vadd.f32 %v1636_v20, %v566_v19 }
 0x109   : > { %795 = vst.msk [vmem:[%s1654_s12 + $0x24] sm:$0xf] %vm785_vm2, %v1255_v16  ;;  %v585_v31 = vmul.f32 %v1331_v27, %v1630_v18  ;;  %v567_v32 = vmul.f32 %v1630_v18, %v471_v28  ;;  %811 = vst.msk [vmem:[%s1654_s12 + $0x64] sm:$0xf] %vm785_vm2, %v1271_v23  ;;  %v639_v34 = vmax.f32 %v607_v24, 0.0  ;;  %v583_v37 = vmul.f32 %v1630_v18, %v535_v33 }
 0x10a   : > { %v621_v35 = vadd.f32 %v1636_v20, %v582_v25  ;;  %v608_v36 = vadd.f32 %v1636_v20, %v569_v26  ;;  %v655_v38 = vmax.f32 %v623_v29, 0.0  ;;  %v637_v39 = vmax.f32 %v605_v30, 0.0 }
 0x10b   : > { %v624_v40 = vadd.f32 %v1636_v20, %v585_v31  ;;  %v606_v41 = vadd.f32 %v1636_v20, %v567_v32  ;;  %v1260_v42 = vpack.c.bf16 %v639_v34, %v639_v34  ;;  %v622_v45 = vadd.f32 %v1636_v20, %v583_v37 }
 0x10c   : > { %v653_v43 = vmax.f32 %v621_v35, 0.0  ;;  %v640_v44 = vmax.f32 %v608_v36, 0.0  ;;  %v1276_v46 = vpack.c.bf16 %v655_v38, %v655_v38  ;;  %v1258_v47 = vpack.c.bf16 %v637_v39, %v637_v39  ;;  %824 = sbr.rel (!%p1578_p4) target bundleno = 345 (0x159), region = 40 }
 0x10d   : > { %v656_v18 = vmax.f32 %v624_v40, 0.0  ;;  %v638_v48 = vmax.f32 %v606_v41, 0.0  ;;  %800 = vst.msk [vmem:[%s1654_s12 + $0x38] sm:$0xf] %vm785_vm2, %v1260_v42  ;;  %v654_v51 = vmax.f32 %v622_v45, 0.0 }
 0x10e   : > { %v1274_v49 = vpack.c.bf16 %v653_v43, %v653_v43  ;;  %v1261_v50 = vpack.c.bf16 %v640_v44, %v640_v44  ;;  %816 = vst.msk [vmem:[%s1654_s12 + $0x78] sm:$0xf] %vm785_vm2, %v1276_v46  ;;  %798 = vst.msk [vmem:[%s1654_s12 + $0x30] sm:$0xf] %vm785_vm2, %v1258_v47 }
 0x10f   : > { %v1277_v52 = vpack.c.bf16 %v656_v18, %v656_v18  ;;  %v1259_v53 = vpack.c.bf16 %v638_v48, %v638_v48  ;;  %v1275_v20 = vpack.c.bf16 %v654_v51, %v654_v51 }
 0x110   : > { %814 = vst.msk [vmem:[%s1654_s12 + $0x70] sm:$0xf] %vm785_vm2, %v1274_v49  ;;  %801 = vst.msk [vmem:[%s1654_s12 + $0x3c] sm:$0xf] %vm785_vm2, %v1261_v50 }
 0x111   : > { %817 = vst.msk [vmem:[%s1654_s12 + $0x7c] sm:$0xf] %vm785_vm2, %v1277_v52  ;;  %799 = vst.msk [vmem:[%s1654_s12 + $0x34] sm:$0xf] %vm785_vm2, %v1259_v53 }
 0x112   : > { %815 = vst.msk [vmem:[%s1654_s12 + $0x74] sm:$0xf] %vm785_vm2, %v1275_v20 }
 0x113   : > { %s1916_s13 = smov (!%p827_p8, %s826_s13), 32 }
 0x114   : > { %s1231_s21 = sshll.u32 %s1916_s13, 6 }
 0x115   : > { %p1234_p9 = scmp.eq.s32.totalorder %s1231_s21, 0 }
 0x116   : > { %s1781_s24 = sshrl.u32 (!%p1234_p9), %s1916_s13, 5 }
 0x117   : > { %835 = sbr.rel (%p1234_p9) target bundleno = 345 (0x159), region = 44  ;;  %p1235_p10 = scmp.le.s32.totalorder (!%p1234_p9), %s1781_s24, 0 }
 0x11e   : > { %1112 = sbr.rel (%p1235_p10) target bundleno = 324 (0x144), region = 116  ;;  %s1909_s18 = smov (!%p1235_p10), %s1775_s20 }
 0x11f   : > { %s1910_s23 = smov (!%p1235_p10), %s1654_s12  ;;  %s1790_s25 = smov (!%p1235_p10), 0  }
 0x120   : > { %s1792_s26 = smov (!%p1235_p10), 0  }
 0x125 LB: >> { %v851_v54 = vld [vmem:[%s1502_s23] sm:$0xf]  ;;  %v853_v55 = vld [vmem:[%s1502_s23 + $0x4] sm:$0xf]  ;;  %v855_v56 = vld [vmem:[%s1502_s23 + $0x8] sm:$0xf]  ;;  %s1510_s26 = sphi %s1792_s26, %s845_s26   ;;  %s1506_s25 = sphi %s1790_s25, %s1911_s25   ;;  %s1502_s23 = sphi %s1910_s23, %s920_s23   ;;  %s1498_s18 = sphi %s1909_s18, %s921_s18  }
 0x126   : >> { %852 = vst [vmem:[%s1498_s18] sm:$0xf] %v851_v54  ;;  %854 = vst [vmem:[%s1498_s18 + $0x4] sm:$0xf] %v853_v55  ;;  %v857_v57 = vld [vmem:[%s1502_s23 + $0xc] sm:$0xf]  ;;  %s915_s27 = sadd.s32 1, %s1506_s25 }
 0x127   : >> { %856 = vst [vmem:[%s1498_s18 + $0x8] sm:$0xf] %v855_v56  ;;  %v859_v58 = vld [vmem:[%s1502_s23 + $0x10] sm:$0xf]  ;;  %v861_v59 = vld [vmem:[%s1502_s23 + $0x14] sm:$0xf]  ;;  %p916_p11 = scmp.ge.s32.totalorder %s915_s27, %s1781_s24 }
 0x128   : >> { %858 = vst [vmem:[%s1498_s18 + $0xc] sm:$0xf] %v857_v57  ;;  %860 = vst [vmem:[%s1498_s18 + $0x10] sm:$0xf] %v859_v58  ;;  %v863_v60 = vld [vmem:[%s1502_s23 + $0x18] sm:$0xf] }
 0x129   : >> { %862 = vst [vmem:[%s1498_s18 + $0x14] sm:$0xf] %v861_v59  ;;  %v865_v61 = vld [vmem:[%s1502_s23 + $0x1c] sm:$0xf]  ;;  %v867_v62 = vld [vmem:[%s1502_s23 + $0x20] sm:$0xf] }
 0x12a   : >> { %864 = vst [vmem:[%s1498_s18 + $0x18] sm:$0xf] %v863_v60  ;;  %866 = vst [vmem:[%s1498_s18 + $0x1c] sm:$0xf] %v865_v61  ;;  %v869_v63 = vld [vmem:[%s1502_s23 + $0x24] sm:$0xf] }
 0x12b   : >> { %868 = vst [vmem:[%s1498_s18 + $0x20] sm:$0xf] %v867_v62  ;;  %v871_v0 = vld [vmem:[%s1502_s23 + $0x28] sm:$0xf]  ;;  %v873_v1 = vld [vmem:[%s1502_s23 + $0x2c] sm:$0xf] }
 0x12c   : >> { %870 = vst [vmem:[%s1498_s18 + $0x24] sm:$0xf] %v869_v63  ;;  %872 = vst [vmem:[%s1498_s18 + $0x28] sm:$0xf] %v871_v0  ;;  %v875_v2 = vld [vmem:[%s1502_s23 + $0x30] sm:$0xf] }
 0x12d   : >> { %874 = vst [vmem:[%s1498_s18 + $0x2c] sm:$0xf] %v873_v1  ;;  %v877_v3 = vld [vmem:[%s1502_s23 + $0x34] sm:$0xf]  ;;  %v879_v4 = vld [vmem:[%s1502_s23 + $0x38] sm:$0xf] }
 0x12e   : >> { %876 = vst [vmem:[%s1498_s18 + $0x30] sm:$0xf] %v875_v2  ;;  %878 = vst [vmem:[%s1498_s18 + $0x34] sm:$0xf] %v877_v3  ;;  %v881_v5 = vld [vmem:[%s1502_s23 + $0x3c] sm:$0xf] }
 0x12f   : >> { %880 = vst [vmem:[%s1498_s18 + $0x38] sm:$0xf] %v879_v4  ;;  %v883_v6 = vld [vmem:[%s1502_s23 + $0x40] sm:$0xf]  ;;  %v885_v7 = vld [vmem:[%s1502_s23 + $0x44] sm:$0xf] }
 0x130   : >> { %882 = vst [vmem:[%s1498_s18 + $0x3c] sm:$0xf] %v881_v5  ;;  %884 = vst [vmem:[%s1498_s18 + $0x40] sm:$0xf] %v883_v6  ;;  %v887_v8 = vld [vmem:[%s1502_s23 + $0x48] sm:$0xf] }
 0x131   : >> { %886 = vst [vmem:[%s1498_s18 + $0x44] sm:$0xf] %v885_v7  ;;  %v889_v9 = vld [vmem:[%s1502_s23 + $0x4c] sm:$0xf]  ;;  %v891_v10 = vld [vmem:[%s1502_s23 + $0x50] sm:$0xf] }
 0x132   : >> { %888 = vst [vmem:[%s1498_s18 + $0x48] sm:$0xf] %v887_v8  ;;  %890 = vst [vmem:[%s1498_s18 + $0x4c] sm:$0xf] %v889_v9  ;;  %v893_v11 = vld [vmem:[%s1502_s23 + $0x54] sm:$0xf] }
 0x133   : >> { %892 = vst [vmem:[%s1498_s18 + $0x50] sm:$0xf] %v891_v10  ;;  %v895_v12 = vld [vmem:[%s1502_s23 + $0x58] sm:$0xf]  ;;  %v897_v13 = vld [vmem:[%s1502_s23 + $0x5c] sm:$0xf] }
 0x134   : >> { %894 = vst [vmem:[%s1498_s18 + $0x54] sm:$0xf] %v893_v11  ;;  %896 = vst [vmem:[%s1498_s18 + $0x58] sm:$0xf] %v895_v12  ;;  %v899_v14 = vld [vmem:[%s1502_s23 + $0x60] sm:$0xf] }
 0x135   : >> { %898 = vst [vmem:[%s1498_s18 + $0x5c] sm:$0xf] %v897_v13  ;;  %v901_v15 = vld [vmem:[%s1502_s23 + $0x64] sm:$0xf]  ;;  %v903_v16 = vld [vmem:[%s1502_s23 + $0x68] sm:$0xf] }
 0x136   : >> { %900 = vst [vmem:[%s1498_s18 + $0x60] sm:$0xf] %v899_v14  ;;  %902 = vst [vmem:[%s1498_s18 + $0x64] sm:$0xf] %v901_v15  ;;  %v905_v17 = vld [vmem:[%s1502_s23 + $0x6c] sm:$0xf] }
 0x137   : >> { %904 = vst [vmem:[%s1498_s18 + $0x68] sm:$0xf] %v903_v16  ;;  %v907_v19 = vld [vmem:[%s1502_s23 + $0x70] sm:$0xf]  ;;  %v909_v21 = vld [vmem:[%s1502_s23 + $0x74] sm:$0xf] }
 0x138   : >> { %906 = vst [vmem:[%s1498_s18 + $0x6c] sm:$0xf] %v905_v17  ;;  %908 = vst [vmem:[%s1498_s18 + $0x70] sm:$0xf] %v907_v19  ;;  %v911_v22 = vld [vmem:[%s1502_s23 + $0x78] sm:$0xf] }
 0x139   : >> { %910 = vst [vmem:[%s1498_s18 + $0x74] sm:$0xf] %v909_v21  ;;  %v913_v23 = vld [vmem:[%s1502_s23 + $0x7c] sm:$0xf]  ;;  %912 = vst [vmem:[%s1498_s18 + $0x78] sm:$0xf] %v911_v22 }
 0x13a   : >> { %914 = vst [vmem:[%s1498_s18 + $0x7c] sm:$0xf] %v913_v23  ;;  %s1918_s27 = smov (%p916_p11, %s915_s27), 0  ;;  %s845_s26 = sadd.s32 1, %s1510_s26  }
 0x13b   : >> { %s1236_s28 = sshll.u32 %s1918_s27, 7  ;;  %p844_p12 = scmp.ge.s32.totalorder %s845_s26, %s1781_s24 }
 0x13c   : >> { %s920_s23 = scalar_lea.vmem %s1654_s12, %s1236_s28 [#allocation2]   ;;  %s921_s18 = scalar_lea.vmem %s1775_s20, %s1236_s28  }
 0x13d   : >> { %s1911_s25 = smov %s1918_s27  ;;  %847 = sbr.rel (!%p844_p12) target bundleno = 293 (0x125), region = 122 }
 0x144 PF: > { %s1885_s29 = sand.u32 31, %s1916_s13   ;;  %s1279_s30 = sshll.u32 %s1781_s24, 7 }
 0x145   : > { %s926_s5 = scalar_lea.vmem %s1654_s12, %s1279_s30 [#allocation2]   ;;  %s928_s6 = scalar_lea.vmem %s1775_s20, %s1279_s30  }
 0x146   : > { %p1241_p13 = scmp.le.s32.totalorder %s1885_s29, 0 }
 0x147   : > { %s1512_s7 = smov (!%p1241_p13), %s928_s6   ;;  %s1516_s8 = smov (!%p1241_p13), %s926_s5  }
 0x148   : > { %1126 = sbr.rel (%p1241_p13) target bundleno = 345 (0x159), region = 127  ;;  %s1520_s9 = smov (!%p1241_p13), 0  }
 0x149   : > { %s1524_s10 = smov (!%p1241_p13), 0  }
 0x14f LB: >> { %v938_v24 = vld [vmem:[%s1518_s8] sm:$0xf]  ;;  %s940_s11 = sadd.s32 1, %s1522_s9  ;;  %s932_s10 = sadd.s32 1, %s1526_s10   ;;  %s1526_s10 = sphi %s1524_s10, %s932_s10   ;;  %s1522_s9 = sphi %s1520_s9, %s1521_s9   ;;  %s1518_s8 = sphi %s1516_s8, %s945_s8   ;;  %s1514_s7 = sphi %s1512_s7, %s946_s7  }
 0x150   : >> { %939 = vst [vmem:[%s1514_s7] sm:$0xf] %v938_v24  ;;  %p941_p0 = scmp.ge.s32.totalorder %s940_s11, %s1885_s29  ;;  %p931_p1 = scmp.ge.s32.totalorder %s932_s10, %s1885_s29 }
 0x152   : >> { %s1920_s11 = smov (%p941_p0, %s940_s11), 0  ;;  %934 = sbr.rel (!%p931_p1) target bundleno = 335 (0x14f), region = 133 }
 0x153   : >> { %s1242_s12 = sshll.u32 %s1920_s11, 2  ;;  %s1521_s9 = smov %s1920_s11  }
 0x154   : >> { %s945_s8 = scalar_lea.vmem %s926_s5, %s1242_s12 [#allocation2]   ;;  %s946_s7 = scalar_lea.vmem %s928_s6, %s1242_s12  }
 0x159 PF: > { %p11_p2 = scmp.ge.s32.totalorder %s1568_s19, 5   ;;  %s1912_s15 = smov %s1490_s16 }
 0x15a   : > { %s1913_s16 = smov %s1576_s22  ;;  %s1914_s17 = smov %s1568_s19 }
 0x15b   :  { %13 = sbr.rel (!%p11_p2) target bundleno = 2 (0x2), region = 144 }

// kernel: pretrained_facenet_forward.52
= control target key start
LH: loop header
LB: loop body
LE: loop exit
PB: predicated region body
PF: predicated region fallthrough
CT: control target
= control target key end

     0   :  { %s1160_s15 = smov 0   ;;  %s1376_s0 = inlined_call_operand.vmem [shape: bf16[512,90], index: 0, kind: input, shape index: {}]   ;;  %s1377_s1 = inlined_call_operand.vmem [shape: bf16[90,24], index: 1, kind: input, shape index: {}]   ;;  %s1378_s2 = inlined_call_operand.vmem [shape: f32[1,24], index: 2, kind: input, shape index: {}]   ;;  %s1379_s3 = inlined_call_operand.vmem [shape: f32[1,24], index: 3, kind: input, shape index: {}]   ;;  %s1380_s4 = inlined_call_operand.vmem [shape: bf16[512,24], index: 4, kind: output, shape index: {}]  }
   0x1 LB: > { %s902_s16 = sadd.s32 4294967295, %s1133_s15   ;;  %p906_p0 = scmp.ge.s32.totalorder %s1133_s15, 1  ;;  %s1133_s15 = sphi %s1160_s15, %s14_s15  }
   0x2   : > { %p163_p1 = scmp.lt.s32.totalorder %s1133_s15, 3 }
   0x4   : > { %p164_p2 = pnand %p906_p0, %p163_p1 }
   0x5   : > { %v1105_v0 = vld [vmem:[%s1377_s1] sm:$0xff] (!%p164_p2)   ;;  %v1106_v1 = vld [vmem:[%s1377_s1 + $0x8] sm:$0xff] (!%p164_p2)   ;;  %s907_s21 = sshll.u32 (!%p164_p2), %s902_s16, 5  ;;  %v1107_v2 = vld [vmem:[%s1377_s1 + $0x10] sm:$0xff] (!%p164_p2)   ;;  %vm361_vm0 = vcmask (!%p164_p2), 736256   ;;  %vm410_vm1 = vcmask (!%p164_p2), 1044480  }
   0x6   : > { %167 = sbr.rel (%p164_p2) target bundleno = 281 (0x119), region = 36  ;;  %1039 = vmatprep.subr.bf16.mxu0 (!%p164_p2), %v1105_v0  ;;  %1083 = vmatprep.subr.bf16.mxu1 (!%p164_p2), %v1105_v0  ;;  %p190_p3 = scmp.lt.s32.totalorder (!%p164_p2), %s907_s21, 63  ;;  %v1108_v3 = vld [vmem:[%s1377_s1 + $0x18] sm:$0xff] (!%p164_p2)   ;;  %v1109_v6 = vld [vmem:[%s1377_s1 + $0x20] sm:$0xff] (!%p164_p2)   ;;  %v1110_v7 = vld [vmem:[%s1377_s1 + $0x28] sm:$0x1f] (!%p164_p2)  }
   0x7   : > { %1040 = vmatpush3.bf16.msra.mxu0 (!%p164_p2), %v1105_v0  ;;  %1089 = vmatpush3.bf16.msra.mxu1 (!%p164_p2), %v1105_v0  ;;  %v412_v8 = vsel (!%p164_p2), %vm410_vm1, %v1110_v7, 0  ;;  %v1231_v23 = vld [vmem:[%s1378_s2] ss:$0 sm:$0xff] (!%p164_p2)  ;;  %vm813_vm2 = vcmask (!%p164_p2), 191488  }
   0x8   : > { %1041 = vmatprep.subr.bf16.mxu0 (!%p164_p2), %v1106_v1  ;;  %1084 = vmatprep.subr.bf16.mxu1 (!%p164_p2), %v1106_v1  ;;  %v1236_v25 = vld [vmem:[%s1379_s3] ss:$0 sm:$0xff] (!%p164_p2) }
   0xb   : > { %1042 = vmatpush3.bf16.msra.mxu0 (!%p164_p2), %v1106_v1  ;;  %1090 = vmatpush3.bf16.msra.mxu1 (!%p164_p2), %v1106_v1 }
   0xc   : > { %1043 = vmatprep.subr.bf16.mxu0 (!%p164_p2), %v1107_v2  ;;  %1085 = vmatprep.subr.bf16.mxu1 (!%p164_p2), %v1107_v2 }
   0xd   : > { %s1382_s21 = smov (!%p190_p3, %s907_s21), 63 }
   0xe   : > { %s908_s24 = sshll.u32 %s1382_s21, 2 }
   0xf   : > { %s1188_s29 = scalar_lea.vmem %s1376_s0, %s908_s24  ;;  %1044 = vmatpush3.bf16.msra.mxu0 %v1107_v2  ;;  %1091 = vmatpush3.bf16.msra.mxu1 %v1107_v2  ;;  %s1257_s14 = scalar_lea.vmem %s1380_s4, %s908_s24 }
  0x10   : > { %v1111_v4 = vld [vmem:[%s1188_s29] sm:$0xff]   ;;  %1045 = vmatprep.subr.bf16.mxu0 %v1108_v3  ;;  %1086 = vmatprep.subr.bf16.mxu1 %v1108_v3  ;;  %v1113_v9 = vld [vmem:[%s1188_s29 + $0x8] sm:$0xff]   ;;  %v1115_v11 = vld [vmem:[%s1188_s29 + $0x10] sm:$0xff]  }
  0x11   : > { %v1112_v5 = vld [vmem:[%s1188_s29 + $0x40] sm:$0xff]   ;;  %1051 = vmatprep.mubr.msk.bf16.mxu0 %vm361_vm0, %v1111_v4  ;;  %v1114_v10 = vld [vmem:[%s1188_s29 + $0x48] sm:$0xff]   ;;  %v1116_v12 = vld [vmem:[%s1188_s29 + $0x50] sm:$0xff]  }
  0x12   : > { %1067 = vmatprep.mubr.msk.bf16.mxu1 %vm361_vm0, %v1112_v5  ;;  %v1117_v13 = vld [vmem:[%s1188_s29 + $0x18] sm:$0xff]   ;;  %v1119_v15 = vld [vmem:[%s1188_s29 + $0x20] sm:$0xff]   ;;  %v1121_v17 = vld [vmem:[%s1188_s29 + $0x28] sm:$0xff]  }
  0x13   : > { %1046 = vmatpush3.bf16.msra.mxu0 %v1108_v3  ;;  %1092 = vmatpush3.bf16.msra.mxu1 %v1108_v3  ;;  %v1118_v14 = vld [vmem:[%s1188_s29 + $0x58] sm:$0xff]   ;;  %v1120_v16 = vld [vmem:[%s1188_s29 + $0x60] sm:$0xff]   ;;  %v1122_v18 = vld [vmem:[%s1188_s29 + $0x68] sm:$0xff]  }
  0x14   : > { %1047 = vmatprep.subr.bf16.mxu0 %v1109_v6  ;;  %1087 = vmatprep.subr.bf16.mxu1 %v1109_v6  ;;  %v1123_v19 = vld [vmem:[%s1188_s29 + $0x30] sm:$0xff]   ;;  %v1125_v21 = vld [vmem:[%s1188_s29 + $0x38] sm:$0xff]  }
  0x15   : > { %v1124_v20 = vld [vmem:[%s1188_s29 + $0x70] sm:$0xff]   ;;  %v1126_v22 = vld [vmem:[%s1188_s29 + $0x78] sm:$0xff]  }
  0x17   : > { %1048 = vmatpush3.bf16.msra.mxu0 %v1109_v6  ;;  %1093 = vmatpush3.bf16.msra.mxu1 %v1109_v6 }
  0x18   : > { %1095 = vmatprep.subr.msk.bf16.mxu0 %vm410_vm1, %v1110_v7  ;;  %1096 = vmatprep.subr.msk.bf16.mxu1 %vm410_vm1, %v1110_v7 }
  0x1b   : > { %1050 = vmatpush3.bf16.msra.mxu0 %v412_v8  ;;  %1094 = vmatpush3.bf16.msra.mxu1 %v412_v8 }
  0x1e   : > { %1052 = vmatmul.mubr.msk.bf16.vlgmr.msra.gmra.mrb[0].mxu0 %vm361_vm0, %v1113_v9  ;;  %1068 = vmatmul.mubr.msk.bf16.vlgmr.msra.gmra.mrb[0].mxu1 %vm361_vm0, %v1114_v10 }
  0x1f   : > { %1055 = vmatprep.mubr.msk.bf16.mxu0 %vm361_vm0, %v1115_v11  ;;  %1071 = vmatprep.mubr.msk.bf16.mxu1 %vm361_vm0, %v1116_v12 }
  0x26   : > { %1056 = vmatmul.mubr.msk.bf16.gmra.mrb[4].mxu0 %vm361_vm0, %v1117_v13  ;;  %1072 = vmatmul.mubr.msk.bf16.gmra.mrb[4].mxu1 %vm361_vm0, %v1118_v14 }
  0x27   : > { %1059 = vmatprep.mubr.msk.bf16.mxu0 %vm361_vm0, %v1119_v15  ;;  %1075 = vmatprep.mubr.msk.bf16.mxu1 %vm361_vm0, %v1120_v16 }
  0x2e   : > { %1060 = vmatmul.mubr.msk.bf16.gmra.mrb[8].mxu0 %vm361_vm0, %v1121_v17  ;;  %1076 = vmatmul.mubr.msk.bf16.gmra.mrb[8].mxu1 %vm361_vm0, %v1122_v18 }
  0x2f   : > { %1063 = vmatprep.mubr.msk.bf16.mxu0 %vm361_vm0, %v1123_v19  ;;  %1079 = vmatprep.mubr.msk.bf16.mxu1 %vm361_vm0, %v1124_v20 }
  0x36   : > { %1064 = vmatmul.mubr.msk.bf16.gmra.mrb[12].mxu0 %vm361_vm0, %v1125_v21  ;;  %1080 = vmatmul.mubr.msk.bf16.gmra.mrb[12].mxu1 %vm361_vm0, %v1126_v22 }
  0xf1   : > { %v1053_v24 = vpop.f32.mrb[0].mxu0  ;;  %v1069_v26 = vpop.f32.mrb[0].mxu1 }
  0xf2   : > { %v584_v27 = vmul.f32 %v1053_v24, %v1231_v23  ;;  %v600_v28 = vmul.f32 %v1069_v26, %v1231_v23  ;;  %v448_v29 = vpop.f32.mrb[1].mxu0  ;;  %v512_v30 = vpop.f32.mrb[1].mxu1 }
  0xf3   : > { %v582_v31 = vmul.f32 %v1231_v23, %v448_v29  ;;  %v598_v32 = vmul.f32 %v1231_v23, %v512_v30  ;;  %v1054_v33 = vpop.f32.mrb[2].mxu0  ;;  %v1070_v34 = vpop.f32.mrb[2].mxu1 }
  0xf4   : > { %v623_v35 = vadd.f32 %v1236_v25, %v584_v27  ;;  %v639_v36 = vadd.f32 %v1236_v25, %v600_v28  ;;  %v585_v37 = vmul.f32 %v1054_v33, %v1231_v23  ;;  %v601_v38 = vmul.f32 %v1070_v34, %v1231_v23  ;;  %v451_v39 = vpop.f32.mrb[3].mxu0  ;;  %v515_v40 = vpop.f32.mrb[3].mxu1 }
  0xf5   : > { %v621_v41 = vadd.f32 %v1236_v25, %v582_v31  ;;  %v637_v42 = vadd.f32 %v1236_v25, %v598_v32  ;;  %v583_v43 = vmul.f32 %v1231_v23, %v451_v39  ;;  %v599_v44 = vmul.f32 %v1231_v23, %v515_v40 }
  0xf6   : > { %v655_v45 = vmax.f32 %v623_v35, 0.0  ;;  %v671_v46 = vmax.f32 %v639_v36, 0.0  ;;  %v624_v47 = vadd.f32 %v1236_v25, %v585_v37  ;;  %v640_v48 = vadd.f32 %v1236_v25, %v601_v38 }
  0xf7   : > { %v653_v49 = vmax.f32 %v621_v41, 0.0  ;;  %v669_v50 = vmax.f32 %v637_v42, 0.0  ;;  %v622_v51 = vadd.f32 %v1236_v25, %v583_v43  ;;  %v638_v52 = vadd.f32 %v1236_v25, %v599_v44 }
  0xf8   : > { %v987_v53 = vpack.c.bf16 %v655_v45, %v655_v45  ;;  %v1003_v54 = vpack.c.bf16 %v671_v46, %v671_v46  ;;  %v656_v55 = vmax.f32 %v624_v47, 0.0  ;;  %v672_v56 = vmax.f32 %v640_v48, 0.0 }
  0xf9   : > { %v985_v57 = vpack.c.bf16 %v653_v49, %v653_v49  ;;  %v1001_v58 = vpack.c.bf16 %v669_v50, %v669_v50  ;;  %v654_v59 = vmax.f32 %v622_v51, 0.0  ;;  %v670_v60 = vmax.f32 %v638_v52, 0.0  ;;  %v1057_v61 = vpop.f32.mrb[4].mxu0  ;;  %v1073_v62 = vpop.f32.mrb[4].mxu1 }
  0xfa   : > { %816 = vst.msk [vmem:[%s1257_s14 + $0x8] sm:$0xf] %vm813_vm2, %v987_v53  ;;  %832 = vst.msk [vmem:[%s1257_s14 + $0x48] sm:$0xf] %vm813_vm2, %v1003_v54  ;;  %v988_v63 = vpack.c.bf16 %v656_v55, %v656_v55  ;;  %v1004_v0 = vpack.c.bf16 %v672_v56, %v672_v56  ;;  %v588_v1 = vmul.f32 %v1057_v61, %v1231_v23  ;;  %v464_v3 = vpop.f32.mrb[5].mxu0  ;;  %v528_v4 = vpop.f32.mrb[5].mxu1 }
  0xfb   : > { %v604_v2 = vmul.f32 %v1073_v62, %v1231_v23  ;;  %814 = vst.msk [vmem:[%s1257_s14] sm:$0xf] %vm813_vm2, %v985_v57  ;;  %830 = vst.msk [vmem:[%s1257_s14 + $0x40] sm:$0xf] %vm813_vm2, %v1001_v58  ;;  %v986_v5 = vpack.c.bf16 %v654_v59, %v654_v59  ;;  %v1002_v6 = vpack.c.bf16 %v670_v60, %v670_v60  ;;  %v1058_v9 = vpop.f32.mrb[6].mxu0  ;;  %v1074_v10 = vpop.f32.mrb[6].mxu1 }
  0xfc   : > { %v586_v7 = vmul.f32 %v1231_v23, %v464_v3  ;;  %v602_v8 = vmul.f32 %v1231_v23, %v528_v4  ;;  %817 = vst.msk [vmem:[%s1257_s14 + $0xc] sm:$0xf] %vm813_vm2, %v988_v63  ;;  %833 = vst.msk [vmem:[%s1257_s14 + $0x4c] sm:$0xf] %vm813_vm2, %v1004_v0  ;;  %v627_v11 = vadd.f32 %v1236_v25, %v588_v1  ;;  %v467_v15 = vpop.f32.mrb[7].mxu0  ;;  %v531_v16 = vpop.f32.mrb[7].mxu1 }
  0xfd   : > { %v643_v12 = vadd.f32 %v1236_v25, %v604_v2  ;;  %v589_v13 = vmul.f32 %v1058_v9, %v1231_v23  ;;  %v605_v14 = vmul.f32 %v1074_v10, %v1231_v23  ;;  %815 = vst.msk [vmem:[%s1257_s14 + $0x4] sm:$0xf] %vm813_vm2, %v986_v5  ;;  %831 = vst.msk [vmem:[%s1257_s14 + $0x44] sm:$0xf] %vm813_vm2, %v1002_v6 }
  0xfe   : > { %v625_v17 = vadd.f32 %v1236_v25, %v586_v7  ;;  %v641_v18 = vadd.f32 %v1236_v25, %v602_v8  ;;  %v587_v19 = vmul.f32 %v1231_v23, %v467_v15  ;;  %v603_v20 = vmul.f32 %v1231_v23, %v531_v16 }
  0xff   : > { %v659_v21 = vmax.f32 %v627_v11, 0.0  ;;  %v675_v22 = vmax.f32 %v643_v12, 0.0  ;;  %v628_v24 = vadd.f32 %v1236_v25, %v589_v13  ;;  %v644_v26 = vadd.f32 %v1236_v25, %v605_v14 }
 0x100   : > { %v657_v27 = vmax.f32 %v625_v17, 0.0  ;;  %v673_v28 = vmax.f32 %v641_v18, 0.0  ;;  %v626_v29 = vadd.f32 %v1236_v25, %v587_v19  ;;  %v642_v30 = vadd.f32 %v1236_v25, %v603_v20 }
 0x101   : > { %v991_v31 = vpack.c.bf16 %v659_v21, %v659_v21  ;;  %v1007_v32 = vpack.c.bf16 %v675_v22, %v675_v22  ;;  %v660_v33 = vmax.f32 %v628_v24, 0.0  ;;  %v676_v34 = vmax.f32 %v644_v26, 0.0  ;;  %v1061_v39 = vpop.f32.mrb[8].mxu0  ;;  %v1077_v40 = vpop.f32.mrb[8].mxu1 }
 0x102   : > { %v989_v35 = vpack.c.bf16 %v657_v27, %v657_v27  ;;  %v1005_v36 = vpack.c.bf16 %v673_v28, %v673_v28  ;;  %v658_v37 = vmax.f32 %v626_v29, 0.0  ;;  %v674_v38 = vmax.f32 %v642_v30, 0.0  ;;  %v480_v45 = vpop.f32.mrb[9].mxu0  ;;  %v544_v46 = vpop.f32.mrb[9].mxu1 }
 0x103   : > { %820 = vst.msk [vmem:[%s1257_s14 + $0x18] sm:$0xf] %vm813_vm2, %v991_v31  ;;  %836 = vst.msk [vmem:[%s1257_s14 + $0x58] sm:$0xf] %vm813_vm2, %v1007_v32  ;;  %v992_v41 = vpack.c.bf16 %v660_v33, %v660_v33  ;;  %v1008_v42 = vpack.c.bf16 %v676_v34, %v676_v34  ;;  %v592_v43 = vmul.f32 %v1061_v39, %v1231_v23  ;;  %v1062_v51 = vpop.f32.mrb[10].mxu0  ;;  %v1078_v52 = vpop.f32.mrb[10].mxu1 }
 0x104   : > { %v608_v44 = vmul.f32 %v1077_v40, %v1231_v23  ;;  %818 = vst.msk [vmem:[%s1257_s14 + $0x10] sm:$0xf] %vm813_vm2, %v989_v35  ;;  %834 = vst.msk [vmem:[%s1257_s14 + $0x50] sm:$0xf] %vm813_vm2, %v1005_v36  ;;  %v990_v47 = vpack.c.bf16 %v658_v37, %v658_v37  ;;  %v1006_v48 = vpack.c.bf16 %v674_v38, %v674_v38  ;;  %v483_v57 = vpop.f32.mrb[11].mxu0  ;;  %v547_v58 = vpop.f32.mrb[11].mxu1 }
 0x105   : > { %v590_v49 = vmul.f32 %v1231_v23, %v480_v45  ;;  %v606_v50 = vmul.f32 %v1231_v23, %v544_v46  ;;  %821 = vst.msk [vmem:[%s1257_s14 + $0x1c] sm:$0xf] %vm813_vm2, %v992_v41  ;;  %837 = vst.msk [vmem:[%s1257_s14 + $0x5c] sm:$0xf] %vm813_vm2, %v1008_v42  ;;  %v631_v53 = vadd.f32 %v1236_v25, %v592_v43 }
 0x106   : > { %v647_v54 = vadd.f32 %v1236_v25, %v608_v44  ;;  %v593_v55 = vmul.f32 %v1062_v51, %v1231_v23  ;;  %v609_v56 = vmul.f32 %v1078_v52, %v1231_v23  ;;  %819 = vst.msk [vmem:[%s1257_s14 + $0x14] sm:$0xf] %vm813_vm2, %v990_v47  ;;  %835 = vst.msk [vmem:[%s1257_s14 + $0x54] sm:$0xf] %vm813_vm2, %v1006_v48 }
 0x107   : > { %v629_v59 = vadd.f32 %v1236_v25, %v590_v49  ;;  %v645_v60 = vadd.f32 %v1236_v25, %v606_v50  ;;  %v591_v61 = vmul.f32 %v1231_v23, %v483_v57  ;;  %v607_v62 = vmul.f32 %v1231_v23, %v547_v58 }
 0x108   : > { %v663_v63 = vmax.f32 %v631_v53, 0.0  ;;  %v679_v0 = vmax.f32 %v647_v54, 0.0  ;;  %v632_v1 = vadd.f32 %v1236_v25, %v593_v55  ;;  %v648_v2 = vadd.f32 %v1236_v25, %v609_v56 }
 0x109   : > { %v661_v3 = vmax.f32 %v629_v59, 0.0  ;;  %v677_v4 = vmax.f32 %v645_v60, 0.0  ;;  %v630_v5 = vadd.f32 %v1236_v25, %v591_v61  ;;  %v646_v6 = vadd.f32 %v1236_v25, %v607_v62  ;;  %v1065_v15 = vpop.f32.mrb[12].mxu0  ;;  %v1081_v16 = vpop.f32.mrb[12].mxu1 }
 0x10a   : > { %v995_v7 = vpack.c.bf16 %v663_v63, %v663_v63  ;;  %v1011_v8 = vpack.c.bf16 %v679_v0, %v679_v0  ;;  %v664_v9 = vmax.f32 %v632_v1, 0.0  ;;  %v680_v10 = vmax.f32 %v648_v2, 0.0  ;;  %v496_v21 = vpop.f32.mrb[13].mxu0  ;;  %v560_v22 = vpop.f32.mrb[13].mxu1 }
 0x10b   : > { %v993_v11 = vpack.c.bf16 %v661_v3, %v661_v3  ;;  %v1009_v12 = vpack.c.bf16 %v677_v4, %v677_v4  ;;  %v662_v13 = vmax.f32 %v630_v5, 0.0  ;;  %v678_v14 = vmax.f32 %v646_v6, 0.0  ;;  %v1066_v29 = vpop.f32.mrb[14].mxu0  ;;  %v1082_v30 = vpop.f32.mrb[14].mxu1 }
 0x10c   : > { %824 = vst.msk [vmem:[%s1257_s14 + $0x28] sm:$0xf] %vm813_vm2, %v995_v7  ;;  %840 = vst.msk [vmem:[%s1257_s14 + $0x68] sm:$0xf] %vm813_vm2, %v1011_v8  ;;  %v996_v17 = vpack.c.bf16 %v664_v9, %v664_v9  ;;  %v1012_v18 = vpack.c.bf16 %v680_v10, %v680_v10  ;;  %v596_v19 = vmul.f32 %v1065_v15, %v1231_v23  ;;  %v499_v35 = vpop.f32.mrb[15].mxu0  ;;  %v563_v36 = vpop.f32.mrb[15].mxu1 }
 0x10d   : > { %v612_v20 = vmul.f32 %v1081_v16, %v1231_v23  ;;  %822 = vst.msk [vmem:[%s1257_s14 + $0x20] sm:$0xf] %vm813_vm2, %v993_v11  ;;  %838 = vst.msk [vmem:[%s1257_s14 + $0x60] sm:$0xf] %vm813_vm2, %v1009_v12  ;;  %v994_v24 = vpack.c.bf16 %v662_v13, %v662_v13  ;;  %v1010_v26 = vpack.c.bf16 %v678_v14, %v678_v14 }
 0x10e   : > { %v594_v27 = vmul.f32 %v1231_v23, %v496_v21  ;;  %v610_v28 = vmul.f32 %v1231_v23, %v560_v22  ;;  %825 = vst.msk [vmem:[%s1257_s14 + $0x2c] sm:$0xf] %vm813_vm2, %v996_v17  ;;  %841 = vst.msk [vmem:[%s1257_s14 + $0x6c] sm:$0xf] %vm813_vm2, %v1012_v18  ;;  %v635_v31 = vadd.f32 %v1236_v25, %v596_v19 }
 0x10f   : > { %v651_v32 = vadd.f32 %v1236_v25, %v612_v20  ;;  %v597_v33 = vmul.f32 %v1066_v29, %v1231_v23  ;;  %v613_v34 = vmul.f32 %v1082_v30, %v1231_v23  ;;  %823 = vst.msk [vmem:[%s1257_s14 + $0x24] sm:$0xf] %vm813_vm2, %v994_v24  ;;  %839 = vst.msk [vmem:[%s1257_s14 + $0x64] sm:$0xf] %vm813_vm2, %v1010_v26 }
 0x110   : > { %v633_v37 = vadd.f32 %v1236_v25, %v594_v27  ;;  %v649_v38 = vadd.f32 %v1236_v25, %v610_v28  ;;  %v595_v39 = vmul.f32 %v1231_v23, %v499_v35  ;;  %v611_v40 = vmul.f32 %v1231_v23, %v563_v36 }
 0x111   : > { %v667_v41 = vmax.f32 %v635_v31, 0.0  ;;  %v683_v42 = vmax.f32 %v651_v32, 0.0  ;;  %v636_v43 = vadd.f32 %v1236_v25, %v597_v33  ;;  %v652_v44 = vadd.f32 %v1236_v25, %v613_v34 }
 0x112   : > { %v665_v45 = vmax.f32 %v633_v37, 0.0  ;;  %v681_v46 = vmax.f32 %v649_v38, 0.0  ;;  %v634_v47 = vadd.f32 %v1236_v25, %v595_v39  ;;  %v650_v48 = vadd.f32 %v1236_v25, %v611_v40 }
 0x113   : > { %v999_v49 = vpack.c.bf16 %v667_v41, %v667_v41  ;;  %v1015_v50 = vpack.c.bf16 %v683_v42, %v683_v42  ;;  %v668_v23 = vmax.f32 %v636_v43, 0.0  ;;  %v684_v51 = vmax.f32 %v652_v44, 0.0 }
 0x114   : > { %v997_v52 = vpack.c.bf16 %v665_v45, %v665_v45  ;;  %v1013_v53 = vpack.c.bf16 %v681_v46, %v681_v46  ;;  %v666_v54 = vmax.f32 %v634_v47, 0.0  ;;  %v682_v55 = vmax.f32 %v650_v48, 0.0 }
 0x115   : > { %828 = vst.msk [vmem:[%s1257_s14 + $0x38] sm:$0xf] %vm813_vm2, %v999_v49  ;;  %844 = vst.msk [vmem:[%s1257_s14 + $0x78] sm:$0xf] %vm813_vm2, %v1015_v50  ;;  %v1000_v56 = vpack.c.bf16 %v668_v23, %v668_v23  ;;  %v1016_v57 = vpack.c.bf16 %v684_v51, %v684_v51 }
 0x116   : > { %826 = vst.msk [vmem:[%s1257_s14 + $0x30] sm:$0xf] %vm813_vm2, %v997_v52  ;;  %842 = vst.msk [vmem:[%s1257_s14 + $0x70] sm:$0xf] %vm813_vm2, %v1013_v53  ;;  %v998_v25 = vpack.c.bf16 %v666_v54, %v666_v54  ;;  %v1014_v58 = vpack.c.bf16 %v682_v55, %v682_v55 }
 0x117   : > { %829 = vst.msk [vmem:[%s1257_s14 + $0x3c] sm:$0xf] %vm813_vm2, %v1000_v56  ;;  %845 = vst.msk [vmem:[%s1257_s14 + $0x7c] sm:$0xf] %vm813_vm2, %v1016_v57 }
 0x118   : > { %827 = vst.msk [vmem:[%s1257_s14 + $0x34] sm:$0xf] %vm813_vm2, %v998_v25  ;;  %843 = vst.msk [vmem:[%s1257_s14 + $0x74] sm:$0xf] %vm813_vm2, %v1014_v58 }
 0x119 PF: > { %s14_s15 = sadd.s32 1, %s1133_s15  }
 0x11a   : > { %p11_p4 = scmp.ge.s32.totalorder %s14_s15, 4  }
 0x11c   :  { %13 = sbr.rel (!%p11_p4) target bundleno = 1 (0x1), region = 66 }

// kernel: pretrained_facenet_forward.53
= control target key start
LH: loop header
LB: loop body
LE: loop exit
PB: predicated region body
PF: predicated region fallthrough
CT: control target
= control target key end

     0   :  { %v564_v0 = vmov 0   ;;  %vm199_vm0 = vcmask 719872   ;;  %vm221_vm1 = vcmask 1043456   ;;  %vm419_vm2 = vcmask 257024   ;;  %s793_s1 = inlined_call_operand.vmem [shape: bf16[216,32], index: 1, kind: input, shape index: {}]   ;;  %s794_s0 = inlined_call_operand.vmem [shape: bf16[98,216], index: 0, kind: input, shape index: {}]   ;;  %s795_s2 = inlined_call_operand.vmem [shape: f32[1,32], index: 2, kind: input, shape index: {}]   ;;  %s796_s3 = inlined_call_operand.vmem [shape: f32[1,32], index: 3, kind: input, shape index: {}]   ;;  %s797_s4 = inlined_call_operand.vmem [shape: bf16[98,32], index: 4, kind: output, shape index: {}]  }
   0x1   :  { %225 = vmatprep.subr.bf16.mxu0 %v564_v0  ;;  %v530_v1 = vld [vmem:[%s793_s1] sm:$0xff]   ;;  %501 = vmatprep.subr.bf16.mxu1 %v564_v0  ;;  %v531_v2 = vld [vmem:[%s793_s1 + $0x8] sm:$0xff]   ;;  %v532_v3 = vld [vmem:[%s793_s1 + $0x10] sm:$0xff]   ;;  %vm432_vm3 = vcmask 253952  }
   0x2   :  { %226 = vmatpush1.bf16.msra.mxu0 %v530_v1  ;;  %515 = vmatpush1.bf16.msra.mxu1 %v530_v1  ;;  %v533_v4 = vld [vmem:[%s793_s1 + $0x18] sm:$0xff]   ;;  %v534_v5 = vld [vmem:[%s793_s1 + $0x20] sm:$0xff]   ;;  %v535_v8 = vld [vmem:[%s793_s1 + $0x28] sm:$0xff]  }
   0x3   :  { %227 = vmatprep.subr.bf16.mxu0 %v564_v0  ;;  %502 = vmatprep.subr.bf16.mxu1 %v564_v0  ;;  %v546_v6 = vld [vmem:[%s794_s0 + $0x4] ss:$8 sps:$4 sm:$0xff]   ;;  %v536_v9 = vld [vmem:[%s793_s1 + $0x30] sm:$0xff]   ;;  %v537_v10 = vld [vmem:[%s793_s1 + $0x38] sm:$0xff]  }
   0x4   :  { %466 = vmatprep.mubr.msk.bf16.mxu0 %vm199_vm0, %v546_v6  ;;  %v549_v7 = vld [vmem:[%s794_s0 + $0x44] ss:$8 sps:$4 sm:$0xff]   ;;  %v540_v13 = vld [vmem:[%s793_s1 + $0x50] sm:$0xff]   ;;  %v541_v14 = vld [vmem:[%s793_s1 + $0x58] sm:$0xff]  }
   0x5   :  { %470 = vmatprep.mubr.msk.bf16.mxu1 %vm199_vm0, %v549_v7  ;;  %v538_v11 = vld [vmem:[%s793_s1 + $0x40] sm:$0xff]   ;;  %v539_v12 = vld [vmem:[%s793_s1 + $0x48] sm:$0xff]   ;;  %v550_v20 = vld [vmem:[%s794_s0 + $0x14] ss:$8 sps:$4 sm:$0xff]  }
   0x6   :  { %228 = vmatpush1.bf16.msra.mxu0 %v531_v2  ;;  %516 = vmatpush1.bf16.msra.mxu1 %v531_v2  ;;  %v542_v15 = vld [vmem:[%s793_s1 + $0x60] sm:$0xff]   ;;  %v543_v16 = vld [vmem:[%s793_s1 + $0x68] ss:$0 sps:$4 sm:$0xff]   ;;  %v553_v21 = vld [vmem:[%s794_s0 + $0x54] ss:$8 sps:$4 sm:$0xff]  }
   0x7   :  { %229 = vmatprep.subr.bf16.mxu0 %v564_v0  ;;  %503 = vmatprep.subr.bf16.mxu1 %v564_v0  ;;  %v223_v17 = vsel %vm221_vm1, %v543_v16, 0  ;;  %v544_v18 = vld [vmem:[%s794_s0] ss:$8 sps:$4 sm:$0xff]   ;;  %v552_v23 = vld [vmem:[%s794_s0 + $0x10] ss:$8 sps:$4 sm:$0xff]  }
   0x8   :  { %v547_v19 = vld [vmem:[%s794_s0 + $0x40] ss:$8 sps:$4 sm:$0xff]   ;;  %v557_v24 = vld [vmem:[%s794_s0 + $0x50] ss:$8 sps:$4 sm:$0xff]   ;;  %v555_v25 = vld [vmem:[%s794_s0 + $0x24] ss:$8 sps:$4 sm:$0xff]  }
   0x9   :  { %v30_v22 = vld [vmem:[%s794_s0 + $0x60] sm:$0x11]  ;;  %v560_v29 = vld [vmem:[%s794_s0 + $0x34] ss:$8 sps:$4 sm:$0xff]   ;;  %v563_v30 = vld [vmem:[%s794_s0 + $0x30] ss:$8 sps:$4 sm:$0xff]  }
   0xa   :  { %230 = vmatpush1.bf16.msra.mxu0 %v532_v3  ;;  %517 = vmatpush1.bf16.msra.mxu1 %v532_v3  ;;  %v451_v26 = vcombine.high %v30_v22, %v30_v22  ;;  %v558_v27 = vld [vmem:[%s794_s0 + $0x20] ss:$8 sps:$4 sm:$0xff]   ;;  %v450_v28 = vcombine.low %v30_v22, %v30_v22 }
   0xb   :  { %231 = vmatprep.subr.bf16.mxu0 %v564_v0  ;;  %504 = vmatprep.subr.bf16.mxu1 %v564_v0  ;;  %v709_v31 = vld [vmem:[%s795_s2] ss:$0 sm:$0xff] }
   0xc   :  { %v714_v33 = vld [vmem:[%s796_s3] ss:$0 sm:$0xff] }
   0xe   :  { %232 = vmatpush1.bf16.msra.mxu0 %v533_v4  ;;  %518 = vmatpush1.bf16.msra.mxu1 %v533_v4 }
   0xf   :  { %233 = vmatprep.subr.bf16.mxu0 %v564_v0  ;;  %505 = vmatprep.subr.bf16.mxu1 %v564_v0 }
  0x12   :  { %234 = vmatpush1.bf16.msra.mxu0 %v534_v5  ;;  %519 = vmatpush1.bf16.msra.mxu1 %v534_v5 }
  0x13   :  { %235 = vmatprep.subr.bf16.mxu0 %v564_v0  ;;  %506 = vmatprep.subr.bf16.mxu1 %v564_v0 }
  0x16   :  { %236 = vmatpush1.bf16.msra.mxu0 %v535_v8  ;;  %520 = vmatpush1.bf16.msra.mxu1 %v535_v8 }
  0x17   :  { %237 = vmatprep.subr.bf16.mxu0 %v564_v0  ;;  %507 = vmatprep.subr.bf16.mxu1 %v564_v0 }
  0x1a   :  { %238 = vmatpush1.bf16.msra.mxu0 %v536_v9  ;;  %521 = vmatpush1.bf16.msra.mxu1 %v536_v9 }
  0x1b   :  { %239 = vmatprep.subr.bf16.mxu0 %v564_v0  ;;  %508 = vmatprep.subr.bf16.mxu1 %v564_v0 }
  0x1e   :  { %240 = vmatpush1.bf16.msra.mxu0 %v537_v10  ;;  %522 = vmatpush1.bf16.msra.mxu1 %v537_v10 }
  0x1f   :  { %241 = vmatprep.subr.bf16.mxu0 %v564_v0  ;;  %509 = vmatprep.subr.bf16.mxu1 %v564_v0 }
  0x22   :  { %242 = vmatpush1.bf16.msra.mxu0 %v538_v11  ;;  %523 = vmatpush1.bf16.msra.mxu1 %v538_v11 }
  0x23   :  { %243 = vmatprep.subr.bf16.mxu0 %v564_v0  ;;  %510 = vmatprep.subr.bf16.mxu1 %v564_v0 }
  0x26   :  { %244 = vmatpush1.bf16.msra.mxu0 %v539_v12  ;;  %524 = vmatpush1.bf16.msra.mxu1 %v539_v12 }
  0x27   :  { %245 = vmatprep.subr.bf16.mxu0 %v564_v0  ;;  %511 = vmatprep.subr.bf16.mxu1 %v564_v0 }
  0x2a   :  { %246 = vmatpush1.bf16.msra.mxu0 %v540_v13  ;;  %525 = vmatpush1.bf16.msra.mxu1 %v540_v13 }
  0x2b   :  { %247 = vmatprep.subr.bf16.mxu0 %v564_v0  ;;  %512 = vmatprep.subr.bf16.mxu1 %v564_v0 }
  0x2e   :  { %248 = vmatpush1.bf16.msra.mxu0 %v541_v14  ;;  %526 = vmatpush1.bf16.msra.mxu1 %v541_v14 }
  0x2f   :  { %249 = vmatprep.subr.bf16.mxu0 %v564_v0  ;;  %513 = vmatprep.subr.bf16.mxu1 %v564_v0 }
  0x32   :  { %250 = vmatpush1.bf16.msra.mxu0 %v542_v15  ;;  %527 = vmatpush1.bf16.msra.mxu1 %v542_v15 }
  0x33   :  { %251 = vmatprep.subr.bf16.mxu0 %v564_v0  ;;  %514 = vmatprep.subr.bf16.mxu1 %v564_v0 }
  0x36   :  { %252 = vmatpush1.bf16.msra.mxu0 %v223_v17  ;;  %528 = vmatpush1.bf16.msra.mxu1 %v223_v17 }
  0x39   :  { %258 = vmatmul.mubr.bf16.vlgmr.msra.gmra.mrb[0].mxu0 %v544_v18  ;;  %290 = vmatmul.mubr.bf16.vlgmr.msra.gmra.mrb[0].mxu1 %v547_v19 }
  0x3a   :  { %467 = vmatprep.mubr.msk.bf16.mxu0 %vm199_vm0, %v550_v20  ;;  %471 = vmatprep.mubr.msk.bf16.mxu1 %vm199_vm0, %v553_v21 }
  0x41   :  { %266 = vmatmul.mubr.bf16.gmra.mrb[4].mxu0 %v552_v23  ;;  %298 = vmatmul.mubr.bf16.gmra.mrb[4].mxu1 %v557_v24 }
  0x42   :  { %468 = vmatprep.mubr.msk.bf16.mxu0 %vm199_vm0, %v555_v25  ;;  %472 = vmatprep.mubr.msk.bf16.mxu1 %vm199_vm0, %v451_v26 }
  0x49   :  { %274 = vmatmul.mubr.bf16.gmra.mrb[8].mxu0 %v558_v27  ;;  %306 = vmatmul.mubr.bf16.gmra.mrb[8].mxu1 %v450_v28 }
  0x4a   :  { %469 = vmatprep.mubr.msk.bf16.mxu0 %vm199_vm0, %v560_v29 }
  0x51   :  { %282 = vmatmul.mubr.bf16.gmra.mrb[12].mxu0 %v563_v30 }
 0x10c   :  { %v259_v32 = vpop.f32.mrb[0].mxu0  ;;  %v291_v34 = vpop.f32.mrb[0].mxu1 }
 0x10d   :  { %v320_v35 = vmul.f32 %v709_v31, %v259_v32  ;;  %v261_v36 = vpop.f32.mrb[1].mxu0  ;;  %v328_v37 = vmul.f32 %v709_v31, %v291_v34  ;;  %v293_v38 = vpop.f32.mrb[1].mxu1 }
 0x10e   :  { %v262_v39 = vpop.f32.mrb[2].mxu0  ;;  %v294_v40 = vpop.f32.mrb[2].mxu1 }
 0x10f   :  { %v340_v41 = vadd.f32 %v714_v33, %v320_v35  ;;  %v321_v42 = vmul.f32 %v709_v31, %v262_v39  ;;  %v264_v43 = vpop.f32.mrb[3].mxu0  ;;  %v348_v44 = vadd.f32 %v714_v33, %v328_v37  ;;  %v329_v45 = vmul.f32 %v709_v31, %v294_v40  ;;  %v296_v46 = vpop.f32.mrb[3].mxu1 }
 0x111   :  { %v353_v47 = vmax.f32 %v340_v41, 0.0  ;;  %v341_v48 = vadd.f32 %v714_v33, %v321_v42  ;;  %v361_v49 = vmax.f32 %v348_v44, 0.0  ;;  %v349_v50 = vadd.f32 %v714_v33, %v329_v45 }
 0x113   :  { %v488_v51 = vpack.c.bf16 %v353_v47, %v353_v47  ;;  %v354_v52 = vmax.f32 %v341_v48, 0.0  ;;  %v496_v53 = vpack.c.bf16 %v361_v49, %v361_v49  ;;  %v362_v54 = vmax.f32 %v349_v50, 0.0 }
 0x114   :  { %v267_v55 = vpop.f32.mrb[4].mxu0  ;;  %v299_v56 = vpop.f32.mrb[4].mxu1 }
 0x115   :  { %420 = vst.msk [vmem:[%s797_s4] sm:$0xf] %vm419_vm2, %v488_v51  ;;  %v489_v57 = vpack.c.bf16 %v354_v52, %v354_v52  ;;  %428 = vst.msk [vmem:[%s797_s4 + $0x20] sm:$0xf] %vm419_vm2, %v496_v53  ;;  %v322_v58 = vmul.f32 %v709_v31, %v267_v55  ;;  %v269_v59 = vpop.f32.mrb[5].mxu0  ;;  %v497_v60 = vpack.c.bf16 %v362_v54, %v362_v54  ;;  %v301_v62 = vpop.f32.mrb[5].mxu1 }
 0x116   :  { %v330_v61 = vmul.f32 %v709_v31, %v299_v56  ;;  %v270_v63 = vpop.f32.mrb[6].mxu0  ;;  %v302_v0 = vpop.f32.mrb[6].mxu1 }
 0x117   :  { %421 = vst.msk [vmem:[%s797_s4 + $0x4] sm:$0xf] %vm419_vm2, %v489_v57  ;;  %v342_v1 = vadd.f32 %v714_v33, %v322_v58  ;;  %429 = vst.msk [vmem:[%s797_s4 + $0x24] sm:$0xf] %vm419_vm2, %v497_v60  ;;  %v323_v2 = vmul.f32 %v709_v31, %v270_v63  ;;  %v272_v3 = vpop.f32.mrb[7].mxu0  ;;  %v331_v5 = vmul.f32 %v709_v31, %v302_v0  ;;  %v304_v6 = vpop.f32.mrb[7].mxu1 }
 0x118   :  { %v350_v4 = vadd.f32 %v714_v33, %v330_v61 }
 0x119   :  { %v355_v7 = vmax.f32 %v342_v1, 0.0  ;;  %v343_v8 = vadd.f32 %v714_v33, %v323_v2  ;;  %v351_v10 = vadd.f32 %v714_v33, %v331_v5 }
 0x11a   :  { %v363_v9 = vmax.f32 %v350_v4, 0.0 }
 0x11b   :  { %v490_v11 = vpack.c.bf16 %v355_v7, %v355_v7  ;;  %v356_v12 = vmax.f32 %v343_v8, 0.0  ;;  %v364_v14 = vmax.f32 %v351_v10, 0.0 }
 0x11c   :  { %v498_v13 = vpack.c.bf16 %v363_v9, %v363_v9  ;;  %v275_v15 = vpop.f32.mrb[8].mxu0  ;;  %v307_v16 = vpop.f32.mrb[8].mxu1 }
 0x11d   :  { %422 = vst.msk [vmem:[%s797_s4 + $0x8] sm:$0xf] %vm419_vm2, %v490_v11  ;;  %v491_v17 = vpack.c.bf16 %v356_v12, %v356_v12  ;;  %v324_v18 = vmul.f32 %v709_v31, %v275_v15  ;;  %v277_v19 = vpop.f32.mrb[9].mxu0  ;;  %v499_v20 = vpack.c.bf16 %v364_v14, %v364_v14  ;;  %v332_v21 = vmul.f32 %v709_v31, %v307_v16  ;;  %v309_v22 = vpop.f32.mrb[9].mxu1 }
 0x11e   :  { %430 = vst.msk [vmem:[%s797_s4 + $0x28] sm:$0xf] %vm419_vm2, %v498_v13  ;;  %v278_v23 = vpop.f32.mrb[10].mxu0  ;;  %v310_v24 = vpop.f32.mrb[10].mxu1 }
 0x11f   :  { %423 = vst.msk [vmem:[%s797_s4 + $0xc] sm:$0xf] %vm419_vm2, %v491_v17  ;;  %v344_v25 = vadd.f32 %v714_v33, %v324_v18  ;;  %431 = vst.msk [vmem:[%s797_s4 + $0x2c] sm:$0xf] %vm419_vm2, %v499_v20  ;;  %v325_v26 = vmul.f32 %v709_v31, %v278_v23  ;;  %v280_v27 = vpop.f32.mrb[11].mxu0  ;;  %v352_v28 = vadd.f32 %v714_v33, %v332_v21  ;;  %v311_v29 = vpop.f32.mrb[11].mxu1 }
 0x121   :  { %v357_v30 = vmax.f32 %v344_v25, 0.0  ;;  %v345_v32 = vadd.f32 %v714_v33, %v325_v26  ;;  %v365_v34 = vmax.f32 %v352_v28, 0.0 }
 0x123   :  { %v492_v35 = vpack.c.bf16 %v357_v30, %v357_v30  ;;  %v358_v36 = vmax.f32 %v345_v32, 0.0  ;;  %v500_v37 = vpack.c.bf16 %v365_v34, %v365_v34 }
 0x124   :  { %v283_v38 = vpop.f32.mrb[12].mxu0 }
 0x125   :  { %424 = vst.msk [vmem:[%s797_s4 + $0x10] sm:$0xf] %vm419_vm2, %v492_v35  ;;  %v493_v39 = vpack.c.bf16 %v358_v36, %v358_v36  ;;  %v326_v40 = vmul.f32 %v709_v31, %v283_v38  ;;  %v285_v41 = vpop.f32.mrb[13].mxu0 }
 0x126   :  { %433 = vst.msk [vmem:[%s797_s4 + $0x30] sm:$0x1] %vm432_vm3, %v500_v37  ;;  %v286_v42 = vpop.f32.mrb[14].mxu0 }
 0x127   :  { %425 = vst.msk [vmem:[%s797_s4 + $0x14] sm:$0xf] %vm419_vm2, %v493_v39  ;;  %v346_v43 = vadd.f32 %v714_v33, %v326_v40  ;;  %v327_v44 = vmul.f32 %v709_v31, %v286_v42  ;;  %v288_v45 = vpop.f32.mrb[15].mxu0 }
 0x129   :  { %v359_v46 = vmax.f32 %v346_v43, 0.0  ;;  %v347_v47 = vadd.f32 %v714_v33, %v327_v44 }
 0x12b   :  { %v494_v48 = vpack.c.bf16 %v359_v46, %v359_v46  ;;  %v360_v49 = vmax.f32 %v347_v47, 0.0 }
 0x12d   :  { %426 = vst.msk [vmem:[%s797_s4 + $0x18] sm:$0xf] %vm419_vm2, %v494_v48  ;;  %v495_v50 = vpack.c.bf16 %v360_v49, %v360_v49 }
 0x12f   :  { %427 = vst.msk [vmem:[%s797_s4 + $0x1c] sm:$0xf] %vm419_vm2, %v495_v50 }

// kernel: pretrained_facenet_forward.54
= control target key start
LH: loop header
LB: loop body
LE: loop exit
PB: predicated region body
PF: predicated region fallthrough
CT: control target
= control target key end

     0   :  { %v415_v0 = vmov 0.0   ;;  %vm416_vm0 = vmmov 0   ;;  %vm80_vm1 = vcmask 261120   ;;  %vm296_vm2 = vcmask 93184   ;;  %s570_s1 = inlined_call_operand.vmem [shape: bf16[32,12], index: 1, kind: input, shape index: {}]   ;;  %s571_s0 = inlined_call_operand.vmem [shape: bf16[98,32], index: 0, kind: input, shape index: {}]   ;;  %s572_s2 = inlined_call_operand.vmem [shape: f32[1,12], index: 2, kind: input, shape index: {}]   ;;  %s573_s3 = inlined_call_operand.vmem [shape: f32[1,12], index: 3, kind: input, shape index: {}]   ;;  %s574_s4 = inlined_call_operand.vmem [shape: bf16[98,12], index: 4, kind: output, shape index: {}]  }
   0x1   :  { %368 = vmatprep.subr.bf16.mxu0 %v415_v0  ;;  %v406_v1 = vld [vmem:[%s570_s1] sm:$0xff]   ;;  %400 = vmatprep.subr.bf16.mxu1 %v415_v0  ;;  %v407_v2 = vld [vmem:[%s570_s1 + $0x8] sm:$0xff]   ;;  %v412_v7 = vld [vmem:[%s571_s0 + $0x10] sm:$0xff]   ;;  %vm309_vm3 = vcmask 90112  }
   0x2   :  { %372 = vmatprep.mubr.msk.bf16.mxu0 %vm416_vm0, %v415_v0  ;;  %388 = vmatprep.mubr.msk.bf16.mxu1 %vm416_vm0, %v415_v0  ;;  %v408_v3 = vld [vmem:[%s571_s0] sm:$0xff]   ;;  %v410_v5 = vld [vmem:[%s571_s0 + $0x8] sm:$0xff]   ;;  %v413_v8 = vld [vmem:[%s571_s0 + $0x30] ss:$0 sps:$4 sm:$0x11]  }
   0x3   :  { %369 = vmatpush3.bf16.msra.mxu0 %v406_v1  ;;  %402 = vmatpush3.bf16.msra.mxu1 %v406_v1  ;;  %v409_v4 = vld [vmem:[%s571_s0 + $0x20] sm:$0xff]   ;;  %v411_v6 = vld [vmem:[%s571_s0 + $0x28] sm:$0xff]   ;;  %v414_v9 = vld [vmem:[%s571_s0 + $0x18] sm:$0xff]  }
   0x4   :  { %370 = vmatprep.subr.bf16.mxu0 %v415_v0  ;;  %401 = vmatprep.subr.bf16.mxu1 %v415_v0  ;;  %v486_v10 = vld [vmem:[%s572_s2] ss:$0 sm:$0xff] }
   0x5   :  { %v491_v12 = vld [vmem:[%s573_s3] ss:$0 sm:$0xff] }
   0x7   :  { %371 = vmatpush3.bf16.msra.mxu0 %v407_v2  ;;  %403 = vmatpush3.bf16.msra.mxu1 %v407_v2 }
   0xa   :  { %373 = vmatmul.mubr.msk.bf16.vlgmr.msra.gmra.mrb[0].mxu0 %vm80_vm1, %v408_v3  ;;  %389 = vmatmul.mubr.msk.bf16.vlgmr.msra.gmra.mrb[0].mxu1 %vm80_vm1, %v409_v4 }
   0xb   :  { %376 = vmatprep.mubr.msk.bf16.mxu0 %vm416_vm0, %v415_v0  ;;  %392 = vmatprep.mubr.msk.bf16.mxu1 %vm416_vm0, %v415_v0 }
  0x12   :  { %377 = vmatmul.mubr.msk.bf16.gmra.mrb[4].mxu0 %vm80_vm1, %v410_v5  ;;  %393 = vmatmul.mubr.msk.bf16.gmra.mrb[4].mxu1 %vm80_vm1, %v411_v6 }
  0x13   :  { %380 = vmatprep.mubr.msk.bf16.mxu0 %vm416_vm0, %v415_v0  ;;  %396 = vmatprep.mubr.msk.bf16.mxu1 %vm416_vm0, %v415_v0 }
  0x1a   :  { %381 = vmatmul.mubr.msk.bf16.gmra.mrb[8].mxu0 %vm80_vm1, %v412_v7  ;;  %397 = vmatmul.mubr.msk.bf16.gmra.mrb[8].mxu1 %vm80_vm1, %v413_v8 }
  0x1b   :  { %384 = vmatprep.mubr.msk.bf16.mxu0 %vm416_vm0, %v415_v0 }
  0x22   :  { %385 = vmatmul.mubr.msk.bf16.gmra.mrb[12].mxu0 %vm80_vm1, %v414_v9 }
  0xdd   :  { %v136_v11 = vpop.f32.mrb[0].mxu0  ;;  %v168_v13 = vpop.f32.mrb[0].mxu1 }
  0xde   :  { %v197_v14 = vmul.f32 %v486_v10, %v136_v11  ;;  %v374_v15 = vpop.f32.mrb[1].mxu0  ;;  %v205_v16 = vmul.f32 %v486_v10, %v168_v13  ;;  %v390_v17 = vpop.f32.mrb[1].mxu1 }
  0xdf   :  { %v139_v18 = vpop.f32.mrb[2].mxu0  ;;  %v171_v19 = vpop.f32.mrb[2].mxu1 }
  0xe0   :  { %v217_v20 = vadd.f32 %v491_v12, %v197_v14  ;;  %v198_v21 = vmul.f32 %v486_v10, %v139_v18  ;;  %v375_v22 = vpop.f32.mrb[3].mxu0  ;;  %v225_v23 = vadd.f32 %v491_v12, %v205_v16  ;;  %v206_v24 = vmul.f32 %v486_v10, %v171_v19  ;;  %v391_v25 = vpop.f32.mrb[3].mxu1 }
  0xe2   :  { %v230_v26 = vmax.f32 %v217_v20, 0.0  ;;  %v218_v27 = vadd.f32 %v491_v12, %v198_v21  ;;  %v238_v28 = vmax.f32 %v225_v23, 0.0  ;;  %v226_v29 = vadd.f32 %v491_v12, %v206_v24 }
  0xe4   :  { %v346_v30 = vpack.c.bf16 %v230_v26, %v230_v26  ;;  %v231_v31 = vmax.f32 %v218_v27, 0.0  ;;  %v354_v32 = vpack.c.bf16 %v238_v28, %v238_v28  ;;  %v239_v33 = vmax.f32 %v226_v29, 0.0 }
  0xe5   :  { %v144_v34 = vpop.f32.mrb[4].mxu0  ;;  %v176_v35 = vpop.f32.mrb[4].mxu1 }
  0xe6   :  { %297 = vst.msk [vmem:[%s574_s4] sm:$0xf] %vm296_vm2, %v346_v30  ;;  %v347_v36 = vpack.c.bf16 %v231_v31, %v231_v31  ;;  %305 = vst.msk [vmem:[%s574_s4 + $0x20] sm:$0xf] %vm296_vm2, %v354_v32  ;;  %v199_v37 = vmul.f32 %v486_v10, %v144_v34  ;;  %v378_v38 = vpop.f32.mrb[5].mxu0  ;;  %v355_v39 = vpack.c.bf16 %v239_v33, %v239_v33  ;;  %v394_v41 = vpop.f32.mrb[5].mxu1 }
  0xe7   :  { %v207_v40 = vmul.f32 %v486_v10, %v176_v35  ;;  %v147_v42 = vpop.f32.mrb[6].mxu0  ;;  %v179_v43 = vpop.f32.mrb[6].mxu1 }
  0xe8   :  { %298 = vst.msk [vmem:[%s574_s4 + $0x4] sm:$0xf] %vm296_vm2, %v347_v36  ;;  %v219_v44 = vadd.f32 %v491_v12, %v199_v37  ;;  %306 = vst.msk [vmem:[%s574_s4 + $0x24] sm:$0xf] %vm296_vm2, %v355_v39  ;;  %v200_v45 = vmul.f32 %v486_v10, %v147_v42  ;;  %v379_v46 = vpop.f32.mrb[7].mxu0  ;;  %v208_v48 = vmul.f32 %v486_v10, %v179_v43  ;;  %v395_v49 = vpop.f32.mrb[7].mxu1 }
  0xe9   :  { %v227_v47 = vadd.f32 %v491_v12, %v207_v40 }
  0xea   :  { %v232_v50 = vmax.f32 %v219_v44, 0.0  ;;  %v220_v51 = vadd.f32 %v491_v12, %v200_v45  ;;  %v228_v53 = vadd.f32 %v491_v12, %v208_v48 }
  0xeb   :  { %v240_v52 = vmax.f32 %v227_v47, 0.0 }
  0xec   :  { %v348_v54 = vpack.c.bf16 %v232_v50, %v232_v50  ;;  %v233_v55 = vmax.f32 %v220_v51, 0.0  ;;  %v241_v57 = vmax.f32 %v228_v53, 0.0 }
  0xed   :  { %v356_v56 = vpack.c.bf16 %v240_v52, %v240_v52  ;;  %v152_v58 = vpop.f32.mrb[8].mxu0  ;;  %v184_v59 = vpop.f32.mrb[8].mxu1 }
  0xee   :  { %299 = vst.msk [vmem:[%s574_s4 + $0x8] sm:$0xf] %vm296_vm2, %v348_v54  ;;  %v349_v60 = vpack.c.bf16 %v233_v55, %v233_v55  ;;  %v201_v61 = vmul.f32 %v486_v10, %v152_v58  ;;  %v382_v62 = vpop.f32.mrb[9].mxu0  ;;  %v357_v63 = vpack.c.bf16 %v241_v57, %v241_v57  ;;  %v209_v0 = vmul.f32 %v486_v10, %v184_v59  ;;  %v398_v1 = vpop.f32.mrb[9].mxu1 }
  0xef   :  { %307 = vst.msk [vmem:[%s574_s4 + $0x28] sm:$0xf] %vm296_vm2, %v356_v56  ;;  %v155_v2 = vpop.f32.mrb[10].mxu0  ;;  %v187_v3 = vpop.f32.mrb[10].mxu1 }
  0xf0   :  { %300 = vst.msk [vmem:[%s574_s4 + $0xc] sm:$0xf] %vm296_vm2, %v349_v60  ;;  %v221_v4 = vadd.f32 %v491_v12, %v201_v61  ;;  %308 = vst.msk [vmem:[%s574_s4 + $0x2c] sm:$0xf] %vm296_vm2, %v357_v63  ;;  %v202_v5 = vmul.f32 %v486_v10, %v155_v2  ;;  %v383_v6 = vpop.f32.mrb[11].mxu0  ;;  %v229_v7 = vadd.f32 %v491_v12, %v209_v0  ;;  %v399_v8 = vpop.f32.mrb[11].mxu1 }
  0xf2   :  { %v234_v9 = vmax.f32 %v221_v4, 0.0  ;;  %v222_v11 = vadd.f32 %v491_v12, %v202_v5  ;;  %v242_v13 = vmax.f32 %v229_v7, 0.0 }
  0xf4   :  { %v350_v14 = vpack.c.bf16 %v234_v9, %v234_v9  ;;  %v235_v15 = vmax.f32 %v222_v11, 0.0  ;;  %v358_v16 = vpack.c.bf16 %v242_v13, %v242_v13 }
  0xf5   :  { %v160_v17 = vpop.f32.mrb[12].mxu0 }
  0xf6   :  { %301 = vst.msk [vmem:[%s574_s4 + $0x10] sm:$0xf] %vm296_vm2, %v350_v14  ;;  %v351_v18 = vpack.c.bf16 %v235_v15, %v235_v15  ;;  %v203_v19 = vmul.f32 %v486_v10, %v160_v17  ;;  %v386_v20 = vpop.f32.mrb[13].mxu0 }
  0xf7   :  { %310 = vst.msk [vmem:[%s574_s4 + $0x30] sm:$0x1] %vm309_vm3, %v358_v16  ;;  %v163_v21 = vpop.f32.mrb[14].mxu0 }
  0xf8   :  { %302 = vst.msk [vmem:[%s574_s4 + $0x14] sm:$0xf] %vm296_vm2, %v351_v18  ;;  %v223_v22 = vadd.f32 %v491_v12, %v203_v19  ;;  %v204_v23 = vmul.f32 %v486_v10, %v163_v21  ;;  %v387_v24 = vpop.f32.mrb[15].mxu0 }
  0xfa   :  { %v236_v25 = vmax.f32 %v223_v22, 0.0  ;;  %v224_v26 = vadd.f32 %v491_v12, %v204_v23 }
  0xfc   :  { %v352_v27 = vpack.c.bf16 %v236_v25, %v236_v25  ;;  %v237_v28 = vmax.f32 %v224_v26, 0.0 }
  0xfe   :  { %303 = vst.msk [vmem:[%s574_s4 + $0x18] sm:$0xf] %vm296_vm2, %v352_v27  ;;  %v353_v29 = vpack.c.bf16 %v237_v28, %v237_v28 }
 0x100   :  { %304 = vst.msk [vmem:[%s574_s4 + $0x1c] sm:$0xf] %vm296_vm2, %v353_v29 }

// kernel: pretrained_facenet_forward.55
= control target key start
LH: loop header
LB: loop body
LE: loop exit
PB: predicated region body
PF: predicated region fallthrough
CT: control target
= control target key end

     0   :  { %v430_v0 = vmov 0.0   ;;  %vm431_vm0 = vmmov 0   ;;  %vm106_vm1 = vcmask 1041408   ;;  %vm84_vm2 = vcmask 293888   ;;  %s588_s1 = inlined_call_operand.vmem [shape: bf16[36,4], index: 1, kind: input, shape index: {}]   ;;  %s589_s0 = inlined_call_operand.vmem [shape: bf16[98,36], index: 0, kind: input, shape index: {}]   ;;  %s590_s2 = inlined_call_operand.vmem [shape: f32[1,4], index: 2, kind: input, shape index: {}]   ;;  %s591_s3 = inlined_call_operand.vmem [shape: f32[1,4], index: 3, kind: input, shape index: {}]   ;;  %s592_s4 = inlined_call_operand.vmem [shape: bf16[98,4], index: 4, kind: output, shape index: {}]  }
   0x1   :  { %378 = vmatprep.subr.bf16.mxu0 %v430_v0  ;;  %v420_v1 = vld [vmem:[%s588_s1] sm:$0xff]   ;;  %412 = vmatprep.subr.bf16.mxu1 %v430_v0  ;;  %v421_v2 = vld [vmem:[%s588_s1 + $0x8] sm:$0xff]   ;;  %v422_v3 = vld [vmem:[%s588_s1 + $0x10] ss:$0 sps:$4 sm:$0x33]   ;;  %vm304_vm3 = vcmask 27648  }
   0x2   :  { %384 = vmatprep.mubr.msk.bf16.mxu0 %vm431_vm0, %v430_v0  ;;  %400 = vmatprep.mubr.msk.bf16.mxu1 %vm431_vm0, %v430_v0  ;;  %v108_v4 = vsel %vm106_vm1, %v422_v3, 0  ;;  %v423_v5 = vld [vmem:[%s589_s0] sm:$0xff]   ;;  %v425_v7 = vld [vmem:[%s589_s0 + $0x8] sm:$0xff]   ;;  %v427_v9 = vld [vmem:[%s589_s0 + $0x10] sm:$0xff]   ;;  %vm317_vm4 = vcmask 24576  }
   0x3   :  { %379 = vmatpush3.bf16.msra.mxu0 %v420_v1  ;;  %415 = vmatpush3.bf16.msra.mxu1 %v420_v1  ;;  %v424_v6 = vld [vmem:[%s589_s0 + $0x20] sm:$0xff]   ;;  %v426_v8 = vld [vmem:[%s589_s0 + $0x28] sm:$0xff]   ;;  %v428_v10 = vld [vmem:[%s589_s0 + $0x30] ss:$0 sps:$4 sm:$0x11]  }
   0x4   :  { %380 = vmatprep.subr.bf16.mxu0 %v430_v0  ;;  %413 = vmatprep.subr.bf16.mxu1 %v430_v0  ;;  %v429_v11 = vld [vmem:[%s589_s0 + $0x18] sm:$0xff]   ;;  %v504_v12 = vld [vmem:[%s590_s2] ss:$0 sm:$0xff] }
   0x5   :  { %v509_v14 = vld [vmem:[%s591_s3] ss:$0 sm:$0xff] }
   0x7   :  { %381 = vmatpush3.bf16.msra.mxu0 %v421_v2  ;;  %416 = vmatpush3.bf16.msra.mxu1 %v421_v2 }
   0x8   :  { %382 = vmatprep.subr.bf16.mxu0 %v430_v0  ;;  %414 = vmatprep.subr.bf16.mxu1 %v430_v0 }
   0xb   :  { %383 = vmatpush3.bf16.msra.mxu0 %v108_v4  ;;  %417 = vmatpush3.bf16.msra.mxu1 %v108_v4 }
   0xe   :  { %385 = vmatmul.mubr.msk.bf16.vlgmr.msra.gmra.mrb[0].mxu0 %vm84_vm2, %v423_v5  ;;  %401 = vmatmul.mubr.msk.bf16.vlgmr.msra.gmra.mrb[0].mxu1 %vm84_vm2, %v424_v6 }
   0xf   :  { %388 = vmatprep.mubr.msk.bf16.mxu0 %vm431_vm0, %v430_v0  ;;  %404 = vmatprep.mubr.msk.bf16.mxu1 %vm431_vm0, %v430_v0 }
  0x16   :  { %389 = vmatmul.mubr.msk.bf16.gmra.mrb[4].mxu0 %vm84_vm2, %v425_v7  ;;  %405 = vmatmul.mubr.msk.bf16.gmra.mrb[4].mxu1 %vm84_vm2, %v426_v8 }
  0x17   :  { %392 = vmatprep.mubr.msk.bf16.mxu0 %vm431_vm0, %v430_v0  ;;  %408 = vmatprep.mubr.msk.bf16.mxu1 %vm431_vm0, %v430_v0 }
  0x1e   :  { %393 = vmatmul.mubr.msk.bf16.gmra.mrb[8].mxu0 %vm84_vm2, %v427_v9  ;;  %409 = vmatmul.mubr.msk.bf16.gmra.mrb[8].mxu1 %vm84_vm2, %v428_v10 }
  0x1f   :  { %396 = vmatprep.mubr.msk.bf16.mxu0 %vm431_vm0, %v430_v0 }
  0x26   :  { %397 = vmatmul.mubr.msk.bf16.gmra.mrb[12].mxu0 %vm84_vm2, %v429_v11 }
  0xe1   :  { %v144_v13 = vpop.f32.mrb[0].mxu0  ;;  %v176_v15 = vpop.f32.mrb[0].mxu1 }
  0xe2   :  { %v205_v16 = vmul.f32 %v504_v12, %v144_v13  ;;  %v386_v17 = vpop.f32.mrb[1].mxu0  ;;  %v213_v18 = vmul.f32 %v504_v12, %v176_v15  ;;  %v402_v19 = vpop.f32.mrb[1].mxu1 }
  0xe3   :  { %v147_v20 = vpop.f32.mrb[2].mxu0  ;;  %v179_v21 = vpop.f32.mrb[2].mxu1 }
  0xe4   :  { %v225_v22 = vadd.f32 %v509_v14, %v205_v16  ;;  %v206_v23 = vmul.f32 %v504_v12, %v147_v20  ;;  %v387_v24 = vpop.f32.mrb[3].mxu0  ;;  %v233_v25 = vadd.f32 %v509_v14, %v213_v18  ;;  %v214_v26 = vmul.f32 %v504_v12, %v179_v21  ;;  %v403_v27 = vpop.f32.mrb[3].mxu1 }
  0xe6   :  { %v238_v28 = vmax.f32 %v225_v22, 0.0  ;;  %v226_v29 = vadd.f32 %v509_v14, %v206_v23  ;;  %v246_v30 = vmax.f32 %v233_v25, 0.0  ;;  %v234_v31 = vadd.f32 %v509_v14, %v214_v26 }
  0xe8   :  { %v355_v32 = vpack.c.bf16 %v238_v28, %v238_v28  ;;  %v239_v33 = vmax.f32 %v226_v29, 0.0  ;;  %v363_v34 = vpack.c.bf16 %v246_v30, %v246_v30  ;;  %v247_v35 = vmax.f32 %v234_v31, 0.0 }
  0xe9   :  { %v152_v36 = vpop.f32.mrb[4].mxu0  ;;  %v184_v37 = vpop.f32.mrb[4].mxu1 }
  0xea   :  { %305 = vst.msk [vmem:[%s592_s4] sm:$0xf] %vm304_vm3, %v355_v32  ;;  %v356_v38 = vpack.c.bf16 %v239_v33, %v239_v33  ;;  %313 = vst.msk [vmem:[%s592_s4 + $0x20] sm:$0xf] %vm304_vm3, %v363_v34  ;;  %v207_v39 = vmul.f32 %v504_v12, %v152_v36  ;;  %v390_v40 = vpop.f32.mrb[5].mxu0  ;;  %v364_v41 = vpack.c.bf16 %v247_v35, %v247_v35  ;;  %v406_v43 = vpop.f32.mrb[5].mxu1 }
  0xeb   :  { %v215_v42 = vmul.f32 %v504_v12, %v184_v37  ;;  %v155_v44 = vpop.f32.mrb[6].mxu0  ;;  %v187_v45 = vpop.f32.mrb[6].mxu1 }
  0xec   :  { %306 = vst.msk [vmem:[%s592_s4 + $0x4] sm:$0xf] %vm304_vm3, %v356_v38  ;;  %v227_v46 = vadd.f32 %v509_v14, %v207_v39  ;;  %314 = vst.msk [vmem:[%s592_s4 + $0x24] sm:$0xf] %vm304_vm3, %v364_v41  ;;  %v208_v47 = vmul.f32 %v504_v12, %v155_v44  ;;  %v391_v48 = vpop.f32.mrb[7].mxu0  ;;  %v216_v50 = vmul.f32 %v504_v12, %v187_v45  ;;  %v407_v51 = vpop.f32.mrb[7].mxu1 }
  0xed   :  { %v235_v49 = vadd.f32 %v509_v14, %v215_v42 }
  0xee   :  { %v240_v52 = vmax.f32 %v227_v46, 0.0  ;;  %v228_v53 = vadd.f32 %v509_v14, %v208_v47  ;;  %v236_v55 = vadd.f32 %v509_v14, %v216_v50 }
  0xef   :  { %v248_v54 = vmax.f32 %v235_v49, 0.0 }
  0xf0   :  { %v357_v56 = vpack.c.bf16 %v240_v52, %v240_v52  ;;  %v241_v57 = vmax.f32 %v228_v53, 0.0  ;;  %v249_v59 = vmax.f32 %v236_v55, 0.0 }
  0xf1   :  { %v365_v58 = vpack.c.bf16 %v248_v54, %v248_v54  ;;  %v160_v60 = vpop.f32.mrb[8].mxu0  ;;  %v192_v61 = vpop.f32.mrb[8].mxu1 }
  0xf2   :  { %307 = vst.msk [vmem:[%s592_s4 + $0x8] sm:$0xf] %vm304_vm3, %v357_v56  ;;  %v358_v62 = vpack.c.bf16 %v241_v57, %v241_v57  ;;  %v209_v63 = vmul.f32 %v504_v12, %v160_v60  ;;  %v394_v0 = vpop.f32.mrb[9].mxu0  ;;  %v366_v1 = vpack.c.bf16 %v249_v59, %v249_v59  ;;  %v217_v2 = vmul.f32 %v504_v12, %v192_v61  ;;  %v410_v3 = vpop.f32.mrb[9].mxu1 }
  0xf3   :  { %315 = vst.msk [vmem:[%s592_s4 + $0x28] sm:$0xf] %vm304_vm3, %v365_v58  ;;  %v163_v4 = vpop.f32.mrb[10].mxu0  ;;  %v195_v5 = vpop.f32.mrb[10].mxu1 }
  0xf4   :  { %308 = vst.msk [vmem:[%s592_s4 + $0xc] sm:$0xf] %vm304_vm3, %v358_v62  ;;  %v229_v6 = vadd.f32 %v509_v14, %v209_v63  ;;  %316 = vst.msk [vmem:[%s592_s4 + $0x2c] sm:$0xf] %vm304_vm3, %v366_v1  ;;  %v210_v7 = vmul.f32 %v504_v12, %v163_v4  ;;  %v395_v8 = vpop.f32.mrb[11].mxu0  ;;  %v237_v9 = vadd.f32 %v509_v14, %v217_v2  ;;  %v411_v10 = vpop.f32.mrb[11].mxu1 }
  0xf6   :  { %v242_v11 = vmax.f32 %v229_v6, 0.0  ;;  %v230_v13 = vadd.f32 %v509_v14, %v210_v7  ;;  %v250_v15 = vmax.f32 %v237_v9, 0.0 }
  0xf8   :  { %v359_v16 = vpack.c.bf16 %v242_v11, %v242_v11  ;;  %v243_v17 = vmax.f32 %v230_v13, 0.0  ;;  %v367_v18 = vpack.c.bf16 %v250_v15, %v250_v15 }
  0xf9   :  { %v168_v19 = vpop.f32.mrb[12].mxu0 }
  0xfa   :  { %309 = vst.msk [vmem:[%s592_s4 + $0x10] sm:$0xf] %vm304_vm3, %v359_v16  ;;  %v360_v20 = vpack.c.bf16 %v243_v17, %v243_v17  ;;  %v211_v21 = vmul.f32 %v504_v12, %v168_v19  ;;  %v398_v22 = vpop.f32.mrb[13].mxu0 }
  0xfb   :  { %318 = vst.msk [vmem:[%s592_s4 + $0x30] sm:$0x1] %vm317_vm4, %v367_v18  ;;  %v171_v23 = vpop.f32.mrb[14].mxu0 }
  0xfc   :  { %310 = vst.msk [vmem:[%s592_s4 + $0x14] sm:$0xf] %vm304_vm3, %v360_v20  ;;  %v231_v24 = vadd.f32 %v509_v14, %v211_v21  ;;  %v212_v25 = vmul.f32 %v504_v12, %v171_v23  ;;  %v399_v26 = vpop.f32.mrb[15].mxu0 }
  0xfe   :  { %v244_v27 = vmax.f32 %v231_v24, 0.0  ;;  %v232_v28 = vadd.f32 %v509_v14, %v212_v25 }
 0x100   :  { %v361_v29 = vpack.c.bf16 %v244_v27, %v244_v27  ;;  %v245_v30 = vmax.f32 %v232_v28, 0.0 }
 0x102   :  { %311 = vst.msk [vmem:[%s592_s4 + $0x18] sm:$0xf] %vm304_vm3, %v361_v29  ;;  %v362_v31 = vpack.c.bf16 %v245_v30, %v245_v30 }
 0x104   :  { %312 = vst.msk [vmem:[%s592_s4 + $0x1c] sm:$0xf] %vm304_vm3, %v362_v31 }

// kernel: pretrained_facenet_forward.58
= control target key start
LH: loop header
LB: loop body
LE: loop exit
PB: predicated region body
PF: predicated region fallthrough
CT: control target
= control target key end

     0   :  { %vm96_vm0 = vcmask 1045504   ;;  %v474_v0 = vmov 0.0   ;;  %vm475_vm1 = vmmov 0   ;;  %vm74_vm2 = vcmask 97280   ;;  %s652_s1 = inlined_call_operand.vmem [shape: bf16[12,32], index: 1, kind: input, shape index: {}]   ;;  %s653_s0 = inlined_call_operand.vmem [shape: bf16[98,12], index: 0, kind: input, shape index: {}]   ;;  %s654_s2 = inlined_call_operand.vmem [shape: f32[1,32], index: 2, kind: input, shape index: {}]   ;;  %s655_s4 = inlined_call_operand.vmem [shape: bf16[98,32], index: 4, kind: input, shape index: {}]   ;;  %s656_s3 = inlined_call_operand.vmem [shape: f32[1,32], index: 3, kind: input, shape index: {}]   ;;  %s657_s5 = inlined_call_operand.vmem [shape: bf16[98,32], index: 5, kind: output, shape index: {}]  }
   0x1   :  { %432 = vmatprep.subr.bf16.mxu0 %v474_v0  ;;  %v466_v1 = vld [vmem:[%s652_s1] sm:$0x3f]   ;;  %434 = vmatprep.mubr.msk.bf16.mxu0 %vm475_vm1, %v474_v0  ;;  %v469_v5 = vld [vmem:[%s653_s0 + $0x8] sm:$0xff]   ;;  %v471_v7 = vld [vmem:[%s653_s0 + $0x10] sm:$0xff]   ;;  %vm333_vm3 = vcmask 257024   ;;  %vm346_vm4 = vcmask 253952  }
   0x2   :  { %v467_v2 = vld [vmem:[%s653_s0] sm:$0xff]   ;;  %462 = vmatprep.subr.bf16.mxu1 %v474_v0  ;;  %450 = vmatprep.mubr.msk.bf16.mxu1 %vm475_vm1, %v474_v0  ;;  %v98_v3 = vsel %vm96_vm0, %v466_v1, 0  ;;  %v470_v6 = vld [vmem:[%s653_s0 + $0x28] sm:$0xff]   ;;  %v472_v8 = vld [vmem:[%s653_s0 + $0x30] ss:$0 sps:$4 sm:$0x11]  }
   0x3   :  { %v468_v4 = vld [vmem:[%s653_s0 + $0x20] sm:$0xff]   ;;  %433 = vmatpush3.bf16.msra.mxu0 %v98_v3  ;;  %463 = vmatpush3.bf16.msra.mxu1 %v98_v3  ;;  %v473_v9 = vld [vmem:[%s653_s0 + $0x18] sm:$0xff]   ;;  %v419_v35 = vld [vmem:[%s655_s4 + $0x8] sm:$0xff]  }
   0x4   :  { %v547_v10 = vld [vmem:[%s654_s2] ss:$0 sm:$0xff]  ;;  %v423_v41 = vld [vmem:[%s655_s4 + $0x28] sm:$0xff]   ;;  %v401_v43 = vunpack.c.l.bf16 %v419_v35  ;;  %v402_v44 = vunpack.c.h.bf16 %v419_v35 }
   0x5   :  { %v396_v11 = vld [vmem:[%s655_s4] sm:$0xff]   ;;  %v417_v55 = vunpack.c.l.bf16 %v423_v41  ;;  %v418_v57 = vunpack.c.h.bf16 %v423_v41 }
   0x6   :  { %435 = vmatmul.mubr.msk.bf16.vlgmr.msra.gmra.mrb[0].mxu0 %vm74_vm2, %v467_v2  ;;  %451 = vmatmul.mubr.msk.bf16.vlgmr.msra.gmra.mrb[0].mxu1 %vm74_vm2, %v468_v4  ;;  %v422_v12 = vld [vmem:[%s655_s4 + $0x20] sm:$0xff]   ;;  %v397_v17 = vunpack.c.l.bf16 %v396_v11  ;;  %v398_v23 = vunpack.c.h.bf16 %v396_v11  ;;  %v420_v4 = vld [vmem:[%s655_s4 + $0x10] sm:$0xff]  }
   0x7   :  { %438 = vmatprep.mubr.msk.bf16.mxu0 %vm475_vm1, %v474_v0  ;;  %454 = vmatprep.mubr.msk.bf16.mxu1 %vm475_vm1, %v474_v0  ;;  %v558_v14 = vld [vmem:[%s656_s3] ss:$0 sm:$0xff]  ;;  %v413_v20 = vunpack.c.l.bf16 %v422_v12  ;;  %v414_v25 = vunpack.c.h.bf16 %v422_v12  ;;  %v240_v11 = vld [vmem:[%s655_s4 + $0x30] sm:$0x1] }
   0xe   :  { %439 = vmatmul.mubr.msk.bf16.gmra.mrb[4].mxu0 %vm74_vm2, %v469_v5  ;;  %455 = vmatmul.mubr.msk.bf16.gmra.mrb[4].mxu1 %vm74_vm2, %v470_v6 }
   0xf   :  { %442 = vmatprep.mubr.msk.bf16.mxu0 %vm475_vm1, %v474_v0  ;;  %458 = vmatprep.mubr.msk.bf16.mxu1 %vm475_vm1, %v474_v0 }
  0x16   :  { %443 = vmatmul.mubr.msk.bf16.gmra.mrb[8].mxu0 %vm74_vm2, %v471_v7  ;;  %459 = vmatmul.mubr.msk.bf16.gmra.mrb[8].mxu1 %vm74_vm2, %v472_v8 }
  0x17   :  { %446 = vmatprep.mubr.msk.bf16.mxu0 %vm475_vm1, %v474_v0 }
  0x1e   :  { %447 = vmatmul.mubr.msk.bf16.gmra.mrb[12].mxu0 %vm74_vm2, %v473_v9 }
  0xd9   :  { %v134_v13 = vpop.f32.mrb[0].mxu0  ;;  %v166_v15 = vpop.f32.mrb[0].mxu1 }
  0xda   :  { %v195_v16 = vmul.f32 %v547_v10, %v134_v13  ;;  %v436_v18 = vpop.f32.mrb[1].mxu0  ;;  %v203_v19 = vmul.f32 %v547_v10, %v166_v15  ;;  %v452_v21 = vpop.f32.mrb[1].mxu1  ;;  %v405_v15 = vunpack.c.l.bf16 %v420_v4 }
  0xdb   :  { %v137_v22 = vpop.f32.mrb[2].mxu0  ;;  %v169_v24 = vpop.f32.mrb[2].mxu1 }
  0xdc   :  { %v215_v26 = vadd.f32 %v558_v14, %v195_v16  ;;  %v196_v27 = vmul.f32 %v547_v10, %v137_v22  ;;  %v437_v28 = vpop.f32.mrb[3].mxu0  ;;  %v223_v29 = vadd.f32 %v558_v14, %v203_v19  ;;  %v204_v30 = vmul.f32 %v547_v10, %v169_v24  ;;  %v453_v31 = vpop.f32.mrb[3].mxu1 }
  0xde   :  { %v254_v32 = vadd.f32 %v397_v17, %v215_v26  ;;  %v216_v33 = vadd.f32 %v558_v14, %v196_v27  ;;  %v262_v34 = vadd.f32 %v413_v20, %v223_v29  ;;  %v224_v36 = vadd.f32 %v558_v14, %v204_v30 }
  0xdf   :  { %v253_v27 = vunpack.c.l.bf16 %v240_v11 }
  0xe0   :  { %v267_v37 = vmax.f32 %v254_v32, 0.0  ;;  %v255_v38 = vadd.f32 %v398_v23, %v216_v33  ;;  %v275_v39 = vmax.f32 %v262_v34, 0.0  ;;  %v263_v40 = vadd.f32 %v414_v25, %v224_v36 }
  0xe1   :  { %v142_v42 = vpop.f32.mrb[4].mxu0  ;;  %v174_v45 = vpop.f32.mrb[4].mxu1  ;;  %v406_v25 = vunpack.c.h.bf16 %v420_v4 }
  0xe2   :  { %v382_v46 = vpack.c.bf16 %v267_v37, %v267_v37  ;;  %v268_v47 = vmax.f32 %v255_v38, 0.0  ;;  %v390_v48 = vpack.c.bf16 %v275_v39, %v275_v39  ;;  %v197_v49 = vmul.f32 %v547_v10, %v142_v42  ;;  %v440_v50 = vpop.f32.mrb[5].mxu0  ;;  %v456_v51 = vpop.f32.mrb[5].mxu1  ;;  %v421_v38 = vld [vmem:[%s655_s4 + $0x18] sm:$0xff]  }
  0xe3   :  { %v276_v52 = vmax.f32 %v263_v40, 0.0  ;;  %v145_v53 = vpop.f32.mrb[6].mxu0  ;;  %v205_v54 = vmul.f32 %v547_v10, %v174_v45  ;;  %v177_v56 = vpop.f32.mrb[6].mxu1 }
  0xe4   :  { %334 = vst.msk [vmem:[%s657_s5] sm:$0xf] %vm333_vm3, %v382_v46  ;;  %v383_v58 = vpack.c.bf16 %v268_v47, %v268_v47  ;;  %342 = vst.msk [vmem:[%s657_s5 + $0x20] sm:$0xf] %vm333_vm3, %v390_v48  ;;  %v217_v59 = vadd.f32 %v558_v14, %v197_v49  ;;  %v198_v60 = vmul.f32 %v547_v10, %v145_v53  ;;  %v441_v61 = vpop.f32.mrb[7].mxu0  ;;  %v457_v63 = vpop.f32.mrb[7].mxu1 }
  0xe5   :  { %v206_v62 = vmul.f32 %v547_v10, %v177_v56  ;;  %v391_v0 = vpack.c.bf16 %v276_v52, %v276_v52  ;;  %v225_v1 = vadd.f32 %v558_v14, %v205_v54  ;;  %v410_v54 = vunpack.c.h.bf16 %v421_v38 }
  0xe6   :  { %335 = vst.msk [vmem:[%s657_s5 + $0x4] sm:$0xf] %vm333_vm3, %v383_v58  ;;  %v256_v2 = vadd.f32 %v401_v43, %v217_v59  ;;  %v218_v3 = vadd.f32 %v558_v14, %v198_v60 }
  0xe7   :  { %v226_v5 = vadd.f32 %v558_v14, %v206_v62  ;;  %343 = vst.msk [vmem:[%s657_s5 + $0x24] sm:$0xf] %vm333_vm3, %v391_v0  ;;  %v264_v6 = vadd.f32 %v417_v55, %v225_v1 }
  0xe8   :  { %v269_v7 = vmax.f32 %v256_v2, 0.0  ;;  %v257_v8 = vadd.f32 %v402_v44, %v218_v3  ;;  %v409_v44 = vunpack.c.l.bf16 %v421_v38 }
  0xe9   :  { %v265_v9 = vadd.f32 %v418_v57, %v226_v5  ;;  %v277_v12 = vmax.f32 %v264_v6, 0.0  ;;  %v150_v13 = vpop.f32.mrb[8].mxu0  ;;  %v182_v16 = vpop.f32.mrb[8].mxu1 }
  0xea   :  { %v384_v17 = vpack.c.bf16 %v269_v7, %v269_v7  ;;  %v270_v18 = vmax.f32 %v257_v8, 0.0  ;;  %v199_v19 = vmul.f32 %v547_v10, %v150_v13  ;;  %v444_v20 = vpop.f32.mrb[9].mxu0  ;;  %v460_v22 = vpop.f32.mrb[9].mxu1  ;;  %v207_v26 = vmul.f32 %v547_v10, %v182_v16 }
  0xeb   :  { %v278_v21 = vmax.f32 %v265_v9, 0.0  ;;  %v392_v23 = vpack.c.bf16 %v277_v12, %v277_v12  ;;  %v153_v24 = vpop.f32.mrb[10].mxu0  ;;  %v185_v28 = vpop.f32.mrb[10].mxu1 }
  0xec   :  { %336 = vst.msk [vmem:[%s657_s5 + $0x8] sm:$0xf] %vm333_vm3, %v384_v17  ;;  %v385_v29 = vpack.c.bf16 %v270_v18, %v270_v18  ;;  %v219_v30 = vadd.f32 %v558_v14, %v199_v19  ;;  %v200_v32 = vmul.f32 %v547_v10, %v153_v24  ;;  %v445_v33 = vpop.f32.mrb[11].mxu0  ;;  %v461_v34 = vpop.f32.mrb[11].mxu1  ;;  %v227_v35 = vadd.f32 %v558_v14, %v207_v26 }
  0xed   :  { %v393_v31 = vpack.c.bf16 %v278_v21, %v278_v21  ;;  %344 = vst.msk [vmem:[%s657_s5 + $0x28] sm:$0xf] %vm333_vm3, %v392_v23 }
  0xee   :  { %337 = vst.msk [vmem:[%s657_s5 + $0xc] sm:$0xf] %vm333_vm3, %v385_v29  ;;  %v258_v36 = vadd.f32 %v405_v15, %v219_v30  ;;  %v220_v37 = vadd.f32 %v558_v14, %v200_v32  ;;  %v266_v39 = vadd.f32 %v253_v27, %v227_v35 }
  0xef   :  { %345 = vst.msk [vmem:[%s657_s5 + $0x2c] sm:$0xf] %vm333_vm3, %v393_v31 }
  0xf0   :  { %v271_v40 = vmax.f32 %v258_v36, 0.0  ;;  %v259_v41 = vadd.f32 %v406_v25, %v220_v37  ;;  %v279_v42 = vmax.f32 %v266_v39, 0.0 }
  0xf1   :  { %v158_v43 = vpop.f32.mrb[12].mxu0 }
  0xf2   :  { %v386_v45 = vpack.c.bf16 %v271_v40, %v271_v40  ;;  %v272_v46 = vmax.f32 %v259_v41, 0.0  ;;  %v201_v47 = vmul.f32 %v547_v10, %v158_v43  ;;  %v448_v48 = vpop.f32.mrb[13].mxu0  ;;  %v394_v49 = vpack.c.bf16 %v279_v42, %v279_v42 }
  0xf3   :  { %v161_v50 = vpop.f32.mrb[14].mxu0 }
  0xf4   :  { %338 = vst.msk [vmem:[%s657_s5 + $0x10] sm:$0xf] %vm333_vm3, %v386_v45  ;;  %v387_v51 = vpack.c.bf16 %v272_v46, %v272_v46  ;;  %v221_v52 = vadd.f32 %v558_v14, %v201_v47  ;;  %v202_v53 = vmul.f32 %v547_v10, %v161_v50  ;;  %v449_v55 = vpop.f32.mrb[15].mxu0 }
  0xf5   :  { %347 = vst.msk [vmem:[%s657_s5 + $0x30] sm:$0x1] %vm346_vm4, %v394_v49 }
  0xf6   :  { %339 = vst.msk [vmem:[%s657_s5 + $0x14] sm:$0xf] %vm333_vm3, %v387_v51  ;;  %v260_v56 = vadd.f32 %v409_v44, %v221_v52  ;;  %v222_v57 = vadd.f32 %v558_v14, %v202_v53 }
  0xf8   :  { %v273_v58 = vmax.f32 %v260_v56, 0.0  ;;  %v261_v59 = vadd.f32 %v410_v54, %v222_v57 }
  0xfa   :  { %v388_v60 = vpack.c.bf16 %v273_v58, %v273_v58  ;;  %v274_v61 = vmax.f32 %v261_v59, 0.0 }
  0xfc   :  { %340 = vst.msk [vmem:[%s657_s5 + $0x18] sm:$0xf] %vm333_vm3, %v388_v60  ;;  %v389_v10 = vpack.c.bf16 %v274_v61, %v274_v61 }
  0xfe   :  { %341 = vst.msk [vmem:[%s657_s5 + $0x1c] sm:$0xf] %vm333_vm3, %v389_v10 }

// kernel: pretrained_facenet_forward.65
= control target key start
LH: loop header
LB: loop body
LE: loop exit
PB: predicated region body
PF: predicated region fallthrough
CT: control target
= control target key end

     0   :  { %v415_v0 = vmov 0.0   ;;  %vm416_vm0 = vmmov 0   ;;  %vm80_vm1 = vcmask 261120   ;;  %vm296_vm2 = vcmask 191488   ;;  %s570_s1 = inlined_call_operand.vmem [shape: bf16[32,24], index: 1, kind: input, shape index: {}]   ;;  %s571_s0 = inlined_call_operand.vmem [shape: bf16[98,32], index: 0, kind: input, shape index: {}]   ;;  %s572_s2 = inlined_call_operand.vmem [shape: f32[1,24], index: 2, kind: input, shape index: {}]   ;;  %s573_s3 = inlined_call_operand.vmem [shape: f32[1,24], index: 3, kind: input, shape index: {}]   ;;  %s574_s4 = inlined_call_operand.vmem [shape: bf16[98,24], index: 4, kind: output, shape index: {}]  }
   0x1   :  { %368 = vmatprep.subr.bf16.mxu0 %v415_v0  ;;  %v406_v1 = vld [vmem:[%s570_s1] sm:$0xff]   ;;  %400 = vmatprep.subr.bf16.mxu1 %v415_v0  ;;  %v407_v2 = vld [vmem:[%s570_s1 + $0x8] sm:$0xff]   ;;  %v412_v7 = vld [vmem:[%s571_s0 + $0x10] sm:$0xff]   ;;  %vm309_vm3 = vcmask 188416  }
   0x2   :  { %372 = vmatprep.mubr.msk.bf16.mxu0 %vm416_vm0, %v415_v0  ;;  %388 = vmatprep.mubr.msk.bf16.mxu1 %vm416_vm0, %v415_v0  ;;  %v408_v3 = vld [vmem:[%s571_s0] sm:$0xff]   ;;  %v410_v5 = vld [vmem:[%s571_s0 + $0x8] sm:$0xff]   ;;  %v413_v8 = vld [vmem:[%s571_s0 + $0x30] ss:$0 sps:$4 sm:$0x11]  }
   0x3   :  { %369 = vmatpush3.bf16.msra.mxu0 %v406_v1  ;;  %402 = vmatpush3.bf16.msra.mxu1 %v406_v1  ;;  %v409_v4 = vld [vmem:[%s571_s0 + $0x20] sm:$0xff]   ;;  %v411_v6 = vld [vmem:[%s571_s0 + $0x28] sm:$0xff]   ;;  %v414_v9 = vld [vmem:[%s571_s0 + $0x18] sm:$0xff]  }
   0x4   :  { %370 = vmatprep.subr.bf16.mxu0 %v415_v0  ;;  %401 = vmatprep.subr.bf16.mxu1 %v415_v0  ;;  %v486_v10 = vld [vmem:[%s572_s2] ss:$0 sm:$0xff] }
   0x5   :  { %v491_v12 = vld [vmem:[%s573_s3] ss:$0 sm:$0xff] }
   0x7   :  { %371 = vmatpush3.bf16.msra.mxu0 %v407_v2  ;;  %403 = vmatpush3.bf16.msra.mxu1 %v407_v2 }
   0xa   :  { %373 = vmatmul.mubr.msk.bf16.vlgmr.msra.gmra.mrb[0].mxu0 %vm80_vm1, %v408_v3  ;;  %389 = vmatmul.mubr.msk.bf16.vlgmr.msra.gmra.mrb[0].mxu1 %vm80_vm1, %v409_v4 }
   0xb   :  { %376 = vmatprep.mubr.msk.bf16.mxu0 %vm416_vm0, %v415_v0  ;;  %392 = vmatprep.mubr.msk.bf16.mxu1 %vm416_vm0, %v415_v0 }
  0x12   :  { %377 = vmatmul.mubr.msk.bf16.gmra.mrb[4].mxu0 %vm80_vm1, %v410_v5  ;;  %393 = vmatmul.mubr.msk.bf16.gmra.mrb[4].mxu1 %vm80_vm1, %v411_v6 }
  0x13   :  { %380 = vmatprep.mubr.msk.bf16.mxu0 %vm416_vm0, %v415_v0  ;;  %396 = vmatprep.mubr.msk.bf16.mxu1 %vm416_vm0, %v415_v0 }
  0x1a   :  { %381 = vmatmul.mubr.msk.bf16.gmra.mrb[8].mxu0 %vm80_vm1, %v412_v7  ;;  %397 = vmatmul.mubr.msk.bf16.gmra.mrb[8].mxu1 %vm80_vm1, %v413_v8 }
  0x1b   :  { %384 = vmatprep.mubr.msk.bf16.mxu0 %vm416_vm0, %v415_v0 }
  0x22   :  { %385 = vmatmul.mubr.msk.bf16.gmra.mrb[12].mxu0 %vm80_vm1, %v414_v9 }
  0xdd   :  { %v136_v11 = vpop.f32.mrb[0].mxu0  ;;  %v168_v13 = vpop.f32.mrb[0].mxu1 }
  0xde   :  { %v197_v14 = vmul.f32 %v486_v10, %v136_v11  ;;  %v374_v15 = vpop.f32.mrb[1].mxu0  ;;  %v205_v16 = vmul.f32 %v486_v10, %v168_v13  ;;  %v390_v17 = vpop.f32.mrb[1].mxu1 }
  0xdf   :  { %v139_v18 = vpop.f32.mrb[2].mxu0  ;;  %v171_v19 = vpop.f32.mrb[2].mxu1 }
  0xe0   :  { %v217_v20 = vadd.f32 %v491_v12, %v197_v14  ;;  %v198_v21 = vmul.f32 %v486_v10, %v139_v18  ;;  %v375_v22 = vpop.f32.mrb[3].mxu0  ;;  %v225_v23 = vadd.f32 %v491_v12, %v205_v16  ;;  %v206_v24 = vmul.f32 %v486_v10, %v171_v19  ;;  %v391_v25 = vpop.f32.mrb[3].mxu1 }
  0xe2   :  { %v230_v26 = vmax.f32 %v217_v20, 0.0  ;;  %v218_v27 = vadd.f32 %v491_v12, %v198_v21  ;;  %v238_v28 = vmax.f32 %v225_v23, 0.0  ;;  %v226_v29 = vadd.f32 %v491_v12, %v206_v24 }
  0xe4   :  { %v346_v30 = vpack.c.bf16 %v230_v26, %v230_v26  ;;  %v231_v31 = vmax.f32 %v218_v27, 0.0  ;;  %v354_v32 = vpack.c.bf16 %v238_v28, %v238_v28  ;;  %v239_v33 = vmax.f32 %v226_v29, 0.0 }
  0xe5   :  { %v144_v34 = vpop.f32.mrb[4].mxu0  ;;  %v176_v35 = vpop.f32.mrb[4].mxu1 }
  0xe6   :  { %297 = vst.msk [vmem:[%s574_s4] sm:$0xf] %vm296_vm2, %v346_v30  ;;  %v347_v36 = vpack.c.bf16 %v231_v31, %v231_v31  ;;  %305 = vst.msk [vmem:[%s574_s4 + $0x20] sm:$0xf] %vm296_vm2, %v354_v32  ;;  %v199_v37 = vmul.f32 %v486_v10, %v144_v34  ;;  %v378_v38 = vpop.f32.mrb[5].mxu0  ;;  %v355_v39 = vpack.c.bf16 %v239_v33, %v239_v33  ;;  %v394_v41 = vpop.f32.mrb[5].mxu1 }
  0xe7   :  { %v207_v40 = vmul.f32 %v486_v10, %v176_v35  ;;  %v147_v42 = vpop.f32.mrb[6].mxu0  ;;  %v179_v43 = vpop.f32.mrb[6].mxu1 }
  0xe8   :  { %298 = vst.msk [vmem:[%s574_s4 + $0x4] sm:$0xf] %vm296_vm2, %v347_v36  ;;  %v219_v44 = vadd.f32 %v491_v12, %v199_v37  ;;  %306 = vst.msk [vmem:[%s574_s4 + $0x24] sm:$0xf] %vm296_vm2, %v355_v39  ;;  %v200_v45 = vmul.f32 %v486_v10, %v147_v42  ;;  %v379_v46 = vpop.f32.mrb[7].mxu0  ;;  %v208_v48 = vmul.f32 %v486_v10, %v179_v43  ;;  %v395_v49 = vpop.f32.mrb[7].mxu1 }
  0xe9   :  { %v227_v47 = vadd.f32 %v491_v12, %v207_v40 }
  0xea   :  { %v232_v50 = vmax.f32 %v219_v44, 0.0  ;;  %v220_v51 = vadd.f32 %v491_v12, %v200_v45  ;;  %v228_v53 = vadd.f32 %v491_v12, %v208_v48 }
  0xeb   :  { %v240_v52 = vmax.f32 %v227_v47, 0.0 }
  0xec   :  { %v348_v54 = vpack.c.bf16 %v232_v50, %v232_v50  ;;  %v233_v55 = vmax.f32 %v220_v51, 0.0  ;;  %v241_v57 = vmax.f32 %v228_v53, 0.0 }
  0xed   :  { %v356_v56 = vpack.c.bf16 %v240_v52, %v240_v52  ;;  %v152_v58 = vpop.f32.mrb[8].mxu0  ;;  %v184_v59 = vpop.f32.mrb[8].mxu1 }
  0xee   :  { %299 = vst.msk [vmem:[%s574_s4 + $0x8] sm:$0xf] %vm296_vm2, %v348_v54  ;;  %v349_v60 = vpack.c.bf16 %v233_v55, %v233_v55  ;;  %v201_v61 = vmul.f32 %v486_v10, %v152_v58  ;;  %v382_v62 = vpop.f32.mrb[9].mxu0  ;;  %v357_v63 = vpack.c.bf16 %v241_v57, %v241_v57  ;;  %v209_v0 = vmul.f32 %v486_v10, %v184_v59  ;;  %v398_v1 = vpop.f32.mrb[9].mxu1 }
  0xef   :  { %307 = vst.msk [vmem:[%s574_s4 + $0x28] sm:$0xf] %vm296_vm2, %v356_v56  ;;  %v155_v2 = vpop.f32.mrb[10].mxu0  ;;  %v187_v3 = vpop.f32.mrb[10].mxu1 }
  0xf0   :  { %300 = vst.msk [vmem:[%s574_s4 + $0xc] sm:$0xf] %vm296_vm2, %v349_v60  ;;  %v221_v4 = vadd.f32 %v491_v12, %v201_v61  ;;  %308 = vst.msk [vmem:[%s574_s4 + $0x2c] sm:$0xf] %vm296_vm2, %v357_v63  ;;  %v202_v5 = vmul.f32 %v486_v10, %v155_v2  ;;  %v383_v6 = vpop.f32.mrb[11].mxu0  ;;  %v229_v7 = vadd.f32 %v491_v12, %v209_v0  ;;  %v399_v8 = vpop.f32.mrb[11].mxu1 }
  0xf2   :  { %v234_v9 = vmax.f32 %v221_v4, 0.0  ;;  %v222_v11 = vadd.f32 %v491_v12, %v202_v5  ;;  %v242_v13 = vmax.f32 %v229_v7, 0.0 }
  0xf4   :  { %v350_v14 = vpack.c.bf16 %v234_v9, %v234_v9  ;;  %v235_v15 = vmax.f32 %v222_v11, 0.0  ;;  %v358_v16 = vpack.c.bf16 %v242_v13, %v242_v13 }
  0xf5   :  { %v160_v17 = vpop.f32.mrb[12].mxu0 }
  0xf6   :  { %301 = vst.msk [vmem:[%s574_s4 + $0x10] sm:$0xf] %vm296_vm2, %v350_v14  ;;  %v351_v18 = vpack.c.bf16 %v235_v15, %v235_v15  ;;  %v203_v19 = vmul.f32 %v486_v10, %v160_v17  ;;  %v386_v20 = vpop.f32.mrb[13].mxu0 }
  0xf7   :  { %310 = vst.msk [vmem:[%s574_s4 + $0x30] sm:$0x1] %vm309_vm3, %v358_v16  ;;  %v163_v21 = vpop.f32.mrb[14].mxu0 }
  0xf8   :  { %302 = vst.msk [vmem:[%s574_s4 + $0x14] sm:$0xf] %vm296_vm2, %v351_v18  ;;  %v223_v22 = vadd.f32 %v491_v12, %v203_v19  ;;  %v204_v23 = vmul.f32 %v486_v10, %v163_v21  ;;  %v387_v24 = vpop.f32.mrb[15].mxu0 }
  0xfa   :  { %v236_v25 = vmax.f32 %v223_v22, 0.0  ;;  %v224_v26 = vadd.f32 %v491_v12, %v204_v23 }
  0xfc   :  { %v352_v27 = vpack.c.bf16 %v236_v25, %v236_v25  ;;  %v237_v28 = vmax.f32 %v224_v26, 0.0 }
  0xfe   :  { %303 = vst.msk [vmem:[%s574_s4 + $0x18] sm:$0xf] %vm296_vm2, %v352_v27  ;;  %v353_v29 = vpack.c.bf16 %v237_v28, %v237_v28 }
 0x100   :  { %304 = vst.msk [vmem:[%s574_s4 + $0x1c] sm:$0xf] %vm296_vm2, %v353_v29 }

// kernel: pretrained_facenet_forward.64
= control target key start
LH: loop header
LB: loop body
LE: loop exit
PB: predicated region body
PF: predicated region fallthrough
CT: control target
= control target key end

     0   :  { %vm193_vm0 = vcmask 261120   ;;  %vm332_vm1 = vcmask 388096   ;;  %vm335_vm2 = vcmask 385024   ;;  %s549_s1 = inlined_call_operand.vmem [shape: bf16[288,48], index: 1, kind: input, shape index: {}]   ;;  %s550_s0 = inlined_call_operand.vmem [shape: bf16[18,288], index: 0, kind: input, shape index: {}]   ;;  %s551_s2 = inlined_call_operand.vmem [shape: f32[1,48], index: 2, kind: input, shape index: {}]   ;;  %s552_s3 = inlined_call_operand.vmem [shape: f32[1,48], index: 3, kind: input, shape index: {}]   ;;  %s553_s4 = inlined_call_operand.vmem [shape: bf16[18,48], index: 4, kind: output, shape index: {}]  }
   0x1   :  { %v415_v0 = vld [vmem:[%s549_s1 + $0x40] sm:$0xff]   ;;  %v417_v2 = vld [vmem:[%s549_s1 + $0x48] sm:$0xff]   ;;  %v419_v4 = vld [vmem:[%s549_s1 + $0x50] sm:$0xff]  }
   0x2   :  { %v416_v1 = vld [vmem:[%s549_s1] sm:$0xff]   ;;  %375 = vmatprep.subr.bf16.mxu0 %v415_v0  ;;  %v418_v3 = vld [vmem:[%s549_s1 + $0x8] sm:$0xff]   ;;  %v420_v5 = vld [vmem:[%s549_s1 + $0x10] sm:$0xff]  }
   0x3   :  { %376 = vmatpush3.bf16.msra.mxu0 %v416_v1  ;;  %v421_v6 = vld [vmem:[%s549_s1 + $0x58] sm:$0xff]   ;;  %v423_v8 = vld [vmem:[%s549_s1 + $0x60] sm:$0xff]   ;;  %v425_v11 = vld [vmem:[%s549_s1 + $0x68] sm:$0xff]  }
   0x4   :  { %377 = vmatprep.subr.bf16.mxu0 %v417_v2  ;;  %v422_v7 = vld [vmem:[%s549_s1 + $0x18] sm:$0xff]   ;;  %v429_v9 = vld [vmem:[%s549_s1 + $0x80] sm:$0xff]   ;;  %v432_v12 = vld [vmem:[%s549_s1 + $0x88] sm:$0xff]  }
   0x5   :  { %v424_v10 = vld [vmem:[%s549_s1 + $0x20] sm:$0xff]   ;;  %407 = vmatprep.subr.bf16.mxu1 %v429_v9  ;;  %v426_v13 = vld [vmem:[%s549_s1 + $0x28] sm:$0xff]   ;;  %v427_v15 = vld [vmem:[%s549_s1 + $0x70] sm:$0xff]  }
   0x6   :  { %408 = vmatpush3.bf16.msra.mxu1 %v429_v9  ;;  %v435_v14 = vld [vmem:[%s550_s0 + $0x4] ss:$12 sps:$4 sm:$0xff]   ;;  %v436_v16 = vld [vmem:[%s550_s0 + $0x8] ss:$12 sps:$4 sm:$0xff]   ;;  %v430_v19 = vld [vmem:[%s549_s1 + $0x78] sm:$0xff]  }
   0x7   :  { %378 = vmatpush3.bf16.msra.mxu0 %v418_v3  ;;  %409 = vmatprep.subr.bf16.mxu1 %v432_v12  ;;  %v437_v17 = vld [vmem:[%s550_s0 + $0x20] ss:$0 sps:$4 sm:$0x11]   ;;  %v428_v18 = vld [vmem:[%s549_s1 + $0x30] sm:$0xff]   ;;  %v431_v20 = vld [vmem:[%s549_s1 + $0x38] sm:$0xff]  }
   0x8   :  { %379 = vmatprep.subr.bf16.mxu0 %v419_v4  ;;  %232 = vmatprep.mubr.bf16.mxu0 %v435_v14  ;;  %v22_v21 = vld [vmem:[%s550_s0 + $0x18] sm:$0x11]  ;;  %v433_v22 = vld [vmem:[%s550_s0] ss:$12 sps:$4 sm:$0xff]  }
   0x9   :  { %411 = vmatprep.mubr.msk.bf16.mxu1 %vm193_vm0, %v436_v16  ;;  %v345_v23 = vcombine.high %v22_v21, %v22_v21  ;;  %v344_v24 = vcombine.low %v22_v21, %v22_v21  ;;  %v367_v34 = vld [vmem:[%s551_s2] ss:$0 sm:$0xff] }
   0xa   :  { %410 = vmatpush3.bf16.msra.mxu1 %v432_v12  ;;  %v368_v37 = vld [vmem:[%s552_s3] ss:$0 sm:$0xff] }
   0xb   :  { %380 = vmatpush3.bf16.msra.mxu0 %v420_v5 }
   0xc   :  { %381 = vmatprep.subr.bf16.mxu0 %v421_v6 }
   0xd   :  { %412 = vmatmul.mubr.msk.bf16.vlgmr.msra.gmra.mrb[0].mxu1 %vm193_vm0, %v437_v17 }
   0xf   :  { %382 = vmatpush3.bf16.msra.mxu0 %v422_v7 }
  0x10   :  { %383 = vmatprep.subr.bf16.mxu0 %v423_v8 }
  0x13   :  { %384 = vmatpush3.bf16.msra.mxu0 %v424_v10 }
  0x14   :  { %385 = vmatprep.subr.bf16.mxu0 %v425_v11 }
  0x17   :  { %386 = vmatpush3.bf16.msra.mxu0 %v426_v13 }
  0x18   :  { %387 = vmatprep.subr.bf16.mxu0 %v427_v15 }
  0x1b   :  { %388 = vmatpush3.bf16.msra.mxu0 %v428_v18 }
  0x1c   :  { %389 = vmatprep.subr.bf16.mxu0 %v430_v19 }
  0x1f   :  { %390 = vmatpush3.bf16.msra.mxu0 %v431_v20 }
  0x22   :  { %233 = vmatmul.mubr.bf16.vlgmr.msra.gmra.mrb[0].mxu0 %v433_v22 }
  0x23   :  { %240 = vmatprep.mubr.bf16.mxu0 %v345_v23 }
  0x2a   :  { %241 = vmatmul.mubr.bf16.gmra.mrb[4].mxu0 %v344_v24 }
  0xe0   :  { %v413_v25 = vpop.f32.mrb[0].mxu1 }
  0xe1   :  { %v282_v26 = vpop.f32.mrb[1].mxu1 }
  0xe2   :  { %v414_v27 = vpop.f32.mrb[2].mxu1 }
  0xe3   :  { %v285_v28 = vpop.f32.mrb[3].mxu1 }
  0xf5   :  { %v391_v29 = vpop.f32.mrb[0].mxu0 }
  0xf6   :  { %v392_v30 = vpop.f32.mrb[1].mxu0 }
  0xf7   :  { %v393_v31 = vadd.f32 %v392_v30, %v391_v29  ;;  %v394_v32 = vpop.f32.mrb[2].mxu0 }
  0xf8   :  { %v395_v33 = vpop.f32.mrb[3].mxu0 }
  0xf9   :  { %v396_v35 = vadd.f32 %v395_v33, %v394_v32  ;;  %v283_v36 = vadd.f32 %v393_v31, %v282_v26 }
  0xfb   :  { %v303_v38 = vmul.f32 %v367_v34, %v283_v36  ;;  %v286_v39 = vadd.f32 %v396_v35, %v285_v28 }
  0xfd   :  { %v313_v40 = vadd.f32 %v368_v37, %v303_v38  ;;  %v304_v41 = vmul.f32 %v367_v34, %v286_v39  ;;  %v397_v42 = vpop.f32.mrb[4].mxu0 }
  0xfe   :  { %v398_v43 = vpop.f32.mrb[5].mxu0 }
  0xff   :  { %v316_v44 = vmax.f32 %v313_v40, 0.0  ;;  %v314_v45 = vadd.f32 %v368_v37, %v304_v41  ;;  %v399_v46 = vadd.f32 %v398_v43, %v397_v42  ;;  %v400_v47 = vpop.f32.mrb[6].mxu0 }
 0x100   :  { %v401_v48 = vpop.f32.mrb[7].mxu0 }
 0x101   :  { %v372_v49 = vpack.c.bf16 %v316_v44, %v316_v44  ;;  %v317_v50 = vmax.f32 %v314_v45, 0.0  ;;  %v291_v51 = vadd.f32 %v413_v25, %v399_v46 }
 0x103   :  { %333 = vst.msk [vmem:[%s553_s4] sm:$0xf] %vm332_vm1, %v372_v49  ;;  %v373_v52 = vpack.c.bf16 %v317_v50, %v317_v50  ;;  %v305_v53 = vmul.f32 %v367_v34, %v291_v51 }
 0x105   :  { %334 = vst.msk [vmem:[%s553_s4 + $0x4] sm:$0xf] %vm332_vm1, %v373_v52  ;;  %v315_v54 = vadd.f32 %v368_v37, %v305_v53 }
 0x107   :  { %v318_v55 = vmax.f32 %v315_v54, 0.0 }
 0x109   :  { %v374_v56 = vpack.c.bf16 %v318_v55, %v318_v55 }
 0x10b   :  { %336 = vst.msk [vmem:[%s553_s4 + $0x8] sm:$0x1] %vm335_vm2, %v374_v56 }

// kernel: pretrained_facenet_forward.66
= control target key start
LH: loop header
LB: loop body
LE: loop exit
PB: predicated region body
PF: predicated region fallthrough
CT: control target
= control target key end

     0   :  { %v564_v0 = vmov 0   ;;  %vm199_vm0 = vcmask 719872   ;;  %vm221_vm1 = vcmask 1043456   ;;  %vm419_vm2 = vcmask 191488   ;;  %s793_s1 = inlined_call_operand.vmem [shape: bf16[216,24], index: 1, kind: input, shape index: {}]   ;;  %s794_s0 = inlined_call_operand.vmem [shape: bf16[98,216], index: 0, kind: input, shape index: {}]   ;;  %s795_s2 = inlined_call_operand.vmem [shape: f32[1,24], index: 2, kind: input, shape index: {}]   ;;  %s796_s3 = inlined_call_operand.vmem [shape: f32[1,24], index: 3, kind: input, shape index: {}]   ;;  %s797_s4 = inlined_call_operand.vmem [shape: bf16[98,24], index: 4, kind: output, shape index: {}]  }
   0x1   :  { %225 = vmatprep.subr.bf16.mxu0 %v564_v0  ;;  %v530_v1 = vld [vmem:[%s793_s1] sm:$0xff]   ;;  %501 = vmatprep.subr.bf16.mxu1 %v564_v0  ;;  %v531_v2 = vld [vmem:[%s793_s1 + $0x8] sm:$0xff]   ;;  %v532_v3 = vld [vmem:[%s793_s1 + $0x10] sm:$0xff]   ;;  %vm432_vm3 = vcmask 188416  }
   0x2   :  { %226 = vmatpush1.bf16.msra.mxu0 %v530_v1  ;;  %515 = vmatpush1.bf16.msra.mxu1 %v530_v1  ;;  %v533_v4 = vld [vmem:[%s793_s1 + $0x18] sm:$0xff]   ;;  %v534_v5 = vld [vmem:[%s793_s1 + $0x20] sm:$0xff]   ;;  %v535_v8 = vld [vmem:[%s793_s1 + $0x28] sm:$0xff]  }
   0x3   :  { %227 = vmatprep.subr.bf16.mxu0 %v564_v0  ;;  %502 = vmatprep.subr.bf16.mxu1 %v564_v0  ;;  %v546_v6 = vld [vmem:[%s794_s0 + $0x4] ss:$8 sps:$4 sm:$0xff]   ;;  %v536_v9 = vld [vmem:[%s793_s1 + $0x30] sm:$0xff]   ;;  %v537_v10 = vld [vmem:[%s793_s1 + $0x38] sm:$0xff]  }
   0x4   :  { %466 = vmatprep.mubr.msk.bf16.mxu0 %vm199_vm0, %v546_v6  ;;  %v549_v7 = vld [vmem:[%s794_s0 + $0x44] ss:$8 sps:$4 sm:$0xff]   ;;  %v540_v13 = vld [vmem:[%s793_s1 + $0x50] sm:$0xff]   ;;  %v541_v14 = vld [vmem:[%s793_s1 + $0x58] sm:$0xff]  }
   0x5   :  { %470 = vmatprep.mubr.msk.bf16.mxu1 %vm199_vm0, %v549_v7  ;;  %v538_v11 = vld [vmem:[%s793_s1 + $0x40] sm:$0xff]   ;;  %v539_v12 = vld [vmem:[%s793_s1 + $0x48] sm:$0xff]   ;;  %v550_v20 = vld [vmem:[%s794_s0 + $0x14] ss:$8 sps:$4 sm:$0xff]  }
   0x6   :  { %228 = vmatpush1.bf16.msra.mxu0 %v531_v2  ;;  %516 = vmatpush1.bf16.msra.mxu1 %v531_v2  ;;  %v542_v15 = vld [vmem:[%s793_s1 + $0x60] sm:$0xff]   ;;  %v543_v16 = vld [vmem:[%s793_s1 + $0x68] ss:$0 sps:$4 sm:$0xff]   ;;  %v553_v21 = vld [vmem:[%s794_s0 + $0x54] ss:$8 sps:$4 sm:$0xff]  }
   0x7   :  { %229 = vmatprep.subr.bf16.mxu0 %v564_v0  ;;  %503 = vmatprep.subr.bf16.mxu1 %v564_v0  ;;  %v223_v17 = vsel %vm221_vm1, %v543_v16, 0  ;;  %v544_v18 = vld [vmem:[%s794_s0] ss:$8 sps:$4 sm:$0xff]   ;;  %v552_v23 = vld [vmem:[%s794_s0 + $0x10] ss:$8 sps:$4 sm:$0xff]  }
   0x8   :  { %v547_v19 = vld [vmem:[%s794_s0 + $0x40] ss:$8 sps:$4 sm:$0xff]   ;;  %v557_v24 = vld [vmem:[%s794_s0 + $0x50] ss:$8 sps:$4 sm:$0xff]   ;;  %v555_v25 = vld [vmem:[%s794_s0 + $0x24] ss:$8 sps:$4 sm:$0xff]  }
   0x9   :  { %v30_v22 = vld [vmem:[%s794_s0 + $0x60] sm:$0x11]  ;;  %v560_v29 = vld [vmem:[%s794_s0 + $0x34] ss:$8 sps:$4 sm:$0xff]   ;;  %v563_v30 = vld [vmem:[%s794_s0 + $0x30] ss:$8 sps:$4 sm:$0xff]  }
   0xa   :  { %230 = vmatpush1.bf16.msra.mxu0 %v532_v3  ;;  %517 = vmatpush1.bf16.msra.mxu1 %v532_v3  ;;  %v451_v26 = vcombine.high %v30_v22, %v30_v22  ;;  %v558_v27 = vld [vmem:[%s794_s0 + $0x20] ss:$8 sps:$4 sm:$0xff]   ;;  %v450_v28 = vcombine.low %v30_v22, %v30_v22 }
   0xb   :  { %231 = vmatprep.subr.bf16.mxu0 %v564_v0  ;;  %504 = vmatprep.subr.bf16.mxu1 %v564_v0  ;;  %v709_v31 = vld [vmem:[%s795_s2] ss:$0 sm:$0xff] }
   0xc   :  { %v714_v33 = vld [vmem:[%s796_s3] ss:$0 sm:$0xff] }
   0xe   :  { %232 = vmatpush1.bf16.msra.mxu0 %v533_v4  ;;  %518 = vmatpush1.bf16.msra.mxu1 %v533_v4 }
   0xf   :  { %233 = vmatprep.subr.bf16.mxu0 %v564_v0  ;;  %505 = vmatprep.subr.bf16.mxu1 %v564_v0 }
  0x12   :  { %234 = vmatpush1.bf16.msra.mxu0 %v534_v5  ;;  %519 = vmatpush1.bf16.msra.mxu1 %v534_v5 }
  0x13   :  { %235 = vmatprep.subr.bf16.mxu0 %v564_v0  ;;  %506 = vmatprep.subr.bf16.mxu1 %v564_v0 }
  0x16   :  { %236 = vmatpush1.bf16.msra.mxu0 %v535_v8  ;;  %520 = vmatpush1.bf16.msra.mxu1 %v535_v8 }
  0x17   :  { %237 = vmatprep.subr.bf16.mxu0 %v564_v0  ;;  %507 = vmatprep.subr.bf16.mxu1 %v564_v0 }
  0x1a   :  { %238 = vmatpush1.bf16.msra.mxu0 %v536_v9  ;;  %521 = vmatpush1.bf16.msra.mxu1 %v536_v9 }
  0x1b   :  { %239 = vmatprep.subr.bf16.mxu0 %v564_v0  ;;  %508 = vmatprep.subr.bf16.mxu1 %v564_v0 }
  0x1e   :  { %240 = vmatpush1.bf16.msra.mxu0 %v537_v10  ;;  %522 = vmatpush1.bf16.msra.mxu1 %v537_v10 }
  0x1f   :  { %241 = vmatprep.subr.bf16.mxu0 %v564_v0  ;;  %509 = vmatprep.subr.bf16.mxu1 %v564_v0 }
  0x22   :  { %242 = vmatpush1.bf16.msra.mxu0 %v538_v11  ;;  %523 = vmatpush1.bf16.msra.mxu1 %v538_v11 }
  0x23   :  { %243 = vmatprep.subr.bf16.mxu0 %v564_v0  ;;  %510 = vmatprep.subr.bf16.mxu1 %v564_v0 }
  0x26   :  { %244 = vmatpush1.bf16.msra.mxu0 %v539_v12  ;;  %524 = vmatpush1.bf16.msra.mxu1 %v539_v12 }
  0x27   :  { %245 = vmatprep.subr.bf16.mxu0 %v564_v0  ;;  %511 = vmatprep.subr.bf16.mxu1 %v564_v0 }
  0x2a   :  { %246 = vmatpush1.bf16.msra.mxu0 %v540_v13  ;;  %525 = vmatpush1.bf16.msra.mxu1 %v540_v13 }
  0x2b   :  { %247 = vmatprep.subr.bf16.mxu0 %v564_v0  ;;  %512 = vmatprep.subr.bf16.mxu1 %v564_v0 }
  0x2e   :  { %248 = vmatpush1.bf16.msra.mxu0 %v541_v14  ;;  %526 = vmatpush1.bf16.msra.mxu1 %v541_v14 }
  0x2f   :  { %249 = vmatprep.subr.bf16.mxu0 %v564_v0  ;;  %513 = vmatprep.subr.bf16.mxu1 %v564_v0 }
  0x32   :  { %250 = vmatpush1.bf16.msra.mxu0 %v542_v15  ;;  %527 = vmatpush1.bf16.msra.mxu1 %v542_v15 }
  0x33   :  { %251 = vmatprep.subr.bf16.mxu0 %v564_v0  ;;  %514 = vmatprep.subr.bf16.mxu1 %v564_v0 }
  0x36   :  { %252 = vmatpush1.bf16.msra.mxu0 %v223_v17  ;;  %528 = vmatpush1.bf16.msra.mxu1 %v223_v17 }
  0x39   :  { %258 = vmatmul.mubr.bf16.vlgmr.msra.gmra.mrb[0].mxu0 %v544_v18  ;;  %290 = vmatmul.mubr.bf16.vlgmr.msra.gmra.mrb[0].mxu1 %v547_v19 }
  0x3a   :  { %467 = vmatprep.mubr.msk.bf16.mxu0 %vm199_vm0, %v550_v20  ;;  %471 = vmatprep.mubr.msk.bf16.mxu1 %vm199_vm0, %v553_v21 }
  0x41   :  { %266 = vmatmul.mubr.bf16.gmra.mrb[4].mxu0 %v552_v23  ;;  %298 = vmatmul.mubr.bf16.gmra.mrb[4].mxu1 %v557_v24 }
  0x42   :  { %468 = vmatprep.mubr.msk.bf16.mxu0 %vm199_vm0, %v555_v25  ;;  %472 = vmatprep.mubr.msk.bf16.mxu1 %vm199_vm0, %v451_v26 }
  0x49   :  { %274 = vmatmul.mubr.bf16.gmra.mrb[8].mxu0 %v558_v27  ;;  %306 = vmatmul.mubr.bf16.gmra.mrb[8].mxu1 %v450_v28 }
  0x4a   :  { %469 = vmatprep.mubr.msk.bf16.mxu0 %vm199_vm0, %v560_v29 }
  0x51   :  { %282 = vmatmul.mubr.bf16.gmra.mrb[12].mxu0 %v563_v30 }
 0x10c   :  { %v259_v32 = vpop.f32.mrb[0].mxu0  ;;  %v291_v34 = vpop.f32.mrb[0].mxu1 }
 0x10d   :  { %v320_v35 = vmul.f32 %v709_v31, %v259_v32  ;;  %v261_v36 = vpop.f32.mrb[1].mxu0  ;;  %v328_v37 = vmul.f32 %v709_v31, %v291_v34  ;;  %v293_v38 = vpop.f32.mrb[1].mxu1 }
 0x10e   :  { %v262_v39 = vpop.f32.mrb[2].mxu0  ;;  %v294_v40 = vpop.f32.mrb[2].mxu1 }
 0x10f   :  { %v340_v41 = vadd.f32 %v714_v33, %v320_v35  ;;  %v321_v42 = vmul.f32 %v709_v31, %v262_v39  ;;  %v264_v43 = vpop.f32.mrb[3].mxu0  ;;  %v348_v44 = vadd.f32 %v714_v33, %v328_v37  ;;  %v329_v45 = vmul.f32 %v709_v31, %v294_v40  ;;  %v296_v46 = vpop.f32.mrb[3].mxu1 }
 0x111   :  { %v353_v47 = vmax.f32 %v340_v41, 0.0  ;;  %v341_v48 = vadd.f32 %v714_v33, %v321_v42  ;;  %v361_v49 = vmax.f32 %v348_v44, 0.0  ;;  %v349_v50 = vadd.f32 %v714_v33, %v329_v45 }
 0x113   :  { %v488_v51 = vpack.c.bf16 %v353_v47, %v353_v47  ;;  %v354_v52 = vmax.f32 %v341_v48, 0.0  ;;  %v496_v53 = vpack.c.bf16 %v361_v49, %v361_v49  ;;  %v362_v54 = vmax.f32 %v349_v50, 0.0 }
 0x114   :  { %v267_v55 = vpop.f32.mrb[4].mxu0  ;;  %v299_v56 = vpop.f32.mrb[4].mxu1 }
 0x115   :  { %420 = vst.msk [vmem:[%s797_s4] sm:$0xf] %vm419_vm2, %v488_v51  ;;  %v489_v57 = vpack.c.bf16 %v354_v52, %v354_v52  ;;  %428 = vst.msk [vmem:[%s797_s4 + $0x20] sm:$0xf] %vm419_vm2, %v496_v53  ;;  %v322_v58 = vmul.f32 %v709_v31, %v267_v55  ;;  %v269_v59 = vpop.f32.mrb[5].mxu0  ;;  %v497_v60 = vpack.c.bf16 %v362_v54, %v362_v54  ;;  %v301_v62 = vpop.f32.mrb[5].mxu1 }
 0x116   :  { %v330_v61 = vmul.f32 %v709_v31, %v299_v56  ;;  %v270_v63 = vpop.f32.mrb[6].mxu0  ;;  %v302_v0 = vpop.f32.mrb[6].mxu1 }
 0x117   :  { %421 = vst.msk [vmem:[%s797_s4 + $0x4] sm:$0xf] %vm419_vm2, %v489_v57  ;;  %v342_v1 = vadd.f32 %v714_v33, %v322_v58  ;;  %429 = vst.msk [vmem:[%s797_s4 + $0x24] sm:$0xf] %vm419_vm2, %v497_v60  ;;  %v323_v2 = vmul.f32 %v709_v31, %v270_v63  ;;  %v272_v3 = vpop.f32.mrb[7].mxu0  ;;  %v331_v5 = vmul.f32 %v709_v31, %v302_v0  ;;  %v304_v6 = vpop.f32.mrb[7].mxu1 }
 0x118   :  { %v350_v4 = vadd.f32 %v714_v33, %v330_v61 }
 0x119   :  { %v355_v7 = vmax.f32 %v342_v1, 0.0  ;;  %v343_v8 = vadd.f32 %v714_v33, %v323_v2  ;;  %v351_v10 = vadd.f32 %v714_v33, %v331_v5 }
 0x11a   :  { %v363_v9 = vmax.f32 %v350_v4, 0.0 }
 0x11b   :  { %v490_v11 = vpack.c.bf16 %v355_v7, %v355_v7  ;;  %v356_v12 = vmax.f32 %v343_v8, 0.0  ;;  %v364_v14 = vmax.f32 %v351_v10, 0.0 }
 0x11c   :  { %v498_v13 = vpack.c.bf16 %v363_v9, %v363_v9  ;;  %v275_v15 = vpop.f32.mrb[8].mxu0  ;;  %v307_v16 = vpop.f32.mrb[8].mxu1 }
 0x11d   :  { %422 = vst.msk [vmem:[%s797_s4 + $0x8] sm:$0xf] %vm419_vm2, %v490_v11  ;;  %v491_v17 = vpack.c.bf16 %v356_v12, %v356_v12  ;;  %v324_v18 = vmul.f32 %v709_v31, %v275_v15  ;;  %v277_v19 = vpop.f32.mrb[9].mxu0  ;;  %v499_v20 = vpack.c.bf16 %v364_v14, %v364_v14  ;;  %v332_v21 = vmul.f32 %v709_v31, %v307_v16  ;;  %v309_v22 = vpop.f32.mrb[9].mxu1 }
 0x11e   :  { %430 = vst.msk [vmem:[%s797_s4 + $0x28] sm:$0xf] %vm419_vm2, %v498_v13  ;;  %v278_v23 = vpop.f32.mrb[10].mxu0  ;;  %v310_v24 = vpop.f32.mrb[10].mxu1 }
 0x11f   :  { %423 = vst.msk [vmem:[%s797_s4 + $0xc] sm:$0xf] %vm419_vm2, %v491_v17  ;;  %v344_v25 = vadd.f32 %v714_v33, %v324_v18  ;;  %431 = vst.msk [vmem:[%s797_s4 + $0x2c] sm:$0xf] %vm419_vm2, %v499_v20  ;;  %v325_v26 = vmul.f32 %v709_v31, %v278_v23  ;;  %v280_v27 = vpop.f32.mrb[11].mxu0  ;;  %v352_v28 = vadd.f32 %v714_v33, %v332_v21  ;;  %v311_v29 = vpop.f32.mrb[11].mxu1 }
 0x121   :  { %v357_v30 = vmax.f32 %v344_v25, 0.0  ;;  %v345_v32 = vadd.f32 %v714_v33, %v325_v26  ;;  %v365_v34 = vmax.f32 %v352_v28, 0.0 }
 0x123   :  { %v492_v35 = vpack.c.bf16 %v357_v30, %v357_v30  ;;  %v358_v36 = vmax.f32 %v345_v32, 0.0  ;;  %v500_v37 = vpack.c.bf16 %v365_v34, %v365_v34 }
 0x124   :  { %v283_v38 = vpop.f32.mrb[12].mxu0 }
 0x125   :  { %424 = vst.msk [vmem:[%s797_s4 + $0x10] sm:$0xf] %vm419_vm2, %v492_v35  ;;  %v493_v39 = vpack.c.bf16 %v358_v36, %v358_v36  ;;  %v326_v40 = vmul.f32 %v709_v31, %v283_v38  ;;  %v285_v41 = vpop.f32.mrb[13].mxu0 }
 0x126   :  { %433 = vst.msk [vmem:[%s797_s4 + $0x30] sm:$0x1] %vm432_vm3, %v500_v37  ;;  %v286_v42 = vpop.f32.mrb[14].mxu0 }
 0x127   :  { %425 = vst.msk [vmem:[%s797_s4 + $0x14] sm:$0xf] %vm419_vm2, %v493_v39  ;;  %v346_v43 = vadd.f32 %v714_v33, %v326_v40  ;;  %v327_v44 = vmul.f32 %v709_v31, %v286_v42  ;;  %v288_v45 = vpop.f32.mrb[15].mxu0 }
 0x129   :  { %v359_v46 = vmax.f32 %v346_v43, 0.0  ;;  %v347_v47 = vadd.f32 %v714_v33, %v327_v44 }
 0x12b   :  { %v494_v48 = vpack.c.bf16 %v359_v46, %v359_v46  ;;  %v360_v49 = vmax.f32 %v347_v47, 0.0 }
 0x12d   :  { %426 = vst.msk [vmem:[%s797_s4 + $0x18] sm:$0xf] %vm419_vm2, %v494_v48  ;;  %v495_v50 = vpack.c.bf16 %v360_v49, %v360_v49 }
 0x12f   :  { %427 = vst.msk [vmem:[%s797_s4 + $0x1c] sm:$0xf] %vm419_vm2, %v495_v50 }

// kernel: pretrained_facenet_forward.68
= control target key start
LH: loop header
LB: loop body
LE: loop exit
PB: predicated region body
PF: predicated region fallthrough
CT: control target
= control target key end

     0   :  { %vm85_vm0 = vcmask 916480   ;;  %vm179_vm1 = vcmask 253952   ;;  %vm176_vm2 = vcmask 257024   ;;  %s309_s1 = inlined_call_operand.vmem [shape: bf16[112,32], index: 1, kind: input, shape index: {}]   ;;  %s310_s0 = inlined_call_operand.vmem [shape: bf16[18,112], index: 0, kind: input, shape index: {}]   ;;  %s311_s2 = inlined_call_operand.vmem [shape: f32[1,32], index: 2, kind: input, shape index: {}]   ;;  %s312_s3 = inlined_call_operand.vmem [shape: f32[1,32], index: 3, kind: input, shape index: {}]   ;;  %s313_s4 = inlined_call_operand.vmem [shape: bf16[18,32], index: 4, kind: output, shape index: {}]  }
   0x1   :  { %v231_v0 = vld [vmem:[%s309_s1] sm:$0xff]   ;;  %v232_v1 = vld [vmem:[%s309_s1 + $0x8] sm:$0xff]   ;;  %v233_v2 = vld [vmem:[%s309_s1 + $0x10] sm:$0xff]  }
   0x2   :  { %213 = vmatprep.subr.bf16.mxu0 %v231_v0  ;;  %v234_v3 = vld [vmem:[%s309_s1 + $0x18] sm:$0xff]   ;;  %v238_v4 = vld [vmem:[%s310_s0] sm:$0xff]   ;;  %v236_v6 = vld [vmem:[%s309_s1 + $0x28] sm:$0xff]  }
   0x3   :  { %214 = vmatpush3.bf16.msra.mxu0 %v231_v0  ;;  %227 = vmatprep.mubr.msk.bf16.mxu0 %vm85_vm0, %v238_v4  ;;  %v235_v5 = vld [vmem:[%s309_s1 + $0x20] sm:$0xff]   ;;  %v237_v7 = vld [vmem:[%s309_s1 + $0x30] sm:$0xff]   ;;  %v239_v8 = vld [vmem:[%s310_s0 + $0x8] ss:$0 sps:$4 sm:$0x11]  }
   0x4   :  { %215 = vmatprep.subr.bf16.mxu0 %v232_v1  ;;  %v196_v9 = vld [vmem:[%s311_s2] ss:$0 sm:$0xff] }
   0x5   :  { %v197_v11 = vld [vmem:[%s312_s3] ss:$0 sm:$0xff] }
   0x7   :  { %216 = vmatpush3.bf16.msra.mxu0 %v232_v1 }
   0x8   :  { %217 = vmatprep.subr.bf16.mxu0 %v233_v2 }
   0xb   :  { %218 = vmatpush3.bf16.msra.mxu0 %v233_v2 }
   0xc   :  { %219 = vmatprep.subr.bf16.mxu0 %v234_v3 }
   0xf   :  { %220 = vmatpush3.bf16.msra.mxu0 %v234_v3 }
  0x10   :  { %221 = vmatprep.subr.bf16.mxu0 %v235_v5 }
  0x13   :  { %222 = vmatpush3.bf16.msra.mxu0 %v235_v5 }
  0x14   :  { %223 = vmatprep.subr.bf16.mxu0 %v236_v6 }
  0x17   :  { %224 = vmatpush3.bf16.msra.mxu0 %v236_v6 }
  0x18   :  { %225 = vmatprep.subr.bf16.mxu0 %v237_v7 }
  0x1b   :  { %226 = vmatpush3.bf16.msra.mxu0 %v237_v7 }
  0x1e   :  { %228 = vmatmul.mubr.msk.bf16.vlgmr.msra.gmra.mrb[0].mxu0 %vm85_vm0, %v239_v8 }
  0xf1   :  { %v229_v10 = vpop.f32.mrb[0].mxu0 }
  0xf2   :  { %v149_v12 = vmul.f32 %v229_v10, %v196_v9  ;;  %v126_v13 = vpop.f32.mrb[1].mxu0 }
  0xf3   :  { %v147_v14 = vmul.f32 %v196_v9, %v126_v13  ;;  %v230_v15 = vpop.f32.mrb[2].mxu0 }
  0xf4   :  { %v159_v16 = vadd.f32 %v197_v11, %v149_v12  ;;  %v129_v17 = vpop.f32.mrb[3].mxu0 }
  0xf5   :  { %v157_v18 = vadd.f32 %v197_v11, %v147_v14  ;;  %v148_v19 = vmul.f32 %v196_v9, %v129_v17 }
  0xf6   :  { %v162_v20 = vmax.f32 %v159_v16, 0.0 }
  0xf7   :  { %v160_v21 = vmax.f32 %v157_v18, 0.0  ;;  %v158_v22 = vadd.f32 %v197_v11, %v148_v19 }
  0xf8   :  { %v203_v23 = vpack.c.bf16 %v162_v20, %v162_v20 }
  0xf9   :  { %v201_v24 = vpack.c.bf16 %v160_v21, %v160_v21  ;;  %v161_v25 = vmax.f32 %v158_v22, 0.0 }
  0xfa   :  { %180 = vst.msk [vmem:[%s313_s4 + $0x8] sm:$0x1] %vm179_vm1, %v203_v23 }
  0xfb   :  { %177 = vst.msk [vmem:[%s313_s4] sm:$0xf] %vm176_vm2, %v201_v24  ;;  %v202_v26 = vpack.c.bf16 %v161_v25, %v161_v25 }
  0xfd   :  { %178 = vst.msk [vmem:[%s313_s4 + $0x4] sm:$0xf] %vm176_vm2, %v202_v26 }

// kernel: pretrained_facenet_forward.67
= control target key start
LH: loop header
LB: loop body
LE: loop exit
PB: predicated region body
PF: predicated region fallthrough
CT: control target
= control target key end

     0   :  { %v324_v0 = vmov 0   ;;  %vm144_vm0 = vcmask 719872   ;;  %vm151_vm1 = vcmask 1043456   ;;  %vm239_vm2 = vcmask 257024   ;;  %s444_s1 = inlined_call_operand.vmem [shape: bf16[216,32], index: 1, kind: input, shape index: {}]   ;;  %s445_s0 = inlined_call_operand.vmem [shape: bf16[18,216], index: 0, kind: input, shape index: {}]   ;;  %s446_s2 = inlined_call_operand.vmem [shape: f32[1,32], index: 2, kind: input, shape index: {}]   ;;  %s447_s3 = inlined_call_operand.vmem [shape: f32[1,32], index: 3, kind: input, shape index: {}]   ;;  %s448_s4 = inlined_call_operand.vmem [shape: bf16[18,32], index: 4, kind: output, shape index: {}]  }
   0x1   :  { %155 = vmatprep.subr.bf16.mxu0 %v324_v0  ;;  %276 = vmatprep.subr.bf16.mxu1 %v324_v0  ;;  %v305_v1 = vld [vmem:[%s444_s1] sm:$0xff]   ;;  %v306_v2 = vld [vmem:[%s444_s1 + $0x8] sm:$0xff]   ;;  %v307_v3 = vld [vmem:[%s444_s1 + $0x10] sm:$0xff]   ;;  %vm242_vm3 = vcmask 253952  }
   0x2   :  { %156 = vmatpush1.bf16.msra.mxu0 %v305_v1  ;;  %290 = vmatpush1.bf16.msra.mxu1 %v305_v1  ;;  %v308_v4 = vld [vmem:[%s444_s1 + $0x18] sm:$0xff]   ;;  %v309_v5 = vld [vmem:[%s444_s1 + $0x20] sm:$0xff]   ;;  %v20_v7 = vld [vmem:[%s445_s0 + $0x10] sm:$0x11] }
   0x3   :  { %157 = vmatprep.subr.bf16.mxu0 %v324_v0  ;;  %277 = vmatprep.subr.bf16.mxu1 %v324_v0  ;;  %v321_v6 = vld [vmem:[%s445_s0 + $0x4] ss:$8 sps:$4 sm:$0xff]   ;;  %v251_v8 = vcombine.high %v20_v7, %v20_v7  ;;  %v311_v10 = vld [vmem:[%s444_s1 + $0x30] sm:$0xff]   ;;  %v312_v11 = vld [vmem:[%s444_s1 + $0x38] sm:$0xff]   ;;  %v250_v20 = vcombine.low %v20_v7, %v20_v7 }
   0x4   :  { %266 = vmatprep.mubr.msk.bf16.mxu0 %vm144_vm0, %v321_v6  ;;  %v310_v9 = vld [vmem:[%s444_s1 + $0x28] sm:$0xff]   ;;  %v313_v12 = vld [vmem:[%s444_s1 + $0x40] sm:$0xff]   ;;  %v315_v14 = vld [vmem:[%s444_s1 + $0x50] sm:$0xff]  }
   0x5   :  { %267 = vmatprep.mubr.msk.bf16.mxu1 %vm144_vm0, %v251_v8  ;;  %v314_v13 = vld [vmem:[%s444_s1 + $0x48] sm:$0xff]   ;;  %v316_v15 = vld [vmem:[%s444_s1 + $0x58] sm:$0xff]   ;;  %v317_v16 = vld [vmem:[%s444_s1 + $0x60] sm:$0xff]  }
   0x6   :  { %158 = vmatpush1.bf16.msra.mxu0 %v306_v2  ;;  %291 = vmatpush1.bf16.msra.mxu1 %v306_v2  ;;  %v318_v17 = vld [vmem:[%s444_s1 + $0x68] ss:$0 sps:$4 sm:$0xff]   ;;  %v268_v21 = vld [vmem:[%s446_s2] ss:$0 sm:$0xff] }
   0x7   :  { %159 = vmatprep.subr.bf16.mxu0 %v324_v0  ;;  %278 = vmatprep.subr.bf16.mxu1 %v324_v0  ;;  %v153_v18 = vsel %vm151_vm1, %v318_v17, 0  ;;  %v319_v19 = vld [vmem:[%s445_s0] ss:$8 sps:$4 sm:$0xff]  }
   0x8   :  { %v269_v23 = vld [vmem:[%s447_s3] ss:$0 sm:$0xff] }
   0xa   :  { %160 = vmatpush1.bf16.msra.mxu0 %v307_v3  ;;  %292 = vmatpush1.bf16.msra.mxu1 %v307_v3 }
   0xb   :  { %161 = vmatprep.subr.bf16.mxu0 %v324_v0  ;;  %279 = vmatprep.subr.bf16.mxu1 %v324_v0 }
   0xe   :  { %162 = vmatpush1.bf16.msra.mxu0 %v308_v4  ;;  %293 = vmatpush1.bf16.msra.mxu1 %v308_v4 }
   0xf   :  { %163 = vmatprep.subr.bf16.mxu0 %v324_v0  ;;  %280 = vmatprep.subr.bf16.mxu1 %v324_v0 }
  0x12   :  { %164 = vmatpush1.bf16.msra.mxu0 %v309_v5  ;;  %294 = vmatpush1.bf16.msra.mxu1 %v309_v5 }
  0x13   :  { %165 = vmatprep.subr.bf16.mxu0 %v324_v0  ;;  %281 = vmatprep.subr.bf16.mxu1 %v324_v0 }
  0x16   :  { %166 = vmatpush1.bf16.msra.mxu0 %v310_v9  ;;  %295 = vmatpush1.bf16.msra.mxu1 %v310_v9 }
  0x17   :  { %167 = vmatprep.subr.bf16.mxu0 %v324_v0  ;;  %282 = vmatprep.subr.bf16.mxu1 %v324_v0 }
  0x1a   :  { %168 = vmatpush1.bf16.msra.mxu0 %v311_v10  ;;  %296 = vmatpush1.bf16.msra.mxu1 %v311_v10 }
  0x1b   :  { %169 = vmatprep.subr.bf16.mxu0 %v324_v0  ;;  %283 = vmatprep.subr.bf16.mxu1 %v324_v0 }
  0x1e   :  { %170 = vmatpush1.bf16.msra.mxu0 %v312_v11  ;;  %297 = vmatpush1.bf16.msra.mxu1 %v312_v11 }
  0x1f   :  { %171 = vmatprep.subr.bf16.mxu0 %v324_v0  ;;  %284 = vmatprep.subr.bf16.mxu1 %v324_v0 }
  0x22   :  { %172 = vmatpush1.bf16.msra.mxu0 %v313_v12  ;;  %298 = vmatpush1.bf16.msra.mxu1 %v313_v12 }
  0x23   :  { %173 = vmatprep.subr.bf16.mxu0 %v324_v0  ;;  %285 = vmatprep.subr.bf16.mxu1 %v324_v0 }
  0x26   :  { %174 = vmatpush1.bf16.msra.mxu0 %v314_v13  ;;  %299 = vmatpush1.bf16.msra.mxu1 %v314_v13 }
  0x27   :  { %175 = vmatprep.subr.bf16.mxu0 %v324_v0  ;;  %286 = vmatprep.subr.bf16.mxu1 %v324_v0 }
  0x2a   :  { %176 = vmatpush1.bf16.msra.mxu0 %v315_v14  ;;  %300 = vmatpush1.bf16.msra.mxu1 %v315_v14 }
  0x2b   :  { %177 = vmatprep.subr.bf16.mxu0 %v324_v0  ;;  %287 = vmatprep.subr.bf16.mxu1 %v324_v0 }
  0x2e   :  { %178 = vmatpush1.bf16.msra.mxu0 %v316_v15  ;;  %301 = vmatpush1.bf16.msra.mxu1 %v316_v15 }
  0x2f   :  { %179 = vmatprep.subr.bf16.mxu0 %v324_v0  ;;  %288 = vmatprep.subr.bf16.mxu1 %v324_v0 }
  0x32   :  { %180 = vmatpush1.bf16.msra.mxu0 %v317_v16  ;;  %302 = vmatpush1.bf16.msra.mxu1 %v317_v16 }
  0x33   :  { %181 = vmatprep.subr.bf16.mxu0 %v324_v0  ;;  %289 = vmatprep.subr.bf16.mxu1 %v324_v0 }
  0x36   :  { %182 = vmatpush1.bf16.msra.mxu0 %v153_v18  ;;  %303 = vmatpush1.bf16.msra.mxu1 %v153_v18 }
  0x39   :  { %188 = vmatmul.mubr.bf16.vlgmr.msra.gmra.mrb[0].mxu0 %v319_v19  ;;  %196 = vmatmul.mubr.bf16.vlgmr.msra.gmra.mrb[0].mxu1 %v250_v20 }
 0x10c   :  { %v189_v22 = vpop.f32.mrb[0].mxu0  ;;  %v197_v24 = vpop.f32.mrb[0].mxu1 }
 0x10d   :  { %v210_v25 = vmul.f32 %v268_v21, %v189_v22  ;;  %v212_v26 = vmul.f32 %v268_v21, %v197_v24  ;;  %v191_v27 = vpop.f32.mrb[1].mxu0  ;;  %v199_v28 = vpop.f32.mrb[1].mxu1 }
 0x10e   :  { %v192_v29 = vpop.f32.mrb[2].mxu0  ;;  %v200_v30 = vpop.f32.mrb[2].mxu1 }
 0x10f   :  { %v220_v31 = vadd.f32 %v269_v23, %v210_v25  ;;  %v222_v32 = vadd.f32 %v269_v23, %v212_v26  ;;  %v211_v33 = vmul.f32 %v268_v21, %v192_v29  ;;  %v194_v34 = vpop.f32.mrb[3].mxu0  ;;  %v201_v35 = vpop.f32.mrb[3].mxu1 }
 0x111   :  { %v223_v36 = vmax.f32 %v220_v31, 0.0  ;;  %v225_v37 = vmax.f32 %v222_v32, 0.0  ;;  %v221_v38 = vadd.f32 %v269_v23, %v211_v33 }
 0x113   :  { %v273_v39 = vpack.c.bf16 %v223_v36, %v223_v36  ;;  %v275_v40 = vpack.c.bf16 %v225_v37, %v225_v37  ;;  %v224_v41 = vmax.f32 %v221_v38, 0.0 }
 0x115   :  { %240 = vst.msk [vmem:[%s448_s4] sm:$0xf] %vm239_vm2, %v273_v39  ;;  %v274_v42 = vpack.c.bf16 %v224_v41, %v224_v41 }
 0x116   :  { %243 = vst.msk [vmem:[%s448_s4 + $0x8] sm:$0x1] %vm242_vm3, %v275_v40 }
 0x117   :  { %241 = vst.msk [vmem:[%s448_s4 + $0x4] sm:$0xf] %vm239_vm2, %v274_v42 }

// kernel: pretrained_facenet_forward.69
= control target key start
LH: loop header
LB: loop body
LE: loop exit
PB: predicated region body
PF: predicated region fallthrough
CT: control target
= control target key end

     0   :  { %vm85_vm0 = vcmask 916480   ;;  %vm179_vm1 = vcmask 122880   ;;  %vm176_vm2 = vcmask 125952   ;;  %s309_s1 = inlined_call_operand.vmem [shape: bf16[112,16], index: 1, kind: input, shape index: {}]   ;;  %s310_s0 = inlined_call_operand.vmem [shape: bf16[18,112], index: 0, kind: input, shape index: {}]   ;;  %s311_s2 = inlined_call_operand.vmem [shape: f32[1,16], index: 2, kind: input, shape index: {}]   ;;  %s312_s3 = inlined_call_operand.vmem [shape: f32[1,16], index: 3, kind: input, shape index: {}]   ;;  %s313_s4 = inlined_call_operand.vmem [shape: bf16[18,16], index: 4, kind: output, shape index: {}]  }
   0x1   :  { %v231_v0 = vld [vmem:[%s309_s1] sm:$0xff]   ;;  %v232_v1 = vld [vmem:[%s309_s1 + $0x8] sm:$0xff]   ;;  %v233_v2 = vld [vmem:[%s309_s1 + $0x10] sm:$0xff]  }
   0x2   :  { %213 = vmatprep.subr.bf16.mxu0 %v231_v0  ;;  %v234_v3 = vld [vmem:[%s309_s1 + $0x18] sm:$0xff]   ;;  %v238_v4 = vld [vmem:[%s310_s0] sm:$0xff]   ;;  %v236_v6 = vld [vmem:[%s309_s1 + $0x28] sm:$0xff]  }
   0x3   :  { %214 = vmatpush3.bf16.msra.mxu0 %v231_v0  ;;  %227 = vmatprep.mubr.msk.bf16.mxu0 %vm85_vm0, %v238_v4  ;;  %v235_v5 = vld [vmem:[%s309_s1 + $0x20] sm:$0xff]   ;;  %v237_v7 = vld [vmem:[%s309_s1 + $0x30] sm:$0xff]   ;;  %v239_v8 = vld [vmem:[%s310_s0 + $0x8] ss:$0 sps:$4 sm:$0x11]  }
   0x4   :  { %215 = vmatprep.subr.bf16.mxu0 %v232_v1  ;;  %v196_v9 = vld [vmem:[%s311_s2] ss:$0 sm:$0xff] }
   0x5   :  { %v197_v11 = vld [vmem:[%s312_s3] ss:$0 sm:$0xff] }
   0x7   :  { %216 = vmatpush3.bf16.msra.mxu0 %v232_v1 }
   0x8   :  { %217 = vmatprep.subr.bf16.mxu0 %v233_v2 }
   0xb   :  { %218 = vmatpush3.bf16.msra.mxu0 %v233_v2 }
   0xc   :  { %219 = vmatprep.subr.bf16.mxu0 %v234_v3 }
   0xf   :  { %220 = vmatpush3.bf16.msra.mxu0 %v234_v3 }
  0x10   :  { %221 = vmatprep.subr.bf16.mxu0 %v235_v5 }
  0x13   :  { %222 = vmatpush3.bf16.msra.mxu0 %v235_v5 }
  0x14   :  { %223 = vmatprep.subr.bf16.mxu0 %v236_v6 }
  0x17   :  { %224 = vmatpush3.bf16.msra.mxu0 %v236_v6 }
  0x18   :  { %225 = vmatprep.subr.bf16.mxu0 %v237_v7 }
  0x1b   :  { %226 = vmatpush3.bf16.msra.mxu0 %v237_v7 }
  0x1e   :  { %228 = vmatmul.mubr.msk.bf16.vlgmr.msra.gmra.mrb[0].mxu0 %vm85_vm0, %v239_v8 }
  0xf1   :  { %v229_v10 = vpop.f32.mrb[0].mxu0 }
  0xf2   :  { %v149_v12 = vmul.f32 %v229_v10, %v196_v9  ;;  %v126_v13 = vpop.f32.mrb[1].mxu0 }
  0xf3   :  { %v147_v14 = vmul.f32 %v196_v9, %v126_v13  ;;  %v230_v15 = vpop.f32.mrb[2].mxu0 }
  0xf4   :  { %v159_v16 = vadd.f32 %v197_v11, %v149_v12  ;;  %v129_v17 = vpop.f32.mrb[3].mxu0 }
  0xf5   :  { %v157_v18 = vadd.f32 %v197_v11, %v147_v14  ;;  %v148_v19 = vmul.f32 %v196_v9, %v129_v17 }
  0xf6   :  { %v162_v20 = vmax.f32 %v159_v16, 0.0 }
  0xf7   :  { %v160_v21 = vmax.f32 %v157_v18, 0.0  ;;  %v158_v22 = vadd.f32 %v197_v11, %v148_v19 }
  0xf8   :  { %v203_v23 = vpack.c.bf16 %v162_v20, %v162_v20 }
  0xf9   :  { %v201_v24 = vpack.c.bf16 %v160_v21, %v160_v21  ;;  %v161_v25 = vmax.f32 %v158_v22, 0.0 }
  0xfa   :  { %180 = vst.msk [vmem:[%s313_s4 + $0x8] sm:$0x1] %vm179_vm1, %v203_v23 }
  0xfb   :  { %177 = vst.msk [vmem:[%s313_s4] sm:$0xf] %vm176_vm2, %v201_v24  ;;  %v202_v26 = vpack.c.bf16 %v161_v25, %v161_v25 }
  0xfd   :  { %178 = vst.msk [vmem:[%s313_s4 + $0x4] sm:$0xf] %vm176_vm2, %v202_v26 }

// kernel: pretrained_facenet_forward.71
= control target key start
LH: loop header
LB: loop body
LE: loop exit
PB: predicated region body
PF: predicated region fallthrough
CT: control target
= control target key end

     0   :  { %vm48_vm0 = vcmask 261120   ;;  %vm151_vm1 = vcmask 909312   ;;  %vm148_vm2 = vcmask 912384   ;;  %s254_s1 = inlined_call_operand.vmem [shape: bf16[32,112], index: 1, kind: input, shape index: {}]   ;;  %s255_s0 = inlined_call_operand.vmem [shape: bf16[18,32], index: 0, kind: input, shape index: {}]   ;;  %s256_s2 = inlined_call_operand.vmem [shape: f32[1,112], index: 2, kind: input, shape index: {}]   ;;  %s257_s4 = inlined_call_operand.vmem [shape: bf16[18,112], index: 4, kind: input, shape index: {}]   ;;  %s258_s3 = inlined_call_operand.vmem [shape: f32[1,112], index: 3, kind: input, shape index: {}]   ;;  %s259_s5 = inlined_call_operand.vmem [shape: bf16[18,112], index: 5, kind: output, shape index: {}]  }
   0x1   :  { %v187_v0 = vld [vmem:[%s254_s1] sm:$0xff]   ;;  %v188_v1 = vld [vmem:[%s254_s1 + $0x8] sm:$0xff]  }
   0x2   :  { %179 = vmatprep.subr.bf16.mxu0 %v187_v0  ;;  %v189_v2 = vld [vmem:[%s255_s0] sm:$0xff]   ;;  %v190_v3 = vld [vmem:[%s255_s0 + $0x8] ss:$0 sps:$4 sm:$0x11]  }
   0x3   :  { %180 = vmatpush3.bf16.msra.mxu0 %v187_v0  ;;  %183 = vmatprep.mubr.msk.bf16.mxu0 %vm48_vm0, %v189_v2  ;;  %v163_v4 = vld [vmem:[%s256_s2] ss:$0 sm:$0xff]  ;;  %v125_v5 = vld [vmem:[%s257_s4 + $0x8] sm:$0x1] }
   0x4   :  { %181 = vmatprep.subr.bf16.mxu0 %v188_v1  ;;  %v172_v6 = vld [vmem:[%s257_s4] sm:$0xff]   ;;  %v128_v10 = vunpack.c.l.bf16 %v125_v5 }
   0x5   :  { %v164_v8 = vld [vmem:[%s258_s3] ss:$0 sm:$0xff]  ;;  %v173_v13 = vunpack.c.l.bf16 %v172_v6  ;;  %v174_v19 = vunpack.c.h.bf16 %v172_v6 }
   0x7   :  { %182 = vmatpush3.bf16.msra.mxu0 %v188_v1 }
   0xa   :  { %184 = vmatmul.mubr.msk.bf16.vlgmr.msra.gmra.mrb[0].mxu0 %vm48_vm0, %v190_v3 }
  0xdd   :  { %v185_v7 = vpop.f32.mrb[0].mxu0 }
  0xde   :  { %v112_v9 = vmul.f32 %v185_v7, %v163_v4  ;;  %v89_v11 = vpop.f32.mrb[1].mxu0 }
  0xdf   :  { %v110_v12 = vmul.f32 %v163_v4, %v89_v11  ;;  %v186_v14 = vpop.f32.mrb[2].mxu0 }
  0xe0   :  { %v122_v15 = vadd.f32 %v164_v8, %v112_v9  ;;  %v92_v16 = vpop.f32.mrb[3].mxu0 }
  0xe1   :  { %v120_v17 = vadd.f32 %v164_v8, %v110_v12  ;;  %v111_v18 = vmul.f32 %v163_v4, %v92_v16 }
  0xe2   :  { %v131_v20 = vadd.f32 %v128_v10, %v122_v15 }
  0xe3   :  { %v129_v21 = vadd.f32 %v173_v13, %v120_v17  ;;  %v121_v22 = vadd.f32 %v164_v8, %v111_v18 }
  0xe4   :  { %v134_v23 = vmax.f32 %v131_v20, 0.0 }
  0xe5   :  { %v132_v24 = vmax.f32 %v129_v21, 0.0  ;;  %v130_v25 = vadd.f32 %v174_v19, %v121_v22 }
  0xe6   :  { %v170_v26 = vpack.c.bf16 %v134_v23, %v134_v23 }
  0xe7   :  { %v168_v27 = vpack.c.bf16 %v132_v24, %v132_v24  ;;  %v133_v28 = vmax.f32 %v130_v25, 0.0 }
  0xe8   :  { %152 = vst.msk [vmem:[%s259_s5 + $0x8] sm:$0x1] %vm151_vm1, %v170_v26 }
  0xe9   :  { %149 = vst.msk [vmem:[%s259_s5] sm:$0xf] %vm148_vm2, %v168_v27  ;;  %v169_v29 = vpack.c.bf16 %v133_v28, %v133_v28 }
  0xeb   :  { %150 = vst.msk [vmem:[%s259_s5 + $0x4] sm:$0xf] %vm148_vm2, %v169_v29 }

// kernel: pretrained_facenet_forward.76
= control target key start
LH: loop header
LB: loop body
LE: loop exit
PB: predicated region body
PF: predicated region fallthrough
CT: control target
= control target key end

     0   :  { %vm85_vm0 = vcmask 916480   ;;  %vm179_vm1 = vcmask 778240   ;;  %vm176_vm2 = vcmask 781312   ;;  %s309_s1 = inlined_call_operand.vmem [shape: bf16[112,96], index: 1, kind: input, shape index: {}]   ;;  %s310_s0 = inlined_call_operand.vmem [shape: bf16[18,112], index: 0, kind: input, shape index: {}]   ;;  %s311_s2 = inlined_call_operand.vmem [shape: f32[1,96], index: 2, kind: input, shape index: {}]   ;;  %s312_s3 = inlined_call_operand.vmem [shape: f32[1,96], index: 3, kind: input, shape index: {}]   ;;  %s313_s4 = inlined_call_operand.vmem [shape: bf16[18,96], index: 4, kind: output, shape index: {}]  }
   0x1   :  { %v231_v0 = vld [vmem:[%s309_s1] sm:$0xff]   ;;  %v232_v1 = vld [vmem:[%s309_s1 + $0x8] sm:$0xff]   ;;  %v233_v2 = vld [vmem:[%s309_s1 + $0x10] sm:$0xff]  }
   0x2   :  { %213 = vmatprep.subr.bf16.mxu0 %v231_v0  ;;  %v234_v3 = vld [vmem:[%s309_s1 + $0x18] sm:$0xff]   ;;  %v238_v4 = vld [vmem:[%s310_s0] sm:$0xff]   ;;  %v236_v6 = vld [vmem:[%s309_s1 + $0x28] sm:$0xff]  }
   0x3   :  { %214 = vmatpush3.bf16.msra.mxu0 %v231_v0  ;;  %227 = vmatprep.mubr.msk.bf16.mxu0 %vm85_vm0, %v238_v4  ;;  %v235_v5 = vld [vmem:[%s309_s1 + $0x20] sm:$0xff]   ;;  %v237_v7 = vld [vmem:[%s309_s1 + $0x30] sm:$0xff]   ;;  %v239_v8 = vld [vmem:[%s310_s0 + $0x8] ss:$0 sps:$4 sm:$0x11]  }
   0x4   :  { %215 = vmatprep.subr.bf16.mxu0 %v232_v1  ;;  %v196_v9 = vld [vmem:[%s311_s2] ss:$0 sm:$0xff] }
   0x5   :  { %v197_v11 = vld [vmem:[%s312_s3] ss:$0 sm:$0xff] }
   0x7   :  { %216 = vmatpush3.bf16.msra.mxu0 %v232_v1 }
   0x8   :  { %217 = vmatprep.subr.bf16.mxu0 %v233_v2 }
   0xb   :  { %218 = vmatpush3.bf16.msra.mxu0 %v233_v2 }
   0xc   :  { %219 = vmatprep.subr.bf16.mxu0 %v234_v3 }
   0xf   :  { %220 = vmatpush3.bf16.msra.mxu0 %v234_v3 }
  0x10   :  { %221 = vmatprep.subr.bf16.mxu0 %v235_v5 }
  0x13   :  { %222 = vmatpush3.bf16.msra.mxu0 %v235_v5 }
  0x14   :  { %223 = vmatprep.subr.bf16.mxu0 %v236_v6 }
  0x17   :  { %224 = vmatpush3.bf16.msra.mxu0 %v236_v6 }
  0x18   :  { %225 = vmatprep.subr.bf16.mxu0 %v237_v7 }
  0x1b   :  { %226 = vmatpush3.bf16.msra.mxu0 %v237_v7 }
  0x1e   :  { %228 = vmatmul.mubr.msk.bf16.vlgmr.msra.gmra.mrb[0].mxu0 %vm85_vm0, %v239_v8 }
  0xf1   :  { %v229_v10 = vpop.f32.mrb[0].mxu0 }
  0xf2   :  { %v149_v12 = vmul.f32 %v229_v10, %v196_v9  ;;  %v126_v13 = vpop.f32.mrb[1].mxu0 }
  0xf3   :  { %v147_v14 = vmul.f32 %v196_v9, %v126_v13  ;;  %v230_v15 = vpop.f32.mrb[2].mxu0 }
  0xf4   :  { %v159_v16 = vadd.f32 %v197_v11, %v149_v12  ;;  %v129_v17 = vpop.f32.mrb[3].mxu0 }
  0xf5   :  { %v157_v18 = vadd.f32 %v197_v11, %v147_v14  ;;  %v148_v19 = vmul.f32 %v196_v9, %v129_v17 }
  0xf6   :  { %v162_v20 = vmax.f32 %v159_v16, 0.0 }
  0xf7   :  { %v160_v21 = vmax.f32 %v157_v18, 0.0  ;;  %v158_v22 = vadd.f32 %v197_v11, %v148_v19 }
  0xf8   :  { %v203_v23 = vpack.c.bf16 %v162_v20, %v162_v20 }
  0xf9   :  { %v201_v24 = vpack.c.bf16 %v160_v21, %v160_v21  ;;  %v161_v25 = vmax.f32 %v158_v22, 0.0 }
  0xfa   :  { %180 = vst.msk [vmem:[%s313_s4 + $0x8] sm:$0x1] %vm179_vm1, %v203_v23 }
  0xfb   :  { %177 = vst.msk [vmem:[%s313_s4] sm:$0xf] %vm176_vm2, %v201_v24  ;;  %v202_v26 = vpack.c.bf16 %v161_v25, %v161_v25 }
  0xfd   :  { %178 = vst.msk [vmem:[%s313_s4 + $0x4] sm:$0xf] %vm176_vm2, %v202_v26 }

// kernel: pretrained_facenet_forward.77
= control target key start
LH: loop header
LB: loop body
LE: loop exit
PB: predicated region body
PF: predicated region fallthrough
CT: control target
= control target key end

     0   :  { %v373_v1 = vmov 0.0   ;;  %vm374_vm0 = vmmov 0   ;;  %v375_v7 = vmov 1966171168   ;;  %v67_v9 = vlaneseq  ;;  %s467_s1 = inlined_call_operand.vmem [shape: bf16[288,48], index: 1, kind: input, shape index: {}]   ;;  %s468_s0 = inlined_call_operand.vmem [shape: bf16[2,288], index: 0, kind: input, shape index: {}]   ;;  %s469_s2 = inlined_call_operand.vmem [shape: f32[1,48], index: 2, kind: input, shape index: {}]   ;;  %s470_s3 = inlined_call_operand.vmem [shape: f32[1,48], index: 3, kind: input, shape index: {}]   ;;  %s471_s4 = inlined_call_operand.vmem [shape: bf16[2,48], index: 4, kind: output, shape index: {}]  }
   0x1   :  { %v355_v0 = vld [vmem:[%s467_s1 + $0x40] sm:$0xff]   ;;  %344 = vmatprep.subr.bf16.mxu1 %v373_v1  ;;  %348 = vmatprep.mubr.msk.bf16.mxu1 %vm374_vm0, %v373_v1  ;;  %v357_v3 = vld [vmem:[%s467_s1 + $0x48] sm:$0xff]   ;;  %v359_v5 = vld [vmem:[%s467_s1 + $0x50] sm:$0xff]   ;;  %v65_v8 = vunpack.c.l.s4 %v375_v7  ;;  %vm189_vm1 = vcmask 261120   ;;  %vm291_vm2 = vcmask 385024  }
   0x2   :  { %v356_v2 = vld [vmem:[%s467_s1] sm:$0xff]   ;;  %319 = vmatprep.subr.bf16.mxu0 %v355_v0  ;;  %v358_v4 = vld [vmem:[%s467_s1 + $0x8] sm:$0xff]   ;;  %v360_v6 = vld [vmem:[%s467_s1 + $0x10] sm:$0xff]   ;;  %v68_v13 = vshrl.u32 %v67_v9, 7 }
   0x3   :  { %320 = vmatpush3.bf16.msra.mxu0 %v356_v2  ;;  %v361_v10 = vld [vmem:[%s467_s1 + $0x58] sm:$0xff]   ;;  %v66_v12 = vunpack.c.0.s8 %v65_v8  ;;  %v363_v14 = vld [vmem:[%s467_s1 + $0x60] sm:$0xff]   ;;  %v365_v18 = vld [vmem:[%s467_s1 + $0x68] sm:$0xff]  }
   0x4   :  { %321 = vmatprep.subr.bf16.mxu0 %v357_v3  ;;  %v362_v11 = vld [vmem:[%s467_s1 + $0x18] sm:$0xff]   ;;  %v369_v15 = vld [vmem:[%s467_s1 + $0x80] sm:$0xff]   ;;  %v372_v19 = vld [vmem:[%s467_s1 + $0x88] sm:$0xff]  }
   0x5   :  { %v364_v16 = vld [vmem:[%s467_s1 + $0x20] sm:$0xff]   ;;  %v69_v17 = vsub.s32 %v66_v12, %v68_v13  ;;  %345 = vmatpush3.bf16.msra.mxu1 %v369_v15  ;;  %v366_v21 = vld [vmem:[%s467_s1 + $0x28] sm:$0xff]   ;;  %v367_v24 = vld [vmem:[%s467_s1 + $0x70] sm:$0xff]  }
   0x6   :  { %346 = vmatprep.subr.bf16.mxu1 %v373_v1  ;;  %v297_v20 = vld.sshfl [vmem:[%s468_s0] sm:$0x13 pattern:$0x75316420]  ;;  %v368_v27 = vld [vmem:[%s467_s1 + $0x30] sm:$0xff]   ;;  %v370_v28 = vld [vmem:[%s467_s1 + $0x78] sm:$0xff]  }
   0x7   :  { %322 = vmatpush3.bf16.msra.mxu0 %v358_v4  ;;  %v63_v22 = vcombine.high %v297_v20, %v297_v20  ;;  %v70_v23 = vrot.slane %v297_v20, %v69_v17  ;;  %v371_v29 = vld [vmem:[%s467_s1 + $0x38] sm:$0xff]   ;;  %v317_v38 = vld [vmem:[%s469_s2] ss:$0 sm:$0xff] }
   0x8   :  { %323 = vmatprep.subr.bf16.mxu0 %v359_v5  ;;  %v318_v41 = vld [vmem:[%s470_s3] ss:$0 sm:$0xff] }
   0x9   :  { %347 = vmatpush3.bf16.msra.mxu1 %v372_v19  ;;  %v77_v25 = vrot.slane %v63_v22, %v69_v17  ;;  %v78_v26 = vcombine.high %v70_v23, %v70_v23 }
   0xb   :  { %324 = vmatpush3.bf16.msra.mxu0 %v360_v6  ;;  %225 = vmatprep.mubr.bf16.mxu0 %v77_v25 }
   0xc   :  { %325 = vmatprep.subr.bf16.mxu0 %v361_v10  ;;  %349 = vmatmul.mubr.msk.bf16.vlgmr.msra.gmra.mrb[0].mxu1 %vm189_vm1, %v78_v26 }
   0xf   :  { %326 = vmatpush3.bf16.msra.mxu0 %v362_v11 }
  0x10   :  { %327 = vmatprep.subr.bf16.mxu0 %v363_v14 }
  0x13   :  { %328 = vmatpush3.bf16.msra.mxu0 %v364_v16 }
  0x14   :  { %329 = vmatprep.subr.bf16.mxu0 %v365_v18 }
  0x17   :  { %330 = vmatpush3.bf16.msra.mxu0 %v366_v21 }
  0x18   :  { %331 = vmatprep.subr.bf16.mxu0 %v367_v24 }
  0x1b   :  { %332 = vmatpush3.bf16.msra.mxu0 %v368_v27 }
  0x1c   :  { %333 = vmatprep.subr.bf16.mxu0 %v370_v28 }
  0x1f   :  { %334 = vmatpush3.bf16.msra.mxu0 %v371_v29 }
  0x22   :  { %226 = vmatmul.mubr.bf16.vlgmr.msra.gmra.mrb[0].mxu0 %v70_v23 }
  0xdf   :  { %v267_v30 = vpop.f32.mrb[0].mxu1 }
  0xe0   :  { %v350_v31 = vpop.f32.mrb[1].mxu1 }
  0xe1   :  { %v270_v32 = vpop.f32.mrb[2].mxu1 }
  0xe2   :  { %v351_v33 = vpop.f32.mrb[3].mxu1 }
  0xf5   :  { %v335_v34 = vpop.f32.mrb[0].mxu0 }
  0xf6   :  { %v336_v35 = vpop.f32.mrb[1].mxu0 }
  0xf7   :  { %v337_v36 = vadd.f32 %v336_v35, %v335_v34  ;;  %v338_v37 = vpop.f32.mrb[2].mxu0 }
  0xf8   :  { %v339_v39 = vpop.f32.mrb[3].mxu0 }
  0xf9   :  { %v268_v40 = vadd.f32 %v337_v36, %v267_v30 }
  0xfb   :  { %v280_v42 = vmul.f32 %v317_v38, %v268_v40 }
  0xfd   :  { %v288_v43 = vadd.f32 %v318_v41, %v280_v42 }
  0xff   :  { %v289_v44 = vmax.f32 %v288_v43, 0.0 }
 0x101   :  { %v290_v45 = vpack.c.bf16 %v289_v44, %v289_v44 }
 0x103   :  { %292 = vst.msk [vmem:[%s471_s4] sm:$0x1] %vm291_vm2, %v290_v45 }

// kernel: pretrained_facenet_forward.78
= control target key start
LH: loop header
LB: loop body
LE: loop exit
PB: predicated region body
PF: predicated region fallthrough
CT: control target
= control target key end

     0   :  { %v373_v1 = vmov 0.0   ;;  %vm374_vm0 = vmmov 0   ;;  %v375_v7 = vmov 1966171168   ;;  %v67_v9 = vlaneseq  ;;  %s467_s1 = inlined_call_operand.vmem [shape: bf16[288,32], index: 1, kind: input, shape index: {}]   ;;  %s468_s0 = inlined_call_operand.vmem [shape: bf16[2,288], index: 0, kind: input, shape index: {}]   ;;  %s469_s2 = inlined_call_operand.vmem [shape: f32[1,32], index: 2, kind: input, shape index: {}]   ;;  %s470_s3 = inlined_call_operand.vmem [shape: f32[1,32], index: 3, kind: input, shape index: {}]   ;;  %s471_s4 = inlined_call_operand.vmem [shape: bf16[2,32], index: 4, kind: output, shape index: {}]  }
   0x1   :  { %v355_v0 = vld [vmem:[%s467_s1 + $0x40] sm:$0xff]   ;;  %344 = vmatprep.subr.bf16.mxu1 %v373_v1  ;;  %348 = vmatprep.mubr.msk.bf16.mxu1 %vm374_vm0, %v373_v1  ;;  %v357_v3 = vld [vmem:[%s467_s1 + $0x48] sm:$0xff]   ;;  %v359_v5 = vld [vmem:[%s467_s1 + $0x50] sm:$0xff]   ;;  %v65_v8 = vunpack.c.l.s4 %v375_v7  ;;  %vm189_vm1 = vcmask 261120   ;;  %vm291_vm2 = vcmask 253952  }
   0x2   :  { %v356_v2 = vld [vmem:[%s467_s1] sm:$0xff]   ;;  %319 = vmatprep.subr.bf16.mxu0 %v355_v0  ;;  %v358_v4 = vld [vmem:[%s467_s1 + $0x8] sm:$0xff]   ;;  %v360_v6 = vld [vmem:[%s467_s1 + $0x10] sm:$0xff]   ;;  %v68_v13 = vshrl.u32 %v67_v9, 7 }
   0x3   :  { %320 = vmatpush3.bf16.msra.mxu0 %v356_v2  ;;  %v361_v10 = vld [vmem:[%s467_s1 + $0x58] sm:$0xff]   ;;  %v66_v12 = vunpack.c.0.s8 %v65_v8  ;;  %v363_v14 = vld [vmem:[%s467_s1 + $0x60] sm:$0xff]   ;;  %v365_v18 = vld [vmem:[%s467_s1 + $0x68] sm:$0xff]  }
   0x4   :  { %321 = vmatprep.subr.bf16.mxu0 %v357_v3  ;;  %v362_v11 = vld [vmem:[%s467_s1 + $0x18] sm:$0xff]   ;;  %v369_v15 = vld [vmem:[%s467_s1 + $0x80] sm:$0xff]   ;;  %v372_v19 = vld [vmem:[%s467_s1 + $0x88] sm:$0xff]  }
   0x5   :  { %v364_v16 = vld [vmem:[%s467_s1 + $0x20] sm:$0xff]   ;;  %v69_v17 = vsub.s32 %v66_v12, %v68_v13  ;;  %345 = vmatpush3.bf16.msra.mxu1 %v369_v15  ;;  %v366_v21 = vld [vmem:[%s467_s1 + $0x28] sm:$0xff]   ;;  %v367_v24 = vld [vmem:[%s467_s1 + $0x70] sm:$0xff]  }
   0x6   :  { %346 = vmatprep.subr.bf16.mxu1 %v373_v1  ;;  %v297_v20 = vld.sshfl [vmem:[%s468_s0] sm:$0x13 pattern:$0x75316420]  ;;  %v368_v27 = vld [vmem:[%s467_s1 + $0x30] sm:$0xff]   ;;  %v370_v28 = vld [vmem:[%s467_s1 + $0x78] sm:$0xff]  }
   0x7   :  { %322 = vmatpush3.bf16.msra.mxu0 %v358_v4  ;;  %v63_v22 = vcombine.high %v297_v20, %v297_v20  ;;  %v70_v23 = vrot.slane %v297_v20, %v69_v17  ;;  %v371_v29 = vld [vmem:[%s467_s1 + $0x38] sm:$0xff]   ;;  %v317_v38 = vld [vmem:[%s469_s2] ss:$0 sm:$0xff] }
   0x8   :  { %323 = vmatprep.subr.bf16.mxu0 %v359_v5  ;;  %v318_v41 = vld [vmem:[%s470_s3] ss:$0 sm:$0xff] }
   0x9   :  { %347 = vmatpush3.bf16.msra.mxu1 %v372_v19  ;;  %v77_v25 = vrot.slane %v63_v22, %v69_v17  ;;  %v78_v26 = vcombine.high %v70_v23, %v70_v23 }
   0xb   :  { %324 = vmatpush3.bf16.msra.mxu0 %v360_v6  ;;  %225 = vmatprep.mubr.bf16.mxu0 %v77_v25 }
   0xc   :  { %325 = vmatprep.subr.bf16.mxu0 %v361_v10  ;;  %349 = vmatmul.mubr.msk.bf16.vlgmr.msra.gmra.mrb[0].mxu1 %vm189_vm1, %v78_v26 }
   0xf   :  { %326 = vmatpush3.bf16.msra.mxu0 %v362_v11 }
  0x10   :  { %327 = vmatprep.subr.bf16.mxu0 %v363_v14 }
  0x13   :  { %328 = vmatpush3.bf16.msra.mxu0 %v364_v16 }
  0x14   :  { %329 = vmatprep.subr.bf16.mxu0 %v365_v18 }
  0x17   :  { %330 = vmatpush3.bf16.msra.mxu0 %v366_v21 }
  0x18   :  { %331 = vmatprep.subr.bf16.mxu0 %v367_v24 }
  0x1b   :  { %332 = vmatpush3.bf16.msra.mxu0 %v368_v27 }
  0x1c   :  { %333 = vmatprep.subr.bf16.mxu0 %v370_v28 }
  0x1f   :  { %334 = vmatpush3.bf16.msra.mxu0 %v371_v29 }
  0x22   :  { %226 = vmatmul.mubr.bf16.vlgmr.msra.gmra.mrb[0].mxu0 %v70_v23 }
  0xdf   :  { %v267_v30 = vpop.f32.mrb[0].mxu1 }
  0xe0   :  { %v350_v31 = vpop.f32.mrb[1].mxu1 }
  0xe1   :  { %v270_v32 = vpop.f32.mrb[2].mxu1 }
  0xe2   :  { %v351_v33 = vpop.f32.mrb[3].mxu1 }
  0xf5   :  { %v335_v34 = vpop.f32.mrb[0].mxu0 }
  0xf6   :  { %v336_v35 = vpop.f32.mrb[1].mxu0 }
  0xf7   :  { %v337_v36 = vadd.f32 %v336_v35, %v335_v34  ;;  %v338_v37 = vpop.f32.mrb[2].mxu0 }
  0xf8   :  { %v339_v39 = vpop.f32.mrb[3].mxu0 }
  0xf9   :  { %v268_v40 = vadd.f32 %v337_v36, %v267_v30 }
  0xfb   :  { %v280_v42 = vmul.f32 %v317_v38, %v268_v40 }
  0xfd   :  { %v288_v43 = vadd.f32 %v318_v41, %v280_v42 }
  0xff   :  { %v289_v44 = vmax.f32 %v288_v43, 0.0 }
 0x101   :  { %v290_v45 = vpack.c.bf16 %v289_v44, %v289_v44 }
 0x103   :  { %292 = vst.msk [vmem:[%s471_s4] sm:$0x1] %vm291_vm2, %v290_v45 }

// kernel: pretrained_facenet_forward.79
= control target key start
LH: loop header
LB: loop body
LE: loop exit
PB: predicated region body
PF: predicated region fallthrough
CT: control target
= control target key end

     0   :  { %vm193_vm0 = vcmask 261120   ;;  %vm332_vm1 = vcmask 257024   ;;  %vm335_vm2 = vcmask 253952   ;;  %s549_s1 = inlined_call_operand.vmem [shape: bf16[288,32], index: 1, kind: input, shape index: {}]   ;;  %s550_s0 = inlined_call_operand.vmem [shape: bf16[18,288], index: 0, kind: input, shape index: {}]   ;;  %s551_s2 = inlined_call_operand.vmem [shape: f32[1,32], index: 2, kind: input, shape index: {}]   ;;  %s552_s3 = inlined_call_operand.vmem [shape: f32[1,32], index: 3, kind: input, shape index: {}]   ;;  %s553_s4 = inlined_call_operand.vmem [shape: bf16[18,32], index: 4, kind: output, shape index: {}]  }
   0x1   :  { %v415_v0 = vld [vmem:[%s549_s1 + $0x40] sm:$0xff]   ;;  %v417_v2 = vld [vmem:[%s549_s1 + $0x48] sm:$0xff]   ;;  %v419_v4 = vld [vmem:[%s549_s1 + $0x50] sm:$0xff]  }
   0x2   :  { %v416_v1 = vld [vmem:[%s549_s1] sm:$0xff]   ;;  %375 = vmatprep.subr.bf16.mxu0 %v415_v0  ;;  %v418_v3 = vld [vmem:[%s549_s1 + $0x8] sm:$0xff]   ;;  %v420_v5 = vld [vmem:[%s549_s1 + $0x10] sm:$0xff]  }
   0x3   :  { %376 = vmatpush3.bf16.msra.mxu0 %v416_v1  ;;  %v421_v6 = vld [vmem:[%s549_s1 + $0x58] sm:$0xff]   ;;  %v423_v8 = vld [vmem:[%s549_s1 + $0x60] sm:$0xff]   ;;  %v425_v11 = vld [vmem:[%s549_s1 + $0x68] sm:$0xff]  }
   0x4   :  { %377 = vmatprep.subr.bf16.mxu0 %v417_v2  ;;  %v422_v7 = vld [vmem:[%s549_s1 + $0x18] sm:$0xff]   ;;  %v429_v9 = vld [vmem:[%s549_s1 + $0x80] sm:$0xff]   ;;  %v432_v12 = vld [vmem:[%s549_s1 + $0x88] sm:$0xff]  }
   0x5   :  { %v424_v10 = vld [vmem:[%s549_s1 + $0x20] sm:$0xff]   ;;  %407 = vmatprep.subr.bf16.mxu1 %v429_v9  ;;  %v426_v13 = vld [vmem:[%s549_s1 + $0x28] sm:$0xff]   ;;  %v427_v15 = vld [vmem:[%s549_s1 + $0x70] sm:$0xff]  }
   0x6   :  { %408 = vmatpush3.bf16.msra.mxu1 %v429_v9  ;;  %v435_v14 = vld [vmem:[%s550_s0 + $0x4] ss:$12 sps:$4 sm:$0xff]   ;;  %v436_v16 = vld [vmem:[%s550_s0 + $0x8] ss:$12 sps:$4 sm:$0xff]   ;;  %v430_v19 = vld [vmem:[%s549_s1 + $0x78] sm:$0xff]  }
   0x7   :  { %378 = vmatpush3.bf16.msra.mxu0 %v418_v3  ;;  %409 = vmatprep.subr.bf16.mxu1 %v432_v12  ;;  %v437_v17 = vld [vmem:[%s550_s0 + $0x20] ss:$0 sps:$4 sm:$0x11]   ;;  %v428_v18 = vld [vmem:[%s549_s1 + $0x30] sm:$0xff]   ;;  %v431_v20 = vld [vmem:[%s549_s1 + $0x38] sm:$0xff]  }
   0x8   :  { %379 = vmatprep.subr.bf16.mxu0 %v419_v4  ;;  %232 = vmatprep.mubr.bf16.mxu0 %v435_v14  ;;  %v22_v21 = vld [vmem:[%s550_s0 + $0x18] sm:$0x11]  ;;  %v433_v22 = vld [vmem:[%s550_s0] ss:$12 sps:$4 sm:$0xff]  }
   0x9   :  { %411 = vmatprep.mubr.msk.bf16.mxu1 %vm193_vm0, %v436_v16  ;;  %v345_v23 = vcombine.high %v22_v21, %v22_v21  ;;  %v344_v24 = vcombine.low %v22_v21, %v22_v21  ;;  %v367_v34 = vld [vmem:[%s551_s2] ss:$0 sm:$0xff] }
   0xa   :  { %410 = vmatpush3.bf16.msra.mxu1 %v432_v12  ;;  %v368_v37 = vld [vmem:[%s552_s3] ss:$0 sm:$0xff] }
   0xb   :  { %380 = vmatpush3.bf16.msra.mxu0 %v420_v5 }
   0xc   :  { %381 = vmatprep.subr.bf16.mxu0 %v421_v6 }
   0xd   :  { %412 = vmatmul.mubr.msk.bf16.vlgmr.msra.gmra.mrb[0].mxu1 %vm193_vm0, %v437_v17 }
   0xf   :  { %382 = vmatpush3.bf16.msra.mxu0 %v422_v7 }
  0x10   :  { %383 = vmatprep.subr.bf16.mxu0 %v423_v8 }
  0x13   :  { %384 = vmatpush3.bf16.msra.mxu0 %v424_v10 }
  0x14   :  { %385 = vmatprep.subr.bf16.mxu0 %v425_v11 }
  0x17   :  { %386 = vmatpush3.bf16.msra.mxu0 %v426_v13 }
  0x18   :  { %387 = vmatprep.subr.bf16.mxu0 %v427_v15 }
  0x1b   :  { %388 = vmatpush3.bf16.msra.mxu0 %v428_v18 }
  0x1c   :  { %389 = vmatprep.subr.bf16.mxu0 %v430_v19 }
  0x1f   :  { %390 = vmatpush3.bf16.msra.mxu0 %v431_v20 }
  0x22   :  { %233 = vmatmul.mubr.bf16.vlgmr.msra.gmra.mrb[0].mxu0 %v433_v22 }
  0x23   :  { %240 = vmatprep.mubr.bf16.mxu0 %v345_v23 }
  0x2a   :  { %241 = vmatmul.mubr.bf16.gmra.mrb[4].mxu0 %v344_v24 }
  0xe0   :  { %v413_v25 = vpop.f32.mrb[0].mxu1 }
  0xe1   :  { %v282_v26 = vpop.f32.mrb[1].mxu1 }
  0xe2   :  { %v414_v27 = vpop.f32.mrb[2].mxu1 }
  0xe3   :  { %v285_v28 = vpop.f32.mrb[3].mxu1 }
  0xf5   :  { %v391_v29 = vpop.f32.mrb[0].mxu0 }
  0xf6   :  { %v392_v30 = vpop.f32.mrb[1].mxu0 }
  0xf7   :  { %v393_v31 = vadd.f32 %v392_v30, %v391_v29  ;;  %v394_v32 = vpop.f32.mrb[2].mxu0 }
  0xf8   :  { %v395_v33 = vpop.f32.mrb[3].mxu0 }
  0xf9   :  { %v396_v35 = vadd.f32 %v395_v33, %v394_v32  ;;  %v283_v36 = vadd.f32 %v393_v31, %v282_v26 }
  0xfb   :  { %v303_v38 = vmul.f32 %v367_v34, %v283_v36  ;;  %v286_v39 = vadd.f32 %v396_v35, %v285_v28 }
  0xfd   :  { %v313_v40 = vadd.f32 %v368_v37, %v303_v38  ;;  %v304_v41 = vmul.f32 %v367_v34, %v286_v39  ;;  %v397_v42 = vpop.f32.mrb[4].mxu0 }
  0xfe   :  { %v398_v43 = vpop.f32.mrb[5].mxu0 }
  0xff   :  { %v316_v44 = vmax.f32 %v313_v40, 0.0  ;;  %v314_v45 = vadd.f32 %v368_v37, %v304_v41  ;;  %v399_v46 = vadd.f32 %v398_v43, %v397_v42  ;;  %v400_v47 = vpop.f32.mrb[6].mxu0 }
 0x100   :  { %v401_v48 = vpop.f32.mrb[7].mxu0 }
 0x101   :  { %v372_v49 = vpack.c.bf16 %v316_v44, %v316_v44  ;;  %v317_v50 = vmax.f32 %v314_v45, 0.0  ;;  %v291_v51 = vadd.f32 %v413_v25, %v399_v46 }
 0x103   :  { %333 = vst.msk [vmem:[%s553_s4] sm:$0xf] %vm332_vm1, %v372_v49  ;;  %v373_v52 = vpack.c.bf16 %v317_v50, %v317_v50  ;;  %v305_v53 = vmul.f32 %v367_v34, %v291_v51 }
 0x105   :  { %334 = vst.msk [vmem:[%s553_s4 + $0x4] sm:$0xf] %vm332_vm1, %v373_v52  ;;  %v315_v54 = vadd.f32 %v368_v37, %v305_v53 }
 0x107   :  { %v318_v55 = vmax.f32 %v315_v54, 0.0 }
 0x109   :  { %v374_v56 = vpack.c.bf16 %v318_v55, %v318_v55 }
 0x10b   :  { %336 = vst.msk [vmem:[%s553_s4 + $0x8] sm:$0x1] %vm335_vm2, %v374_v56 }

// kernel: pretrained_facenet_forward.81
= control target key start
LH: loop header
LB: loop body
LE: loop exit
PB: predicated region body
PF: predicated region fallthrough
CT: control target
= control target key end

     0   :  { %v257_v0 = vmov 0   ;;  %v258_v3 = vmov 1966171168   ;;  %v59_v5 = vlaneseq  ;;  %vm155_vm0 = vcmask 785408   ;;  %s338_s1 = inlined_call_operand.vmem [shape: bf16[224,48], index: 1, kind: input, shape index: {}]   ;;  %s339_s0 = inlined_call_operand.vmem [shape: bf16[2,224], index: 0, kind: input, shape index: {}]   ;;  %s340_s2 = inlined_call_operand.vmem [shape: f32[1,48], index: 2, kind: input, shape index: {}]   ;;  %s341_s3 = inlined_call_operand.vmem [shape: f32[1,48], index: 3, kind: input, shape index: {}]   ;;  %s342_s4 = inlined_call_operand.vmem [shape: bf16[2,48], index: 4, kind: output, shape index: {}]  }
   0x1   :  { %159 = vmatprep.subr.bf16.mxu0 %v257_v0  ;;  %v243_v1 = vld [vmem:[%s338_s1] sm:$0xff]   ;;  %v244_v2 = vld [vmem:[%s338_s1 + $0x8] sm:$0xff]   ;;  %v57_v4 = vunpack.c.l.s4 %v258_v3  ;;  %v245_v6 = vld [vmem:[%s338_s1 + $0x10] sm:$0xff]   ;;  %vm217_vm1 = vcmask 385024  }
   0x2   :  { %160 = vmatpush1.bf16.msra.mxu0 %v243_v1  ;;  %v60_v8 = vshrl.u32 %v59_v5, 7  ;;  %v246_v9 = vld [vmem:[%s338_s1 + $0x18] sm:$0xff]   ;;  %v247_v11 = vld [vmem:[%s338_s1 + $0x20] sm:$0xff]   ;;  %v248_v15 = vld [vmem:[%s338_s1 + $0x28] sm:$0xff]  }
   0x3   :  { %161 = vmatprep.subr.bf16.mxu0 %v257_v0  ;;  %v58_v7 = vunpack.c.0.s8 %v57_v4  ;;  %v223_v12 = vld.sshfl [vmem:[%s339_s0] sm:$0x11 pattern:$0x75316420]  ;;  %v249_v16 = vld [vmem:[%s338_s1 + $0x30] sm:$0xff]   ;;  %v250_v17 = vld [vmem:[%s338_s1 + $0x38] sm:$0xff]  }
   0x4   :  { %v55_v13 = vcombine.high %v223_v12, %v223_v12  ;;  %v251_v18 = vld [vmem:[%s338_s1 + $0x40] sm:$0xff]   ;;  %v252_v19 = vld [vmem:[%s338_s1 + $0x48] sm:$0xff]   ;;  %v253_v20 = vld [vmem:[%s338_s1 + $0x50] sm:$0xff]  }
   0x5   :  { %v61_v10 = vsub.s32 %v58_v7, %v60_v8  ;;  %v254_v21 = vld [vmem:[%s338_s1 + $0x58] sm:$0xff]   ;;  %v255_v22 = vld [vmem:[%s338_s1 + $0x60] sm:$0xff]   ;;  %v256_v23 = vld [vmem:[%s338_s1 + $0x68] sm:$0xff]  }
   0x6   :  { %162 = vmatpush1.bf16.msra.mxu0 %v244_v2  ;;  %v239_v25 = vld [vmem:[%s340_s2] ss:$0 sm:$0xff] }
   0x7   :  { %163 = vmatprep.subr.bf16.mxu0 %v257_v0  ;;  %v69_v14 = vrot.slane %v55_v13, %v61_v10  ;;  %v62_v24 = vrot.slane %v223_v12, %v61_v10  ;;  %v240_v27 = vld [vmem:[%s341_s3] ss:$0 sm:$0xff] }
   0x9   :  { %238 = vmatprep.mubr.msk.bf16.mxu0 %vm155_vm0, %v69_v14 }
   0xa   :  { %164 = vmatpush1.bf16.msra.mxu0 %v245_v6 }
   0xb   :  { %165 = vmatprep.subr.bf16.mxu0 %v257_v0 }
   0xe   :  { %166 = vmatpush1.bf16.msra.mxu0 %v246_v9 }
   0xf   :  { %167 = vmatprep.subr.bf16.mxu0 %v257_v0 }
  0x12   :  { %168 = vmatpush1.bf16.msra.mxu0 %v247_v11 }
  0x13   :  { %169 = vmatprep.subr.bf16.mxu0 %v257_v0 }
  0x16   :  { %170 = vmatpush1.bf16.msra.mxu0 %v248_v15 }
  0x17   :  { %171 = vmatprep.subr.bf16.mxu0 %v257_v0 }
  0x1a   :  { %172 = vmatpush1.bf16.msra.mxu0 %v249_v16 }
  0x1b   :  { %173 = vmatprep.subr.bf16.mxu0 %v257_v0 }
  0x1e   :  { %174 = vmatpush1.bf16.msra.mxu0 %v250_v17 }
  0x1f   :  { %175 = vmatprep.subr.bf16.mxu0 %v257_v0 }
  0x22   :  { %176 = vmatpush1.bf16.msra.mxu0 %v251_v18 }
  0x23   :  { %177 = vmatprep.subr.bf16.mxu0 %v257_v0 }
  0x26   :  { %178 = vmatpush1.bf16.msra.mxu0 %v252_v19 }
  0x27   :  { %179 = vmatprep.subr.bf16.mxu0 %v257_v0 }
  0x2a   :  { %180 = vmatpush1.bf16.msra.mxu0 %v253_v20 }
  0x2b   :  { %181 = vmatprep.subr.bf16.mxu0 %v257_v0 }
  0x2e   :  { %182 = vmatpush1.bf16.msra.mxu0 %v254_v21 }
  0x2f   :  { %183 = vmatprep.subr.bf16.mxu0 %v257_v0 }
  0x32   :  { %184 = vmatpush1.bf16.msra.mxu0 %v255_v22 }
  0x33   :  { %185 = vmatprep.subr.bf16.mxu0 %v257_v0 }
  0x36   :  { %186 = vmatpush1.bf16.msra.mxu0 %v256_v23 }
  0x39   :  { %192 = vmatmul.mubr.bf16.vlgmr.msra.gmra.mrb[0].mxu0 %v62_v24 }
 0x10c   :  { %v193_v26 = vpop.f32.mrb[0].mxu0 }
 0x10d   :  { %v206_v28 = vmul.f32 %v239_v25, %v193_v26  ;;  %v195_v29 = vpop.f32.mrb[1].mxu0 }
 0x10e   :  { %v196_v30 = vpop.f32.mrb[2].mxu0 }
 0x10f   :  { %v214_v31 = vadd.f32 %v240_v27, %v206_v28  ;;  %v197_v32 = vpop.f32.mrb[3].mxu0 }
 0x111   :  { %v215_v33 = vmax.f32 %v214_v31, 0.0 }
 0x113   :  { %v216_v34 = vpack.c.bf16 %v215_v33, %v215_v33 }
 0x115   :  { %218 = vst.msk [vmem:[%s342_s4] sm:$0x1] %vm217_vm1, %v216_v34 }

// kernel: pretrained_facenet_forward.82
= control target key start
LH: loop header
LB: loop body
LE: loop exit
PB: predicated region body
PF: predicated region fallthrough
CT: control target
= control target key end

     0   :  { %v162_v0 = vmov 0.0   ;;  %vm163_vm0 = vmmov 0   ;;  %vm59_vm1 = vcmask 1043456   ;;  %vm55_vm2 = vcmask 588800   ;;  %s216_s1 = inlined_call_operand.vmem [shape: bf16[72,24], index: 1, kind: input, shape index: {}]   ;;  %s217_s0 = inlined_call_operand.vmem [shape: bf16[2,72], index: 0, kind: input, shape index: {}]   ;;  %s218_s2 = inlined_call_operand.vmem [shape: f32[1,24], index: 2, kind: input, shape index: {}]   ;;  %s219_s3 = inlined_call_operand.vmem [shape: f32[1,24], index: 3, kind: input, shape index: {}]   ;;  %s220_s4 = inlined_call_operand.vmem [shape: bf16[2,24], index: 4, kind: output, shape index: {}]  }
   0x1   :  { %141 = vmatprep.subr.bf16.mxu0 %v162_v0  ;;  %v157_v1 = vld [vmem:[%s216_s1] sm:$0xff]   ;;  %151 = vmatprep.mubr.msk.bf16.mxu0 %vm163_vm0, %v162_v0  ;;  %v158_v2 = vld [vmem:[%s216_s1 + $0x8] sm:$0xff]   ;;  %v159_v3 = vld [vmem:[%s216_s1 + $0x10] sm:$0xff]   ;;  %vm121_vm3 = vcmask 188416  }
   0x2   :  { %142 = vmatpush3.bf16.msra.mxu0 %v157_v1  ;;  %v160_v4 = vld [vmem:[%s216_s1 + $0x18] sm:$0xff]   ;;  %v161_v5 = vld [vmem:[%s216_s1 + $0x20] ss:$0 sps:$4 sm:$0xff]  }
   0x3   :  { %143 = vmatprep.subr.bf16.mxu0 %v162_v0  ;;  %v61_v6 = vsel %vm59_vm1, %v161_v5, 0  ;;  %v18_v7 = vld [vmem:[%s217_s0] sm:$0x1] }
   0x4   :  { %v133_v8 = vld [vmem:[%s218_s2] ss:$0 sm:$0xff] }
   0x5   :  { %v134_v10 = vld [vmem:[%s219_s3] ss:$0 sm:$0xff] }
   0x6   :  { %144 = vmatpush3.bf16.msra.mxu0 %v158_v2 }
   0x7   :  { %145 = vmatprep.subr.bf16.mxu0 %v162_v0 }
   0xa   :  { %146 = vmatpush3.bf16.msra.mxu0 %v159_v3 }
   0xb   :  { %147 = vmatprep.subr.bf16.mxu0 %v162_v0 }
   0xe   :  { %148 = vmatpush3.bf16.msra.mxu0 %v160_v4 }
   0xf   :  { %149 = vmatprep.subr.bf16.mxu0 %v162_v0 }
  0x12   :  { %150 = vmatpush3.bf16.msra.mxu0 %v61_v6 }
  0x15   :  { %152 = vmatmul.mubr.msk.bf16.vlgmr.msra.gmra.mrb[0].mxu0 %vm55_vm2, %v18_v7 }
  0xe8   :  { %v97_v9 = vpop.f32.mrb[0].mxu0 }
  0xe9   :  { %v110_v11 = vmul.f32 %v133_v8, %v97_v9  ;;  %v153_v12 = vpop.f32.mrb[1].mxu0 }
  0xea   :  { %v100_v13 = vpop.f32.mrb[2].mxu0 }
  0xeb   :  { %v118_v14 = vadd.f32 %v134_v10, %v110_v11  ;;  %v154_v15 = vpop.f32.mrb[3].mxu0 }
  0xed   :  { %v119_v16 = vmax.f32 %v118_v14, 0.0 }
  0xef   :  { %v120_v17 = vpack.c.bf16 %v119_v16, %v119_v16 }
  0xf1   :  { %122 = vst.msk [vmem:[%s220_s4] sm:$0x1] %vm121_vm3, %v120_v17 }

// kernel: pretrained_facenet_forward.84
= control target key start
LH: loop header
LB: loop body
LE: loop exit
PB: predicated region body
PF: predicated region fallthrough
CT: control target
= control target key end

     0   :  { %v196_v1 = vmov 0   ;;  %vm58_vm0 = vcmask 392192   ;;  %v105_v8 = vlaneseq  ;;  %v197_v9 = vmov 1983009808   ;;  %s262_s1 = inlined_call_operand.vmem [shape: bf16[48,224], index: 1, kind: input, shape index: {}]   ;;  %s263_s0 = inlined_call_operand.vmem [shape: bf16[2,48], index: 0, kind: input, shape index: {}]   ;;  %s264_s4 = inlined_call_operand.vmem [shape: bf16[2,224], index: 4, kind: input, shape index: {}]   ;;  %s265_s2 = inlined_call_operand.vmem [shape: f32[1,224], index: 2, kind: input, shape index: {}]   ;;  %s266_s3 = inlined_call_operand.vmem [shape: f32[1,224], index: 3, kind: input, shape index: {}]   ;;  %s267_s5 = inlined_call_operand.vmem [shape: bf16[2,224], index: 5, kind: output, shape index: {}]  }
   0x1   :  { %v187_v0 = vld [vmem:[%s262_s1 + $0x4] ss:$8 sps:$4 sm:$0xff]   ;;  %94 = vmatprep.mubr.bf16.mxu0 %v196_v1  ;;  %v189_v2 = vld [vmem:[%s262_s1] ss:$8 sps:$4 sm:$0xff]   ;;  %v190_v3 = vld [vmem:[%s262_s1 + $0x14] ss:$8 sps:$4 sm:$0xff]   ;;  %v135_v10 = vunpack.c.l.s4 %v197_v9 }
   0x2   :  { %62 = vmatprep.subr.bf16.mxu0 %v187_v0  ;;  %v192_v4 = vld [vmem:[%s262_s1 + $0x10] ss:$8 sps:$4 sm:$0xff]   ;;  %v193_v5 = vld [vmem:[%s262_s1 + $0x24] ss:$8 sps:$4 sm:$0xff]   ;;  %v195_v6 = vld [vmem:[%s262_s1 + $0x20] ss:$8 sps:$4 sm:$0xff]  }
   0x3   :  { %63 = vmatpush1.bf16.msra.mxu0 %v189_v2  ;;  %v21_v7 = vld [vmem:[%s263_s0] sm:$0x1]  ;;  %v106_v11 = vshrl.u32 %v105_v8, 7  ;;  %v136_v12 = vunpack.c.0.s8 %v135_v10  ;;  %v198_v26 = vmov 1966171168   ;;  %vm168_vm1 = vcmask 1040384  }
   0x4   :  { %64 = vmatprep.subr.bf16.mxu0 %v190_v3  ;;  %v131_v13 = vld [vmem:[%s264_s4] sm:$0x3]  ;;  %v154_v27 = vunpack.c.l.s4 %v198_v26  ;;  %vm169_vm2 = vcmask 779265  }
   0x5   :  { %v107_v14 = vsub.s32 0, %v106_v11  ;;  %v103_v15 = vld [vmem:[%s265_s2] sm:$0x3]  ;;  %v132_v16 = vunpack.c.l.bf16 %v131_v13  ;;  %v139_v17 = vsub.s32 %v136_v12, %v106_v11  ;;  %v111_v18 = vsub.s32 1, %v106_v11  ;;  %vm170_vm3 = vmor %vm169_vm2, %vm168_vm1 }
   0x6   :  { %v117_v19 = vld [vmem:[%s266_s3] sm:$0x3]  ;;  %v155_v36 = vunpack.c.0.s8 %v154_v27 }
   0x7   :  { %65 = vmatpush1.bf16.msra.mxu0 %v192_v4  ;;  %v108_v20 = vrot.slane %v103_v15, %v107_v14  ;;  %v140_v21 = vrot.slane %v132_v16, %v139_v17  ;;  %v112_v22 = vrot.slane %v103_v15, %v111_v18  ;;  %v122_v23 = vrot.slane %v117_v19, %v107_v14 }
   0x8   :  { %66 = vmatprep.subr.bf16.mxu0 %v193_v5  ;;  %v126_v25 = vrot.slane %v117_v19, %v111_v18  ;;  %v158_v41 = vsub.s32 %v155_v36, %v106_v11 }
   0x9   :  { %v141_v31 = vcombine.high %v140_v21, %v140_v21 }
   0xb   :  { %67 = vmatpush1.bf16.msra.mxu0 %v195_v6 }
   0xe   :  { %182 = vmatmul.mubr.msk.bf16.vlgmr.msra.gmra.mrb[0].mxu0 %vm58_vm0, %v21_v7 }
  0xe1   :  { %v96_v24 = vpop.f32.mrb[0].mxu0 }
  0xe2   :  { %v115_v28 = vmul.f32 %v108_v20, %v96_v24  ;;  %v98_v29 = vpop.f32.mrb[1].mxu0 }
  0xe3   :  { %v116_v30 = vmul.f32 %v112_v22, %v98_v29  ;;  %v100_v32 = vpop.f32.mrb[2].mxu0 }
  0xe4   :  { %v129_v33 = vadd.f32 %v122_v23, %v115_v28  ;;  %v101_v34 = vpop.f32.mrb[3].mxu0 }
  0xe5   :  { %v130_v35 = vadd.f32 %v126_v25, %v116_v30 }
  0xe6   :  { %v144_v37 = vadd.f32 %v140_v21, %v129_v33 }
  0xe7   :  { %v145_v38 = vadd.f32 %v141_v31, %v130_v35 }
  0xe8   :  { %v146_v39 = vmax.f32 %v144_v37, 0.0 }
  0xe9   :  { %v147_v40 = vmax.f32 %v145_v38, 0.0 }
  0xeb   :  { %v183_v42 = vpack.c.bf16 %v147_v40, %v146_v39 }
  0xed   :  { %v159_v43 = vrot.slane %v183_v42, %v158_v41 }
  0xef   :  { %v166_v44 = vrot.slane %v159_v43, %v158_v41 }
  0xf1   :  { %171 = vst.msk [vmem:[%s267_s5] sm:$0x3] %vm170_vm3, %v166_v44 }

// kernel: pretrained_facenet_forward.92
= control target key start
LH: loop header
LB: loop body
LE: loop exit
PB: predicated region body
PF: predicated region fallthrough
CT: control target
= control target key end

     0   :  { %v194_v1 = vmov 0   ;;  %vm58_vm0 = vcmask 392192   ;;  %v105_v8 = vlaneseq  ;;  %v195_v9 = vmov 1983009808   ;;  %s260_s1 = inlined_call_operand.vmem [shape: bf16[48,224], index: 1, kind: input, shape index: {}]   ;;  %s261_s0 = inlined_call_operand.vmem [shape: bf16[2,48], index: 0, kind: input, shape index: {}]   ;;  %s262_s4 = inlined_call_operand.vmem [shape: bf16[2,224], index: 4, kind: input, shape index: {}]   ;;  %s263_s2 = inlined_call_operand.vmem [shape: f32[1,224], index: 2, kind: input, shape index: {}]   ;;  %s264_s3 = inlined_call_operand.vmem [shape: f32[1,224], index: 3, kind: input, shape index: {}]   ;;  %s265_s5 = inlined_call_operand.vmem [shape: bf16[2,224], index: 5, kind: output, shape index: {}]  }
   0x1   :  { %v185_v0 = vld [vmem:[%s260_s1 + $0x4] ss:$8 sps:$4 sm:$0xff]   ;;  %94 = vmatprep.mubr.bf16.mxu0 %v194_v1  ;;  %v187_v2 = vld [vmem:[%s260_s1] ss:$8 sps:$4 sm:$0xff]   ;;  %v188_v3 = vld [vmem:[%s260_s1 + $0x14] ss:$8 sps:$4 sm:$0xff]   ;;  %v135_v10 = vunpack.c.l.s4 %v195_v9 }
   0x2   :  { %62 = vmatprep.subr.bf16.mxu0 %v185_v0  ;;  %v190_v4 = vld [vmem:[%s260_s1 + $0x10] ss:$8 sps:$4 sm:$0xff]   ;;  %v191_v5 = vld [vmem:[%s260_s1 + $0x24] ss:$8 sps:$4 sm:$0xff]   ;;  %v193_v6 = vld [vmem:[%s260_s1 + $0x20] ss:$8 sps:$4 sm:$0xff]  }
   0x3   :  { %63 = vmatpush1.bf16.msra.mxu0 %v187_v2  ;;  %v21_v7 = vld [vmem:[%s261_s0] sm:$0x1]  ;;  %v106_v11 = vshrl.u32 %v105_v8, 7  ;;  %v136_v12 = vunpack.c.0.s8 %v135_v10  ;;  %v196_v23 = vmov 1966171168   ;;  %vm166_vm1 = vcmask 1040384  }
   0x4   :  { %64 = vmatprep.subr.bf16.mxu0 %v188_v3  ;;  %v131_v13 = vld [vmem:[%s262_s4] sm:$0x3]  ;;  %v152_v24 = vunpack.c.l.s4 %v196_v23  ;;  %vm167_vm2 = vcmask 779265  }
   0x5   :  { %v107_v14 = vsub.s32 0, %v106_v11  ;;  %v103_v15 = vld [vmem:[%s263_s2] sm:$0x3]  ;;  %v132_v16 = vunpack.c.l.bf16 %v131_v13  ;;  %v139_v17 = vsub.s32 %v136_v12, %v106_v11  ;;  %v111_v18 = vsub.s32 1, %v106_v11  ;;  %vm168_vm3 = vmor %vm167_vm2, %vm166_vm1 }
   0x6   :  { %v117_v19 = vld [vmem:[%s264_s3] sm:$0x3]  ;;  %v153_v32 = vunpack.c.0.s8 %v152_v24 }
   0x7   :  { %65 = vmatpush1.bf16.msra.mxu0 %v190_v4  ;;  %v108_v20 = vrot.slane %v103_v15, %v107_v14  ;;  %v140_v21 = vrot.slane %v132_v16, %v139_v17  ;;  %v112_v22 = vrot.slane %v103_v15, %v111_v18  ;;  %v122_v25 = vrot.slane %v117_v19, %v107_v14 }
   0x8   :  { %66 = vmatprep.subr.bf16.mxu0 %v191_v5  ;;  %v126_v27 = vrot.slane %v117_v19, %v111_v18  ;;  %v156_v39 = vsub.s32 %v153_v32, %v106_v11 }
   0x9   :  { %v141_v31 = vcombine.high %v140_v21, %v140_v21 }
   0xb   :  { %67 = vmatpush1.bf16.msra.mxu0 %v193_v6 }
   0xe   :  { %180 = vmatmul.mubr.msk.bf16.vlgmr.msra.gmra.mrb[0].mxu0 %vm58_vm0, %v21_v7 }
  0xe1   :  { %v96_v26 = vpop.f32.mrb[0].mxu0 }
  0xe2   :  { %v115_v28 = vmul.f32 %v108_v20, %v96_v26  ;;  %v98_v29 = vpop.f32.mrb[1].mxu0 }
  0xe3   :  { %v116_v30 = vmul.f32 %v112_v22, %v98_v29  ;;  %v100_v33 = vpop.f32.mrb[2].mxu0 }
  0xe4   :  { %v129_v34 = vadd.f32 %v122_v25, %v115_v28  ;;  %v101_v35 = vpop.f32.mrb[3].mxu0 }
  0xe5   :  { %v130_v36 = vadd.f32 %v126_v27, %v116_v30 }
  0xe6   :  { %v144_v37 = vadd.f32 %v140_v21, %v129_v34 }
  0xe7   :  { %v145_v38 = vadd.f32 %v141_v31, %v130_v36 }
  0xe9   :  { %v181_v40 = vpack.c.bf16 %v145_v38, %v144_v37 }
  0xeb   :  { %v157_v41 = vrot.slane %v181_v40, %v156_v39 }
  0xed   :  { %v164_v42 = vrot.slane %v157_v41, %v156_v39 }
  0xef   :  { %169 = vst.msk [vmem:[%s265_s5] sm:$0x3] %vm168_vm3, %v164_v42 }

// kernel: pretrained_facenet_forward.93
= control target key start
LH: loop header
LB: loop body
LE: loop exit
PB: predicated region body
PF: predicated region fallthrough
CT: control target
= control target key end

     0   :  { %v16_v0 = vlaneseq  ;;  %v139_v3 = vmov 1966171168   ;;  %v140_v5 = vmov 1935823168   ;;  %vm107_vm0 = vcmask 1041409   ;;  %s160_s0 = inlined_call_operand.vmem [shape: bf16[2,1,224], index: 0, kind: input, shape index: {}]   ;;  %s161_s1 = inlined_call_operand.vmem [shape: bf16[2,224], index: 1, kind: output, shape index: {}]  }
   0x1   :  { %v8_v1 = vld [vmem:[%s160_s0] sm:$0x3]  ;;  %v9_v2 = vld [vmem:[%s160_s0 + $0x2] sm:$0x3]  ;;  %v46_v4 = vunpack.c.l.s4 %v139_v3  ;;  %v75_v6 = vunpack.c.l.s4 %v140_v5  ;;  %vm127_vm1 = vcmask 1040384   ;;  %vm128_vm2 = vcmask 779265  }
   0x2   :  { %v10_v7 = vunpack.c.l.bf16 %v8_v1  ;;  %v11_v8 = vunpack.c.l.bf16 %v9_v2  ;;  %v17_v9 = vshrl.u32 %v16_v0, 7  ;;  %vm129_vm3 = vmor %vm128_vm2, %vm127_vm1 }
   0x3   :  { %v47_v10 = vunpack.c.0.s8 %v46_v4  ;;  %v76_v14 = vunpack.c.0.s8 %v75_v6 }
   0x4   :  { %v18_v11 = vsub.s32 0, %v17_v9  ;;  %v22_v12 = vsub.s32 2, %v17_v9 }
   0x5   :  { %v50_v13 = vsub.s32 %v47_v10, %v17_v9  ;;  %v79_v23 = vsub.s32 %v76_v14, %v17_v9 }
   0x6   :  { %v19_v15 = vrot.slane %v10_v7, %v18_v11  ;;  %v23_v16 = vrot.slane %v10_v7, %v22_v12  ;;  %v27_v17 = vrot.slane %v11_v8, %v18_v11  ;;  %v31_v18 = vrot.slane %v11_v8, %v22_v12 }
   0x8   :  { %v135_v19 = vpack.c.bf16 %v23_v16, %v19_v15  ;;  %v136_v20 = vpack.c.bf16 %v31_v18, %v27_v17 }
   0xa   :  { %v51_v21 = vrot.slane %v135_v19, %v50_v13  ;;  %v66_v22 = vrot.slane %v136_v20, %v50_v13 }
   0xc   :  { %v58_v24 = vrot.slane %v51_v21, %v50_v13  ;;  %v73_v25 = vrot.slane %v66_v22, %v50_v13 }
   0xe   :  { %v80_v26 = vrot.slane %v58_v24, %v79_v23  ;;  %v94_v27 = vrot.slane %v73_v25, %v79_v23 }
  0x10   :  { %v87_v28 = vrot.slane %v80_v26, %v79_v23  ;;  %v101_v29 = vrot.slane %v94_v27, %v79_v23 }
  0x12   :  { %v102_v30 = vunpack.c.l.b16 %v87_v28  ;;  %v103_v31 = vunpack.c.h.b16 %v87_v28  ;;  %v104_v32 = vunpack.c.l.b16 %v101_v29  ;;  %v105_v33 = vunpack.c.h.b16 %v101_v29 }
  0x14   :  { %v106_v34 = vrot.slane %v104_v32, 7  ;;  %v109_v35 = vrot.slane %v105_v33, 7 }
  0x16   :  { %v108_v36 = vsel %vm107_vm0, %v106_v34, %v102_v30  ;;  %v110_v37 = vsel %vm107_vm0, %v109_v35, %v103_v31 }
  0x17   :  { %v111_v38 = vpack.c.b16 %v110_v37, %v108_v36 }
  0x19   :  { %v118_v39 = vrot.slane %v111_v38, %v50_v13 }
  0x1b   :  { %v125_v40 = vrot.slane %v118_v39, %v50_v13 }
  0x1d   :  { %130 = vst.msk [vmem:[%s161_s1] sm:$0x3] %vm129_vm3, %v125_v40 }

// kernel: pretrained_facenet_forward.94
= control target key start
LH: loop header
LB: loop body
LE: loop exit
PB: predicated region body
PF: predicated region fallthrough
CT: control target
= control target key end

     0   :  { %v255_v0 = vmov 0   ;;  %v256_v3 = vmov 1966171168   ;;  %v59_v5 = vlaneseq  ;;  %vm155_vm0 = vcmask 785408   ;;  %s336_s1 = inlined_call_operand.vmem [shape: bf16[224,64], index: 1, kind: input, shape index: {}]   ;;  %s337_s0 = inlined_call_operand.vmem [shape: bf16[2,224], index: 0, kind: input, shape index: {}]   ;;  %s338_s2 = inlined_call_operand.vmem [shape: f32[1,64], index: 2, kind: input, shape index: {}]   ;;  %s339_s3 = inlined_call_operand.vmem [shape: f32[1,64], index: 3, kind: input, shape index: {}]   ;;  %s340_s4 = inlined_call_operand.vmem [shape: f32[2,64], index: 4, kind: output, shape index: {}]  }
   0x1   :  { %159 = vmatprep.subr.bf16.mxu0 %v255_v0  ;;  %v241_v1 = vld [vmem:[%s336_s1] sm:$0xff]   ;;  %v242_v2 = vld [vmem:[%s336_s1 + $0x8] sm:$0xff]   ;;  %v57_v4 = vunpack.c.l.s4 %v256_v3  ;;  %v243_v6 = vld [vmem:[%s336_s1 + $0x10] sm:$0xff]   ;;  %vm215_vm1 = vcmask 517120  }
   0x2   :  { %160 = vmatpush1.bf16.msra.mxu0 %v241_v1  ;;  %v60_v8 = vshrl.u32 %v59_v5, 7  ;;  %v244_v9 = vld [vmem:[%s336_s1 + $0x18] sm:$0xff]   ;;  %v245_v11 = vld [vmem:[%s336_s1 + $0x20] sm:$0xff]   ;;  %v246_v15 = vld [vmem:[%s336_s1 + $0x28] sm:$0xff]  }
   0x3   :  { %161 = vmatprep.subr.bf16.mxu0 %v255_v0  ;;  %v58_v7 = vunpack.c.0.s8 %v57_v4  ;;  %v221_v12 = vld.sshfl [vmem:[%s337_s0] sm:$0x11 pattern:$0x75316420]  ;;  %v247_v16 = vld [vmem:[%s336_s1 + $0x30] sm:$0xff]   ;;  %v248_v17 = vld [vmem:[%s336_s1 + $0x38] sm:$0xff]  }
   0x4   :  { %v55_v13 = vcombine.high %v221_v12, %v221_v12  ;;  %v249_v18 = vld [vmem:[%s336_s1 + $0x40] sm:$0xff]   ;;  %v250_v19 = vld [vmem:[%s336_s1 + $0x48] sm:$0xff]   ;;  %v251_v20 = vld [vmem:[%s336_s1 + $0x50] sm:$0xff]  }
   0x5   :  { %v61_v10 = vsub.s32 %v58_v7, %v60_v8  ;;  %v252_v21 = vld [vmem:[%s336_s1 + $0x58] sm:$0xff]   ;;  %v253_v22 = vld [vmem:[%s336_s1 + $0x60] sm:$0xff]   ;;  %v254_v23 = vld [vmem:[%s336_s1 + $0x68] sm:$0xff]  }
   0x6   :  { %162 = vmatpush1.bf16.msra.mxu0 %v242_v2  ;;  %v237_v25 = vld [vmem:[%s338_s2] ss:$0 sm:$0xff] }
   0x7   :  { %163 = vmatprep.subr.bf16.mxu0 %v255_v0  ;;  %v69_v14 = vrot.slane %v55_v13, %v61_v10  ;;  %v62_v24 = vrot.slane %v221_v12, %v61_v10  ;;  %v238_v27 = vld [vmem:[%s339_s3] ss:$0 sm:$0xff] }
   0x9   :  { %236 = vmatprep.mubr.msk.bf16.mxu0 %vm155_vm0, %v69_v14 }
   0xa   :  { %164 = vmatpush1.bf16.msra.mxu0 %v243_v6 }
   0xb   :  { %165 = vmatprep.subr.bf16.mxu0 %v255_v0 }
   0xe   :  { %166 = vmatpush1.bf16.msra.mxu0 %v244_v9 }
   0xf   :  { %167 = vmatprep.subr.bf16.mxu0 %v255_v0 }
  0x12   :  { %168 = vmatpush1.bf16.msra.mxu0 %v245_v11 }
  0x13   :  { %169 = vmatprep.subr.bf16.mxu0 %v255_v0 }
  0x16   :  { %170 = vmatpush1.bf16.msra.mxu0 %v246_v15 }
  0x17   :  { %171 = vmatprep.subr.bf16.mxu0 %v255_v0 }
  0x1a   :  { %172 = vmatpush1.bf16.msra.mxu0 %v247_v16 }
  0x1b   :  { %173 = vmatprep.subr.bf16.mxu0 %v255_v0 }
  0x1e   :  { %174 = vmatpush1.bf16.msra.mxu0 %v248_v17 }
  0x1f   :  { %175 = vmatprep.subr.bf16.mxu0 %v255_v0 }
  0x22   :  { %176 = vmatpush1.bf16.msra.mxu0 %v249_v18 }
  0x23   :  { %177 = vmatprep.subr.bf16.mxu0 %v255_v0 }
  0x26   :  { %178 = vmatpush1.bf16.msra.mxu0 %v250_v19 }
  0x27   :  { %179 = vmatprep.subr.bf16.mxu0 %v255_v0 }
  0x2a   :  { %180 = vmatpush1.bf16.msra.mxu0 %v251_v20 }
  0x2b   :  { %181 = vmatprep.subr.bf16.mxu0 %v255_v0 }
  0x2e   :  { %182 = vmatpush1.bf16.msra.mxu0 %v252_v21 }
  0x2f   :  { %183 = vmatprep.subr.bf16.mxu0 %v255_v0 }
  0x32   :  { %184 = vmatpush1.bf16.msra.mxu0 %v253_v22 }
  0x33   :  { %185 = vmatprep.subr.bf16.mxu0 %v255_v0 }
  0x36   :  { %186 = vmatpush1.bf16.msra.mxu0 %v254_v23 }
  0x39   :  { %192 = vmatmul.mubr.bf16.vlgmr.msra.gmra.mrb[0].mxu0 %v62_v24 }
 0x10c   :  { %v193_v26 = vpop.f32.mrb[0].mxu0 }
 0x10d   :  { %v206_v28 = vmul.f32 %v237_v25, %v193_v26  ;;  %v195_v29 = vpop.f32.mrb[1].mxu0 }
 0x10e   :  { %v196_v30 = vpop.f32.mrb[2].mxu0 }
 0x10f   :  { %v214_v31 = vadd.f32 %v238_v27, %v206_v28  ;;  %v197_v32 = vpop.f32.mrb[3].mxu0 }
 0x111   :  { %216 = vst.msk [vmem:[%s340_s4] sm:$0x3] %vm215_vm1, %v214_v31 }

// kernel: pretrained_facenet_forward.95
= control target key start
LH: loop header
LB: loop body
LE: loop exit
PB: predicated region body
PF: predicated region fallthrough
CT: control target
= control target key end

     0   :  { %v204_v3 = vmov 0.0|0.0   ;;  %vm205_vm0 = vmmov 0   ;;  %v206_v6 = vmov 0.0   ;;  %s278_s0 = inlined_call_operand.vmem [shape: f32[2,64], index: 0, kind: input, shape index: {}]   ;;  %s279_s1 = inlined_call_operand.vmem [shape: f32[64,32], index: 1, kind: input, shape index: {}]   ;;  %s280_s2 = inlined_call_operand.vmem [shape: f32[1,32], index: 2, kind: input, shape index: {}]   ;;  %s281_s3 = inlined_call_operand.vmem [shape: f32[1,32], index: 3, kind: input, shape index: {}]   ;;  %s282_s4 = inlined_call_operand.hbm [shape: f32[2,32], index: 4, kind: output, shape index: {}]  }
   0x1   :  { %v19_v0 = vld [vmem:[%s279_s1] sm:$0xff]  ;;  %v20_v1 = vld [vmem:[%s279_s1 + $0x8] sm:$0xff]  ;;  %v21_v2 = vld [vmem:[%s279_s1 + $0x10] sm:$0xff]  ;;  %164 = vmatprep.subr.bf16.mxu0 %v204_v3  ;;  %161 = vmatprep.mubr.msk.f32.mxu0 %vm205_vm0, %v206_v6 }
   0x2   :  { %v165_v4 = vpack.c.bf16 %v20_v1, %v19_v0  ;;  %v22_v5 = vld [vmem:[%s279_s1 + $0x18] sm:$0xff] }
   0x3   :  { %v168_v7 = vpack.c.bf16 %v22_v5, %v21_v2 }
   0x4   :  { %166 = vmatpush3.bf16.msra.mxu0 %v165_v4 }
   0x5   :  { %9 = vsyncpa [#allocation3], 0  ;;  %167 = vmatprep.subr.bf16.mxu0 %v204_v3  ;;  %v23_v8 = vld [vmem:[%s279_s1 + $0x20] sm:$0xff]  ;;  %v24_v9 = vld [vmem:[%s279_s1 + $0x28] sm:$0xff]  ;;  %vm27_vm1 = vcmask 523264   ;;  %vm117_vm2 = vcmask 254976  }
   0x6   :  { %v171_v10 = vpack.c.bf16 %v24_v9, %v23_v8  ;;  %v25_v11 = vld [vmem:[%s279_s1 + $0x30] sm:$0xff]  ;;  %v26_v12 = vld [vmem:[%s279_s1 + $0x38] sm:$0xff]  ;;  %v18_v14 = vld [vmem:[%s278_s0] sm:$0x3]  ;;  %s207_s1 = smov [#allocation2]  }
   0x7   :  { %v174_v13 = vpack.c.bf16 %v26_v12, %v25_v11  ;;  %v134_v15 = vld [vmem:[%s280_s2] ss:$0 sm:$0xff]  ;;  %s125_s11 = sshll.u32 %s207_s1, 4  ;;  %s126_s11 = int_to_ptr.vmem [resolvable:$true] %s125_s11 }
   0x8   :  { %169 = vmatpush3.bf16.msra.mxu0 %v168_v7  ;;  %v135_v17 = vld [vmem:[%s281_s3] ss:$0 sm:$0xff]  ;;  %s180_s0 = scalar_lea.vmem %s126_s11, 32  ;;  %p185_p1 = scmp.lt.s32.totalorder %s126_s11, %s126_s11 }
   0x9   :  { %170 = vmatprep.subr.bf16.mxu0 %v204_v3  ;;  %p181_p0 = scmp.ne.s32.totalorder %s126_s11, %s180_s0  ;;  %p186_p2 = scmp.lt.s32.totalorder %s180_s0, %s180_s0 }
   0xb   :  { %p187_p3 = por %p186_p2, %p185_p1 }
   0xc   :  { %172 = vmatpush3.bf16.msra.mxu0 %v171_v10 }
   0xd   :  { %173 = vmatprep.subr.bf16.mxu0 %v204_v3  ;;  %p188_p4 = pnand %p187_p3, %p181_p0 }
  0x10   :  { %175 = vmatpush3.bf16.msra.mxu0 %v174_v13 }
  0x13   :  { %162 = vmatmul.mubr.msk.f32.vlgmr.msra.gmra.mrb[0].mxu0 %vm27_vm1, %v18_v14 }
  0xe6   :  { %v97_v16 = vpop.f32.mrb[0].mxu0 }
  0xe7   :  { %v108_v18 = vmul.f32 %v134_v15, %v97_v16  ;;  %v163_v19 = vpop.f32.mrb[1].mxu0 }
  0xe9   :  { %v116_v20 = vadd.f32 %v135_v17, %v108_v18 }
  0xeb   :  { %118 = vst.msk [vmem:[#allocation2] sm:$0x3] %vm117_vm2, %v116_v20 }
  0xec   :  { %191 = shalt.err (!%p188_p4)
}
  0xed   :  { %s192_s13 = scalar_lea.hbm %s282_s4, 32 }
  0xee   :  { %p193_p5 = scmp.ne.s32.totalorder %s282_s4, %s192_s13  ;;  %p196_p6 = scmp.lt.u32.totalorder %s192_s13, %s282_s4 }
  0xf0   :  { %p198_p7 = pnand %p196_p6, %p193_p5 }
  0xf2   :  { %201 = shalt.err (!%p198_p7)
}
  0xf3   :  { %128 = dma.vmem_to_hbm [thread:$0]  %s126_s11, 32, %s282_s4, [#allocation3]  }
  0xf4   :  { %202 = dma.done.wait [#allocation3], 32  }
  0xf5   :  { %203 = vsyncadd [#allocation3], 4294967264 }
  0xf6   :  { %132 = vsyncpa [#allocation3], 1 }

</bundles_post_ra>
